<compile_context>
chip_gen: v5e
topology: v5e:2x2
jax: 0.10.0
libtpu: 0.0.40
codegen_flags: <defaults>
</compile_context>

<pallas_src>
import functools

import jax
import jax.numpy as jnp
from jax.experimental import pallas as pl
from jax.experimental.pallas import tpu as pltpu


# ----------------------------------- shared attention body -----------------------------------

def _attention_core(q2, k2, v2, out_ref, *, BB, T, S, num_heads, mxu_dtype, approx_recip):
    """q2: (BB*T, E), k2/v2: (BB*S, E) f32 projections (gamma already folded into v).

    Writes the fused (BB, T, E) result into out_ref with a single lane-dense store.
    """
    E = out_ref.shape[-1]
    D = E // num_heads
    scale = 1.0 / (D ** 0.5)

    # leading-dim reshapes only (lane dim untouched) + one cast to the MXU dtype
    q = q2.reshape(BB, T, E).astype(mxu_dtype)
    k = k2.reshape(BB, S, E).astype(mxu_dtype)
    v = v2.reshape(BB, S, E).astype(mxu_dtype)

    head_outs = []
    for h in range(num_heads):                       # static unrolled loop over heads
        sl = slice(h * D, (h + 1) * D)               # lane-aligned 16-wide slice
        s = jnp.einsum('btd,bsd->bts', q[:, :, sl], k[:, :, sl],
                       preferred_element_type=jnp.float32) * scale
        m = jnp.max(s, axis=-1, keepdims=True)       # softmax in f32
        p = jnp.exp(s - m)
        inv = pl.reciprocal(jnp.sum(p, axis=-1, keepdims=True), approx=approx_recip)
        attn = (p * inv).astype(mxu_dtype)
        head_outs.append(jnp.einsum('bts,bsd->btd', attn, v[:, :, sl],
                                    preferred_element_type=jnp.float32))

    # heads re-fused in channel order -> (BB, T, E); single full-width store
    ws = jnp.concatenate(head_outs, axis=-1)
    out_ref[...] = ws.astype(out_ref.dtype)


# ----------------------------------------- kernels -----------------------------------------

def _mha_self_kernel(x_ref, wqkv_ref, out_ref, *, num_heads, mxu_dtype, approx_recip):
    """Self-attention fast path: one input slab, one fused (E, 3E) projection weight."""
    BB, T, E = x_ref.shape
    x2 = x_ref[...].reshape(BB * T, E).astype(mxu_dtype)
    # single lane-dense MXU matmul: (BB*T, E) @ (E, 3E), f32 accumulation
    qkv = jnp.dot(x2, wqkv_ref[...], preferred_element_type=jnp.float32)
    _attention_core(qkv[:, 0 * E:1 * E], qkv[:, 1 * E:2 * E], qkv[:, 2 * E:3 * E], out_ref,
                    BB=BB, T=T, S=T, num_heads=num_heads,
                    mxu_dtype=mxu_dtype, approx_recip=approx_recip)


def _mha_cross_kernel(xq_ref, xk_ref, xv_ref, wq_ref, wk_ref, wv_ref, out_ref,
                      *, num_heads, mxu_dtype, approx_recip):
    """General path (query / key / value are distinct tensors)."""
    BB, T, E = xq_ref.shape
    S = xk_ref.shape[1]
    q2 = jnp.dot(xq_ref[...].reshape(BB * T, E).astype(mxu_dtype), wq_ref[...],
                 preferred_element_type=jnp.float32)
    k2 = jnp.dot(xk_ref[...].reshape(BB * S, E).astype(mxu_dtype), wk_ref[...],
                 preferred_element_type=jnp.float32)
    v2 = jnp.dot(xv_ref[...].reshape(BB * S, E).astype(mxu_dtype), wv_ref[...],
                 preferred_element_type=jnp.float32)
    _attention_core(q2, k2, v2, out_ref, BB=BB, T=T, S=S, num_heads=num_heads,
                    mxu_dtype=mxu_dtype, approx_recip=approx_recip)


# ----------------------------------------- wrapper -----------------------------------------

def _pick_bb(B, T, block_b=None):
    """Batch block: fill MXU rows (aim bb*T in [256, 1024]) while keeping >= 2 grid steps
    (both v7x TensorCores busy).  bb must divide B.  VMEM per step stays well under the
    scoped limit at these shapes; re-derive for v7x (64 MiB) at production T/S."""
    if block_b is not None:
        assert B % block_b == 0, "block_b must divide B"
        return block_b
    divisors = [d for d in range(1, B + 1) if B % d == 0]
    cands = [d for d in divisors if B // d >= 2] or divisors
    good = [d for d in cands if 256 <= d * T <= 1024]
    if good:
        return min(good)
    small = [d for d in cands if d * T <= 1024]
    return max(small) if small else min(cands)


def multihead_attention(query, key, value, params, *, num_heads, block_b=None,
                        mxu_dtype=jnp.bfloat16, approx_recip=None, vmem_limit_bytes=None):
    """query: (B, T, E); key/value: (B, S, E) -> (B, T, E) (matches the PyTorch return).

    mxu_dtype: dtype fed to the MXU matmuls (accumulation is always f32).
    approx_recip: EUP approximate reciprocal for the softmax denom (default: only on the
                  reduced-precision path so the f32 path stays bit-accurate-ish).
    """
    B, T, E = query.shape
    S = key.shape[1]
    assert E % num_heads == 0
    assert key.shape == value.shape
    assert T % 8 == 0 and S % 8 == 0 and E % 128 == 0, "pad to satisfy (8,128) blocks"
    D = E // num_heads
    out_dtype = query.dtype
    if approx_recip is None:
        approx_recip = (mxu_dtype != jnp.float32)

    # nn.Linear stores W as (out, in); pre-transpose so the kernel computes x @ W^T.
    # Fold the per-head gamma into Wv: (attn @ v) * gamma_c == attn @ (v * gamma_c).
    gamma_vec = jnp.repeat(params["gamma"].astype(jnp.float32), D)            # (E,)
    wq_t = params["wq"].T.astype(jnp.float32)
    wk_t = params["wk"].T.astype(jnp.float32)
    wv_t = params["wv"].T.astype(jnp.float32) * gamma_vec[None, :]

    bb = _pick_bb(B, T, block_b)
    grid = (B // bb,)
    cparams = pltpu.CompilerParams(dimension_semantics=("parallel",),
                                   vmem_limit_bytes=vmem_limit_bytes)

    self_attention = (query is key) and (key is value)

    if self_attention:
        # fused (E, 3E) projection weight; input DMA'd once per grid step
        w_qkv = jnp.concatenate([wq_t, wk_t, wv_t], axis=1).astype(mxu_dtype)
        kernel = functools.partial(_mha_self_kernel, num_heads=num_heads,
                                   mxu_dtype=mxu_dtype, approx_recip=approx_recip)
        return pl.pallas_call(
            kernel,
            out_shape=jax.ShapeDtypeStruct((B, T, E), out_dtype),
            grid_spec=pltpu.PrefetchScalarGridSpec(
                num_scalar_prefetch=0,
                grid=grid,
                in_specs=[
                    pl.BlockSpec((bb, T, E), lambda i: (i, 0, 0)),   # shared q/k/v input
                    pl.BlockSpec((E, 3 * E), lambda i: (0, 0)),      # fused Wqkv^T (gamma in Wv)
                ],
                out_specs=pl.BlockSpec((bb, T, E), lambda i: (i, 0, 0)),
            ),
            compiler_params=cparams,
        )(query, w_qkv)

    # general (cross-attention) path
    kernel = functools.partial(_mha_cross_kernel, num_heads=num_heads,
                               mxu_dtype=mxu_dtype, approx_recip=approx_recip)
    return pl.pallas_call(
        kernel,
        out_shape=jax.ShapeDtypeStruct((B, T, E), out_dtype),
        grid_spec=pltpu.PrefetchScalarGridSpec(
            num_scalar_prefetch=0,
            grid=grid,
            in_specs=[
                pl.BlockSpec((bb, T, E), lambda i: (i, 0, 0)),       # query block
                pl.BlockSpec((bb, S, E), lambda i: (i, 0, 0)),       # key block
                pl.BlockSpec((bb, S, E), lambda i: (i, 0, 0)),       # value block
                pl.BlockSpec((E, E), lambda i: (0, 0)),              # Wq^T
                pl.BlockSpec((E, E), lambda i: (0, 0)),              # Wk^T
                pl.BlockSpec((E, E), lambda i: (0, 0)),              # Wv^T * gamma
            ],
            out_specs=pl.BlockSpec((bb, T, E), lambda i: (i, 0, 0)),
        ),
        compiler_params=cparams,
    )(query, key, value,
      wq_t.astype(mxu_dtype), wk_t.astype(mxu_dtype), wv_t.astype(mxu_dtype))


# ------------------------------------- pure-JAX reference -------------------------------------

def reference(query, key, value, params, num_heads):
    B, T, E = query.shape
    D = E // num_heads
    hp = jax.lax.Precision.HIGHEST

    q = jnp.einsum('bte,fe->btf', query, params["wq"], precision=hp)
    k = jnp.einsum('bse,fe->bsf', key, params["wk"], precision=hp)
    v = jnp.einsum('bse,fe->bsf', value, params["wv"], precision=hp)

    def split(x):
        Bx, L, _ = x.shape
        return x.reshape(Bx, L, num_heads, D).transpose(0, 2, 1, 3)

    qh, kh, vh = split(q), split(k), split(v)
    scores = jnp.einsum('bhtd,bhsd->bhts', qh, kh, precision=hp) / (D ** 0.5)
    attn = jax.nn.softmax(scores, axis=-1)
    # dropout(p=0.1) is identity in eval mode
    ws = jnp.einsum('bhts,bhsd->bhtd', attn, vh, precision=hp)
    ws = ws * params["gamma"][None, :, None, None]
    ws = ws.transpose(0, 2, 1, 3).reshape(B, T, E)
    # NOTE: the PyTorch forward also computes out_linear(ws) but returns ws.
    return ws


# --------------------------------------------- main ---------------------------------------------

if __name__ == "__main__":
    B, T, E, H = 16, 16, 128, 8   # batch, seq, embed_dim, num_heads (head_dim = 16)

    root = jax.random.PRNGKey(0)
    kx, kq, kk, kv, kwq, kwk, kwv, kg = jax.random.split(root, 8)

    params = {
        "wq": jax.random.normal(kwq, (E, E), jnp.float32) / jnp.sqrt(E),
        "wk": jax.random.normal(kwk, (E, E), jnp.float32) / jnp.sqrt(E),
        "wv": jax.random.normal(kwv, (E, E), jnp.float32) / jnp.sqrt(E),
        "gamma": jax.random.uniform(kg, (H,), jnp.float32, 0.5, 1.5),
    }

    # ---- self-attention fast path (fused QKV), bf16 MXU + approx reciprocal ----
    x = jax.random.normal(kx, (B, T, E), jnp.float32)
    out_self = jax.block_until_ready(multihead_attention(x, x, x, params, num_heads=H))
    ref_self = jax.block_until_ready(reference(x, x, x, params, H))
    assert out_self.shape == (B, T, E), out_self.shape
    assert jnp.all(jnp.isfinite(out_self)), "non-finite output (self path)"
    err_max = float(jnp.max(jnp.abs(out_self - ref_self)))
    err_mean = float(jnp.mean(jnp.abs(out_self - ref_self)))
    # bf16 MXU path vs f32 reference: quantization of K=128 contractions gives ~1e-2-scale
    # max-abs error after softmax/attn/gamma; the f32 path below is checked tightly.
    assert err_max < 7.5e-2, f"self-attention (bf16) mismatch: max {err_max}"
    assert err_mean < 1e-2, f"self-attention (bf16) mismatch: mean {err_mean}"

    # ---- general (cross-attention) path, f32 MXU: tight numerical check ----
    q_in = jax.random.normal(kq, (B, T, E), jnp.float32)
    k_in = jax.random.normal(kk, (B, T, E), jnp.float32)
    v_in = jax.random.normal(kv, (B, T, E), jnp.float32)
    out_x = jax.block_until_ready(
        multihead_attention(q_in, k_in, v_in, params, num_heads=H, mxu_dtype=jnp.float32))
    ref_x = jax.block_until_ready(reference(q_in, k_in, v_in, params, H))
    assert jnp.all(jnp.isfinite(out_x)), "non-finite output (cross path)"
    err_x = float(jnp.max(jnp.abs(out_x - ref_x)))
    assert err_x < 2e-3, f"cross-attention (f32) mismatch: {err_x}"

    print("KERNEL_OK")
</pallas_src>

<mosaic_0001>
module attributes {stable_mosaic.version = 11 : i64} {
  func.func @_mha_self_kernel(%arg0: i32, %arg1: memref<8x16x128xf32, #tpu.memory_space<vmem>>, %arg2: memref<128x384xbf16, #tpu.memory_space<vmem>>, %arg3: memref<8x16x128xf32, #tpu.memory_space<vmem>>) attributes {dimension_semantics = [#tpu.dimension_semantics<parallel>], iteration_bounds = array<i64: 2>, scalar_prefetch = 0 : i64, scratch_operands = 0 : i64, tpu.core_type = #tpu.core_type<tc>, window_params = [{transform_indices = @transform_0, window_bounds = array<i64: 8, 16, 128>}, {pipeline_mode = #tpu.pipeline_mode<synchronous>, transform_indices = @transform_1, window_bounds = array<i64: 128, 384>}, {transform_indices = @transform_2, window_bounds = array<i64: 8, 16, 128>}]} {
    %c0 = arith.constant 0 : index
    %c0_0 = arith.constant 0 : index
    %c0_1 = arith.constant 0 : index
    %0 = vector.load %arg1[%c0, %c0_0, %c0_1] : memref<8x16x128xf32, #tpu.memory_space<vmem>>, vector<8x16x128xf32>
    %1 = vector.shape_cast %0 : vector<8x16x128xf32> to vector<128x128xf32>
    %2 = arith.truncf %1 : vector<128x128xf32> to vector<128x128xbf16>
    %c0_2 = arith.constant 0 : index
    %c0_3 = arith.constant 0 : index
    %3 = vector.load %arg2[%c0_2, %c0_3] : memref<128x384xbf16, #tpu.memory_space<vmem>>, vector<128x384xbf16>
    %cst = arith.constant dense<0.000000e+00> : vector<128x384xf32>
    %4 = tpu.matmul %2, %3, %cst {dimension_numbers = #tpu.dot_dimension_numbers<[1], [0], [0], [1], [0, 0, 1, 1], [], []>} : vector<128x128xbf16>, vector<128x384xbf16>, vector<128x384xf32> -> vector<128x384xf32>
    %5 = vector.extract_strided_slice %4 {offsets = [0, 0], sizes = [128, 128], strides = [1, 1]} : vector<128x384xf32> to vector<128x128xf32>
    %6 = vector.extract_strided_slice %4 {offsets = [0, 128], sizes = [128, 128], strides = [1, 1]} : vector<128x384xf32> to vector<128x128xf32>
    %7 = vector.extract_strided_slice %4 {offsets = [0, 256], sizes = [128, 128], strides = [1, 1]} : vector<128x384xf32> to vector<128x128xf32>
    %8 = vector.shape_cast %5 : vector<128x128xf32> to vector<8x16x128xf32>
    %9 = arith.truncf %8 : vector<8x16x128xf32> to vector<8x16x128xbf16>
    %10 = vector.shape_cast %6 : vector<128x128xf32> to vector<8x16x128xf32>
    %11 = arith.truncf %10 : vector<8x16x128xf32> to vector<8x16x128xbf16>
    %12 = vector.shape_cast %7 : vector<128x128xf32> to vector<8x16x128xf32>
    %13 = arith.truncf %12 : vector<8x16x128xf32> to vector<8x16x128xbf16>
    %14 = vector.extract_strided_slice %9 {offsets = [0, 0, 0], sizes = [8, 16, 16], strides = [1, 1, 1]} : vector<8x16x128xbf16> to vector<8x16x16xbf16>
    %15 = vector.extract_strided_slice %11 {offsets = [0, 0, 0], sizes = [8, 16, 16], strides = [1, 1, 1]} : vector<8x16x128xbf16> to vector<8x16x16xbf16>
    "tpu.trace_start"() <{level = 10 : i32, message = "btd,bsd->bts"}> : () -> ()
    %cst_4 = arith.constant dense<0.000000e+00> : vector<8x16x16xf32>
    %16 = tpu.matmul %14, %15, %cst_4 {dimension_numbers = #tpu.dot_dimension_numbers<[2], [2], [1], [1], [0, 0, 0, 1, 1, 1], [0], [0]>} : vector<8x16x16xbf16>, vector<8x16x16xbf16>, vector<8x16x16xf32> -> vector<8x16x16xf32>
    "tpu.trace_stop"() : () -> ()
    %cst_5 = arith.constant 2.500000e-01 : f32
    %17 = vector.broadcast %cst_5 : f32 to vector<8x16x16xf32>
    %18 = arith.mulf %16, %17 : vector<8x16x16xf32>
    %cst_6 = arith.constant dense<0xFF800000> : vector<8x16xf32>
    %19 = vector.multi_reduction <maximumf>, %18, %cst_6 [2] : vector<8x16x16xf32> to vector<8x16xf32>
    %20 = vector.shape_cast %19 : vector<8x16xf32> to vector<8x16x1xf32>
    %21 = vector.broadcast %20 : vector<8x16x1xf32> to vector<8x16x16xf32>
    %22 = arith.subf %18, %21 : vector<8x16x16xf32>
    %23 = math.exp %22 : vector<8x16x16xf32>
    %cst_7 = arith.constant dense<0.000000e+00> : vector<8x16xf32>
    %24 = vector.multi_reduction <add>, %23, %cst_7 [2] : vector<8x16x16xf32> to vector<8x16xf32>
    %25 = vector.shape_cast %24 : vector<8x16xf32> to vector<8x16x1xf32>
    %26 = tpu.reciprocal %25 {approx = true} : vector<8x16x1xf32> -> vector<8x16x1xf32>
    %27 = vector.broadcast %26 : vector<8x16x1xf32> to vector<8x16x16xf32>
    %28 = arith.mulf %23, %27 : vector<8x16x16xf32>
    %29 = arith.truncf %28 : vector<8x16x16xf32> to vector<8x16x16xbf16>
    %30 = vector.extract_strided_slice %13 {offsets = [0, 0, 0], sizes = [8, 16, 16], strides = [1, 1, 1]} : vector<8x16x128xbf16> to vector<8x16x16xbf16>
    "tpu.trace_start"() <{level = 10 : i32, message = "bts,bsd->btd"}> : () -> ()
    %cst_8 = arith.constant dense<0.000000e+00> : vector<8x16x16xf32>
    %31 = tpu.matmul %29, %30, %cst_8 {dimension_numbers = #tpu.dot_dimension_numbers<[2], [1], [1], [2], [0, 0, 0, 1, 1, 2], [0], [0]>} : vector<8x16x16xbf16>, vector<8x16x16xbf16>, vector<8x16x16xf32> -> vector<8x16x16xf32>
    "tpu.trace_stop"() : () -> ()
    %32 = vector.extract_strided_slice %9 {offsets = [0, 0, 16], sizes = [8, 16, 16], strides = [1, 1, 1]} : vector<8x16x128xbf16> to vector<8x16x16xbf16>
    %33 = vector.extract_strided_slice %11 {offsets = [0, 0, 16], sizes = [8, 16, 16], strides = [1, 1, 1]} : vector<8x16x128xbf16> to vector<8x16x16xbf16>
    "tpu.trace_start"() <{level = 10 : i32, message = "btd,bsd->bts"}> : () -> ()
    %cst_9 = arith.constant dense<0.000000e+00> : vector<8x16x16xf32>
    %34 = tpu.matmul %32, %33, %cst_9 {dimension_numbers = #tpu.dot_dimension_numbers<[2], [2], [1], [1], [0, 0, 0, 1, 1, 1], [0], [0]>} : vector<8x16x16xbf16>, vector<8x16x16xbf16>, vector<8x16x16xf32> -> vector<8x16x16xf32>
    "tpu.trace_stop"() : () -> ()
    %cst_10 = arith.constant 2.500000e-01 : f32
    %35 = vector.broadcast %cst_10 : f32 to vector<8x16x16xf32>
    %36 = arith.mulf %34, %35 : vector<8x16x16xf32>
    %cst_11 = arith.constant dense<0xFF800000> : vector<8x16xf32>
    %37 = vector.multi_reduction <maximumf>, %36, %cst_11 [2] : vector<8x16x16xf32> to vector<8x16xf32>
    %38 = vector.shape_cast %37 : vector<8x16xf32> to vector<8x16x1xf32>
    %39 = vector.broadcast %38 : vector<8x16x1xf32> to vector<8x16x16xf32>
    %40 = arith.subf %36, %39 : vector<8x16x16xf32>
    %41 = math.exp %40 : vector<8x16x16xf32>
    %cst_12 = arith.constant dense<0.000000e+00> : vector<8x16xf32>
    %42 = vector.multi_reduction <add>, %41, %cst_12 [2] : vector<8x16x16xf32> to vector<8x16xf32>
    %43 = vector.shape_cast %42 : vector<8x16xf32> to vector<8x16x1xf32>
    %44 = tpu.reciprocal %43 {approx = true} : vector<8x16x1xf32> -> vector<8x16x1xf32>
    %45 = vector.broadcast %44 : vector<8x16x1xf32> to vector<8x16x16xf32>
    %46 = arith.mulf %41, %45 : vector<8x16x16xf32>
    %47 = arith.truncf %46 : vector<8x16x16xf32> to vector<8x16x16xbf16>
    %48 = vector.extract_strided_slice %13 {offsets = [0, 0, 16], sizes = [8, 16, 16], strides = [1, 1, 1]} : vector<8x16x128xbf16> to vector<8x16x16xbf16>
    "tpu.trace_start"() <{level = 10 : i32, message = "bts,bsd->btd"}> : () -> ()
    %cst_13 = arith.constant dense<0.000000e+00> : vector<8x16x16xf32>
    %49 = tpu.matmul %47, %48, %cst_13 {dimension_numbers = #tpu.dot_dimension_numbers<[2], [1], [1], [2], [0, 0, 0, 1, 1, 2], [0], [0]>} : vector<8x16x16xbf16>, vector<8x16x16xbf16>, vector<8x16x16xf32> -> vector<8x16x16xf32>
    "tpu.trace_stop"() : () -> ()
    %50 = vector.extract_strided_slice %9 {offsets = [0, 0, 32], sizes = [8, 16, 16], strides = [1, 1, 1]} : vector<8x16x128xbf16> to vector<8x16x16xbf16>
    %51 = vector.extract_strided_slice %11 {offsets = [0, 0, 32], sizes = [8, 16, 16], strides = [1, 1, 1]} : vector<8x16x128xbf16> to vector<8x16x16xbf16>
    "tpu.trace_start"() <{level = 10 : i32, message = "btd,bsd->bts"}> : () -> ()
    %cst_14 = arith.constant dense<0.000000e+00> : vector<8x16x16xf32>
    %52 = tpu.matmul %50, %51, %cst_14 {dimension_numbers = #tpu.dot_dimension_numbers<[2], [2], [1], [1], [0, 0, 0, 1, 1, 1], [0], [0]>} : vector<8x16x16xbf16>, vector<8x16x16xbf16>, vector<8x16x16xf32> -> vector<8x16x16xf32>
    "tpu.trace_stop"() : () -> ()
    %cst_15 = arith.constant 2.500000e-01 : f32
    %53 = vector.broadcast %cst_15 : f32 to vector<8x16x16xf32>
    %54 = arith.mulf %52, %53 : vector<8x16x16xf32>
    %cst_16 = arith.constant dense<0xFF800000> : vector<8x16xf32>
    %55 = vector.multi_reduction <maximumf>, %54, %cst_16 [2] : vector<8x16x16xf32> to vector<8x16xf32>
    %56 = vector.shape_cast %55 : vector<8x16xf32> to vector<8x16x1xf32>
    %57 = vector.broadcast %56 : vector<8x16x1xf32> to vector<8x16x16xf32>
    %58 = arith.subf %54, %57 : vector<8x16x16xf32>
    %59 = math.exp %58 : vector<8x16x16xf32>
    %cst_17 = arith.constant dense<0.000000e+00> : vector<8x16xf32>
    %60 = vector.multi_reduction <add>, %59, %cst_17 [2] : vector<8x16x16xf32> to vector<8x16xf32>
    %61 = vector.shape_cast %60 : vector<8x16xf32> to vector<8x16x1xf32>
    %62 = tpu.reciprocal %61 {approx = true} : vector<8x16x1xf32> -> vector<8x16x1xf32>
    %63 = vector.broadcast %62 : vector<8x16x1xf32> to vector<8x16x16xf32>
    %64 = arith.mulf %59, %63 : vector<8x16x16xf32>
    %65 = arith.truncf %64 : vector<8x16x16xf32> to vector<8x16x16xbf16>
    %66 = vector.extract_strided_slice %13 {offsets = [0, 0, 32], sizes = [8, 16, 16], strides = [1, 1, 1]} : vector<8x16x128xbf16> to vector<8x16x16xbf16>
    "tpu.trace_start"() <{level = 10 : i32, message = "bts,bsd->btd"}> : () -> ()
    %cst_18 = arith.constant dense<0.000000e+00> : vector<8x16x16xf32>
    %67 = tpu.matmul %65, %66, %cst_18 {dimension_numbers = #tpu.dot_dimension_numbers<[2], [1], [1], [2], [0, 0, 0, 1, 1, 2], [0], [0]>} : vector<8x16x16xbf16>, vector<8x16x16xbf16>, vector<8x16x16xf32> -> vector<8x16x16xf32>
    "tpu.trace_stop"() : () -> ()
    %68 = vector.extract_strided_slice %9 {offsets = [0, 0, 48], sizes = [8, 16, 16], strides = [1, 1, 1]} : vector<8x16x128xbf16> to vector<8x16x16xbf16>
    %69 = vector.extract_strided_slice %11 {offsets = [0, 0, 48], sizes = [8, 16, 16], strides = [1, 1, 1]} : vector<8x16x128xbf16> to vector<8x16x16xbf16>
    "tpu.trace_start"() <{level = 10 : i32, message = "btd,bsd->bts"}> : () -> ()
    %cst_19 = arith.constant dense<0.000000e+00> : vector<8x16x16xf32>
    %70 = tpu.matmul %68, %69, %cst_19 {dimension_numbers = #tpu.dot_dimension_numbers<[2], [2], [1], [1], [0, 0, 0, 1, 1, 1], [0], [0]>} : vector<8x16x16xbf16>, vector<8x16x16xbf16>, vector<8x16x16xf32> -> vector<8x16x16xf32>
    "tpu.trace_stop"() : () -> ()
    %cst_20 = arith.constant 2.500000e-01 : f32
    %71 = vector.broadcast %cst_20 : f32 to vector<8x16x16xf32>
    %72 = arith.mulf %70, %71 : vector<8x16x16xf32>
    %cst_21 = arith.constant dense<0xFF800000> : vector<8x16xf32>
    %73 = vector.multi_reduction <maximumf>, %72, %cst_21 [2] : vector<8x16x16xf32> to vector<8x16xf32>
    %74 = vector.shape_cast %73 : vector<8x16xf32> to vector<8x16x1xf32>
    %75 = vector.broadcast %74 : vector<8x16x1xf32> to vector<8x16x16xf32>
    %76 = arith.subf %72, %75 : vector<8x16x16xf32>
    %77 = math.exp %76 : vector<8x16x16xf32>
    %cst_22 = arith.constant dense<0.000000e+00> : vector<8x16xf32>
    %78 = vector.multi_reduction <add>, %77, %cst_22 [2] : vector<8x16x16xf32> to vector<8x16xf32>
    %79 = vector.shape_cast %78 : vector<8x16xf32> to vector<8x16x1xf32>
    %80 = tpu.reciprocal %79 {approx = true} : vector<8x16x1xf32> -> vector<8x16x1xf32>
    %81 = vector.broadcast %80 : vector<8x16x1xf32> to vector<8x16x16xf32>
    %82 = arith.mulf %77, %81 : vector<8x16x16xf32>
    %83 = arith.truncf %82 : vector<8x16x16xf32> to vector<8x16x16xbf16>
    %84 = vector.extract_strided_slice %13 {offsets = [0, 0, 48], sizes = [8, 16, 16], strides = [1, 1, 1]} : vector<8x16x128xbf16> to vector<8x16x16xbf16>
    "tpu.trace_start"() <{level = 10 : i32, message = "bts,bsd->btd"}> : () -> ()
    %cst_23 = arith.constant dense<0.000000e+00> : vector<8x16x16xf32>
    %85 = tpu.matmul %83, %84, %cst_23 {dimension_numbers = #tpu.dot_dimension_numbers<[2], [1], [1], [2], [0, 0, 0, 1, 1, 2], [0], [0]>} : vector<8x16x16xbf16>, vector<8x16x16xbf16>, vector<8x16x16xf32> -> vector<8x16x16xf32>
    "tpu.trace_stop"() : () -> ()
    %86 = vector.extract_strided_slice %9 {offsets = [0, 0, 64], sizes = [8, 16, 16], strides = [1, 1, 1]} : vector<8x16x128xbf16> to vector<8x16x16xbf16>
    %87 = vector.extract_strided_slice %11 {offsets = [0, 0, 64], sizes = [8, 16, 16], strides = [1, 1, 1]} : vector<8x16x128xbf16> to vector<8x16x16xbf16>
    "tpu.trace_start"() <{level = 10 : i32, message = "btd,bsd->bts"}> : () -> ()
    %cst_24 = arith.constant dense<0.000000e+00> : vector<8x16x16xf32>
    %88 = tpu.matmul %86, %87, %cst_24 {dimension_numbers = #tpu.dot_dimension_numbers<[2], [2], [1], [1], [0, 0, 0, 1, 1, 1], [0], [0]>} : vector<8x16x16xbf16>, vector<8x16x16xbf16>, vector<8x16x16xf32> -> vector<8x16x16xf32>
    "tpu.trace_stop"() : () -> ()
    %cst_25 = arith.constant 2.500000e-01 : f32
    %89 = vector.broadcast %cst_25 : f32 to vector<8x16x16xf32>
    %90 = arith.mulf %88, %89 : vector<8x16x16xf32>
    %cst_26 = arith.constant dense<0xFF800000> : vector<8x16xf32>
    %91 = vector.multi_reduction <maximumf>, %90, %cst_26 [2] : vector<8x16x16xf32> to vector<8x16xf32>
    %92 = vector.shape_cast %91 : vector<8x16xf32> to vector<8x16x1xf32>
    %93 = vector.broadcast %92 : vector<8x16x1xf32> to vector<8x16x16xf32>
    %94 = arith.subf %90, %93 : vector<8x16x16xf32>
    %95 = math.exp %94 : vector<8x16x16xf32>
    %cst_27 = arith.constant dense<0.000000e+00> : vector<8x16xf32>
    %96 = vector.multi_reduction <add>, %95, %cst_27 [2] : vector<8x16x16xf32> to vector<8x16xf32>
    %97 = vector.shape_cast %96 : vector<8x16xf32> to vector<8x16x1xf32>
    %98 = tpu.reciprocal %97 {approx = true} : vector<8x16x1xf32> -> vector<8x16x1xf32>
    %99 = vector.broadcast %98 : vector<8x16x1xf32> to vector<8x16x16xf32>
    %100 = arith.mulf %95, %99 : vector<8x16x16xf32>
    %101 = arith.truncf %100 : vector<8x16x16xf32> to vector<8x16x16xbf16>
    %102 = vector.extract_strided_slice %13 {offsets = [0, 0, 64], sizes = [8, 16, 16], strides = [1, 1, 1]} : vector<8x16x128xbf16> to vector<8x16x16xbf16>
    "tpu.trace_start"() <{level = 10 : i32, message = "bts,bsd->btd"}> : () -> ()
    %cst_28 = arith.constant dense<0.000000e+00> : vector<8x16x16xf32>
    %103 = tpu.matmul %101, %102, %cst_28 {dimension_numbers = #tpu.dot_dimension_numbers<[2], [1], [1], [2], [0, 0, 0, 1, 1, 2], [0], [0]>} : vector<8x16x16xbf16>, vector<8x16x16xbf16>, vector<8x16x16xf32> -> vector<8x16x16xf32>
    "tpu.trace_stop"() : () -> ()
    %104 = vector.extract_strided_slice %9 {offsets = [0, 0, 80], sizes = [8, 16, 16], strides = [1, 1, 1]} : vector<8x16x128xbf16> to vector<8x16x16xbf16>
    %105 = vector.extract_strided_slice %11 {offsets = [0, 0, 80], sizes = [8, 16, 16], strides = [1, 1, 1]} : vector<8x16x128xbf16> to vector<8x16x16xbf16>
    "tpu.trace_start"() <{level = 10 : i32, message = "btd,bsd->bts"}> : () -> ()
    %cst_29 = arith.constant dense<0.000000e+00> : vector<8x16x16xf32>
    %106 = tpu.matmul %104, %105, %cst_29 {dimension_numbers = #tpu.dot_dimension_numbers<[2], [2], [1], [1], [0, 0, 0, 1, 1, 1], [0], [0]>} : vector<8x16x16xbf16>, vector<8x16x16xbf16>, vector<8x16x16xf32> -> vector<8x16x16xf32>
    "tpu.trace_stop"() : () -> ()
    %cst_30 = arith.constant 2.500000e-01 : f32
    %107 = vector.broadcast %cst_30 : f32 to vector<8x16x16xf32>
    %108 = arith.mulf %106, %107 : vector<8x16x16xf32>
    %cst_31 = arith.constant dense<0xFF800000> : vector<8x16xf32>
    %109 = vector.multi_reduction <maximumf>, %108, %cst_31 [2] : vector<8x16x16xf32> to vector<8x16xf32>
    %110 = vector.shape_cast %109 : vector<8x16xf32> to vector<8x16x1xf32>
    %111 = vector.broadcast %110 : vector<8x16x1xf32> to vector<8x16x16xf32>
    %112 = arith.subf %108, %111 : vector<8x16x16xf32>
    %113 = math.exp %112 : vector<8x16x16xf32>
    %cst_32 = arith.constant dense<0.000000e+00> : vector<8x16xf32>
    %114 = vector.multi_reduction <add>, %113, %cst_32 [2] : vector<8x16x16xf32> to vector<8x16xf32>
    %115 = vector.shape_cast %114 : vector<8x16xf32> to vector<8x16x1xf32>
    %116 = tpu.reciprocal %115 {approx = true} : vector<8x16x1xf32> -> vector<8x16x1xf32>
    %117 = vector.broadcast %116 : vector<8x16x1xf32> to vector<8x16x16xf32>
    %118 = arith.mulf %113, %117 : vector<8x16x16xf32>
    %119 = arith.truncf %118 : vector<8x16x16xf32> to vector<8x16x16xbf16>
    %120 = vector.extract_strided_slice %13 {offsets = [0, 0, 80], sizes = [8, 16, 16], strides = [1, 1, 1]} : vector<8x16x128xbf16> to vector<8x16x16xbf16>
    "tpu.trace_start"() <{level = 10 : i32, message = "bts,bsd->btd"}> : () -> ()
    %cst_33 = arith.constant dense<0.000000e+00> : vector<8x16x16xf32>
    %121 = tpu.matmul %119, %120, %cst_33 {dimension_numbers = #tpu.dot_dimension_numbers<[2], [1], [1], [2], [0, 0, 0, 1, 1, 2], [0], [0]>} : vector<8x16x16xbf16>, vector<8x16x16xbf16>, vector<8x16x16xf32> -> vector<8x16x16xf32>
    "tpu.trace_stop"() : () -> ()
    %122 = vector.extract_strided_slice %9 {offsets = [0, 0, 96], sizes = [8, 16, 16], strides = [1, 1, 1]} : vector<8x16x128xbf16> to vector<8x16x16xbf16>
    %123 = vector.extract_strided_slice %11 {offsets = [0, 0, 96], sizes = [8, 16, 16], strides = [1, 1, 1]} : vector<8x16x128xbf16> to vector<8x16x16xbf16>
    "tpu.trace_start"() <{level = 10 : i32, message = "btd,bsd->bts"}> : () -> ()
    %cst_34 = arith.constant dense<0.000000e+00> : vector<8x16x16xf32>
    %124 = tpu.matmul %122, %123, %cst_34 {dimension_numbers = #tpu.dot_dimension_numbers<[2], [2], [1], [1], [0, 0, 0, 1, 1, 1], [0], [0]>} : vector<8x16x16xbf16>, vector<8x16x16xbf16>, vector<8x16x16xf32> -> vector<8x16x16xf32>
    "tpu.trace_stop"() : () -> ()
    %cst_35 = arith.constant 2.500000e-01 : f32
    %125 = vector.broadcast %cst_35 : f32 to vector<8x16x16xf32>
    %126 = arith.mulf %124, %125 : vector<8x16x16xf32>
    %cst_36 = arith.constant dense<0xFF800000> : vector<8x16xf32>
    %127 = vector.multi_reduction <maximumf>, %126, %cst_36 [2] : vector<8x16x16xf32> to vector<8x16xf32>
    %128 = vector.shape_cast %127 : vector<8x16xf32> to vector<8x16x1xf32>
    %129 = vector.broadcast %128 : vector<8x16x1xf32> to vector<8x16x16xf32>
    %130 = arith.subf %126, %129 : vector<8x16x16xf32>
    %131 = math.exp %130 : vector<8x16x16xf32>
    %cst_37 = arith.constant dense<0.000000e+00> : vector<8x16xf32>
    %132 = vector.multi_reduction <add>, %131, %cst_37 [2] : vector<8x16x16xf32> to vector<8x16xf32>
    %133 = vector.shape_cast %132 : vector<8x16xf32> to vector<8x16x1xf32>
    %134 = tpu.reciprocal %133 {approx = true} : vector<8x16x1xf32> -> vector<8x16x1xf32>
    %135 = vector.broadcast %134 : vector<8x16x1xf32> to vector<8x16x16xf32>
    %136 = arith.mulf %131, %135 : vector<8x16x16xf32>
    %137 = arith.truncf %136 : vector<8x16x16xf32> to vector<8x16x16xbf16>
    %138 = vector.extract_strided_slice %13 {offsets = [0, 0, 96], sizes = [8, 16, 16], strides = [1, 1, 1]} : vector<8x16x128xbf16> to vector<8x16x16xbf16>
    "tpu.trace_start"() <{level = 10 : i32, message = "bts,bsd->btd"}> : () -> ()
    %cst_38 = arith.constant dense<0.000000e+00> : vector<8x16x16xf32>
    %139 = tpu.matmul %137, %138, %cst_38 {dimension_numbers = #tpu.dot_dimension_numbers<[2], [1], [1], [2], [0, 0, 0, 1, 1, 2], [0], [0]>} : vector<8x16x16xbf16>, vector<8x16x16xbf16>, vector<8x16x16xf32> -> vector<8x16x16xf32>
    "tpu.trace_stop"() : () -> ()
    %140 = vector.extract_strided_slice %9 {offsets = [0, 0, 112], sizes = [8, 16, 16], strides = [1, 1, 1]} : vector<8x16x128xbf16> to vector<8x16x16xbf16>
    %141 = vector.extract_strided_slice %11 {offsets = [0, 0, 112], sizes = [8, 16, 16], strides = [1, 1, 1]} : vector<8x16x128xbf16> to vector<8x16x16xbf16>
    "tpu.trace_start"() <{level = 10 : i32, message = "btd,bsd->bts"}> : () -> ()
    %cst_39 = arith.constant dense<0.000000e+00> : vector<8x16x16xf32>
    %142 = tpu.matmul %140, %141, %cst_39 {dimension_numbers = #tpu.dot_dimension_numbers<[2], [2], [1], [1], [0, 0, 0, 1, 1, 1], [0], [0]>} : vector<8x16x16xbf16>, vector<8x16x16xbf16>, vector<8x16x16xf32> -> vector<8x16x16xf32>
    "tpu.trace_stop"() : () -> ()
    %cst_40 = arith.constant 2.500000e-01 : f32
    %143 = vector.broadcast %cst_40 : f32 to vector<8x16x16xf32>
    %144 = arith.mulf %142, %143 : vector<8x16x16xf32>
    %cst_41 = arith.constant dense<0xFF800000> : vector<8x16xf32>
    %145 = vector.multi_reduction <maximumf>, %144, %cst_41 [2] : vector<8x16x16xf32> to vector<8x16xf32>
    %146 = vector.shape_cast %145 : vector<8x16xf32> to vector<8x16x1xf32>
    %147 = vector.broadcast %146 : vector<8x16x1xf32> to vector<8x16x16xf32>
    %148 = arith.subf %144, %147 : vector<8x16x16xf32>
    %149 = math.exp %148 : vector<8x16x16xf32>
    %cst_42 = arith.constant dense<0.000000e+00> : vector<8x16xf32>
    %150 = vector.multi_reduction <add>, %149, %cst_42 [2] : vector<8x16x16xf32> to vector<8x16xf32>
    %151 = vector.shape_cast %150 : vector<8x16xf32> to vector<8x16x1xf32>
    %152 = tpu.reciprocal %151 {approx = true} : vector<8x16x1xf32> -> vector<8x16x1xf32>
    %153 = vector.broadcast %152 : vector<8x16x1xf32> to vector<8x16x16xf32>
    %154 = arith.mulf %149, %153 : vector<8x16x16xf32>
    %155 = arith.truncf %154 : vector<8x16x16xf32> to vector<8x16x16xbf16>
    %156 = vector.extract_strided_slice %13 {offsets = [0, 0, 112], sizes = [8, 16, 16], strides = [1, 1, 1]} : vector<8x16x128xbf16> to vector<8x16x16xbf16>
    "tpu.trace_start"() <{level = 10 : i32, message = "bts,bsd->btd"}> : () -> ()
    %cst_43 = arith.constant dense<0.000000e+00> : vector<8x16x16xf32>
    %157 = tpu.matmul %155, %156, %cst_43 {dimension_numbers = #tpu.dot_dimension_numbers<[2], [1], [1], [2], [0, 0, 0, 1, 1, 2], [0], [0]>} : vector<8x16x16xbf16>, vector<8x16x16xbf16>, vector<8x16x16xf32> -> vector<8x16x16xf32>
    "tpu.trace_stop"() : () -> ()
    %158 = tpu.concatenate %31, %49, %67, %85, %103, %121, %139, %157 in 2 : vector<8x16x16xf32>, vector<8x16x16xf32>, vector<8x16x16xf32>, vector<8x16x16xf32>, vector<8x16x16xf32>, vector<8x16x16xf32>, vector<8x16x16xf32>, vector<8x16x16xf32> -> vector<8x16x128xf32>
    %c0_44 = arith.constant 0 : index
    %c0_45 = arith.constant 0 : index
    %c0_46 = arith.constant 0 : index
    %159 = vector.load %arg3[%c0_44, %c0_45, %c0_46] : memref<8x16x128xf32, #tpu.memory_space<vmem>>, vector<8x16x128xf32>
    tpu.vector_store %arg3[%c0_44, %c0_45, %c0_46], %158 {strides = array<i32>} : memref<8x16x128xf32, #tpu.memory_space<vmem>>, vector<8x16x128xf32>,
    return
  }
  func.func @transform_0(%arg0: i32) -> (i32, i32, i32) {
    %c0_i32 = arith.constant 0 : i32
    %c0_i32_0 = arith.constant 0 : i32
    %c0_i32_1 = arith.constant 0 : i32
    return %arg0, %c0_i32, %c0_i32_0 : i32, i32, i32
  }
  func.func @transform_1(%arg0: i32) -> (i32, i32) {
    %c0_i32 = arith.constant 0 : i32
    %c0_i32_0 = arith.constant 0 : i32
    %c0_i32_1 = arith.constant 0 : i32
    return %c0_i32, %c0_i32_0 : i32, i32
  }
  func.func @transform_2(%arg0: i32) -> (i32, i32, i32) {
    %c0_i32 = arith.constant 0 : i32
    %c0_i32_0 = arith.constant 0 : i32
    %c0_i32_1 = arith.constant 0 : i32
    return %arg0, %c0_i32, %c0_i32_0 : i32, i32, i32
  }
}

</mosaic_0001>

<bundles_post_ra>
// kernel: tpu_custom_call.1
= control target key start
LH: loop header
LB: loop body
LE: loop exit
PB: predicated region body
PF: predicated region fallthrough
CT: control target
= control target key end

     0   :  { %7 = vsyncpa [#allocation3], 0  ;;  %s10106_s0 = inlined_call_operand.hbm [shape: f32[16,16,128], index: 0, kind: input, shape index: {}]   ;;  %s10107_s1 = inlined_call_operand.hbm [shape: bf16[128,384], index: 1, kind: input, shape index: {}]   ;;  %s10108_s2 = inlined_call_operand.hbm [shape: f32[16,16,128], index: 2, kind: output, shape index: {}]  }
   0x1   :  { %9 = vsyncpa [#allocation3 + $0x1], 0 }
   0x2   :  { %10 = vsyncpa [#allocation6], 0 }
   0x3   :  { %11 = vsyncpa [#allocation4], 0 }
   0x4   :  { %13 = vsyncpa [#allocation4 + $0x1], 0  ;;  %s7132_s9 = smov 0   ;;  %s7134_s10 = smov 0  }
   0x5   :  { %s7136_s11 = smov 0   ;;  %s7138_s12 = smov 0  }
   0x6 LB: > { %s7153_s13 = sadd.s32 4294967295, %s7101_s12   ;;  %s6119_s14 = sadd.s32 4294967294, %s7101_s12   ;;  %s7101_s12 = sphi %s7138_s12, %s10298_s12   ;;  %s7097_s11 = sphi %s7136_s11, %s10297_s11   ;;  %s7093_s10 = sphi %s7134_s10, %s10296_s10   ;;  %s7089_s9 = sphi %s7132_s9, %s10295_s9  }
   0x7   : > { %p39_p0 = scmp.ne.s32.totalorder %s7093_s10, %s7089_s9  ;;  %p40_p1 = scmp.eq.s32.totalorder %s7153_s13, 0 }
   0x8   : > { %p84_p2 = scmp.eq.s32.totalorder %s7153_s13, 1  ;;  %p90_p3 = scmp.eq.s32.totalorder %s6119_s14, 1 }
   0x9   : > { %p7162_p4 = por %p40_p1, %p39_p0  ;;  %p6120_p5 = scmp.ge.s32.totalorder %s7101_s12, 1 }
   0xa   : > { %p7167_p6 = por %p90_p3, %p39_p0  ;;  %p97_p7 = scmp.lt.s32.totalorder %s7101_s12, 3 }
   0xb   : > { %s108_s19 = sshll.u32 %s10107_s1, 4  ;;  %s7103_s21 = smov [#allocation5]   ;;  %s109_s19 = int_to_ptr.hbm [resolvable:$true] %s108_s19 }
   0xc   : > { %p7175_p8 = pnand %p6120_p5, %p97_p7  ;;  %s110_s22 = sshll.u32 %s7103_s21, 4  ;;  %s111_s22 = int_to_ptr.vmem [resolvable:$true] %s110_s22 }
   0xd   : > { %s7185_s23 = sadd.s32 1, %s7101_s12   ;;  %s7104_s24 = smov 192  }
   0xe   : > { %p6397_p9 = pneg %p7175_p8  ;;  %s7105_s25 = smov 12  }
   0xf   : > { %s23_s26 = ssub.s32 %s7101_s12, %s7185_s23  ;;  %s26_s27 = sadd.s32 1, %s7097_s11 }
  0x10   : > { %p6398_p10 = pnand %p6397_p9, %p40_p1  ;;  %p24_p12 = scmp.eq.s32.totalorder %s23_s26, 0 }
  0x11   : > { %p33_p13 = scmp.ne.s32.totalorder %s7097_s11, %s7093_s10  ;;  %p34_p0 = scmp.eq.s32.totalorder %s7101_s12, 0 }
  0x12   : > { %6400 = dma.hbm_to_vmem [thread:$0]  (!%p6398_p10), %s109_s19, 3072, %s111_s22, [#allocation6], %s7104_s24, %s7104_s24, %s7105_s25  }
  0x13   : > { %p6410_p3 = scmp.lt.s32.totalorder %s7101_s12, 2  ;;  %p35_p5 = por %p34_p0, %p33_p13 }
  0x14   : > { %s7195_s28 = scalar_select %p24_p12, %s7097_s11, %s26_s27  }
  0x15   : > { %p7199_p7 = por %p84_p2, %p33_p13  ;;  %s124_s30 = sand.u32 1, %s7097_s11  }
  0x16   : > { %s6362_s3 = sshll.u32 %s7101_s12, 7  ;;  %s6123_s4 = sshll.u32 %s124_s30, 7 }
  0x17   : > { %s134_s7 = scalar_lea.hbm %s10106_s0, %s6362_s3  ;;  %s128_s14 = scalar_lea.vmem [#allocation2], %s6123_s4 }
  0x18   : > { %s135_s8 = sshll.u32 %s134_s7, 4  ;;  %s137_s17 = sshll.u32 %s128_s14, 4  ;;  %s136_s8 = int_to_ptr.hbm [resolvable:$true] %s135_s8  ;;  %s138_s17 = int_to_ptr.vmem [resolvable:$true] %s137_s17 }
  0x19   : > { %p7210_p9 = pnand %p6410_p3, %p35_p5  ;;  %s125_s19 = scalar_lea.sflag [#allocation3], %s124_s30 }
  0x1a   : > { %s7001_s21 = sshra.s32 %s136_s8, 4  ;;  %s7008_s26 = scalar_lea.hbm %s10106_s0, 256  ;;  %s7002_s21 = int_to_ptr.hbm [resolvable:$true] %s7001_s21 }
  0x1b   : > { %s7003_s22 = scalar_lea.hbm %s7002_s21, 128  ;;  %p7005_p10 = pneg %p7210_p9 }
  0x1c   : > { %p7004_p2 = scmp.ne.s32.totalorder %s7002_s21, %s7003_s22  ;;  %p7009_p0 = scmp.lt.s32.totalorder %s7002_s21, %s10106_s0 }
  0x1d   : > { %p7010_p3 = scmp.lt.s32.totalorder %s7008_s26, %s7003_s22 }
  0x1e   : > { %p7006_p12 = pnand %p7005_p10, %p7004_p2 }
  0x1f   : > { %p7011_p5 = por %p7010_p3, %p7009_p0 }
  0x20   : > { %p7007_p13 = pneg %p7006_p12 }
  0x22   : > { %p7012_p11 = pnand %p7011_p5, %p7007_p13 }
  0x24   : > { %7015 = shalt.err (!%p7012_p11)
}
  0x25   : > { %s7106_s30 = smov 128   ;;  %s7107_s4 = smov 8  }
  0x26   : > { %6404 = dma.hbm_to_vmem [thread:$0]  (!%p7210_p9), %s136_s8, 2048, %s138_s17, %s125_s19, %s7106_s30, %s7106_s30, %s7107_s4  }
  0x27   : > { %149 = sbr.rel (%p7175_p8) target bundleno = 4558 (0x11ce), region = 28 }
  0x2c   : > { %s7227_s5 = sand.u32 1, %s7093_s10  }
  0x2d   : > { %s6128_s6 = sshll.u32 %s7227_s5, 7  ;;  %s152_s7 = scalar_lea.sflag [#allocation3], %s7227_s5 }
  0x2e   : > { %s7233_s14 = scalar_lea.vmem [#allocation2], %s6128_s6 }
  0x2f   : > { %7076 = dma.done.wait (%p7162_p4), %s152_s7, 2048  }
  0x30   : > { %7078 = vsyncadd (%p7162_p4), %s152_s7, 4294965248 }
  0x31   : > { %7080 = dma.done.wait (%p40_p1), [#allocation6], 3072  }
  0x32   : > { %7082 = vsyncadd (%p40_p1), [#allocation6], 4294964224  ;;  %v6384_v0 = vld [vmem:[#allocation5 + $0xac] sm:$0xf]  ;;  %v6219_v1 = vld [vmem:[#allocation5 + $0xb4] sm:$0xf0] }
  0x33   : > { %v6381_v2 = vld [vmem:[#allocation5 + $0x94] sm:$0xf]  ;;  %v6222_v3 = vor.u32 %v6384_v0, %v6219_v1  ;;  %v6207_v4 = vld [vmem:[#allocation5 + $0x9c] sm:$0xf0]  ;;  %v6217_v5 = vld [vmem:[#allocation5 + $0xa8] sm:$0xf] }
  0x34   : > { %v6385_v6 = vld [vmem:[#allocation5 + $0xb0] sm:$0xf0]  ;;  %v6205_v8 = vld [vmem:[#allocation5 + $0x90] sm:$0xf]  ;;  %v6210_v9 = vor.u32 %v6381_v2, %v6207_v4  ;;  %v6382_v10 = vld [vmem:[#allocation5 + $0x98] sm:$0xf0] }
  0x35   : > { %v6218_v7 = vor.u32 %v6385_v6, %v6217_v5  ;;  %418 = vmatpush.bf16.msra.mxu1 %v6222_v3  ;;  %v6378_v11 = vld [vmem:[#allocation5 + $0x7c] sm:$0xf]  ;;  %v6195_v12 = vld [vmem:[#allocation5 + $0x84] sm:$0xf0]  ;;  %v6206_v13 = vor.u32 %v6382_v10, %v6205_v8  ;;  %v6193_v14 = vld [vmem:[#allocation5 + $0x78] sm:$0xf] }
  0x36   : > { %v6379_v15 = vld [vmem:[#allocation5 + $0x80] sm:$0xf0]  ;;  %v6198_v16 = vor.u32 %v6378_v11, %v6195_v12  ;;  %v6183_v18 = vld [vmem:[#allocation5 + $0x6c] sm:$0xf0]  ;;  %v6181_v20 = vld [vmem:[#allocation5 + $0x60] sm:$0xf] }
  0x37   : > { %369 = vmatpush.bf16.msra.mxu0 %v6218_v7  ;;  %v6375_v17 = vld [vmem:[#allocation5 + $0x64] sm:$0xf]  ;;  %v6194_v19 = vor.u32 %v6379_v15, %v6193_v14  ;;  %v6376_v21 = vld [vmem:[#allocation5 + $0x68] sm:$0xf0]  ;;  %v6225_v23 = vld [vmem:[#allocation5 + $0xb0] sm:$0xf] }
  0x38   : > { %v6186_v22 = vor.u32 %v6375_v17, %v6183_v18  ;;  %v6386_v24 = vld [vmem:[#allocation5 + $0xb8] sm:$0xf0]  ;;  %v6372_v25 = vld [vmem:[#allocation5 + $0x4c] sm:$0xf]  ;;  %v6171_v26 = vld [vmem:[#allocation5 + $0x54] sm:$0xf0]  ;;  %v6182_v27 = vor.u32 %v6376_v21, %v6181_v20 }
  0x39   : > { %419 = vmatpush.bf16.msra.mxu1 %v6210_v9  ;;  %v6226_v28 = vor.u32 %v6386_v24, %v6225_v23  ;;  %v6169_v29 = vld [vmem:[#allocation5 + $0x48] sm:$0xf]  ;;  %v6373_v30 = vld [vmem:[#allocation5 + $0x50] sm:$0xf0]  ;;  %v6174_v31 = vor.u32 %v6372_v25, %v6171_v26  ;;  %v6159_v33 = vld [vmem:[#allocation5 + $0x3c] sm:$0xf0] }
  0x3a   : > { %v6369_v32 = vld [vmem:[#allocation5 + $0x34] sm:$0xf]  ;;  %v6170_v34 = vor.u32 %v6373_v30, %v6169_v29  ;;  %v6157_v35 = vld [vmem:[#allocation5 + $0x30] sm:$0xf]  ;;  %v6370_v36 = vld [vmem:[#allocation5 + $0x38] sm:$0xf0] }
  0x3b   : > { %370 = vmatpush.bf16.msra.mxu0 %v6206_v13  ;;  %467 = vmatpush.bf16.msra.mxu2 %v6226_v28  ;;  %v6213_v37 = vld [vmem:[#allocation5 + $0x98] sm:$0xf]  ;;  %v6383_v38 = vld [vmem:[#allocation5 + $0xa0] sm:$0xf0]  ;;  %v6201_v39 = vld [vmem:[#allocation5 + $0x80] sm:$0xf]  ;;  %v6162_v40 = vor.u32 %v6369_v32, %v6159_v33  ;;  %v6158_v45 = vor.u32 %v6370_v36, %v6157_v35 }
  0x3c   : > { %v6214_v41 = vor.u32 %v6383_v38, %v6213_v37  ;;  %v6380_v42 = vld [vmem:[#allocation5 + $0x88] sm:$0xf0]  ;;  %v6366_v43 = vld [vmem:[#allocation5 + $0x1c] sm:$0xf]  ;;  %v6147_v44 = vld [vmem:[#allocation5 + $0x24] sm:$0xf0] }
  0x3d   : > { %420 = vmatpush.bf16.msra.mxu1 %v6198_v16  ;;  %v6145_v46 = vld [vmem:[#allocation5 + $0x18] sm:$0xf]  ;;  %v6367_v47 = vld [vmem:[#allocation5 + $0x20] sm:$0xf0]  ;;  %v6202_v48 = vor.u32 %v6380_v42, %v6201_v39  ;;  %v6189_v49 = vld [vmem:[#allocation5 + $0x68] sm:$0xf]  ;;  %v6150_v51 = vor.u32 %v6366_v43, %v6147_v44 }
  0x3e   : > { %v6377_v50 = vld [vmem:[#allocation5 + $0x70] sm:$0xf0]  ;;  %v6363_v52 = vld [vmem:[#allocation5 + $0x4] sm:$0xf]  ;;  %v6135_v53 = vld [vmem:[#allocation5 + $0xc] sm:$0xf0]  ;;  %v6146_v54 = vor.u32 %v6367_v47, %v6145_v46 }
  0x3f   : > { %371 = vmatpush.bf16.msra.mxu0 %v6194_v19  ;;  %468 = vmatpush.bf16.msra.mxu2 %v6214_v41  ;;  %v6133_v55 = vld [vmem:[#allocation5] sm:$0xf]  ;;  %v6364_v56 = vld [vmem:[#allocation5 + $0x8] sm:$0xf0]  ;;  %v6190_v57 = vor.u32 %v6377_v50, %v6189_v49  ;;  %v6177_v58 = vld [vmem:[#allocation5 + $0x50] sm:$0xf]  ;;  %v6138_v60 = vor.u32 %v6363_v52, %v6135_v53 }
  0x40   : > { %v6374_v59 = vld [vmem:[#allocation5 + $0x58] sm:$0xf0]  ;;  %v185_v61 = vld [vmem:[%s7233_s14] sm:$0xff]  ;;  %v186_v62 = vld [vmem:[%s7233_s14 + $0x8] sm:$0xff]  ;;  %v6134_v63 = vor.u32 %v6364_v56, %v6133_v55  ;;  %vm574_vm0 = vcmask 130048   ;;  %s7108_s15 = smov 112  }
  0x41   : > { %421 = vmatpush.bf16.msra.mxu1 %v6186_v22  ;;  %v6178_v0 = vor.u32 %v6374_v59, %v6177_v58  ;;  %v201_v1 = vpack.c.bf16 %v186_v62, %v185_v61  ;;  %v6165_v2 = vld [vmem:[#allocation5 + $0x38] sm:$0xf]  ;;  %v6371_v3 = vld [vmem:[#allocation5 + $0x40] sm:$0xf0]  ;;  %v6153_v4 = vld [vmem:[#allocation5 + $0x20] sm:$0xf] }
  0x42   : > { %v6166_v5 = vor.u32 %v6371_v3, %v6165_v2  ;;  %v6368_v6 = vld [vmem:[#allocation5 + $0x28] sm:$0xf0]  ;;  %v6141_v8 = vld [vmem:[#allocation5 + $0x8] sm:$0xf]  ;;  %v6365_v9 = vld [vmem:[#allocation5 + $0x10] sm:$0xf0] }
  0x43   : > { %372 = vmatpush.bf16.msra.mxu0 %v6182_v27  ;;  %469 = vmatpush.bf16.msra.mxu2 %v6202_v48  ;;  %v6154_v7 = vor.u32 %v6368_v6, %v6153_v4  ;;  %v6142_v10 = vor.u32 %v6365_v9, %v6141_v8  ;;  %v187_v11 = vld [vmem:[%s7233_s14 + $0x10] sm:$0xff]  ;;  %v188_v12 = vld [vmem:[%s7233_s14 + $0x18] sm:$0xff]  ;;  %v189_v14 = vld [vmem:[%s7233_s14 + $0x20] sm:$0xff]  ;;  %s7109_s20 = smov 96   ;;  %s7110_s8 = smov 80   ;;  %vm5901_vm1 = vcmask 261120  }
  0x44   : > { %v202_v13 = vpack.c.bf16 %v188_v12, %v187_v11  ;;  %v190_v15 = vld [vmem:[%s7233_s14 + $0x28] sm:$0xff]  ;;  %v191_v17 = vld [vmem:[%s7233_s14 + $0x30] sm:$0xff]  ;;  %v192_v18 = vld [vmem:[%s7233_s14 + $0x38] sm:$0xff]  ;;  %s7111_s17 = smov 64   ;;  %s7112_s18 = smov 48   ;;  %vm5918_vm2 = vcmask 392192  }
  0x45   : > { %422 = vmatpush.bf16.msra.mxu1 %v6174_v31  ;;  %v203_v16 = vpack.c.bf16 %v190_v15, %v189_v14  ;;  %v204_v19 = vpack.c.bf16 %v192_v18, %v191_v17  ;;  %v193_v20 = vld [vmem:[%s7233_s14 + $0x40] sm:$0xff]  ;;  %v194_v21 = vld [vmem:[%s7233_s14 + $0x48] sm:$0xff]  ;;  %v195_v23 = vld [vmem:[%s7233_s14 + $0x50] sm:$0xff]  ;;  %s7113_s19 = smov 32   ;;  %s7114_s21 = smov 16   ;;  %vm5935_vm3 = vcmask 523264  }
  0x46   : > { %v205_v22 = vpack.c.bf16 %v194_v21, %v193_v20  ;;  %v196_v24 = vld [vmem:[%s7233_s14 + $0x58] sm:$0xff]  ;;  %v197_v26 = vld [vmem:[%s7233_s14 + $0x60] sm:$0xff]  ;;  %v198_v27 = vld [vmem:[%s7233_s14 + $0x68] sm:$0xff]  ;;  %vm5952_vm4 = vcmask 654336   ;;  %vm5969_vm5 = vcmask 785408   ;;  %vm5986_vm6 = vcmask 916480  }
  0x47   : > { %373 = vmatpush.bf16.msra.mxu0 %v6170_v34  ;;  %470 = vmatpush.bf16.msra.mxu2 %v6190_v57  ;;  %v206_v25 = vpack.c.bf16 %v196_v24, %v195_v23  ;;  %v207_v28 = vpack.c.bf16 %v198_v27, %v197_v26  ;;  %v199_v29 = vld [vmem:[%s7233_s14 + $0x70] sm:$0xff]  ;;  %v200_v30 = vld [vmem:[%s7233_s14 + $0x78] sm:$0xff]  ;;  %s10015_s22 = scalar_lea.vmem [#allocation7], %s6128_s6  ;;  %s6388_s24 = sshll.u32 %s7153_s13, 7 }
  0x48   : > { %v208_v31 = vpack.c.bf16 %v200_v30, %v199_v29  ;;  %s6032_s27 = scalar_lea.hbm %s10108_s2, %s6388_s24  ;;  %s6033_s3 = sshll.u32 %s10015_s22, 4  ;;  %s6034_s3 = int_to_ptr.vmem [resolvable:$true] %s6033_s3 }
  0x49   : > { %423 = vmatpush.bf16.msra.mxu1 %v6162_v40  ;;  %s6035_s30 = sshll.u32 %s6032_s27, 4  ;;  %s6020_s13 = scalar_lea.sflag [#allocation4], %s7227_s5  ;;  %s6036_s30 = int_to_ptr.hbm [resolvable:$true] %s6035_s30 }
  0x4a   : > { %s7045_s4 = sshra.s32 %s6036_s30, 4  ;;  %s7046_s4 = int_to_ptr.hbm [resolvable:$true] %s7045_s4 }
  0x4b   : > { %374 = vmatpush.bf16.msra.mxu0 %v6158_v45  ;;  %471 = vmatpush.bf16.msra.mxu2 %v6178_v0  ;;  %s7047_s6 = scalar_lea.hbm %s7046_s4, 128  ;;  %p7052_p11 = scmp.lt.s32.totalorder %s7046_s4, %s10108_s2 }
  0x4c   : > { %p7048_p1 = scmp.ne.s32.totalorder %s7046_s4, %s7047_s6 }
  0x4d   : > { %424 = vmatpush.bf16.msra.mxu1 %v6150_v51 }
  0x4e   : > { %p7049_p4 = pnand %p7048_p1, %p7199_p7 }
  0x4f   : > { %375 = vmatpush.bf16.msra.mxu0 %v6146_v54  ;;  %472 = vmatpush.bf16.msra.mxu2 %v6166_v5 }
  0x50   : > { %p7050_p8 = pneg %p7049_p4 }
  0x51   : > { %425 = vmatpush.bf16.msra.mxu1 %v6138_v60 }
  0x53   : > { %376 = vmatpush.bf16.msra.mxu0 %v6134_v63  ;;  %473 = vmatpush.bf16.msra.mxu2 %v6154_v7 }
  0x54   : > { %426 = vmatmul.bf16.vlgmr.msra.gmra.mxu1 %v201_v1 }
  0x56   : > { %377 = vmatmul.bf16.vlgmr.msra.gmra.mxu0 %v201_v1 }
  0x57   : > { %474 = vmatpush.bf16.msra.mxu2 %v6142_v10 }
  0x5a   : > { %475 = vmatmul.bf16.vlgmr.msra.gmra.mxu2 %v201_v1 }
  0x64   : > { %431 = vmatmul.bf16.gmra.mxu1 %v202_v13 }
  0x66   : > { %382 = vmatmul.bf16.gmra.mxu0 %v202_v13 }
  0x6a   : > { %480 = vmatmul.bf16.gmra.mxu2 %v202_v13 }
  0x74   : > { %436 = vmatmul.bf16.gmra.mxu1 %v203_v16 }
  0x76   : > { %387 = vmatmul.bf16.gmra.mxu0 %v203_v16 }
  0x7a   : > { %485 = vmatmul.bf16.gmra.mxu2 %v203_v16 }
  0x84   : > { %441 = vmatmul.bf16.gmra.mxu1 %v204_v19 }
  0x86   : > { %392 = vmatmul.bf16.gmra.mxu0 %v204_v19 }
  0x8a   : > { %490 = vmatmul.bf16.gmra.mxu2 %v204_v19 }
  0x94   : > { %446 = vmatmul.bf16.gmra.mxu1 %v205_v22 }
  0x96   : > { %397 = vmatmul.bf16.gmra.mxu0 %v205_v22 }
  0x9a   : > { %495 = vmatmul.bf16.gmra.mxu2 %v205_v22 }
  0xa4   : > { %451 = vmatmul.bf16.gmra.mxu1 %v206_v25 }
  0xa6   : > { %402 = vmatmul.bf16.gmra.mxu0 %v206_v25 }
  0xaa   : > { %500 = vmatmul.bf16.gmra.mxu2 %v206_v25 }
  0xb4   : > { %456 = vmatmul.bf16.gmra.mxu1 %v207_v28 }
  0xb6   : > { %407 = vmatmul.bf16.gmra.mxu0 %v207_v28 }
  0xba   : > { %505 = vmatmul.bf16.gmra.mxu2 %v207_v28 }
  0xc4   : > { %461 = vmatmul.bf16.gmra.mxu1 %v208_v31 }
  0xc6   : > { %412 = vmatmul.bf16.gmra.mxu0 %v208_v31 }
  0xca   : > { %510 = vmatmul.bf16.gmra.mxu2 %v208_v31 }
  0xd1   : > { %v427_v32 = vpop.f32.mrf.mxu1 }
  0xd2   : > { %v532_v35 = vpack.c.bf16 %v427_v32, %v427_v32 }
  0xd3   : > { %v378_v33 = vpop.f32.mrf.mxu0 }
  0xd4   : > { %v516_v34 = vpack.c.bf16 %v378_v33, %v378_v33  ;;  %v571_v41 = vunpack.c.l.b16 %v532_v35 }
  0xd6   : > { %v566_v39 = vunpack.c.l.b16 %v516_v34 }
  0xd9   : > { %v429_v36 = vpop.f32.mrf.mxu1 }
  0xda   : > { %v533_v37 = vpack.c.bf16 %v429_v36, %v429_v36 }
  0xdb   : > { %v380_v38 = vpop.f32.mrf.mxu0 }
  0xdc   : > { %v517_v40 = vpack.c.bf16 %v380_v38, %v380_v38  ;;  %v572_v42 = vunpack.c.l.b16 %v533_v37 }
  0xdd   : > { %v7269_v49 = vpop.f32.mrf.mxu2 }
  0xde   : > { %v567_v43 = vunpack.c.l.b16 %v517_v40  ;;  %v7259_v44 = vpack.c.b16 %v572_v42, %v571_v41 }
  0xe0   : > { %v7261_v45 = vpack.c.b16 %v567_v43, %v566_v39  ;;  %1239 = vrot.lane.b32.xlu0 %v7259_v44, %s7108_s15  ;;  %v579_v46 = vsel %vm574_vm0, %v7259_v44, 0 }
  0xe1   : > { %v432_v47 = vpop.f32.mrf.mxu1  ;;  %588 = vmatpush.bf16.xpose.msra.mxu3 %v579_v46 }
  0xe2   : > { %1237 = vrot.lane.b32.xlu2 %v7261_v45, %s7108_s15  ;;  %v534_v50 = vpack.c.bf16 %v432_v47, %v432_v47 }
  0xe3   : > { %v383_v48 = vpop.f32.mrf.mxu0 }
  0xe4   : > { %v602_v54 = vunpack.c.l.b16 %v534_v50  ;;  %v518_v58 = vpack.c.bf16 %v383_v48, %v383_v48 }
  0xe5   : > { %v7273_v56 = vpop.f32.mrf.mxu2 }
  0xe6   : > { %v597_v62 = vunpack.c.l.b16 %v518_v58 }
  0xe8   : > { %6227 = vmatmul.msk.bf16.vlgmr.msra.gmra.mxu3 %vm574_vm0, %v7261_v45 }
  0xe9   : > { %v434_v51 = vpop.f32.mrf.mxu1 }
  0xea   : > { %v535_v52 = vpack.c.bf16 %v434_v51, %v434_v51 }
  0xeb   : > { %v385_v53 = vpop.f32.mrf.mxu0 }
  0xec   : > { %v603_v55 = vunpack.c.l.b16 %v535_v52  ;;  %v519_v59 = vpack.c.bf16 %v385_v53, %v385_v53 }
  0xed   : > { %v7281_v1 = vpop.f32.mrf.mxu2 }
  0xee   : > { %v7275_v57 = vpack.c.b16 %v603_v55, %v602_v54  ;;  %v598_v63 = vunpack.c.l.b16 %v519_v59 }
  0xf0   : > { %1263 = vrot.lane.b32.xlu1 %v7275_v57, %s7108_s15  ;;  %v609_v60 = vsel %vm574_vm0, %v7275_v57, 0  ;;  %v7283_v2 = vpack.c.b16 %v598_v63, %v597_v62 }
  0xf1   : > { %v437_v61 = vpop.f32.mrf.mxu1  ;;  %618 = vmatpush.bf16.xpose.msrb.mxu3 %v609_v60 }
  0xf2   : > { %v536_v3 = vpack.c.bf16 %v437_v61, %v437_v61 }
  0xf3   : > { %v388_v0 = vpop.f32.mrf.mxu0 }
  0xf4   : > { %v632_v7 = vunpack.c.l.b16 %v536_v3  ;;  %v520_v11 = vpack.c.bf16 %v388_v0, %v388_v0 }
  0xf5   : > { %v7289_v9 = vpop.f32.mrf.mxu2 }
  0xf6   : > { %v627_v15 = vunpack.c.l.b16 %v520_v11 }
  0xf8   : > { %6228 = vmatmul.msk.bf16.vlgmr.msrb.gmra.mxu3 %vm574_vm0, %v7283_v2  ;;  %1261 = vrot.lane.b32.xlu1 %v7283_v2, %s7108_s15 }
  0xf9   : > { %v439_v4 = vpop.f32.mrf.mxu1 }
  0xfa   : > { %v537_v5 = vpack.c.bf16 %v439_v4, %v439_v4 }
  0xfb   : > { %v390_v6 = vpop.f32.mrf.mxu0 }
  0xfc   : > { %v633_v8 = vunpack.c.l.b16 %v537_v5  ;;  %v521_v12 = vpack.c.bf16 %v390_v6, %v390_v6 }
  0xfd   : > { %v486_v18 = vpop.f32.mrf.mxu2 }
  0xfe   : > { %v7291_v10 = vpack.c.b16 %v633_v8, %v632_v7  ;;  %v628_v16 = vunpack.c.l.b16 %v521_v12  ;;  %v552_v24 = vpack.c.bf16 %v486_v18, %v486_v18 }
 0x100   : > { %v639_v13 = vsel %vm574_vm0, %v7291_v10, 0  ;;  %v7295_v19 = vpack.c.b16 %v628_v16, %v627_v15  ;;  %v1076_v31 = vunpack.c.l.b16 %v552_v24 }
 0x101   : > { %v442_v14 = vpop.f32.mrf.mxu1  ;;  %648 = vmatpush.bf16.xpose.msra.mxu3 %v639_v13 }
 0x102   : > { %v538_v20 = vpack.c.bf16 %v442_v14, %v442_v14 }
 0x103   : > { %v393_v17 = vpop.f32.mrf.mxu0 }
 0x104   : > { %v662_v25 = vunpack.c.l.b16 %v538_v20  ;;  %v522_v27 = vpack.c.bf16 %v393_v17, %v393_v17 }
 0x105   : > { %v488_v28 = vpop.f32.mrf.mxu2 }
 0x106   : > { %v553_v32 = vpack.c.bf16 %v488_v28, %v488_v28  ;;  %v657_v36 = vunpack.c.l.b16 %v522_v27 }
 0x108   : > { %6229 = vmatmul.msk.bf16.vlgmr.msra.gmra.mxu3 %vm574_vm0, %v7295_v19  ;;  %v1077_v34 = vunpack.c.l.b16 %v553_v32 }
 0x109   : > { %v444_v21 = vpop.f32.mrf.mxu1 }
 0x10a   : > { %v539_v22 = vpack.c.bf16 %v444_v21, %v444_v21  ;;  %v7303_v39 = vpack.c.b16 %v1077_v34, %v1076_v31 }
 0x10b   : > { %v395_v23 = vpop.f32.mrf.mxu0 }
 0x10c   : > { %v663_v26 = vunpack.c.l.b16 %v539_v22  ;;  %v523_v30 = vpack.c.bf16 %v395_v23, %v395_v23  ;;  %1090 = vmatpush.bf16.msrb.mxu0 %v7303_v39 }
 0x10d   : > { %v491_v40 = vpop.f32.mrf.mxu2 }
 0x10e   : > { %v7299_v29 = vpack.c.b16 %v663_v26, %v662_v25  ;;  %v658_v37 = vunpack.c.l.b16 %v523_v30  ;;  %v554_v48 = vpack.c.bf16 %v491_v40, %v491_v40 }
 0x110   : > { %v669_v33 = vsel %vm574_vm0, %v7299_v29, 0  ;;  %v7306_v41 = vpack.c.b16 %v658_v37, %v657_v36  ;;  %v1104_v58 = vunpack.c.l.b16 %v554_v48 }
 0x111   : > { %v447_v35 = vpop.f32.mrf.mxu1  ;;  %678 = vmatpush.bf16.xpose.msrb.mxu3 %v669_v33 }
 0x112   : > { %v540_v42 = vpack.c.bf16 %v447_v35, %v447_v35 }
 0x113   : > { %v398_v38 = vpop.f32.mrf.mxu0 }
 0x114   : > { %v692_v50 = vunpack.c.l.b16 %v540_v42  ;;  %v524_v52 = vpack.c.bf16 %v398_v38, %v398_v38 }
 0x115   : > { %v493_v53 = vpop.f32.mrf.mxu2 }
 0x116   : > { %v555_v59 = vpack.c.bf16 %v493_v53, %v493_v53  ;;  %v687_v63 = vunpack.c.l.b16 %v524_v52  ;;  %v548_v52 = vpack.c.bf16 %v7269_v49, %v7269_v49  ;;  %v549_v53 = vpack.c.bf16 %v7273_v56, %v7273_v56 }
 0x117   : > { %v551_v49 = vpack.c.bf16 %v7289_v9, %v7289_v9 }
 0x118   : > { %6230 = vmatmul.msk.bf16.vlgmr.msrb.gmra.mxu3 %vm574_vm0, %v7306_v41  ;;  %v1105_v61 = vunpack.c.l.b16 %v555_v59  ;;  %v1020_v59 = vunpack.c.l.b16 %v548_v52 }
 0x119   : > { %v449_v43 = vpop.f32.mrf.mxu1 }
 0x11a   : > { %v541_v46 = vpack.c.bf16 %v449_v43, %v449_v43  ;;  %v7316_v4 = vpack.c.b16 %v1105_v61, %v1104_v58 }
 0x11b   : > { %v400_v47 = vpop.f32.mrf.mxu0 }
 0x11c   : > { %v693_v51 = vunpack.c.l.b16 %v541_v46  ;;  %v525_v55 = vpack.c.bf16 %v400_v47, %v400_v47  ;;  %1118 = vmatpush.bf16.msrb.mxu1 %v7316_v4 }
 0x11d   : > { %v496_v5 = vpop.f32.mrf.mxu2 }
 0x11e   : > { %v7310_v54 = vpack.c.b16 %v693_v51, %v692_v50  ;;  %v688_v0 = vunpack.c.l.b16 %v525_v55  ;;  %v556_v12 = vpack.c.bf16 %v496_v5, %v496_v5 }
 0x120   : > { %1335 = vrot.lane.b32.xlu1 %v7310_v54, %s7108_s15  ;;  %v699_v60 = vsel %vm574_vm0, %v7310_v54, 0  ;;  %v7319_v6 = vpack.c.b16 %v688_v0, %v687_v63  ;;  %v1132_v21 = vunpack.c.l.b16 %v556_v12 }
 0x121   : > { %v452_v62 = vpop.f32.mrf.mxu1  ;;  %708 = vmatpush.bf16.xpose.msra.mxu3 %v699_v60  ;;  %v1021_v60 = vunpack.c.l.b16 %v549_v53 }
 0x122   : > { %v542_v7 = vpack.c.bf16 %v452_v62, %v452_v62 }
 0x123   : > { %v403_v3 = vpop.f32.mrf.mxu0  ;;  %v7350_v5 = vpack.c.b16 %v1021_v60, %v1020_v59 }
 0x124   : > { %v722_v14 = vunpack.c.l.b16 %v542_v7  ;;  %v526_v16 = vpack.c.bf16 %v403_v3, %v403_v3  ;;  %v550_v3 = vpack.c.bf16 %v7281_v1, %v7281_v1 }
 0x125   : > { %v498_v17 = vpop.f32.mrf.mxu2 }
 0x126   : > { %v557_v22 = vpack.c.bf16 %v498_v17, %v498_v17  ;;  %v717_v26 = vunpack.c.l.b16 %v526_v16 }
 0x128   : > { %6231 = vmatmul.msk.bf16.vlgmr.msra.gmra.mxu3 %vm574_vm0, %v7319_v6  ;;  %v1133_v24 = vunpack.c.l.b16 %v557_v22 }
 0x129   : > { %v454_v8 = vpop.f32.mrf.mxu1 }
 0x12a   : > { %v543_v11 = vpack.c.bf16 %v454_v8, %v454_v8  ;;  %v7327_v28 = vpack.c.b16 %v1133_v24, %v1132_v21 }
 0x12b   : > { %v405_v13 = vpop.f32.mrf.mxu0 }
 0x12c   : > { %v723_v15 = vunpack.c.l.b16 %v543_v11  ;;  %v527_v20 = vpack.c.bf16 %v405_v13, %v405_v13  ;;  %1146 = vmatpush.bf16.msrb.mxu2 %v7327_v28  ;;  %v1048_v13 = vunpack.c.l.b16 %v550_v3 }
 0x12e   : > { %v7323_v18 = vpack.c.b16 %v723_v15, %v722_v14  ;;  %v718_v27 = vunpack.c.l.b16 %v527_v20  ;;  %v1049_v14 = vunpack.c.l.b16 %v551_v49 }
 0x130   : > { %v729_v23 = vsel %vm574_vm0, %v7323_v18, 0  ;;  %v7330_v31 = vpack.c.b16 %v718_v27, %v717_v26  ;;  %v7360_v17 = vpack.c.b16 %v1049_v14, %v1048_v13 }
 0x131   : > { %738 = vmatpush.bf16.xpose.msrb.mxu3 %v729_v23  ;;  %v457_v25 = vpop.f32.mrf.mxu1 }
 0x132   : > { %v544_v32 = vpack.c.bf16 %v457_v25, %v457_v25 }
 0x133   : > { %v408_v30 = vpop.f32.mrf.mxu0 }
 0x134   : > { %v752_v34 = vunpack.c.l.b16 %v544_v32  ;;  %v528_v36 = vpack.c.bf16 %v408_v30, %v408_v30 }
 0x136   : > { %v747_v43 = vunpack.c.l.b16 %v528_v36 }
 0x138   : > { %6232 = vmatmul.msk.bf16.vlgmr.msrb.gmra.mxu3 %vm574_vm0, %v7330_v31 }
 0x139   : > { %v459_v33 = vpop.f32.mrf.mxu1 }
 0x13a   : > { %v545_v35 = vpack.c.bf16 %v459_v33, %v459_v33 }
 0x13b   : > { %v410_v38 = vpop.f32.mrf.mxu0 }
 0x13c   : > { %v753_v37 = vunpack.c.l.b16 %v545_v35  ;;  %v529_v40 = vpack.c.bf16 %v410_v38, %v410_v38 }
 0x13e   : > { %v7334_v42 = vpack.c.b16 %v753_v37, %v752_v34  ;;  %v748_v46 = vunpack.c.l.b16 %v529_v40 }
 0x140   : > { %v759_v47 = vsel %vm574_vm0, %v7334_v42, 0  ;;  %v7338_v50 = vpack.c.b16 %v748_v46, %v747_v43 }
 0x141   : > { %v462_v48 = vpop.f32.mrf.mxu1  ;;  %768 = vmatpush.bf16.xpose.msra.mxu3 %v759_v47 }
 0x142   : > { %v546_v55 = vpack.c.bf16 %v462_v48, %v462_v48 }
 0x143   : > { %v413_v51 = vpop.f32.mrf.mxu0 }
 0x144   : > { %v782_v61 = vunpack.c.l.b16 %v546_v55  ;;  %v530_v63 = vpack.c.bf16 %v413_v51, %v413_v51 }
 0x146   : > { %v777_v8 = vunpack.c.l.b16 %v530_v63 }
 0x148   : > { %6233 = vmatmul.msk.bf16.vlgmr.msra.gmra.mxu3 %vm574_vm0, %v7338_v50 }
 0x149   : > { %v464_v58 = vpop.f32.mrf.mxu1 }
 0x14a   : > { %v547_v62 = vpack.c.bf16 %v464_v58, %v464_v58 }
 0x14b   : > { %v415_v7 = vpop.f32.mrf.mxu0 }
 0x14c   : > { %v783_v0 = vunpack.c.l.b16 %v547_v62  ;;  %v531_v11 = vpack.c.bf16 %v415_v7, %v415_v7 }
 0x14e   : > { %v7352_v56 = vpack.c.b16 %v783_v0, %v782_v61  ;;  %v778_v16 = vunpack.c.l.b16 %v531_v11 }
 0x150   : > { %v789_v12 = vsel %vm574_vm0, %v7352_v56, 0  ;;  %v7358_v9 = vpack.c.b16 %v778_v16, %v777_v8 }
 0x151   : > { %798 = vmatpush.bf16.xpose.msrb.mxu3 %v789_v12 }
 0x152   : > { %v1240_v15 = vpop.permute.xlu0 %1239 }
 0x153   : > { %v1245_v1 = vsel %vm574_vm0, %v1240_v15, 0 }
 0x154   : > { %1254 = vmatpush.bf16.xpose.msra.mxu2 %v1245_v1 }
 0x158   : > { %6234 = vmatmul.msk.bf16.vlgmr.msrb.gmra.mxu3 %vm574_vm0, %v7358_v9 }
 0x159   : > { %1034 = vmatpush.bf16.msra.mxu3 %v7350_v5 }
 0x15d   : > { %1062 = vmatpush.bf16.msrb.mxu3 %v7360_v17 }
 0x162   : > { %v7411_v11 = vpop.permute.xlu1 %1263 }
 0x16a   : > { %v7415_v13 = vpop.permute.xlu1 %1261 }
 0x16b   : > { %v590_v20 = vpop.f32.mrf.mxu3 }
 0x16c   : > { %v805_v21 = vmul.f32 0.25, %v590_v20 }
 0x16e   : > { %v821_v22 = vsel %vm574_vm0, %v805_v21, -inf }
 0x16f   : > { %822 = vmax.xlane.f32.xlu0 %v821_v22 }
 0x173   : > { %v592_v23 = vpop.f32.mrf.mxu3 }
 0x174   : > { %v7366_v24 = vmul.f32 0.25, %v592_v23 }
 0x176   : > { %v824_v25 = vsel %vm574_vm0, %v7366_v24, -inf }
 0x177   : > { %825 = vmax.xlane.f32.xlu0 %v824_v25 }
 0x17b   : > { %v620_v26 = vpop.f32.mrf.mxu3 }
 0x17c   : > { %v807_v27 = vmul.f32 0.25, %v620_v26 }
 0x17e   : > { %v827_v30 = vsel %vm574_vm0, %v807_v27, -inf }
 0x17f   : > { %828 = vmax.xlane.f32.xlu1 %v827_v30 }
 0x183   : > { %v622_v32 = vpop.f32.mrf.mxu3 }
 0x184   : > { %v7371_v33 = vmul.f32 0.25, %v622_v32 }
 0x186   : > { %v830_v34 = vsel %vm574_vm0, %v7371_v33, -inf }
 0x187   : > { %831 = vmax.xlane.f32.xlu1 %v830_v34 }
 0x18b   : > { %v650_v35 = vpop.f32.mrf.mxu3 }
 0x18c   : > { %v7375_v36 = vmul.f32 0.25, %v650_v35 }
 0x18e   : > { %v833_v37 = vsel %vm574_vm0, %v7375_v36, -inf }
 0x18f   : > { %834 = vmax.xlane.f32.xlu1 %v833_v37 }
 0x192   : > { %v7417_v16 = vpop.permute.xlu1 %1335 }
 0x193   : > { %v652_v38 = vpop.f32.mrf.mxu3 }
 0x194   : > { %v7379_v40 = vmul.f32 0.25, %v652_v38 }
 0x196   : > { %v836_v43 = vsel %vm574_vm0, %v7379_v40, -inf }
 0x197   : > { %837 = vmax.xlane.f32.xlu2 %v836_v43 }
 0x19b   : > { %v680_v46 = vpop.f32.mrf.mxu3 }
 0x19c   : > { %v7383_v47 = vmul.f32 0.25, %v680_v46 }
 0x19e   : > { %v839_v48 = vsel %vm574_vm0, %v7383_v47, -inf }
 0x19f   : > { %840 = vmax.xlane.f32.xlu0 %v839_v48 }
 0x1a3   : > { %v682_v51 = vpop.f32.mrf.mxu3 }
 0x1a4   : > { %v7387_v52 = vmul.f32 0.25, %v682_v51 }
 0x1a6   : > { %v842_v53 = vsel %vm574_vm0, %v7387_v52, -inf }
 0x1a7   : > { %843 = vmax.xlane.f32.xlu1 %v842_v53  ;;  %v7435_v53 = vpop.permute.xlu2 %1237 }
 0x1ab   : > { %v710_v55 = vpop.f32.mrf.mxu3 }
 0x1ac   : > { %v7391_v58 = vmul.f32 0.25, %v710_v55 }
 0x1ae   : > { %v845_v59 = vsel %vm574_vm0, %v7391_v58, -inf }
 0x1af   : > { %846 = vmax.xlane.f32.xlu2 %v845_v59 }
 0x1b3   : > { %v712_v60 = vpop.f32.mrf.mxu3 }
 0x1b4   : > { %v7395_v61 = vmul.f32 0.25, %v712_v60 }
 0x1b6   : > { %v848_v62 = vsel %vm574_vm0, %v7395_v61, -inf }
 0x1b7   : > { %849 = vmax.xlane.f32.xlu2 %v848_v62 }
 0x1bb   : > { %v740_v63 = vpop.f32.mrf.mxu3 }
 0x1bc   : > { %v7399_v0 = vmul.f32 0.25, %v740_v63 }
 0x1be   : > { %v851_v3 = vsel %vm574_vm0, %v7399_v0, -inf }
 0x1bf   : > { %852 = vmax.xlane.f32.xlu0 %v851_v3 }
 0x1c3   : > { %v742_v49 = vpop.f32.mrf.mxu3 }
 0x1c4   : > { %v7403_v7 = vmul.f32 0.25, %v742_v49 }
 0x1c6   : > { %v854_v8 = vsel %vm574_vm0, %v7403_v7, -inf }
 0x1c7   : > { %855 = vmax.xlane.f32.xlu1 %v854_v8 }
 0x1cb   : > { %v770_v12 = vpop.f32.mrf.mxu3 }
 0x1cc   : > { %v7442_v62 = vmul.f32 0.25, %v770_v12 }
 0x1ce   : > { %v857_v8 = vsel %vm574_vm0, %v7442_v62, -inf }
 0x1cf   : > { %1357 = vrot.lane.b32.xlu2 %v7330_v31, %s7108_s15 }
 0x1d3   : > { %1333 = vrot.lane.b32.xlu0 %v7319_v6, %s7108_s15  ;;  %v772_v15 = vpop.f32.mrf.mxu3 }
 0x1d4   : > { %v7419_v22 = vmul.f32 0.25, %v772_v15 }
 0x1d6   : > { %v860_v32 = vsel %vm574_vm0, %v7419_v22, -inf }
 0x1db   : > { %v800_v30 = vpop.f32.mrf.mxu3 }
 0x1dc   : > { %v7424_v35 = vmul.f32 0.25, %v800_v30 }
 0x1e0   : > { %1359 = vrot.lane.b32.xlu1 %v7323_v18, %s7108_s15 }
 0x1e2   : > { %v823_v14 = vpop.xlane.xlu0 %822 }
 0x1e3   : > { %v869_v1 = vsub.f32 %v805_v21, %v823_v14  ;;  %v863_v21 = vsel %vm574_vm0, %v7424_v35, -inf  ;;  %v802_v14 = vpop.f32.mrf.mxu3 }
 0x1e5   : > { %v885_v23 = vmul.f32 1.442695, %v869_v1 }
 0x1e7   : > { %6459 = vpow2.f32 %v885_v23  ;;  %v7455_v23 = vmul.f32 0.25, %v802_v14 }
 0x1ea   : > { %v826_v20 = vpop.xlane.xlu0 %825 }
 0x1eb   : > { %v870_v26 = vsub.f32 %v7366_v24, %v826_v20 }
 0x1ed   : > { %v887_v37 = vmul.f32 1.442695, %v870_v26  ;;  %v7429_v48 = vpop.eup %6459  ;;  %v866_v26 = vsel %vm574_vm0, %v7455_v23, -inf }
 0x1ef   : > { %6461 = vpow2.f32 %v887_v37 }
 0x1f2   : > { %v829_v25 = vpop.xlane.xlu1 %828 }
 0x1f3   : > { %v871_v34 = vsub.f32 %v807_v27, %v829_v25  ;;  %v917_v27 = vsel %vm574_vm0, %v7429_v48, 0.0 }
 0x1f5   : > { %v889_v38 = vmul.f32 1.442695, %v871_v34  ;;  %v7433_v51 = vpop.eup %6461 }
 0x1f7   : > { %6463 = vpow2.f32 %v889_v38 }
 0x1f8   : > { %861 = vmax.xlane.f32.xlu2 %v860_v32 }
 0x1fa   : > { %v832_v43 = vpop.xlane.xlu1 %831 }
 0x1fb   : > { %v872_v46 = vsub.f32 %v7371_v33, %v832_v43  ;;  %v920_v33 = vsel %vm574_vm0, %v7433_v51, 0.0 }
 0x1fd   : > { %864 = vmax.xlane.f32.xlu0 %v863_v21  ;;  %v891_v24 = vmul.f32 1.442695, %v872_v46  ;;  %v7438_v60 = vpop.eup %6463 }
 0x1fe   : > { %v923_v3 = vsel %vm574_vm0, %v7438_v60, 0.0 }
 0x1ff   : > { %6465 = vpow2.f32 %v891_v24 }
 0x200   : > { %918 = vadd.xlane.f32.xlu2 %v917_v27 }
 0x202   : > { %v835_v55 = vpop.xlane.xlu1 %834 }
 0x203   : > { %v873_v59 = vsub.f32 %v7375_v36, %v835_v55 }
 0x205   : > { %v893_v63 = vmul.f32 1.442695, %v873_v59  ;;  %921 = vadd.xlane.f32.xlu0 %v920_v33  ;;  %v7446_v49 = vpop.eup %6465 }
 0x206   : > { %v926_v12 = vsel %vm574_vm0, %v7446_v49, 0.0 }
 0x207   : > { %6467 = vpow2.f32 %v893_v63 }
 0x208   : > { %924 = vadd.xlane.f32.xlu2 %v923_v3 }
 0x20a   : > { %v838_v36 = vpop.xlane.xlu2 %837  ;;  %858 = vmax.xlane.f32.xlu1 %v857_v8 }
 0x20b   : > { %v874_v15 = vsub.f32 %v7379_v40, %v838_v36 }
 0x20d   : > { %v7453_v1 = vpop.eup %6467  ;;  %v895_v20 = vmul.f32 1.442695, %v874_v15  ;;  %927 = vadd.xlane.f32.xlu0 %v926_v12 }
 0x20e   : > { %v929_v25 = vsel %vm574_vm0, %v7453_v1, 0.0 }
 0x20f   : > { %6469 = vpow2.f32 %v895_v20 }
 0x210   : > { %930 = vadd.xlane.f32.xlu2 %v929_v25 }
 0x212   : > { %v841_v30 = vpop.xlane.xlu0 %840  ;;  %867 = vmax.xlane.f32.xlu1 %v866_v26 }
 0x213   : > { %v875_v40 = vsub.f32 %v7383_v47, %v841_v30 }
 0x215   : > { %v7462_v32 = vpop.eup %6469  ;;  %v897_v34 = vmul.f32 1.442695, %v875_v40 }
 0x216   : > { %v932_v37 = vsel %vm574_vm0, %v7462_v32, 0.0 }
 0x217   : > { %6471 = vpow2.f32 %v897_v34 }
 0x218   : > { %933 = vadd.xlane.f32.xlu2 %v932_v37 }
 0x21a   : > { %v844_v38 = vpop.xlane.xlu1 %843 }
 0x21b   : > { %v876_v43 = vsub.f32 %v7387_v52, %v844_v38 }
 0x21d   : > { %v7467_v21 = vpop.eup %6471  ;;  %v899_v46 = vmul.f32 1.442695, %v876_v43  ;;  %v501_v43 = vpop.f32.mrf.mxu2 }
 0x21e   : > { %v935_v24 = vsel %vm574_vm0, %v7467_v21, 0.0 }
 0x21f   : > { %6473 = vpow2.f32 %v899_v46 }
 0x220   : > { %936 = vadd.xlane.f32.xlu2 %v935_v24 }
 0x222   : > { %v847_v47 = vpop.xlane.xlu2 %846 }
 0x223   : > { %v877_v27 = vsub.f32 %v7391_v58, %v847_v47 }
 0x225   : > { %v7472_v55 = vpop.eup %6473  ;;  %v901_v59 = vmul.f32 1.442695, %v877_v27 }
 0x226   : > { %v938_v33 = vsel %vm574_vm0, %v7472_v55, 0.0 }
 0x227   : > { %6475 = vpow2.f32 %v901_v59  ;;  %939 = vadd.xlane.f32.xlu0 %v938_v33 }
 0x22a   : > { %v850_v52 = vpop.xlane.xlu2 %849 }
 0x22b   : > { %v878_v63 = vsub.f32 %v7395_v61, %v850_v52  ;;  %v503_v52 = vpop.f32.mrf.mxu2 }
 0x22d   : > { %v7477_v3 = vpop.eup %6475  ;;  %v903_v8 = vmul.f32 1.442695, %v878_v63 }
 0x22e   : > { %v941_v36 = vsel %vm574_vm0, %v7477_v3, 0.0 }
 0x22f   : > { %6477 = vpow2.f32 %v903_v8  ;;  %942 = vadd.xlane.f32.xlu2 %v941_v36 }
 0x232   : > { %v853_v58 = vpop.xlane.xlu0 %852 }
 0x233   : > { %v879_v14 = vsub.f32 %v7399_v0, %v853_v58 }
 0x235   : > { %v7482_v15 = vpop.eup %6477  ;;  %v905_v12 = vmul.f32 1.442695, %v879_v14  ;;  %v558_v14 = vpack.c.bf16 %v501_v43, %v501_v43 }
 0x236   : > { %v944_v20 = vsel %vm574_vm0, %v7482_v15, 0.0 }
 0x237   : > { %6479 = vpow2.f32 %v905_v12  ;;  %945 = vadd.xlane.f32.xlu0 %v944_v20  ;;  %v559_v12 = vpack.c.bf16 %v503_v52, %v503_v52 }
 0x23a   : > { %v856_v61 = vpop.xlane.xlu1 %855 }
 0x23b   : > { %v880_v25 = vsub.f32 %v7403_v7, %v856_v61  ;;  %v7505_v7 = vpop.permute.xlu2 %1357 }
 0x23d   : > { %v7487_v26 = vpop.eup %6479  ;;  %v907_v30 = vmul.f32 1.442695, %v880_v25 }
 0x23e   : > { %v947_v40 = vsel %vm574_vm0, %v7487_v26, 0.0 }
 0x23f   : > { %6481 = vpow2.f32 %v907_v30  ;;  %948 = vadd.xlane.f32.xlu1 %v947_v40 }
 0x245   : > { %v7491_v0 = vpop.eup %6481  ;;  %v7509_v37 = vpop.permute.xlu0 %1333 }
 0x246   : > { %v950_v34 = vsel %vm574_vm0, %v7491_v0, 0.0 }
 0x247   : > { %951 = vadd.xlane.f32.xlu2 %v950_v34 }
 0x24b   : > { %1311 = vrot.lane.b32.xlu0 %v7299_v29, %s7108_s15 }
 0x252   : > { %v7514_v59 = vpop.permute.xlu1 %1359 }
 0x253   : > { %1285 = vrot.lane.b32.xlu0 %v7295_v19, %s7108_s15 }
 0x258   : > { %1287 = vrot.lane.b32.xlu1 %v7291_v10, %s7108_s15 }
 0x25b   : > { %1383 = vrot.lane.b32.xlu0 %v7334_v42, %s7108_s15 }
 0x25f   : > { %1309 = vrot.lane.b32.xlu2 %v7306_v41, %s7108_s15 }
 0x263   : > { %1405 = vrot.lane.b32.xlu0 %v7358_v9, %s7108_s15 }
 0x26b   : > { %v862_v38 = vpop.xlane.xlu2 %861  ;;  %1642 = vrot.lane.b32.xlu0 %v7350_v5, %s7108_s15 }
 0x26c   : > { %v882_v46 = vsub.f32 %v7419_v22, %v862_v38  ;;  %v506_v38 = vpop.f32.mrf.mxu2 }
 0x26e   : > { %v911_v27 = vmul.f32 1.442695, %v882_v46 }
 0x270   : > { %v865_v24 = vpop.xlane.xlu0 %864 }
 0x271   : > { %v883_v43 = vsub.f32 %v7424_v35, %v865_v24 }
 0x273   : > { %v919_v47 = vpop.xlane.xlu2 %918 }
 0x274   : > { %6483 = vrcp.f32 %v919_v47  ;;  %v1160_v47 = vunpack.c.l.b16 %v558_v14  ;;  %v560_v14 = vpack.c.bf16 %v506_v38, %v506_v38 }
 0x275   : > { %6485 = vpow2.f32 %v911_v27 }
 0x278   : > { %v922_v33 = vpop.xlane.xlu0 %921 }
 0x279   : > { %6487 = vrcp.f32 %v922_v33 }
 0x27a   : > { %v6484_v63 = vpop.eup %6483 }
 0x27b   : > { %v925_v8 = vpop.xlane.xlu2 %924  ;;  %v981_v36 = vmul.f32 %v6484_v63, %v7429_v48  ;;  %v7517_v20 = vpop.eup %6485  ;;  %v1161_v48 = vunpack.c.l.b16 %v559_v12 }
 0x27c   : > { %v956_v46 = vsel %vm574_vm0, %v7517_v20, 0.0  ;;  %v508_v12 = vpop.f32.mrf.mxu2 }
 0x27d   : > { %v859_v58 = vpop.xlane.xlu1 %858  ;;  %v997_v25 = vpack.c.bf16 %v981_v36, %v981_v36  ;;  %v7524_v63 = vpack.c.b16 %v1161_v48, %v1160_v47  ;;  %v561_v38 = vpack.c.bf16 %v508_v12, %v508_v12 }
 0x27e   : > { %v881_v22 = vsub.f32 %v7442_v62, %v859_v58  ;;  %v913_v58 = vmul.f32 1.442695, %v883_v43 }
 0x27f   : > { %v6488_v61 = vpop.eup %6487  ;;  %v1015_v33 = vunpack.c.l.b16 %v997_v25  ;;  %v1189_v48 = vunpack.c.l.b16 %v561_v38 }
 0x280   : > { %v982_v30 = vmul.f32 %v6488_v61, %v7433_v51  ;;  %v909_v40 = vmul.f32 1.442695, %v881_v22  ;;  %v928_v34 = vpop.xlane.xlu0 %927 }
 0x281   : > { %6489 = vrcp.f32 %v928_v34 }
 0x282   : > { %v998_v27 = vpack.c.bf16 %v982_v30, %v982_v30  ;;  %6491 = vpow2.f32 %v909_v40  ;;  %957 = vadd.xlane.f32.xlu1 %v956_v46  ;;  %v1188_v46 = vunpack.c.l.b16 %v560_v14 }
 0x283   : > { %6493 = vrcp.f32 %v925_v8  ;;  %v931_v62 = vpop.xlane.xlu2 %930 }
 0x284   : > { %v1016_v52 = vunpack.c.l.b16 %v998_v27  ;;  %6495 = vrcp.f32 %v931_v62 }
 0x285   : > { %v868_v61 = vpop.xlane.xlu1 %867  ;;  %6497 = vpow2.f32 %v913_v58 }
 0x286   : > { %v1017_v51 = vpack.c.b16 %v1016_v52, %v1015_v33  ;;  %v884_v8 = vsub.f32 %v7455_v23, %v868_v61  ;;  %v7536_v33 = vpack.c.b16 %v1189_v48, %v1188_v46 }
 0x287   : > { %v6490_v36 = vpop.eup %6489 }
 0x288   : > { %v7526_v22 = vpop.eup %6491  ;;  %6235 = vmatmul.msk.bf16.vlgmr.msra.gmra.mxu3 %vm574_vm0, %v1017_v51  ;;  %v984_v24 = vmul.f32 %v6490_v36, %v7446_v49  ;;  %v915_v43 = vmul.f32 1.442695, %v884_v8  ;;  %v511_v49 = vpop.f32.mrf.mxu2  ;;  %1202 = vmatpush.bf16.msra.mxu0 %v7536_v33  ;;  %v1269_v8 = vsel %vm574_vm0, %v7411_v11, 0 }
 0x289   : > { %v6494_v30 = vpop.eup %6493  ;;  %v953_v35 = vsel %vm574_vm0, %v7526_v22, 0.0  ;;  %1174 = vmatpush.bf16.msra.mxu3 %v7524_v63  ;;  %v562_v12 = vpack.c.bf16 %v511_v49, %v511_v49 }
 0x28a   : > { %954 = vadd.xlane.f32.xlu2 %v953_v35  ;;  %v6496_v40 = vpop.eup %6495  ;;  %v983_v34 = vmul.f32 %v6494_v30, %v7438_v60  ;;  %v1000_v47 = vpack.c.bf16 %v984_v24, %v984_v24 }
 0x28b   : > { %v934_v25 = vpop.xlane.xlu2 %933  ;;  %v985_v27 = vmul.f32 %v6496_v40, %v7453_v1  ;;  %v7538_v52 = vpop.eup %6497 }
 0x28c   : > { %6499 = vrcp.f32 %v934_v25  ;;  %v999_v62 = vpack.c.bf16 %v983_v34, %v983_v34  ;;  %v1044_v23 = vunpack.c.l.b16 %v1000_v47  ;;  %v959_v1 = vsel %vm574_vm0, %v7538_v52, 0.0 }
 0x28d   : > { %v1001_v36 = vpack.c.bf16 %v985_v27, %v985_v27  ;;  %6501 = vpow2.f32 %v915_v43  ;;  %v1216_v34 = vunpack.c.l.b16 %v562_v12 }
 0x28e   : > { %v1043_v61 = vunpack.c.l.b16 %v999_v62 }
 0x28f   : > { %v1071_v35 = vunpack.c.l.b16 %v1001_v36 }
 0x290   : > { %v1045_v30 = vpack.c.b16 %v1044_v23, %v1043_v61  ;;  %v513_v25 = vpop.f32.mrf.mxu2 }
 0x291   : > { %v563_v46 = vpack.c.bf16 %v513_v25, %v513_v25 }
 0x292   : > { %v6500_v51 = vpop.eup %6499 }
 0x293   : > { %v986_v60 = vmul.f32 %v6500_v51, %v7462_v32  ;;  %v937_v58 = vpop.xlane.xlu2 %936  ;;  %v7547_v40 = vpop.eup %6501  ;;  %v1217_v48 = vunpack.c.l.b16 %v563_v46 }
 0x294   : > { %6503 = vrcp.f32 %v937_v58  ;;  %v962_v11 = vsel %vm574_vm0, %v7547_v40, 0.0 }
 0x295   : > { %v1002_v14 = vpack.c.bf16 %v986_v60, %v986_v60  ;;  %960 = vadd.xlane.f32.xlu0 %v959_v1  ;;  %v7554_v27 = vpack.c.b16 %v1217_v48, %v1216_v34 }
 0x297   : > { %v1072_v24 = vunpack.c.l.b16 %v1002_v14  ;;  %1230 = vmatpush.bf16.msra.mxu1 %v7554_v27 }
 0x298   : > { %6236 = vmatmul.msk.bf16.vlgmr.msrb.gmra.mxu3 %vm574_vm0, %v1045_v30 }
 0x299   : > { %1278 = vmatpush.bf16.xpose.msrb.mxu3 %v1269_v8  ;;  %v1073_v32 = vpack.c.b16 %v1072_v24, %v1071_v35 }
 0x29a   : > { %v940_v38 = vpop.xlane.xlu0 %939  ;;  %v6504_v47 = vpop.eup %6503 }
 0x29b   : > { %6505 = vrcp.f32 %v940_v38  ;;  %6237 = vmatmul.msk.bf16.vlgmr.msrb.gmra.mxu0 %vm574_vm0, %v1073_v32  ;;  %1407 = vrot.lane.b32.xlu1 %v7352_v56, %s7108_s15  ;;  %v987_v43 = vmul.f32 %v6504_v47, %v7467_v21  ;;  %v1341_v32 = vsel %vm574_vm0, %v7417_v16, 0 }
 0x29d   : > { %963 = vadd.xlane.f32.xlu0 %v962_v11  ;;  %v1003_v49 = vpack.c.bf16 %v987_v43, %v987_v43 }
 0x29f   : > { %v1099_v60 = vunpack.c.l.b16 %v1003_v49 }
 0x2a1   : > { %v6506_v62 = vpop.eup %6505 }
 0x2a2   : > { %v988_v51 = vmul.f32 %v6506_v62, %v7472_v55  ;;  %1381 = vrot.lane.b32.xlu2 %v7338_v50, %s7108_s15  ;;  %v943_v23 = vpop.xlane.xlu2 %942 }
 0x2a3   : > { %1667 = vrot.lane.b32.xlu1 %v7360_v17, %s7108_s15  ;;  %6507 = vrcp.f32 %v943_v23 }
 0x2a4   : > { %v1004_v36 = vpack.c.bf16 %v988_v51, %v988_v51 }
 0x2a6   : > { %v1100_v58 = vunpack.c.l.b16 %v1004_v36 }
 0x2a8   : > { %v1101_v61 = vpack.c.b16 %v1100_v58, %v1099_v60 }
 0x2a9   : > { %v6508_v1 = vpop.eup %6507 }
 0x2aa   : > { %1767 = vrot.lane.b32.xlu2 %v7524_v63, %s7108_s15  ;;  %6238 = vmatmul.msk.bf16.vlgmr.msrb.gmra.mxu1 %vm574_vm0, %v1101_v61  ;;  %v946_v21 = vpop.xlane.xlu0 %945  ;;  %v989_v55 = vmul.f32 %v6508_v1, %v7477_v3 }
 0x2ab   : > { %6509 = vrcp.f32 %v946_v21  ;;  %1742 = vrot.lane.b32.xlu1 %v7327_v28, %s7108_s15 }
 0x2ac   : > { %v1005_v12 = vpack.c.bf16 %v989_v55, %v989_v55 }
 0x2ae   : > { %v1127_v8 = vunpack.c.l.b16 %v1005_v12 }
 0x2b1   : > { %v6510_v14 = vpop.eup %6509  ;;  %1837 = vrot.lane.b32.xlu0 %v7261_v45, %s7109_s20 }
 0x2b2   : > { %v990_v30 = vmul.f32 %v6510_v14, %v7482_v15  ;;  %1692 = vrot.lane.b32.xlu2 %v7303_v39, %s7108_s15  ;;  %v949_v35 = vpop.xlane.xlu1 %948 }
 0x2b3   : > { %1839 = vrot.lane.b32.xlu1 %v7259_v44, %s7109_s20  ;;  %6511 = vrcp.f32 %v949_v35 }
 0x2b4   : > { %v1006_v24 = vpack.c.bf16 %v990_v30, %v990_v30 }
 0x2b6   : > { %v1128_v25 = vunpack.c.l.b16 %v1006_v24 }
 0x2b8   : > { %v1129_v3 = vpack.c.b16 %v1128_v25, %v1127_v8 }
 0x2b9   : > { %1717 = vrot.lane.b32.xlu0 %v7316_v4, %s7108_s15  ;;  %v6512_v34 = vpop.eup %6511 }
 0x2ba   : > { %1933 = vrot.lane.b32.xlu2 %v7319_v6, %s7109_s20  ;;  %v952_v15 = vpop.xlane.xlu2 %951  ;;  %6239 = vmatmul.msk.bf16.vlgmr.msrb.gmra.mxu2 %vm574_vm0, %v1129_v3  ;;  %v991_v38 = vmul.f32 %v6512_v34, %v7487_v26  ;;  %v1365_v26 = vsel %vm574_vm0, %v7514_v59, 0 }
 0x2bb   : > { %6513 = vrcp.f32 %v952_v15  ;;  %1350 = vmatpush.bf16.xpose.msrb.mxu2 %v1341_v32  ;;  %1863 = vrot.lane.b32.xlu1 %v7275_v57, %s7109_s20 }
 0x2bc   : > { %v1007_v16 = vpack.c.bf16 %v991_v38, %v991_v38 }
 0x2bd   : > { %v1312_v46 = vpop.permute.xlu0 %1311 }
 0x2be   : > { %v1317_v47 = vsel %vm574_vm0, %v1312_v46, 0  ;;  %v1155_v49 = vunpack.c.l.b16 %v1007_v16 }
 0x2bf   : > { %1326 = vmatpush.bf16.xpose.msrb.mxu1 %v1317_v47 }
 0x2c1   : > { %v6514_v48 = vpop.eup %6513  ;;  %1935 = vrot.lane.b32.xlu0 %v7310_v54, %s7109_s20 }
 0x2c2   : > { %v992_v11 = vmul.f32 %v6514_v48, %v7491_v0 }
 0x2c3   : > { %1861 = vrot.lane.b32.xlu1 %v7283_v2, %s7109_s20 }
 0x2c4   : > { %v1008_v43 = vpack.c.bf16 %v992_v11, %v992_v11 }
 0x2c5   : > { %v1286_v62 = vpop.permute.xlu0 %1285 }
 0x2c6   : > { %v1156_v51 = vunpack.c.l.b16 %v1008_v43 }
 0x2c8   : > { %v1157_v23 = vpack.c.b16 %v1156_v51, %v1155_v49 }
 0x2c9   : > { %1959 = vrot.lane.b32.xlu0 %v7323_v18, %s7109_s20 }
 0x2ca   : > { %6240 = vmatmul.msk.bf16.vlgmr.msra.gmra.mxu3 %vm574_vm0, %v1157_v23  ;;  %6243 = vmatmul.msk.bf16.vlgmr.msra.gmra.mxu2 %vm574_vm0, %v7435_v53  ;;  %v1288_v0 = vpop.permute.xlu1 %1287  ;;  %v1310_v53 = vpop.permute.xlu2 %1309 }
 0x2cb   : > { %1374 = vmatpush.bf16.xpose.msra.mxu3 %v1365_v26  ;;  %v1293_v36 = vsel %vm574_vm0, %v1288_v0, 0 }
 0x2cc   : > { %1302 = vmatpush.bf16.xpose.msrb.mxu0 %v1293_v36 }
 0x2cd   : > { %v1384_v60 = vpop.permute.xlu0 %1383 }
 0x2d1   : > { %1957 = vrot.lane.b32.xlu0 %v7330_v31, %s7109_s20 }
 0x2d5   : > { %v1406_v58 = vpop.permute.xlu0 %1405 }
 0x2da   : > { %6244 = vmatmul.msk.bf16.vlgmr.msrb.gmra.mxu3 %vm574_vm0, %v7415_v13  ;;  %6247 = vmatmul.msk.bf16.vlgmr.msrb.gmra.mxu2 %vm574_vm0, %v7509_v37 }
 0x2dd   : > { %v1643_v59 = vpop.permute.xlu0 %1642 }
 0x2de   : > { %1655 = vmatpush.bf16.msra.mxu2 %v1643_v59 }
 0x2ea   : > { %6248 = vmatmul.msk.bf16.vlgmr.msra.gmra.mxu3 %vm574_vm0, %v7505_v7  ;;  %v1389_v7 = vsel %vm574_vm0, %v1384_v60, 0 }
 0x2f5   : > { %v958_v61 = vpop.xlane.xlu1 %957 }
 0x2f6   : > { %6515 = vrcp.f32 %v958_v61 }
 0x2fc   : > { %v6516_v1 = vpop.eup %6515 }
 0x2fd   : > { %v955_v21 = vpop.xlane.xlu2 %954  ;;  %v994_v55 = vmul.f32 %v6516_v1, %v7517_v20 }
 0x2fe   : > { %6517 = vrcp.f32 %v955_v21 }
 0x2ff   : > { %v1010_v12 = vpack.c.bf16 %v994_v55, %v994_v55 }
 0x301   : > { %v1184_v37 = vunpack.c.l.b16 %v1010_v12 }
 0x304   : > { %v6518_v14 = vpop.eup %6517 }
 0x305   : > { %v993_v13 = vmul.f32 %v6518_v14, %v7526_v22  ;;  %v1382_v8 = vpop.permute.xlu2 %1381 }
 0x307   : > { %v1009_v30 = vpack.c.bf16 %v993_v13, %v993_v13 }
 0x308   : > { %v961_v35 = vpop.xlane.xlu0 %960 }
 0x309   : > { %v1183_v24 = vunpack.c.l.b16 %v1009_v30  ;;  %6519 = vrcp.f32 %v961_v35 }
 0x30b   : > { %v1185_v25 = vpack.c.b16 %v1184_v37, %v1183_v24  ;;  %v7619_v26 = vpop.f32.mrf.mxu3 }
 0x30c   : > { %10114 = vst [vmem:[#allocation11_spill] sm:$0xff] %v7619_v26 }
 0x30d   : > { %6241 = vmatmul.msk.bf16.vlgmr.msra.gmra.mxu0 %vm574_vm0, %v1185_v25  ;;  %v1408_v3 = vpop.permute.xlu1 %1407  ;;  %v1768_v20 = vpop.permute.xlu2 %1767 }
 0x30e   : > { %1398 = vmatpush.bf16.xpose.msra.mxu0 %v1389_v7  ;;  %v1413_v23 = vsel %vm574_vm0, %v1408_v3, 0 }
 0x30f   : > { %v6520_v15 = vpop.eup %6519 }
 0x310   : > { %v964_v32 = vpop.xlane.xlu0 %963  ;;  %v995_v34 = vmul.f32 %v6520_v15, %v7538_v52 }
 0x311   : > { %6521 = vrcp.f32 %v964_v32 }
 0x312   : > { %v1011_v38 = vpack.c.bf16 %v995_v34, %v995_v34 }
 0x313   : > { %v7623_v0 = vpop.f32.mrf.mxu3 }
 0x314   : > { %v1211_v16 = vunpack.c.l.b16 %v1011_v38  ;;  %10115 = vst [vmem:[#allocation12_spill] sm:$0xff] %v7623_v0 }
 0x315   : > { %v1668_v22 = vpop.permute.xlu1 %1667  ;;  %v1693_v43 = vpop.permute.xlu2 %1692 }
 0x316   : > { %1680 = vmatpush.bf16.msrb.mxu3 %v1668_v22 }
 0x317   : > { %v6522_v46 = vpop.eup %6521 }
 0x318   : > { %v996_v47 = vmul.f32 %v6522_v46, %v7547_v40 }
 0x31a   : > { %1780 = vmatpush.bf16.msra.mxu3 %v1768_v20  ;;  %v1012_v48 = vpack.c.bf16 %v996_v47, %v996_v47 }
 0x31c   : > { %v1212_v11 = vunpack.c.l.b16 %v1012_v48  ;;  %v7668_v48 = vpop.f32.mrf.mxu0 }
 0x31d   : > { %6245 = vmatmul.msk.bf16.vlgmr.msrb.gmra.mxu0 %vm574_vm0, %v1286_v62  ;;  %v1743_v49 = vpop.permute.xlu1 %1742  ;;  %v7625_v62 = vpop.f32.mrf.mxu3  ;;  %10122 = vst [vmem:[#allocation19_spill] sm:$0xff] %v7668_v48 }
 0x31e   : > { %v1213_v51 = vpack.c.b16 %v1212_v11, %v1211_v16  ;;  %1705 = vmatpush.bf16.msrb.mxu0 %v1693_v43  ;;  %1755 = vmatpush.bf16.msrb.mxu2 %v1743_v49  ;;  %10116 = vst [vmem:[#allocation13_spill] sm:$0xff] %v7625_v62 }
 0x320   : > { %6242 = vmatmul.msk.bf16.vlgmr.msra.gmra.mxu1 %vm574_vm0, %v1213_v51 }
 0x321   : > { %1422 = vmatpush.bf16.xpose.msra.mxu1 %v1413_v23 }
 0x323   : > { %v7617_v52 = vpop.permute.xlu0 %1837 }
 0x324   : > { %v7672_v11 = vpop.f32.mrf.mxu0 }
 0x325   : > { %v7630_v60 = vpop.f32.mrf.mxu3  ;;  %10123 = vst [vmem:[#allocation20_spill] sm:$0xff] %v7672_v11 }
 0x326   : > { %10118 = vst [vmem:[#allocation15_spill] sm:$0xff] %v7630_v60 }
 0x327   : > { %v7676_v49 = vpop.f32.mrf.mxu1 }
 0x328   : > { %10125 = vst [vmem:[#allocation22_spill] sm:$0xff] %v7676_v49 }
 0x32b   : > { %v1718_v40 = vpop.permute.xlu0 %1717 }
 0x32d   : > { %6249 = vmatmul.msk.bf16.vlgmr.msra.gmra.mxu0 %vm574_vm0, %v1382_v8 }
 0x32f   : > { %v7680_v23 = vpop.f32.mrf.mxu1 }
 0x330   : > { %6246 = vmatmul.msk.bf16.vlgmr.msrb.gmra.mxu1 %vm574_vm0, %v1310_v53  ;;  %10127 = vst [vmem:[#allocation24_spill] sm:$0xff] %v7680_v23 }
 0x331   : > { %1730 = vmatpush.bf16.msrb.mxu1 %v1718_v40 }
 0x33d   : > { %v7627_v36 = vpop.f32.mrf.mxu2 }
 0x33e   : > { %10117 = vst [vmem:[#allocation14_spill] sm:$0xff] %v7627_v36 }
 0x340   : > { %6250 = vmatmul.msk.bf16.vlgmr.msra.gmra.mxu1 %vm574_vm0, %v1406_v58 }
 0x345   : > { %v7632_v59 = vpop.f32.mrf.mxu2 }
 0x346   : > { %10119 = vst [vmem:[#allocation16_spill] sm:$0xff] %v7632_v59 }
 0x34d   : > { %v7634_v61 = vpop.f32.mrf.mxu3  ;;  %v1256_v21 = vpop.f32.mrf.mxu2 }
 0x34e   : > { %10120 = vst [vmem:[#allocation17_spill] sm:$0xff] %v7634_v61  ;;  %v7636_v1 = vmul.f32 0.25, %v1256_v21 }
 0x350   : > { %v1445_v53 = vsel %vm574_vm0, %v7636_v1, -inf }
 0x351   : > { %1446 = vmax.xlane.f32.xlu1 %v1445_v53 }
 0x355   : > { %v7640_v55 = vpop.f32.mrf.mxu3  ;;  %v1258_v14 = vpop.f32.mrf.mxu2 }
 0x356   : > { %10121 = vst [vmem:[#allocation18_spill] sm:$0xff] %v7640_v55  ;;  %v7642_v12 = vmul.f32 0.25, %v1258_v14 }
 0x358   : > { %v1448_v58 = vsel %vm574_vm0, %v7642_v12, -inf }
 0x359   : > { %1449 = vmax.xlane.f32.xlu2 %v1448_v58 }
 0x35d   : > { %v1280_v13 = vpop.f32.mrf.mxu3  ;;  %v1352_v30 = vpop.f32.mrf.mxu2 }
 0x35e   : > { %v7646_v35 = vmul.f32 0.25, %v1280_v13  ;;  %v7648_v37 = vmul.f32 0.25, %v1352_v30 }
 0x360   : > { %v1469_v24 = vsel %vm574_vm0, %v7648_v37, -inf  ;;  %v1451_v8 = vsel %vm574_vm0, %v7646_v35, -inf }
 0x361   : > { %1470 = vmax.xlane.f32.xlu2 %v1469_v24  ;;  %1452 = vmax.xlane.f32.xlu0 %v1451_v8  ;;  %v7694_v8 = vpop.permute.xlu1 %1839 }
 0x365   : > { %v1282_v25 = vpop.f32.mrf.mxu3  ;;  %v1354_v7 = vpop.f32.mrf.mxu2 }
 0x366   : > { %v7654_v3 = vmul.f32 0.25, %v1282_v25  ;;  %v7656_v32 = vmul.f32 0.25, %v1354_v7 }
 0x368   : > { %v1472_v15 = vsel %vm574_vm0, %v7656_v32, -inf  ;;  %v1454_v20 = vsel %vm574_vm0, %v7654_v3, -inf }
 0x369   : > { %1473 = vmax.xlane.f32.xlu0 %v1472_v15  ;;  %1455 = vmax.xlane.f32.xlu1 %v1454_v20 }
 0x36d   : > { %v1376_v34 = vpop.f32.mrf.mxu3 }
 0x36e   : > { %v7662_v22 = vmul.f32 0.25, %v1376_v34  ;;  %v7700_v34 = vpop.permute.xlu1 %1863 }
 0x370   : > { %v1475_v46 = vsel %vm574_vm0, %v7662_v22, -inf }
 0x371   : > { %1476 = vmax.xlane.f32.xlu1 %v1475_v46 }
 0x375   : > { %v1378_v38 = vpop.f32.mrf.mxu3 }
 0x376   : > { %v7666_v47 = vmul.f32 0.25, %v1378_v38 }
 0x378   : > { %v1478_v16 = vsel %vm574_vm0, %v7666_v47, -inf }
 0x379   : > { %1479 = vmax.xlane.f32.xlu2 %v1478_v16 }
 0x38a   : > { %v7674_v43 = vpop.f32.mrf.mxu0 }
 0x38b   : > { %10124 = vst [vmem:[#allocation21_spill] sm:$0xff] %v7674_v43 }
 0x392   : > { %v7678_v51 = vpop.f32.mrf.mxu0 }
 0x393   : > { %10126 = vst [vmem:[#allocation23_spill] sm:$0xff] %v7678_v51  ;;  %v7724_v51 = vpop.permute.xlu2 %1933 }
 0x39a   : > { %v1304_v40 = vpop.f32.mrf.mxu0 }
 0x39b   : > { %v7682_v21 = vmul.f32 0.25, %v1304_v40  ;;  %v7706_v40 = vpop.permute.xlu0 %1935 }
 0x39d   : > { %v7684_v53 = vpop.f32.mrf.mxu1  ;;  %v1457_v14 = vsel %vm574_vm0, %v7682_v21, -inf }
 0x39e   : > { %10128 = vst [vmem:[#allocation25_spill] sm:$0xff] %v7684_v53  ;;  %1458 = vmax.xlane.f32.xlu0 %v1457_v14 }
 0x3a2   : > { %v1306_v58 = vpop.f32.mrf.mxu0 }
 0x3a3   : > { %v7688_v13 = vmul.f32 0.25, %v1306_v58  ;;  %v7722_v36 = vpop.permute.xlu0 %1959 }
 0x3a5   : > { %v7690_v30 = vpop.f32.mrf.mxu1  ;;  %v1460_v24 = vsel %vm574_vm0, %v7688_v13, -inf }
 0x3a6   : > { %10129 = vst [vmem:[#allocation26_spill] sm:$0xff] %v7690_v30  ;;  %1461 = vmax.xlane.f32.xlu1 %v1460_v24 }
 0x3aa   : > { %v1400_v15 = vpop.f32.mrf.mxu0 }
 0x3ab   : > { %v7702_v46 = vmul.f32 0.25, %v1400_v15  ;;  %v7731_v23 = vpop.permute.xlu0 %1957 }
 0x3ad   : > { %v1328_v25 = vpop.f32.mrf.mxu1  ;;  %v1481_v58 = vsel %vm574_vm0, %v7702_v46, -inf }
 0x3ae   : > { %v7696_v7 = vmul.f32 0.25, %v1328_v25  ;;  %v7712_v25 = vpop.permute.xlu1 %1861 }
 0x3b0   : > { %v1463_v20 = vsel %vm574_vm0, %v7696_v7, -inf }
 0x3b1   : > { %1464 = vmax.xlane.f32.xlu2 %v1463_v20 }
 0x3b2   : > { %v1402_v24 = vpop.f32.mrf.mxu0 }
 0x3b3   : > { %v7714_v20 = vmul.f32 0.25, %v1402_v24 }
 0x3b5   : > { %v1330_v38 = vpop.f32.mrf.mxu1 }
 0x3b6   : > { %v7704_v16 = vmul.f32 0.25, %v1330_v38  ;;  %v1484_v38 = vsel %vm574_vm0, %v7714_v20, -inf }
 0x3b8   : > { %v1466_v14 = vsel %vm574_vm0, %v7704_v16, -inf }
 0x3b9   : > { %1467 = vmax.xlane.f32.xlu0 %v1466_v14  ;;  %1482 = vmax.xlane.f32.xlu2 %v1481_v58 }
 0x3bd   : > { %v1424_v15 = vpop.f32.mrf.mxu1 }
 0x3be   : > { %v7716_v53 = vmul.f32 0.25, %v1424_v15 }
 0x3c0   : > { %v1487_v55 = vsel %vm574_vm0, %v7716_v53, -inf }
 0x3c1   : > { %1485 = vmax.xlane.f32.xlu0 %v1484_v38  ;;  %1488 = vmax.xlane.f32.xlu1 %v1487_v55 }
 0x3c4   : > { %v1447_v14 = vpop.xlane.xlu1 %1446 }
 0x3c5   : > { %v1493_v58 = vsub.f32 %v7636_v1, %v1447_v14  ;;  %v1426_v24 = vpop.f32.mrf.mxu1 }
 0x3c6   : > { %v7727_v11 = vmul.f32 0.25, %v1426_v24 }
 0x3c7   : > { %v1509_v15 = vmul.f32 1.442695, %v1493_v58 }
 0x3c8   : > { %v1490_v61 = vsel %vm574_vm0, %v7727_v11, -inf }
 0x3c9   : > { %6523 = vpow2.f32 %v1509_v15  ;;  %1491 = vmax.xlane.f32.xlu2 %v1490_v61 }
 0x3cc   : > { %v1450_v38 = vpop.xlane.xlu2 %1449 }
 0x3cd   : > { %v1494_v55 = vsub.f32 %v7642_v12, %v1450_v38 }
 0x3cf   : > { %v7734_v62 = vpop.eup %6523  ;;  %v1511_v30 = vmul.f32 1.442695, %v1494_v55 }
 0x3d0   : > { %v1541_v1 = vsel %vm574_vm0, %v7734_v62, 0.0 }
 0x3d1   : > { %6525 = vpow2.f32 %v1511_v30  ;;  %1542 = vadd.xlane.f32.xlu1 %v1541_v1 }
 0x3d4   : > { %v1471_v14 = vpop.xlane.xlu2 %1470  ;;  %v1453_v58 = vpop.xlane.xlu0 %1452 }
 0x3d5   : > { %v1501_v24 = vsub.f32 %v7648_v37, %v1471_v14  ;;  %v1495_v15 = vsub.f32 %v7646_v35, %v1453_v58 }
 0x3d7   : > { %v7740_v61 = vpop.eup %6525  ;;  %v1525_v48 = vmul.f32 1.442695, %v1501_v24  ;;  %v1513_v43 = vmul.f32 1.442695, %v1495_v15 }
 0x3d8   : > { %v1544_v12 = vsel %vm574_vm0, %v7740_v61, 0.0 }
 0x3d9   : > { %6527 = vpow2.f32 %v1525_v48  ;;  %1545 = vadd.xlane.f32.xlu2 %v1544_v12 }
 0x3da   : > { %6529 = vpow2.f32 %v1513_v43 }
 0x3dc   : > { %v1456_v38 = vpop.xlane.xlu1 %1455  ;;  %v1474_v14 = vpop.xlane.xlu0 %1473 }
 0x3dd   : > { %v1496_v30 = vsub.f32 %v7654_v3, %v1456_v38  ;;  %v1502_v24 = vsub.f32 %v7656_v32, %v1474_v14 }
 0x3df   : > { %v7745_v55 = vpop.eup %6527  ;;  %v1515_v1 = vmul.f32 1.442695, %v1496_v30  ;;  %v1527_v12 = vmul.f32 1.442695, %v1502_v24 }
 0x3e0   : > { %v7747_v0 = vpop.eup %6529  ;;  %v1565_v35 = vsel %vm574_vm0, %v7745_v55, 0.0 }
 0x3e1   : > { %v1547_v37 = vsel %vm574_vm0, %v7747_v0, 0.0  ;;  %1566 = vadd.xlane.f32.xlu2 %v1565_v35  ;;  %6531 = vpow2.f32 %v1515_v1 }
 0x3e2   : > { %1548 = vadd.xlane.f32.xlu0 %v1547_v37 }
 0x3e4   : > { %v1477_v3 = vpop.xlane.xlu1 %1476 }
 0x3e5   : > { %v1503_v58 = vsub.f32 %v7662_v22, %v1477_v3 }
 0x3e7   : > { %v7753_v48 = vpop.eup %6531  ;;  %v1529_v15 = vmul.f32 1.442695, %v1503_v58 }
 0x3e8   : > { %v1550_v43 = vsel %vm574_vm0, %v7753_v48, 0.0 }
 0x3e9   : > { %1551 = vadd.xlane.f32.xlu1 %v1550_v43  ;;  %6533 = vpow2.f32 %v1529_v15 }
 0x3ea   : > { %6535 = vpow2.f32 %v1527_v12 }
 0x3ec   : > { %v1480_v43 = vpop.xlane.xlu2 %1479 }
 0x3ed   : > { %v1504_v22 = vsub.f32 %v7666_v47, %v1480_v43 }
 0x3ef   : > { %v7767_v37 = vpop.eup %6533 }
 0x3f0   : > { %v7769_v49 = vpop.eup %6535  ;;  %v1571_v32 = vsel %vm574_vm0, %v7767_v37, 0.0 }
 0x3f1   : > { %v1568_v3 = vsel %vm574_vm0, %v7769_v49, 0.0 }
 0x3f6   : > { %1817 = vrot.lane.b32.xlu0 %v7554_v27, %s7108_s15 }
 0x3f9   : > { %1887 = vrot.lane.b32.xlu2 %v7291_v10, %s7109_s20 }
 0x402   : > { %1792 = vrot.lane.b32.xlu1 %v7536_v33, %s7108_s15 }
 0x411   : > { %v1459_v38 = vpop.xlane.xlu0 %1458 }
 0x412   : > { %v1497_v35 = vsub.f32 %v7682_v21, %v1459_v38  ;;  %v1531_v21 = vmul.f32 1.442695, %v1504_v22 }
 0x414   : > { %v1517_v60 = vmul.f32 1.442695, %v1497_v35 }
 0x419   : > { %v1462_v30 = vpop.xlane.xlu1 %1461 }
 0x41a   : > { %v1498_v1 = vsub.f32 %v7688_v13, %v1462_v30 }
 0x41c   : > { %v1519_v59 = vmul.f32 1.442695, %v1498_v1 }
 0x41e   : > { %6537 = vpow2.f32 %v1519_v59 }
 0x41f   : > { %6539 = vpow2.f32 %v1517_v60 }
 0x420   : > { %1572 = vadd.xlane.f32.xlu0 %v1571_v32  ;;  %6541 = vpow2.f32 %v1531_v21 }
 0x422   : > { %1569 = vadd.xlane.f32.xlu2 %v1568_v3 }
 0x424   : > { %v1465_v13 = vpop.xlane.xlu2 %1464  ;;  %v7777_v58 = vpop.eup %6537 }
 0x425   : > { %v1499_v14 = vsub.f32 %v7696_v7, %v1465_v13  ;;  %v7779_v15 = vpop.eup %6539  ;;  %v1556_v59 = vsel %vm574_vm0, %v7777_v58, 0.0 }
 0x426   : > { %v1553_v60 = vsel %vm574_vm0, %v7779_v15, 0.0  ;;  %v7787_v30 = vpop.eup %6541 }
 0x427   : > { %v1521_v24 = vmul.f32 1.442695, %v1499_v14  ;;  %v1574_v22 = vsel %vm574_vm0, %v7787_v30, 0.0 }
 0x429   : > { %6543 = vpow2.f32 %v1521_v24 }
 0x42a   : > { %1557 = vadd.xlane.f32.xlu2 %v1556_v59 }
 0x42c   : > { %v1468_v47 = vpop.xlane.xlu0 %1467  ;;  %v1483_v12 = vpop.xlane.xlu2 %1482  ;;  %1554 = vadd.xlane.f32.xlu1 %v1553_v60 }
 0x42d   : > { %v1500_v38 = vsub.f32 %v7704_v16, %v1468_v47  ;;  %v1505_v7 = vsub.f32 %v7702_v46, %v1483_v12 }
 0x42f   : > { %v7789_v1 = vpop.eup %6543  ;;  %v1523_v35 = vmul.f32 1.442695, %v1500_v38  ;;  %v1533_v43 = vmul.f32 1.442695, %v1505_v7 }
 0x430   : > { %v1559_v32 = vsel %vm574_vm0, %v7789_v1, 0.0 }
 0x431   : > { %6545 = vpow2.f32 %v1523_v35  ;;  %1560 = vadd.xlane.f32.xlu0 %v1559_v32 }
 0x432   : > { %6547 = vpow2.f32 %v1533_v43  ;;  %1575 = vadd.xlane.f32.xlu2 %v1574_v22 }
 0x434   : > { %v1489_v13 = vpop.xlane.xlu1 %1488  ;;  %v1486_v35 = vpop.xlane.xlu0 %1485 }
 0x437   : > { %v7795_v16 = vpop.eup %6545 }
 0x438   : > { %v7797_v46 = vpop.eup %6547  ;;  %v1562_v3 = vsel %vm574_vm0, %v7795_v16, 0.0 }
 0x439   : > { %v1577_v21 = vsel %vm574_vm0, %v7797_v46, 0.0  ;;  %1563 = vadd.xlane.f32.xlu0 %v1562_v3 }
 0x43a   : > { %1578 = vadd.xlane.f32.xlu1 %v1577_v21 }
 0x43c   : > { %v1492_v14 = vpop.xlane.xlu2 %1491 }
 0x43d   : > { %v1508_v24 = vsub.f32 %v7727_v11, %v1492_v14 }
 0x43f   : > { %v1539_v59 = vmul.f32 1.442695, %v1508_v24 }
 0x441   : > { %6549 = vpow2.f32 %v1539_v59 }
 0x444   : > { %v1543_v47 = vpop.xlane.xlu1 %1542 }
 0x445   : > { %6551 = vrcp.f32 %v1543_v47  ;;  %v1845_v47 = vsel %vm574_vm0, %v7694_v8, 0 }
 0x447   : > { %v7804_v12 = vpop.eup %6549 }
 0x448   : > { %v1586_v60 = vsel %vm574_vm0, %v7804_v12, 0.0 }
 0x449   : > { %1587 = vadd.xlane.f32.xlu1 %v1586_v60 }
 0x44a   : > { %1885 = vrot.lane.b32.xlu2 %v7295_v19, %s7109_s20 }
 0x44b   : > { %v6552_v7 = vpop.eup %6551 }
 0x44c   : > { %v1546_v38 = vpop.xlane.xlu2 %1545  ;;  %v1605_v11 = vmul.f32 %v6552_v7, %v7734_v62  ;;  %v1506_v62 = vsub.f32 %v7714_v20, %v1486_v35  ;;  %v1869_v20 = vsel %vm574_vm0, %v7700_v34, 0 }
 0x44d   : > { %6553 = vrcp.f32 %v1546_v38  ;;  %1911 = vrot.lane.b32.xlu0 %v7299_v29, %s7109_s20 }
 0x44e   : > { %v1621_v32 = vpack.c.bf16 %v1605_v11, %v1605_v11  ;;  %v1535_v11 = vmul.f32 1.442695, %v1506_v62 }
 0x450   : > { %v1639_v14 = vunpack.c.l.b16 %v1621_v32 }
 0x453   : > { %v6554_v43 = vpop.eup %6553 }
 0x454   : > { %v1606_v22 = vmul.f32 %v6554_v43, %v7740_v61  ;;  %v1507_v43 = vsub.f32 %v7716_v53, %v1489_v13 }
 0x455   : > { %v1549_v3 = vpop.xlane.xlu0 %1548 }
 0x456   : > { %v1622_v21 = vpack.c.bf16 %v1606_v22, %v1606_v22  ;;  %6555 = vrcp.f32 %v1549_v3 }
 0x458   : > { %v1640_v24 = vunpack.c.l.b16 %v1622_v21  ;;  %v1537_v21 = vmul.f32 1.442695, %v1507_v43 }
 0x45a   : > { %v1641_v59 = vpack.c.b16 %v1640_v24, %v1639_v14 }
 0x45c   : > { %6251 = vmatmul.msk.bf16.vlgmr.msra.gmra.mxu2 %vm574_vm0, %v1641_v59  ;;  %v1552_v60 = vpop.xlane.xlu1 %1551  ;;  %v6556_v38 = vpop.eup %6555 }
 0x45d   : > { %1854 = vmatpush.bf16.xpose.msra.mxu2 %v1845_v47  ;;  %6557 = vrcp.f32 %v1552_v60  ;;  %v1607_v7 = vmul.f32 %v6556_v38, %v7747_v0  ;;  %v1567_v59 = vpop.xlane.xlu2 %1566 }
 0x45e   : > { %6559 = vpow2.f32 %v1535_v11 }
 0x45f   : > { %v1623_v32 = vpack.c.bf16 %v1607_v7, %v1607_v7  ;;  %6561 = vpow2.f32 %v1537_v21 }
 0x460   : > { %6563 = vrcp.f32 %v1567_v59 }
 0x461   : > { %v1664_v14 = vunpack.c.l.b16 %v1623_v32 }
 0x462   : > { %1909 = vrot.lane.b32.xlu1 %v7306_v41, %s7109_s20 }
 0x463   : > { %v6558_v61 = vpop.eup %6557 }
 0x464   : > { %v1608_v8 = vmul.f32 %v6558_v61, %v7753_v48  ;;  %v7828_v53 = vpop.eup %6559 }
 0x465   : > { %v1580_v48 = vsel %vm574_vm0, %v7828_v53, 0.0  ;;  %v7834_v13 = vpop.eup %6561  ;;  %v1888_v47 = vpop.permute.xlu2 %1887 }
 0x466   : > { %v1624_v22 = vpack.c.bf16 %v1608_v8, %v1608_v8  ;;  %v1583_v34 = vsel %vm574_vm0, %v7834_v13, 0.0  ;;  %v6564_v38 = vpop.eup %6563 }
 0x467   : > { %v1613_v62 = vmul.f32 %v6564_v38, %v7745_v55 }
 0x468   : > { %v1818_v3 = vpop.permute.xlu0 %1817  ;;  %v1665_v24 = vunpack.c.l.b16 %v1624_v22 }
 0x469   : > { %1830 = vmatpush.bf16.msra.mxu1 %v1818_v3  ;;  %v1629_v11 = vpack.c.bf16 %v1613_v62, %v1613_v62 }
 0x46a   : > { %1981 = vrot.lane.b32.xlu1 %v7338_v50, %s7109_s20  ;;  %v1666_v0 = vpack.c.b16 %v1665_v24, %v1664_v14 }
 0x46b   : > { %v1739_v3 = vunpack.c.l.b16 %v1629_v11 }
 0x46c   : > { %6252 = vmatmul.msk.bf16.vlgmr.msrb.gmra.mxu3 %vm574_vm0, %v1666_v0 }
 0x46d   : > { %1878 = vmatpush.bf16.xpose.msrb.mxu3 %v1869_v20 }
 0x472   : > { %2367 = vrot.lane.b32.xlu1 %v7524_v63, %s7109_s20 }
 0x473   : > { %1581 = vadd.xlane.f32.xlu2 %v1580_v48 }
 0x474   : > { %v1793_v35 = vpop.permute.xlu1 %1792 }
 0x475   : > { %1805 = vmatpush.bf16.msra.mxu0 %v1793_v35 }
 0x477   : > { %1584 = vadd.xlane.f32.xlu0 %v1583_v34 }
 0x47a   : > { %2437 = vrot.lane.b32.xlu1 %v7261_v45, %s7110_s8 }
 0x482   : > { %2533 = vrot.lane.b32.xlu1 %v7319_v6, %s7110_s8 }
 0x48b   : > { %2007 = vrot.lane.b32.xlu2 %v7352_v56, %s7109_s20  ;;  %1983 = vrot.lane.b32.xlu0 %v7334_v42, %s7109_s20 }
 0x493   : > { %2242 = vrot.lane.b32.xlu2 %v7350_v5, %s7109_s20  ;;  %2005 = vrot.lane.b32.xlu0 %v7358_v9, %s7109_s20  ;;  %v1573_v61 = vpop.xlane.xlu0 %1572 }
 0x495   : > { %v1570_v60 = vpop.xlane.xlu2 %1569 }
 0x496   : > { %6565 = vrcp.f32 %v1570_v60 }
 0x49b   : > { %2342 = vrot.lane.b32.xlu2 %v7327_v28, %s7109_s20  ;;  %2267 = vrot.lane.b32.xlu0 %v7360_v17, %s7109_s20 }
 0x49c   : > { %v6566_v7 = vpop.eup %6565 }
 0x49d   : > { %v1614_v43 = vmul.f32 %v6566_v7, %v7769_v49  ;;  %v1558_v32 = vpop.xlane.xlu2 %1557  ;;  %v1941_v49 = vsel %vm574_vm0, %v7706_v40, 0 }
 0x49e   : > { %6567 = vrcp.f32 %v1558_v32 }
 0x49f   : > { %v1630_v8 = vpack.c.bf16 %v1614_v43, %v1614_v43  ;;  %6569 = vrcp.f32 %v1573_v61  ;;  %v1555_v22 = vpop.xlane.xlu1 %1554 }
 0x4a0   : > { %6571 = vrcp.f32 %v1555_v22 }
 0x4a1   : > { %v1740_v21 = vunpack.c.l.b16 %v1630_v8 }
 0x4a3   : > { %v1741_v55 = vpack.c.b16 %v1740_v21, %v1739_v3  ;;  %2439 = vrot.lane.b32.xlu2 %v7259_v44, %s7110_s8  ;;  %2463 = vrot.lane.b32.xlu0 %v7275_v57, %s7110_s8 }
 0x4a4   : > { %v6568_v14 = vpop.eup %6567  ;;  %v1561_v24 = vpop.xlane.xlu0 %1560 }
 0x4a5   : > { %v1610_v0 = vmul.f32 %v6568_v14, %v7777_v58  ;;  %v1576_v20 = vpop.xlane.xlu2 %1575  ;;  %6255 = vmatmul.msk.bf16.vlgmr.msrb.gmra.mxu2 %vm574_vm0, %v1741_v55  ;;  %v6570_v48 = vpop.eup %6569 }
 0x4a6   : > { %6573 = vrcp.f32 %v1576_v20  ;;  %1950 = vmatpush.bf16.xpose.msrb.mxu2 %v1941_v49  ;;  %v6572_v35 = vpop.eup %6571  ;;  %v1615_v60 = vmul.f32 %v6570_v48, %v7767_v37  ;;  %v1893_v37 = vsel %vm574_vm0, %v1888_v47, 0  ;;  %v1965_v47 = vsel %vm574_vm0, %v7722_v36, 0 }
 0x4a7   : > { %6575 = vrcp.f32 %v1561_v24  ;;  %v1626_v34 = vpack.c.bf16 %v1610_v0, %v1610_v0  ;;  %v1609_v59 = vmul.f32 %v6572_v35, %v7779_v15 }
 0x4a8   : > { %v1631_v11 = vpack.c.bf16 %v1615_v60, %v1615_v60 }
 0x4a9   : > { %v1625_v38 = vpack.c.bf16 %v1609_v59, %v1609_v59  ;;  %v1690_v58 = vunpack.c.l.b16 %v1626_v34 }
 0x4aa   : > { %v1764_v22 = vunpack.c.l.b16 %v1631_v11 }
 0x4ab   : > { %2461 = vrot.lane.b32.xlu2 %v7283_v2, %s7110_s8  ;;  %2292 = vrot.lane.b32.xlu0 %v7303_v39, %s7109_s20  ;;  %v1689_v62 = vunpack.c.l.b16 %v1625_v38 }
 0x4ac   : > { %v6574_v40 = vpop.eup %6573  ;;  %v1564_v7 = vpop.xlane.xlu0 %1563 }
 0x4ad   : > { %v6576_v61 = vpop.eup %6575  ;;  %v1616_v43 = vmul.f32 %v6574_v40, %v7787_v30  ;;  %6577 = vrcp.f32 %v1564_v7  ;;  %v1691_v32 = vpack.c.b16 %v1690_v58, %v1689_v62  ;;  %v1886_v20 = vpop.permute.xlu2 %1885 }
 0x4ae   : > { %v1611_v8 = vmul.f32 %v6576_v61, %v7789_v1 }
 0x4af   : > { %v1632_v15 = vpack.c.bf16 %v1616_v43, %v1616_v43  ;;  %6253 = vmatmul.msk.bf16.vlgmr.msrb.gmra.mxu0 %vm574_vm0, %v1691_v32 }
 0x4b0   : > { %1902 = vmatpush.bf16.xpose.msrb.mxu0 %v1893_v37  ;;  %v1627_v30 = vpack.c.bf16 %v1611_v8, %v1611_v8 }
 0x4b1   : > { %v1765_v3 = vunpack.c.l.b16 %v1632_v15 }
 0x4b2   : > { %v1714_v24 = vunpack.c.l.b16 %v1627_v30 }
 0x4b3   : > { %v6578_v21 = vpop.eup %6577  ;;  %v1766_v55 = vpack.c.b16 %v1765_v3, %v1764_v22  ;;  %2317 = vrot.lane.b32.xlu2 %v7316_v4, %s7109_s20  ;;  %2559 = vrot.lane.b32.xlu0 %v7323_v18, %s7110_s8 }
 0x4b4   : > { %v1612_v14 = vmul.f32 %v6578_v21, %v7795_v16 }
 0x4b5   : > { %6256 = vmatmul.msk.bf16.vlgmr.msra.gmra.mxu3 %vm574_vm0, %v1766_v55  ;;  %6259 = vmatmul.msk.bf16.vlgmr.msra.gmra.mxu2 %vm574_vm0, %v7617_v52  ;;  %v1579_v52 = vpop.xlane.xlu1 %1578 }
 0x4b6   : > { %v1628_v1 = vpack.c.bf16 %v1612_v14, %v1612_v14  ;;  %1974 = vmatpush.bf16.xpose.msra.mxu3 %v1965_v47  ;;  %6579 = vrcp.f32 %v1579_v52 }
 0x4b8   : > { %v1715_v49 = vunpack.c.l.b16 %v1628_v1 }
 0x4ba   : > { %v1716_v0 = vpack.c.b16 %v1715_v49, %v1714_v24 }
 0x4bb   : > { %2535 = vrot.lane.b32.xlu2 %v7310_v54, %s7110_s8  ;;  %2557 = vrot.lane.b32.xlu0 %v7330_v31, %s7110_s8 }
 0x4bc   : > { %6254 = vmatmul.msk.bf16.vlgmr.msrb.gmra.mxu1 %vm574_vm0, %v1716_v0  ;;  %v6580_v34 = vpop.eup %6579 }
 0x4bd   : > { %v1588_v48 = vpop.xlane.xlu1 %1587  ;;  %v1617_v59 = vmul.f32 %v6580_v34, %v7797_v46 }
 0x4be   : > { %6581 = vrcp.f32 %v1588_v48 }
 0x4bf   : > { %v1912_v16 = vpop.permute.xlu0 %1911  ;;  %v1633_v40 = vpack.c.bf16 %v1617_v59, %v1617_v59 }
 0x4c0   : > { %v1917_v36 = vsel %vm574_vm0, %v1912_v16, 0 }
 0x4c1   : > { %1926 = vmatpush.bf16.xpose.msrb.mxu1 %v1917_v36  ;;  %v1789_v61 = vunpack.c.l.b16 %v1633_v40 }
 0x4c3   : > { %2392 = vrot.lane.b32.xlu2 %v7536_v33, %s7109_s20  ;;  %2417 = vrot.lane.b32.xlu0 %v7554_v27, %s7109_s20 }
 0x4c4   : > { %v6582_v38 = vpop.eup %6581 }
 0x4c5   : > { %6260 = vmatmul.msk.bf16.vlgmr.msrb.gmra.mxu3 %vm574_vm0, %v7712_v25  ;;  %6263 = vmatmul.msk.bf16.vlgmr.msrb.gmra.mxu2 %vm574_vm0, %v7724_v51  ;;  %v1620_v51 = vmul.f32 %v6582_v38, %v7804_v12 }
 0x4c7   : > { %v1636_v11 = vpack.c.bf16 %v1620_v51, %v1620_v51 }
 0x4c9   : > { %v1815_v46 = vunpack.c.l.b16 %v1636_v11 }
 0x4d4   : > { %v1910_v12 = vpop.permute.xlu1 %1909 }
 0x4d5   : > { %6264 = vmatmul.msk.bf16.vlgmr.msra.gmra.mxu3 %vm574_vm0, %v7731_v23 }
 0x4df   : > { %v7916_v16 = vpop.f32.mrf.mxu2 }
 0x4e0   : > { %10130 = vst [vmem:[#allocation27_spill] sm:$0xff] %v7916_v16 }
 0x4e6   : > { %v1582_v35 = vpop.xlane.xlu2 %1581 }
 0x4e7   : > { %6583 = vrcp.f32 %v1582_v35  ;;  %v7922_v48 = vpop.f32.mrf.mxu2 }
 0x4e8   : > { %10131 = vst [vmem:[#allocation28_spill] sm:$0xff] %v7922_v48 }
 0x4ea   : > { %v1585_v60 = vpop.xlane.xlu0 %1584 }
 0x4eb   : > { %6585 = vrcp.f32 %v1585_v60 }
 0x4ed   : > { %v6584_v25 = vpop.eup %6583 }
 0x4ee   : > { %v1618_v58 = vmul.f32 %v6584_v25, %v7828_v53  ;;  %v2008_v23 = vpop.permute.xlu2 %2007 }
 0x4ef   : > { %v2013_v53 = vsel %vm574_vm0, %v2008_v23, 0  ;;  %v7926_v34 = vpop.f32.mrf.mxu3 }
 0x4f0   : > { %v1634_v62 = vpack.c.bf16 %v1618_v58, %v1618_v58  ;;  %10132 = vst [vmem:[#allocation29_spill] sm:$0xff] %v7926_v34 }
 0x4f1   : > { %v6586_v7 = vpop.eup %6585 }
 0x4f2   : > { %v1790_v43 = vunpack.c.l.b16 %v1634_v62  ;;  %v1619_v32 = vmul.f32 %v6586_v7, %v7834_v13  ;;  %v1982_v13 = vpop.permute.xlu1 %1981 }
 0x4f4   : > { %v1791_v15 = vpack.c.b16 %v1790_v43, %v1789_v61  ;;  %v1635_v37 = vpack.c.bf16 %v1619_v32, %v1619_v32 }
 0x4f6   : > { %v1814_v8 = vunpack.c.l.b16 %v1635_v37  ;;  %v2243_v22 = vpop.permute.xlu2 %2242  ;;  %6257 = vmatmul.msk.bf16.vlgmr.msra.gmra.mxu0 %vm574_vm0, %v1791_v15 }
 0x4f7   : > { %2255 = vmatpush.bf16.msra.mxu2 %v2243_v22  ;;  %v7932_v25 = vpop.f32.mrf.mxu3 }
 0x4f8   : > { %v1816_v3 = vpack.c.b16 %v1815_v46, %v1814_v8  ;;  %10134 = vst [vmem:[#allocation31_spill] sm:$0xff] %v7932_v25 }
 0x4fa   : > { %6258 = vmatmul.msk.bf16.vlgmr.msra.gmra.mxu1 %vm574_vm0, %v1816_v3  ;;  %v2368_v24 = vpop.permute.xlu1 %2367 }
 0x4fb   : > { %2022 = vmatpush.bf16.xpose.msra.mxu1 %v2013_v53 }
 0x4fd   : > { %v1984_v21 = vpop.permute.xlu0 %1983 }
 0x4fe   : > { %v1989_v55 = vsel %vm574_vm0, %v1984_v21, 0  ;;  %v2343_v30 = vpop.permute.xlu2 %2342 }
 0x4ff   : > { %1998 = vmatpush.bf16.xpose.msra.mxu0 %v1989_v55  ;;  %2355 = vmatpush.bf16.msrb.mxu2 %v2343_v30 }
 0x505   : > { %v2006_v14 = vpop.permute.xlu0 %2005 }
 0x506   : > { %v7908_v47 = vpop.permute.xlu2 %2439  ;;  %6261 = vmatmul.msk.bf16.vlgmr.msrb.gmra.mxu0 %vm574_vm0, %v1886_v20 }
 0x50a   : > { %6262 = vmatmul.msk.bf16.vlgmr.msrb.gmra.mxu1 %vm574_vm0, %v1910_v12 }
 0x50d   : > { %v2268_v1 = vpop.permute.xlu0 %2267 }
 0x50e   : > { %v7912_v49 = vpop.permute.xlu2 %2461  ;;  %2280 = vmatpush.bf16.msrb.mxu3 %v2268_v1 }
 0x512   : > { %2380 = vmatpush.bf16.msra.mxu3 %v2368_v24 }
 0x515   : > { %v7914_v0 = vpop.permute.xlu0 %2463 }
 0x516   : > { %v2318_v36 = vpop.permute.xlu2 %2317  ;;  %6265 = vmatmul.msk.bf16.vlgmr.msra.gmra.mxu0 %vm574_vm0, %v1982_v13 }
 0x517   : > { %2330 = vmatpush.bf16.msrb.mxu1 %v2318_v36 }
 0x51a   : > { %6266 = vmatmul.msk.bf16.vlgmr.msra.gmra.mxu1 %vm574_vm0, %v2006_v14 }
 0x51d   : > { %v2293_v52 = vpop.permute.xlu0 %2292 }
 0x51e   : > { %v7920_v20 = vpop.permute.xlu2 %2535  ;;  %2305 = vmatpush.bf16.msrb.mxu0 %v2293_v52 }
 0x525   : > { %v7924_v35 = vpop.permute.xlu0 %2559 }
 0x526   : > { %v2393_v59 = vpop.permute.xlu2 %2392 }
 0x527   : > { %2405 = vmatpush.bf16.msra.mxu0 %v2393_v59 }
 0x528   : > { %v7928_v60 = vpop.f32.mrf.mxu2 }
 0x529   : > { %10133 = vst [vmem:[#allocation30_spill] sm:$0xff] %v7928_v60 }
 0x52c   : > { %v7956_v12 = vpop.f32.mrf.mxu0 }
 0x52d   : > { %v7930_v38 = vpop.permute.xlu0 %2557  ;;  %10138 = vst [vmem:[#allocation35_spill] sm:$0xff] %v7956_v12 }
 0x530   : > { %v7934_v40 = vpop.f32.mrf.mxu2 }
 0x531   : > { %10135 = vst [vmem:[#allocation32_spill] sm:$0xff] %v7934_v40 }
 0x534   : > { %v7960_v21 = vpop.f32.mrf.mxu0 }
 0x535   : > { %v2418_v51 = vpop.permute.xlu0 %2417  ;;  %10140 = vst [vmem:[#allocation37_spill] sm:$0xff] %v7960_v21 }
 0x536   : > { %2430 = vmatpush.bf16.msra.mxu1 %v2418_v51 }
 0x538   : > { %v7936_v58 = vpop.f32.mrf.mxu3  ;;  %v1856_v23 = vpop.f32.mrf.mxu2 }
 0x539   : > { %10136 = vst [vmem:[#allocation33_spill] sm:$0xff] %v7936_v58  ;;  %v7938_v62 = vmul.f32 0.25, %v1856_v23  ;;  %v7958_v53 = vpop.f32.mrf.mxu1 }
 0x53a   : > { %10139 = vst [vmem:[#allocation36_spill] sm:$0xff] %v7958_v53 }
 0x53b   : > { %v2045_v7 = vsel %vm574_vm0, %v7938_v62, -inf }
 0x53c   : > { %2046 = vmax.xlane.f32.xlu2 %v2045_v7 }
 0x540   : > { %v7942_v61 = vpop.f32.mrf.mxu3  ;;  %v1858_v11 = vpop.f32.mrf.mxu2 }
 0x541   : > { %10137 = vst [vmem:[#allocation34_spill] sm:$0xff] %v7942_v61  ;;  %v7944_v43 = vmul.f32 0.25, %v1858_v11  ;;  %v7962_v55 = vpop.f32.mrf.mxu1 }
 0x542   : > { %10141 = vst [vmem:[#allocation38_spill] sm:$0xff] %v7962_v55 }
 0x543   : > { %v2048_v32 = vsel %vm574_vm0, %v7944_v43, -inf }
 0x544   : > { %2049 = vmax.xlane.f32.xlu1 %v2048_v32 }
 0x548   : > { %v1880_v15 = vpop.f32.mrf.mxu3  ;;  %v1952_v37 = vpop.f32.mrf.mxu2 }
 0x549   : > { %v7948_v46 = vmul.f32 0.25, %v1880_v15  ;;  %v7950_v8 = vmul.f32 0.25, %v1952_v37 }
 0x54b   : > { %v2069_v22 = vsel %vm574_vm0, %v7950_v8, -inf  ;;  %v2051_v3 = vsel %vm574_vm0, %v7948_v46, -inf }
 0x54c   : > { %2070 = vmax.xlane.f32.xlu1 %v2069_v22  ;;  %2052 = vmax.xlane.f32.xlu0 %v2051_v3 }
 0x550   : > { %v1882_v13 = vpop.f32.mrf.mxu3 }
 0x551   : > { %v7978_v11 = vmul.f32 0.25, %v1882_v13 }
 0x558   : > { %v1976_v36 = vpop.f32.mrf.mxu3 }
 0x560   : > { %v1978_v15 = vpop.f32.mrf.mxu3 }
 0x561   : > { %v7984_v3 = vmul.f32 0.25, %v1978_v15 }
 0x573   : > { %v7964_v30 = vpop.f32.mrf.mxu0 }
 0x574   : > { %10142 = vst [vmem:[#allocation39_spill] sm:$0xff] %v7964_v30 }
 0x577   : > { %v7966_v14 = vpop.f32.mrf.mxu1 }
 0x578   : > { %10143 = vst [vmem:[#allocation40_spill] sm:$0xff] %v7966_v14 }
 0x57b   : > { %v7968_v1 = vpop.f32.mrf.mxu0 }
 0x57c   : > { %10144 = vst [vmem:[#allocation41_spill] sm:$0xff] %v7968_v1 }
 0x57f   : > { %v7970_v24 = vpop.f32.mrf.mxu1 }
 0x580   : > { %10145 = vst [vmem:[#allocation42_spill] sm:$0xff] %v7970_v24  ;;  %v7992_v24 = vmul.f32 0.25, %v1976_v36 }
 0x582   : > { %v2075_v30 = vsel %vm574_vm0, %v7992_v24, -inf }
 0x583   : > { %v1904_v52 = vpop.f32.mrf.mxu0 }
 0x584   : > { %v7972_v59 = vmul.f32 0.25, %v1904_v52  ;;  %v2054_v52 = vsel %vm574_vm0, %v7978_v11, -inf }
 0x586   : > { %v2057_v51 = vsel %vm574_vm0, %v7972_v59, -inf }
 0x587   : > { %2058 = vmax.xlane.f32.xlu2 %v2057_v51  ;;  %v1928_v23 = vpop.f32.mrf.mxu1 }
 0x588   : > { %v7976_v7 = vmul.f32 0.25, %v1928_v23  ;;  %v1954_v23 = vpop.f32.mrf.mxu2 }
 0x589   : > { %v7990_v26 = vmul.f32 0.25, %v1954_v23 }
 0x58a   : > { %v2063_v32 = vsel %vm574_vm0, %v7976_v7, -inf }
 0x58b   : > { %v1906_v37 = vpop.f32.mrf.mxu0  ;;  %2064 = vmax.xlane.f32.xlu1 %v2063_v32  ;;  %v2078_v32 = vsel %vm574_vm0, %v7984_v3, -inf }
 0x58c   : > { %v7982_v22 = vmul.f32 0.25, %v1906_v37  ;;  %v2072_v37 = vsel %vm574_vm0, %v7990_v26, -inf }
 0x58e   : > { %v2060_v51 = vsel %vm574_vm0, %v7982_v22, -inf }
 0x58f   : > { %2055 = vmax.xlane.f32.xlu2 %v2054_v52  ;;  %2061 = vmax.xlane.f32.xlu0 %v2060_v51  ;;  %v1930_v13 = vpop.f32.mrf.mxu1 }
 0x590   : > { %v8000_v51 = vmul.f32 0.25, %v1930_v13 }
 0x593   : > { %2079 = vmax.xlane.f32.xlu1 %v2078_v32  ;;  %v2000_v15 = vpop.f32.mrf.mxu0  ;;  %v2066_v32 = vsel %vm574_vm0, %v8000_v51, -inf }
 0x594   : > { %v8002_v23 = vmul.f32 0.25, %v2000_v15  ;;  %v8016_v15 = vpop.permute.xlu1 %2437 }
 0x596   : > { %v2081_v53 = vsel %vm574_vm0, %v8002_v23, -inf }
 0x597   : > { %2073 = vmax.xlane.f32.xlu2 %v2072_v37  ;;  %2076 = vmax.xlane.f32.xlu0 %v2075_v30  ;;  %v2024_v52 = vpop.f32.mrf.mxu1 }
 0x598   : > { %v8012_v30 = vmul.f32 0.25, %v2024_v52 }
 0x59b   : > { %v2002_v36 = vpop.f32.mrf.mxu0 }
 0x59c   : > { %v8004_v40 = vmul.f32 0.25, %v2002_v36  ;;  %v2087_v36 = vsel %vm574_vm0, %v8012_v30, -inf  ;;  %v8022_v61 = vpop.permute.xlu1 %2533 }
 0x59e   : > { %v2084_v14 = vsel %vm574_vm0, %v8004_v40, -inf }
 0x59f   : > { %2067 = vmax.xlane.f32.xlu2 %v2066_v32  ;;  %v2026_v37 = vpop.f32.mrf.mxu1  ;;  %2082 = vmax.xlane.f32.xlu0 %v2081_v53 }
 0x5a0   : > { %2085 = vmax.xlane.f32.xlu1 %v2084_v14  ;;  %v8014_v13 = vmul.f32 0.25, %v2026_v37 }
 0x5a2   : > { %v2090_v25 = vsel %vm574_vm0, %v8014_v13, -inf }
 0x5a7   : > { %2088 = vmax.xlane.f32.xlu2 %v2087_v36  ;;  %2091 = vmax.xlane.f32.xlu0 %v2090_v25 }
 0x5af   : > { %v2047_v32 = vpop.xlane.xlu2 %2046 }
 0x5b0   : > { %v2093_v53 = vsub.f32 %v7938_v62, %v2047_v32 }
 0x5b2   : > { %v2109_v14 = vmul.f32 1.442695, %v2093_v53 }
 0x5b4   : > { %6587 = vpow2.f32 %v2109_v14 }
 0x5b7   : > { %v2050_v52 = vpop.xlane.xlu1 %2049 }
 0x5b8   : > { %v2094_v37 = vsub.f32 %v7944_v43, %v2050_v52 }
 0x5ba   : > { %v8026_v48 = vpop.eup %6587  ;;  %v2111_v60 = vmul.f32 1.442695, %v2094_v37 }
 0x5bb   : > { %v2141_v21 = vsel %vm574_vm0, %v8026_v48, 0.0 }
 0x5bc   : > { %6589 = vpow2.f32 %v2111_v60  ;;  %2142 = vadd.xlane.f32.xlu1 %v2141_v21 }
 0x5bf   : > { %v2053_v36 = vpop.xlane.xlu0 %2052  ;;  %v2071_v25 = vpop.xlane.xlu1 %2070 }
 0x5c0   : > { %v2095_v1 = vsub.f32 %v7948_v46, %v2053_v36  ;;  %v2101_v58 = vsub.f32 %v7950_v8, %v2071_v25 }
 0x5c2   : > { %v8032_v62 = vpop.eup %6589  ;;  %v2113_v32 = vmul.f32 1.442695, %v2095_v1  ;;  %v2125_v53 = vmul.f32 1.442695, %v2101_v58 }
 0x5c3   : > { %v2144_v43 = vsel %vm574_vm0, %v8032_v62, 0.0 }
 0x5c4   : > { %6591 = vpow2.f32 %v2113_v32  ;;  %2145 = vadd.xlane.f32.xlu2 %v2144_v43 }
 0x5c5   : > { %6593 = vpow2.f32 %v2125_v53 }
 0x5ca   : > { %v8036_v14 = vpop.eup %6591 }
 0x5cb   : > { %v8038_v60 = vpop.eup %6593  ;;  %v2147_v21 = vsel %vm574_vm0, %v8036_v14, 0.0 }
 0x5cc   : > { %2148 = vadd.xlane.f32.xlu0 %v2147_v21  ;;  %v2165_v46 = vsel %vm574_vm0, %v8038_v60, 0.0 }
 0x5cd   : > { %2166 = vadd.xlane.f32.xlu1 %v2165_v46 }
 0x5fa   : > { %v2059_v8 = vpop.xlane.xlu2 %2058 }
 0x5fb   : > { %v2097_v58 = vsub.f32 %v7972_v59, %v2059_v8 }
 0x5fd   : > { %v2117_v1 = vmul.f32 1.442695, %v2097_v58 }
 0x5fe   : > { %v2065_v52 = vpop.xlane.xlu1 %2064 }
 0x5ff   : > { %6595 = vpow2.f32 %v2117_v1  ;;  %v2099_v37 = vsub.f32 %v7976_v7, %v2065_v52 }
 0x601   : > { %v2121_v36 = vmul.f32 1.442695, %v2099_v37 }
 0x602   : > { %v2056_v25 = vpop.xlane.xlu2 %2055  ;;  %v2062_v32 = vpop.xlane.xlu0 %2061 }
 0x603   : > { %6597 = vpow2.f32 %v2121_v36  ;;  %v2096_v53 = vsub.f32 %v7978_v11, %v2056_v25  ;;  %v2098_v11 = vsub.f32 %v7982_v22, %v2062_v32 }
 0x605   : > { %v8047_v43 = vpop.eup %6595  ;;  %v2115_v21 = vmul.f32 1.442695, %v2096_v53  ;;  %v2119_v25 = vmul.f32 1.442695, %v2098_v11 }
 0x606   : > { %v2153_v46 = vsel %vm574_vm0, %v8047_v43, 0.0 }
 0x607   : > { %6599 = vpow2.f32 %v2115_v21  ;;  %2154 = vadd.xlane.f32.xlu2 %v2153_v46  ;;  %v2080_v21 = vpop.xlane.xlu1 %2079 }
 0x609   : > { %v8051_v59 = vpop.eup %6597 }
 0x60a   : > { %v2074_v8 = vpop.xlane.xlu2 %2073  ;;  %v2077_v58 = vpop.xlane.xlu0 %2076  ;;  %v2159_v7 = vsel %vm574_vm0, %v8051_v59, 0.0 }
 0x60b   : > { %v2102_v1 = vsub.f32 %v7990_v26, %v2074_v8  ;;  %2160 = vadd.xlane.f32.xlu0 %v2159_v7  ;;  %v2103_v26 = vsub.f32 %v7992_v24, %v2077_v58  ;;  %v2104_v7 = vsub.f32 %v7984_v3, %v2080_v21 }
 0x60d   : > { %v8056_v52 = vpop.eup %6599  ;;  %v2127_v37 = vmul.f32 1.442695, %v2102_v1  ;;  %v2129_v32 = vmul.f32 1.442695, %v2103_v26  ;;  %v2131_v1 = vmul.f32 1.442695, %v2104_v7 }
 0x60e   : > { %v2150_v36 = vsel %vm574_vm0, %v8056_v52, 0.0 }
 0x60f   : > { %6601 = vpow2.f32 %v2127_v37  ;;  %2151 = vadd.xlane.f32.xlu1 %v2150_v36 }
 0x610   : > { %6603 = vpow2.f32 %v2119_v25 }
 0x612   : > { %v2083_v53 = vpop.xlane.xlu0 %2082  ;;  %v2068_v37 = vpop.xlane.xlu2 %2067 }
 0x613   : > { %v2105_v46 = vsub.f32 %v8002_v23, %v2083_v53  ;;  %v2100_v36 = vsub.f32 %v8000_v51, %v2068_v37  ;;  %v2086_v21 = vpop.xlane.xlu1 %2085 }
 0x615   : > { %v8062_v55 = vpop.eup %6601  ;;  %v2133_v8 = vmul.f32 1.442695, %v2105_v46  ;;  %v2123_v58 = vmul.f32 1.442695, %v2100_v36 }
 0x616   : > { %v2168_v22 = vsel %vm574_vm0, %v8062_v55, 0.0  ;;  %v8068_v11 = vpop.eup %6603 }
 0x617   : > { %2169 = vadd.xlane.f32.xlu1 %v2168_v22  ;;  %6605 = vpow2.f32 %v2133_v8  ;;  %v2156_v24 = vsel %vm574_vm0, %v8068_v11, 0.0 }
 0x618   : > { %6607 = vpow2.f32 %v2129_v32  ;;  %v2106_v32 = vsub.f32 %v8004_v40, %v2086_v21 }
 0x619   : > { %6609 = vpow2.f32 %v2131_v1 }
 0x61a   : > { %6611 = vpow2.f32 %v2123_v58  ;;  %v2089_v8 = vpop.xlane.xlu2 %2088  ;;  %v2135_v36 = vmul.f32 1.442695, %v2106_v32  ;;  %v2092_v32 = vpop.xlane.xlu0 %2091 }
 0x61b   : > { %v2107_v21 = vsub.f32 %v8012_v30, %v2089_v8 }
 0x61d   : > { %v8070_v23 = vpop.eup %6605 }
 0x61e   : > { %v2177_v3 = vsel %vm574_vm0, %v8070_v23, 0.0  ;;  %v8079_v25 = vpop.eup %6607 }
 0x61f   : > { %2511 = vrot.lane.b32.xlu2 %v7299_v29, %s7110_s8  ;;  %2157 = vadd.xlane.f32.xlu1 %v2156_v24  ;;  %v8081_v53 = vpop.eup %6609  ;;  %v2171_v51 = vsel %vm574_vm0, %v8079_v25, 0.0 }
 0x620   : > { %2178 = vadd.xlane.f32.xlu0 %v2177_v3  ;;  %v2174_v46 = vsel %vm574_vm0, %v8081_v53, 0.0  ;;  %v8087_v26 = vpop.eup %6611 }
 0x621   : > { %v2162_v7 = vsel %vm574_vm0, %v8087_v26, 0.0 }
 0x627   : > { %2172 = vadd.xlane.f32.xlu1 %v2171_v51 }
 0x628   : > { %2175 = vadd.xlane.f32.xlu0 %v2174_v46 }
 0x62f   : > { %v2143_v22 = vpop.xlane.xlu1 %2142 }
 0x630   : > { %2163 = vadd.xlane.f32.xlu0 %v2162_v7  ;;  %6613 = vrcp.f32 %v2143_v22 }
 0x636   : > { %v6614_v37 = vpop.eup %6613 }
 0x637   : > { %v2146_v1 = vpop.xlane.xlu2 %2145  ;;  %v2205_v24 = vmul.f32 %v6614_v37, %v8026_v48  ;;  %v2445_v48 = vsel %vm574_vm0, %v7908_v47, 0  ;;  %v2108_v37 = vsub.f32 %v8014_v13, %v2092_v32 }
 0x638   : > { %6615 = vrcp.f32 %v2146_v1  ;;  %v2137_v1 = vmul.f32 1.442695, %v2107_v21 }
 0x639   : > { %6617 = vpow2.f32 %v2135_v36  ;;  %v2221_v58 = vpack.c.bf16 %v2205_v24, %v2205_v24  ;;  %v2139_v36 = vmul.f32 1.442695, %v2108_v37 }
 0x63a   : > { %6619 = vpow2.f32 %v2137_v1 }
 0x63b   : > { %v2239_v12 = vunpack.c.l.b16 %v2221_v58  ;;  %6621 = vpow2.f32 %v2139_v36 }
 0x63e   : > { %v6616_v3 = vpop.eup %6615 }
 0x63f   : > { %v2206_v51 = vmul.f32 %v6616_v3, %v8032_v62  ;;  %v8096_v22 = vpop.eup %6617  ;;  %v2149_v13 = vpop.xlane.xlu0 %2148 }
 0x640   : > { %2487 = vrot.lane.b32.xlu1 %v7291_v10, %s7110_s8  ;;  %v2180_v62 = vsel %vm574_vm0, %v8096_v22, 0.0  ;;  %v8109_v47 = vpop.eup %6619  ;;  %v2167_v8 = vpop.xlane.xlu1 %2166  ;;  %6623 = vrcp.f32 %v2149_v13 }
 0x641   : > { %v2222_v46 = vpack.c.bf16 %v2206_v51, %v2206_v51  ;;  %v8115_v24 = vpop.eup %6621 }
 0x642   : > { %v2186_v30 = vsel %vm574_vm0, %v8115_v24, 0.0 }
 0x643   : > { %v2240_v7 = vunpack.c.l.b16 %v2222_v46 }
 0x644   : > { %2485 = vrot.lane.b32.xlu0 %v7295_v19, %s7110_s8 }
 0x645   : > { %v2241_v40 = vpack.c.b16 %v2240_v7, %v2239_v12  ;;  %v2183_v12 = vsel %vm574_vm0, %v8109_v47, 0.0 }
 0x646   : > { %v6624_v58 = vpop.eup %6623 }
 0x647   : > { %6267 = vmatmul.msk.bf16.vlgmr.msra.gmra.mxu2 %vm574_vm0, %v2241_v40  ;;  %v2207_v51 = vmul.f32 %v6624_v58, %v8036_v14 }
 0x648   : > { %2454 = vmatpush.bf16.xpose.msra.mxu2 %v2445_v48  ;;  %2181 = vadd.xlane.f32.xlu2 %v2180_v62 }
 0x649   : > { %v2223_v7 = vpack.c.bf16 %v2207_v51, %v2207_v51 }
 0x64b   : > { %v2264_v14 = vunpack.c.l.b16 %v2223_v7 }
 0x660   : > { %2583 = vrot.lane.b32.xlu2 %v7334_v42, %s7110_s8 }
 0x668   : > { %2605 = vrot.lane.b32.xlu2 %v7358_v9, %s7110_s8 }
 0x66a   : > { %2184 = vadd.xlane.f32.xlu1 %v2183_v12 }
 0x66e   : > { %2187 = vadd.xlane.f32.xlu0 %v2186_v30  ;;  %v2469_v30 = vsel %vm574_vm0, %v7914_v0, 0 }
 0x670   : > { %2842 = vrot.lane.b32.xlu2 %v7350_v5, %s7110_s8 }
 0x678   : > { %3063 = vrot.lane.b32.xlu2 %v7275_v57, %s7111_s17 }
 0x67a   : > { %v2155_v40 = vpop.xlane.xlu2 %2154 }
 0x67e   : > { %v2161_v32 = vpop.xlane.xlu0 %2160 }
 0x680   : > { %3061 = vrot.lane.b32.xlu2 %v7283_v2, %s7111_s17 }
 0x682   : > { %2607 = vrot.lane.b32.xlu0 %v7352_v56, %s7110_s8  ;;  %v2152_v3 = vpop.xlane.xlu1 %2151 }
 0x683   : > { %6625 = vrcp.f32 %v2152_v3  ;;  %2509 = vrot.lane.b32.xlu1 %v7306_v41, %s7110_s8 }
 0x684   : > { %6627 = vrcp.f32 %v2167_v8 }
 0x688   : > { %3017 = vrot.lane.b32.xlu2 %v7554_v27, %s7110_s8 }
 0x689   : > { %v6626_v46 = vpop.eup %6625 }
 0x68a   : > { %v2208_v48 = vmul.f32 %v6626_v46, %v8056_v52  ;;  %2867 = vrot.lane.b32.xlu0 %v7360_v17, %s7110_s8  ;;  %v2170_v62 = vpop.xlane.xlu1 %2169  ;;  %v6628_v21 = vpop.eup %6627 }
 0x68b   : > { %6629 = vrcp.f32 %v2170_v62  ;;  %2581 = vrot.lane.b32.xlu1 %v7338_v50, %s7110_s8  ;;  %v2213_v37 = vmul.f32 %v6628_v21, %v8038_v60 }
 0x68c   : > { %v2224_v1 = vpack.c.bf16 %v2208_v48, %v2208_v48  ;;  %6631 = vrcp.f32 %v2155_v40  ;;  %v2541_v48 = vsel %vm574_vm0, %v7920_v20, 0 }
 0x68d   : > { %v2229_v13 = vpack.c.bf16 %v2213_v37, %v2213_v37 }
 0x68e   : > { %v2265_v36 = vunpack.c.l.b16 %v2224_v1 }
 0x68f   : > { %v2339_v46 = vunpack.c.l.b16 %v2229_v13 }
 0x690   : > { %v2266_v12 = vpack.c.b16 %v2265_v36, %v2264_v14  ;;  %3157 = vrot.lane.b32.xlu2 %v7330_v31, %s7111_s17 }
 0x691   : > { %v6630_v52 = vpop.eup %6629 }
 0x692   : > { %v2214_v8 = vmul.f32 %v6630_v52, %v8062_v55  ;;  %2942 = vrot.lane.b32.xlu0 %v7327_v28, %s7110_s8  ;;  %6268 = vmatmul.msk.bf16.vlgmr.msrb.gmra.mxu3 %vm574_vm0, %v2266_v12  ;;  %v2158_v3 = vpop.xlane.xlu1 %2157  ;;  %v6632_v58 = vpop.eup %6631 }
 0x693   : > { %v2179_v60 = vpop.xlane.xlu0 %2178  ;;  %2478 = vmatpush.bf16.xpose.msrb.mxu3 %v2469_v30  ;;  %6633 = vrcp.f32 %v2158_v3  ;;  %2967 = vrot.lane.b32.xlu1 %v7524_v63, %s7110_s8  ;;  %v2209_v0 = vmul.f32 %v6632_v58, %v8047_v43 }
 0x694   : > { %v2230_v51 = vpack.c.bf16 %v2214_v8, %v2214_v8 }
 0x695   : > { %v2225_v62 = vpack.c.bf16 %v2209_v0, %v2209_v0 }
 0x696   : > { %v2340_v7 = vunpack.c.l.b16 %v2230_v51 }
 0x697   : > { %v2289_v37 = vunpack.c.l.b16 %v2225_v62  ;;  %v2512_v62 = vpop.permute.xlu2 %2511 }
 0x698   : > { %v2341_v40 = vpack.c.b16 %v2340_v7, %v2339_v46 }
 0x699   : > { %v6634_v55 = vpop.eup %6633 }
 0x69a   : > { %v2210_v21 = vmul.f32 %v6634_v55, %v8068_v11  ;;  %3039 = vrot.lane.b32.xlu0 %v7259_v44, %s7111_s17  ;;  %6271 = vmatmul.msk.bf16.vlgmr.msrb.gmra.mxu2 %vm574_vm0, %v2341_v40  ;;  %v2173_v1 = vpop.xlane.xlu1 %2172 }
 0x69b   : > { %v2176_v14 = vpop.xlane.xlu0 %2175  ;;  %2550 = vmatpush.bf16.xpose.msrb.mxu2 %v2541_v48  ;;  %6635 = vrcp.f32 %v2173_v1  ;;  %2917 = vrot.lane.b32.xlu1 %v7316_v4, %s7110_s8 }
 0x69c   : > { %v2226_v43 = vpack.c.bf16 %v2210_v21, %v2210_v21  ;;  %6637 = vrcp.f32 %v2176_v14 }
 0x69d   : > { %6639 = vrcp.f32 %v2161_v32 }
 0x69e   : > { %v2290_v20 = vunpack.c.l.b16 %v2226_v43 }
 0x6a0   : > { %v2291_v36 = vpack.c.b16 %v2290_v20, %v2289_v37 }
 0x6a1   : > { %v6636_v12 = vpop.eup %6635 }
 0x6a2   : > { %v6638_v11 = vpop.eup %6637  ;;  %v2215_v52 = vmul.f32 %v6636_v12, %v8079_v25  ;;  %2892 = vrot.lane.b32.xlu0 %v7303_v39, %s7110_s8  ;;  %6269 = vmatmul.msk.bf16.vlgmr.msrb.gmra.mxu0 %vm574_vm0, %v2291_v36 }
 0x6a3   : > { %v2216_v30 = vmul.f32 %v6638_v11, %v8081_v53  ;;  %v2164_v13 = vpop.xlane.xlu0 %2163  ;;  %3135 = vrot.lane.b32.xlu1 %v7310_v54, %s7111_s17  ;;  %v6640_v8 = vpop.eup %6639  ;;  %v2565_v53 = vsel %vm574_vm0, %v7924_v35, 0 }
 0x6a4   : > { %v2231_v3 = vpack.c.bf16 %v2215_v52, %v2215_v52  ;;  %6641 = vrcp.f32 %v2164_v13  ;;  %v2211_v51 = vmul.f32 %v6640_v8, %v8051_v59 }
 0x6a5   : > { %v2232_v32 = vpack.c.bf16 %v2216_v30, %v2216_v30  ;;  %6643 = vrcp.f32 %v2179_v60 }
 0x6a6   : > { %v2364_v58 = vunpack.c.l.b16 %v2231_v3  ;;  %v2227_v7 = vpack.c.bf16 %v2211_v51, %v2211_v51 }
 0x6a7   : > { %v2365_v46 = vunpack.c.l.b16 %v2232_v32 }
 0x6a8   : > { %v2314_v59 = vunpack.c.l.b16 %v2227_v7 }
 0x6a9   : > { %v2366_v25 = vpack.c.b16 %v2365_v46, %v2364_v58 }
 0x6aa   : > { %v6642_v0 = vpop.eup %6641  ;;  %3037 = vrot.lane.b32.xlu0 %v7261_v45, %s7111_s17  ;;  %6275 = vmatmul.msk.bf16.vlgmr.msra.gmra.mxu2 %vm574_vm0, %v8016_v15  ;;  %v2517_v15 = vsel %vm574_vm0, %v2512_v62, 0 }
 0x6ab   : > { %v2212_v40 = vmul.f32 %v6642_v0, %v8087_v26  ;;  %6272 = vmatmul.msk.bf16.vlgmr.msra.gmra.mxu3 %vm574_vm0, %v2366_v25  ;;  %v6644_v14 = vpop.eup %6643 }
 0x6ac   : > { %2574 = vmatpush.bf16.xpose.msra.mxu3 %v2565_v53  ;;  %v2217_v43 = vmul.f32 %v6644_v14, %v8070_v23 }
 0x6ad   : > { %v2228_v55 = vpack.c.bf16 %v2212_v40, %v2212_v40 }
 0x6ae   : > { %v2233_v20 = vpack.c.bf16 %v2217_v43, %v2217_v43 }
 0x6af   : > { %v2315_v48 = vunpack.c.l.b16 %v2228_v55 }
 0x6b0   : > { %v2389_v11 = vunpack.c.l.b16 %v2233_v20 }
 0x6b1   : > { %v2316_v21 = vpack.c.b16 %v2315_v48, %v2314_v59 }
 0x6b2   : > { %3159 = vrot.lane.b32.xlu0 %v7323_v18, %s7111_s17  ;;  %v2488_v1 = vpop.permute.xlu1 %2487 }
 0x6b3   : > { %6270 = vmatmul.msk.bf16.vlgmr.msrb.gmra.mxu1 %vm574_vm0, %v2316_v21  ;;  %v2493_v35 = vsel %vm574_vm0, %v2488_v1, 0 }
 0x6b4   : > { %2526 = vmatpush.bf16.xpose.msrb.mxu1 %v2517_v15  ;;  %2502 = vmatpush.bf16.xpose.msrb.mxu0 %v2493_v35 }
 0x6b6   : > { %v2486_v13 = vpop.permute.xlu0 %2485 }
 0x6ba   : > { %2992 = vrot.lane.b32.xlu0 %v7536_v33, %s7110_s8  ;;  %6279 = vmatmul.msk.bf16.vlgmr.msrb.gmra.mxu2 %vm574_vm0, %v8022_v61 }
 0x6bb   : > { %6276 = vmatmul.msk.bf16.vlgmr.msrb.gmra.mxu3 %vm574_vm0, %v7912_v49  ;;  %v2182_v26 = vpop.xlane.xlu2 %2181 }
 0x6bc   : > { %6645 = vrcp.f32 %v2182_v26 }
 0x6c2   : > { %v6646_v37 = vpop.eup %6645  ;;  %3133 = vrot.lane.b32.xlu0 %v7319_v6, %s7111_s17 }
 0x6c3   : > { %v2218_v60 = vmul.f32 %v6646_v37, %v8096_v22  ;;  %v2584_v36 = vpop.permute.xlu2 %2583 }
 0x6c4   : > { %v2589_v30 = vsel %vm574_vm0, %v2584_v36, 0 }
 0x6c5   : > { %v2234_v12 = vpack.c.bf16 %v2218_v60, %v2218_v60 }
 0x6c7   : > { %v2390_v52 = vunpack.c.l.b16 %v2234_v12 }
 0x6c9   : > { %v2391_v61 = vpack.c.b16 %v2390_v52, %v2389_v11 }
 0x6ca   : > { %v8203_v1 = vpop.f32.mrf.mxu2 }
 0x6cb   : > { %6280 = vmatmul.msk.bf16.vlgmr.msra.gmra.mxu3 %vm574_vm0, %v7930_v38  ;;  %v2606_v49 = vpop.permute.xlu2 %2605  ;;  %6273 = vmatmul.msk.bf16.vlgmr.msra.gmra.mxu0 %vm574_vm0, %v2391_v61  ;;  %10146 = vst [vmem:[#allocation43_spill] sm:$0xff] %v8203_v1 }
 0x6cc   : > { %2598 = vmatpush.bf16.xpose.msra.mxu0 %v2589_v30 }
 0x6d2   : > { %v8208_v43 = vpop.f32.mrf.mxu2 }
 0x6d3   : > { %v2843_v23 = vpop.permute.xlu2 %2842  ;;  %10147 = vst [vmem:[#allocation44_spill] sm:$0xff] %v8208_v43 }
 0x6d4   : > { %2855 = vmatpush.bf16.msra.mxu2 %v2843_v23 }
 0x6db   : > { %6277 = vmatmul.msk.bf16.vlgmr.msrb.gmra.mxu0 %vm574_vm0, %v2486_v13  ;;  %v8197_v48 = vpop.permute.xlu2 %3063 }
 0x6dd   : > { %v2185_v22 = vpop.xlane.xlu1 %2184 }
 0x6de   : > { %6647 = vrcp.f32 %v2185_v22 }
 0x6e1   : > { %v2188_v8 = vpop.xlane.xlu0 %2187 }
 0x6e2   : > { %6649 = vrcp.f32 %v2188_v8 }
 0x6e3   : > { %v8201_v21 = vpop.permute.xlu2 %3061 }
 0x6e4   : > { %v6648_v3 = vpop.eup %6647 }
 0x6e5   : > { %v2219_v32 = vmul.f32 %v6648_v3, %v8109_v47 }
 0x6e7   : > { %v2235_v51 = vpack.c.bf16 %v2219_v32, %v2219_v32 }
 0x6e8   : > { %v6650_v58 = vpop.eup %6649 }
 0x6e9   : > { %v2220_v38 = vmul.f32 %v6650_v58, %v8115_v24  ;;  %v2414_v25 = vunpack.c.l.b16 %v2235_v51 }
 0x6eb   : > { %v2236_v46 = vpack.c.bf16 %v2220_v38, %v2220_v38  ;;  %v3018_v26 = vpop.permute.xlu2 %3017 }
 0x6ed   : > { %v2415_v0 = vunpack.c.l.b16 %v2236_v46 }
 0x6ef   : > { %v2416_v53 = vpack.c.b16 %v2415_v0, %v2414_v25 }
 0x6f1   : > { %6274 = vmatmul.msk.bf16.vlgmr.msra.gmra.mxu1 %vm574_vm0, %v2416_v53 }
 0x6f4   : > { %v2608_v7 = vpop.permute.xlu0 %2607 }
 0x6f5   : > { %v2613_v40 = vsel %vm574_vm0, %v2608_v7, 0  ;;  %v2510_v55 = vpop.permute.xlu1 %2509 }
 0x6f6   : > { %2622 = vmatpush.bf16.xpose.msra.mxu1 %v2613_v40 }
 0x6fc   : > { %v2868_v59 = vpop.permute.xlu0 %2867 }
 0x6fd   : > { %2880 = vmatpush.bf16.msrb.mxu3 %v2868_v59  ;;  %v2582_v47 = vpop.permute.xlu1 %2581 }
 0x6fe   : > { %6281 = vmatmul.msk.bf16.vlgmr.msra.gmra.mxu0 %vm574_vm0, %v2582_v47 }
 0x701   : > { %6278 = vmatmul.msk.bf16.vlgmr.msrb.gmra.mxu1 %vm574_vm0, %v2510_v55 }
 0x704   : > { %v2943_v24 = vpop.permute.xlu0 %2942 }
 0x705   : > { %2955 = vmatpush.bf16.msrb.mxu2 %v2943_v24  ;;  %v2968_v62 = vpop.permute.xlu1 %2967 }
 0x706   : > { %2980 = vmatpush.bf16.msra.mxu3 %v2968_v62 }
 0x70c   : > { %v8205_v15 = vpop.permute.xlu0 %3039 }
 0x70d   : > { %v2918_v35 = vpop.permute.xlu1 %2917 }
 0x70e   : > { %2930 = vmatpush.bf16.msrb.mxu1 %v2918_v35 }
 0x711   : > { %6282 = vmatmul.msk.bf16.vlgmr.msra.gmra.mxu1 %vm574_vm0, %v2606_v49 }
 0x712   : > { %3030 = vmatpush.bf16.msra.mxu1 %v3018_v26 }
 0x714   : > { %v2893_v14 = vpop.permute.xlu0 %2892 }
 0x715   : > { %2905 = vmatpush.bf16.msrb.mxu0 %v2893_v14  ;;  %v8222_v30 = vpop.f32.mrf.mxu3 }
 0x716   : > { %10150 = vst [vmem:[#allocation47_spill] sm:$0xff] %v8222_v30 }
 0x71c   : > { %v8210_v37 = vpop.permute.xlu0 %3037 }
 0x71d   : > { %v8212_v20 = vpop.f32.mrf.mxu2  ;;  %v8230_v3 = vpop.f32.mrf.mxu3 }
 0x71e   : > { %10148 = vst [vmem:[#allocation45_spill] sm:$0xff] %v8212_v20 }
 0x71f   : > { %v8224_v23 = vpop.f32.mrf.mxu0  ;;  %10152 = vst [vmem:[#allocation49_spill] sm:$0xff] %v8230_v3 }
 0x720   : > { %10151 = vst [vmem:[#allocation48_spill] sm:$0xff] %v8224_v23 }
 0x724   : > { %v8214_v60 = vpop.permute.xlu0 %3159 }
 0x725   : > { %v8216_v36 = vpop.f32.mrf.mxu2 }
 0x726   : > { %10149 = vst [vmem:[#allocation46_spill] sm:$0xff] %v8216_v36 }
 0x727   : > { %v8234_v58 = vpop.f32.mrf.mxu0 }
 0x728   : > { %10153 = vst [vmem:[#allocation50_spill] sm:$0xff] %v8234_v58 }
 0x72c   : > { %v2993_v12 = vpop.permute.xlu0 %2992 }
 0x72d   : > { %3005 = vmatpush.bf16.msra.mxu0 %v2993_v12  ;;  %v2456_v11 = vpop.f32.mrf.mxu2 }
 0x72e   : > { %v8218_v52 = vmul.f32 0.25, %v2456_v11  ;;  %v8238_v38 = vpop.f32.mrf.mxu3 }
 0x72f   : > { %10154 = vst [vmem:[#allocation51_spill] sm:$0xff] %v8238_v38 }
 0x730   : > { %v2645_v61 = vsel %vm574_vm0, %v8218_v52, -inf  ;;  %v8250_v59 = vpop.f32.mrf.mxu1 }
 0x731   : > { %2646 = vmax.xlane.f32.xlu0 %v2645_v61  ;;  %10158 = vst [vmem:[#allocation55_spill] sm:$0xff] %v8250_v59 }
 0x735   : > { %v2458_v49 = vpop.f32.mrf.mxu2 }
 0x736   : > { %v8226_v13 = vmul.f32 0.25, %v2458_v49  ;;  %v8242_v25 = vpop.f32.mrf.mxu3 }
 0x737   : > { %10156 = vst [vmem:[#allocation53_spill] sm:$0xff] %v8242_v25 }
 0x738   : > { %v2648_v22 = vsel %vm574_vm0, %v8226_v13, -inf  ;;  %v8260_v11 = vpop.f32.mrf.mxu1 }
 0x739   : > { %2649 = vmax.xlane.f32.xlu1 %v2648_v22  ;;  %10159 = vst [vmem:[#allocation56_spill] sm:$0xff] %v8260_v11 }
 0x73d   : > { %v2552_v8 = vpop.f32.mrf.mxu2 }
 0x73e   : > { %v8232_v32 = vmul.f32 0.25, %v2552_v8  ;;  %v2480_v40 = vpop.f32.mrf.mxu3 }
 0x73f   : > { %v8252_v47 = vmul.f32 0.25, %v2480_v40 }
 0x740   : > { %v2669_v51 = vsel %vm574_vm0, %v8232_v32, -inf }
 0x741   : > { %2670 = vmax.xlane.f32.xlu1 %v2669_v51  ;;  %v2651_v35 = vsel %vm574_vm0, %v8252_v47, -inf }
 0x745   : > { %v2554_v12 = vpop.f32.mrf.mxu2 }
 0x746   : > { %v2482_v14 = vpop.f32.mrf.mxu3  ;;  %v8264_v49 = vmul.f32 0.25, %v2554_v12 }
 0x747   : > { %v8262_v61 = vmul.f32 0.25, %v2482_v14 }
 0x748   : > { %v8240_v46 = vpop.f32.mrf.mxu0  ;;  %v2672_v22 = vsel %vm574_vm0, %v8264_v49, -inf }
 0x749   : > { %10155 = vst [vmem:[#allocation52_spill] sm:$0xff] %v8240_v46  ;;  %v2654_v8 = vsel %vm574_vm0, %v8262_v61, -inf }
 0x750   : > { %v8244_v0 = vpop.f32.mrf.mxu0 }
 0x751   : > { %10157 = vst [vmem:[#allocation54_spill] sm:$0xff] %v8244_v0 }
 0x758   : > { %v2504_v53 = vpop.f32.mrf.mxu0 }
 0x759   : > { %v8246_v7 = vmul.f32 0.25, %v2504_v53 }
 0x75b   : > { %v2657_v55 = vsel %vm574_vm0, %v8246_v7, -inf }
 0x75c   : > { %2658 = vmax.xlane.f32.xlu2 %v2657_v55 }
 0x760   : > { %v2506_v24 = vpop.f32.mrf.mxu0 }
 0x761   : > { %v8254_v62 = vmul.f32 0.25, %v2506_v24 }
 0x763   : > { %v2660_v26 = vsel %vm574_vm0, %v8254_v62, -inf }
 0x764   : > { %2652 = vmax.xlane.f32.xlu2 %v2651_v35  ;;  %2661 = vmax.xlane.f32.xlu0 %v2660_v26  ;;  %v2576_v26 = vpop.f32.mrf.mxu3 }
 0x76c   : > { %2673 = vmax.xlane.f32.xlu2 %v2672_v22  ;;  %2655 = vmax.xlane.f32.xlu0 %v2654_v8  ;;  %v8282_v22 = vmul.f32 0.25, %v2576_v26  ;;  %v2578_v58 = vpop.f32.mrf.mxu3 }
 0x76d   : > { %v8294_v26 = vmul.f32 0.25, %v2578_v58  ;;  %v8306_v58 = vpop.permute.xlu0 %3133 }
 0x76e   : > { %v8270_v51 = vpop.f32.mrf.mxu1 }
 0x76f   : > { %10160 = vst [vmem:[#allocation57_spill] sm:$0xff] %v8270_v51 }
 0x776   : > { %v8272_v53 = vpop.f32.mrf.mxu1 }
 0x777   : > { %10161 = vst [vmem:[#allocation58_spill] sm:$0xff] %v8272_v53 }
 0x77b   : > { %v2600_v40 = vpop.f32.mrf.mxu0 }
 0x77c   : > { %v8274_v55 = vmul.f32 0.25, %v2600_v40  ;;  %v2675_v40 = vsel %vm574_vm0, %v8282_v22, -inf }
 0x77e   : > { %v2528_v24 = vpop.f32.mrf.mxu1  ;;  %v2681_v35 = vsel %vm574_vm0, %v8274_v55, -inf }
 0x77f   : > { %v8278_v14 = vmul.f32 0.25, %v2528_v24  ;;  %2682 = vmax.xlane.f32.xlu0 %v2681_v35 }
 0x781   : > { %v2663_v12 = vsel %vm574_vm0, %v8278_v14, -inf }
 0x782   : > { %2664 = vmax.xlane.f32.xlu1 %v2663_v12 }
 0x783   : > { %v2602_v8 = vpop.f32.mrf.mxu0 }
 0x784   : > { %v8284_v51 = vmul.f32 0.25, %v2602_v8 }
 0x786   : > { %v2530_v25 = vpop.f32.mrf.mxu1  ;;  %v2684_v35 = vsel %vm574_vm0, %v8284_v51, -inf }
 0x787   : > { %v8288_v20 = vmul.f32 0.25, %v2530_v25  ;;  %2676 = vmax.xlane.f32.xlu0 %v2675_v40  ;;  %v2678_v25 = vsel %vm574_vm0, %v8294_v26, -inf }
 0x789   : > { %v2666_v24 = vsel %vm574_vm0, %v8288_v20, -inf }
 0x78a   : > { %2667 = vmax.xlane.f32.xlu2 %v2666_v24  ;;  %2685 = vmax.xlane.f32.xlu1 %v2684_v35  ;;  %v8308_v35 = vpop.permute.xlu1 %3135 }
 0x78e   : > { %v2624_v12 = vpop.f32.mrf.mxu1 }
 0x78f   : > { %v8296_v8 = vmul.f32 0.25, %v2624_v12 }
 0x791   : > { %v2687_v0 = vsel %vm574_vm0, %v8296_v8, -inf }
 0x792   : > { %2688 = vmax.xlane.f32.xlu2 %v2687_v0  ;;  %2679 = vmax.xlane.f32.xlu1 %v2678_v25 }
 0x796   : > { %v2626_v40 = vpop.f32.mrf.mxu1 }
 0x797   : > { %v8302_v30 = vmul.f32 0.25, %v2626_v40 }
 0x799   : > { %v2690_v24 = vsel %vm574_vm0, %v8302_v30, -inf }
 0x79a   : > { %2691 = vmax.xlane.f32.xlu0 %v2690_v24 }
 0x7a4   : > { %v2647_v12 = vpop.xlane.xlu0 %2646 }
 0x7a5   : > { %v2693_v38 = vsub.f32 %v8218_v52, %v2647_v12 }
 0x7a7   : > { %v2709_v11 = vmul.f32 1.442695, %v2693_v38  ;;  %v8325_v38 = vpop.permute.xlu2 %3157 }
 0x7a9   : > { %6651 = vpow2.f32 %v2709_v11 }
 0x7ac   : > { %v2650_v23 = vpop.xlane.xlu1 %2649 }
 0x7ad   : > { %v2694_v0 = vsub.f32 %v8226_v13, %v2650_v23 }
 0x7af   : > { %v8312_v25 = vpop.eup %6651  ;;  %v2711_v40 = vmul.f32 1.442695, %v2694_v0 }
 0x7b0   : > { %v2741_v43 = vsel %vm574_vm0, %v8312_v25, 0.0 }
 0x7b1   : > { %6653 = vpow2.f32 %v2711_v40  ;;  %2742 = vadd.xlane.f32.xlu1 %v2741_v43 }
 0x7b4   : > { %v2671_v24 = vpop.xlane.xlu1 %2670 }
 0x7b5   : > { %v2701_v53 = vsub.f32 %v8232_v32, %v2671_v24 }
 0x7b7   : > { %v8317_v46 = vpop.eup %6653  ;;  %v2725_v36 = vmul.f32 1.442695, %v2701_v53 }
 0x7b8   : > { %v2744_v52 = vsel %vm574_vm0, %v8317_v46, 0.0 }
 0x7b9   : > { %6655 = vpow2.f32 %v2725_v36  ;;  %2745 = vadd.xlane.f32.xlu2 %v2744_v52 }
 0x7bf   : > { %v8321_v23 = vpop.eup %6655 }
 0x7c0   : > { %v2765_v13 = vsel %vm574_vm0, %v8321_v23, 0.0 }
 0x7c1   : > { %2766 = vadd.xlane.f32.xlu1 %v2765_v13 }
 0x7cf   : > { %v2659_v43 = vpop.xlane.xlu2 %2658 }
 0x7d0   : > { %v2697_v11 = vsub.f32 %v8246_v7, %v2659_v43 }
 0x7d2   : > { %v2717_v32 = vmul.f32 1.442695, %v2697_v11 }
 0x7d4   : > { %6657 = vpow2.f32 %v2717_v32 }
 0x7d7   : > { %v2653_v12 = vpop.xlane.xlu2 %2652  ;;  %v2662_v53 = vpop.xlane.xlu0 %2661 }
 0x7d8   : > { %v2695_v0 = vsub.f32 %v8252_v47, %v2653_v12  ;;  %v2698_v36 = vsub.f32 %v8254_v62, %v2662_v53 }
 0x7da   : > { %v8330_v40 = vpop.eup %6657  ;;  %v2713_v24 = vmul.f32 1.442695, %v2695_v0  ;;  %v2719_v52 = vmul.f32 1.442695, %v2698_v36 }
 0x7db   : > { %v2753_v13 = vsel %vm574_vm0, %v8330_v40, 0.0 }
 0x7dc   : > { %6659 = vpow2.f32 %v2713_v24  ;;  %2754 = vadd.xlane.f32.xlu0 %v2753_v13 }
 0x7dd   : > { %6661 = vpow2.f32 %v2719_v52 }
 0x7df   : > { %v2656_v59 = vpop.xlane.xlu0 %2655  ;;  %v2674_v7 = vpop.xlane.xlu2 %2673 }
 0x7e0   : > { %v2696_v43 = vsub.f32 %v8262_v61, %v2656_v59  ;;  %v2702_v62 = vsub.f32 %v8264_v49, %v2674_v7 }
 0x7e2   : > { %v8335_v11 = vpop.eup %6659  ;;  %v2715_v32 = vmul.f32 1.442695, %v2696_v43  ;;  %v2727_v0 = vmul.f32 1.442695, %v2702_v62 }
 0x7e3   : > { %v8337_v47 = vpop.eup %6661  ;;  %v2747_v12 = vsel %vm574_vm0, %v8335_v11, 0.0 }
 0x7e4   : > { %2748 = vadd.xlane.f32.xlu0 %v2747_v12  ;;  %v2756_v53 = vsel %vm574_vm0, %v8337_v47, 0.0  ;;  %6663 = vpow2.f32 %v2715_v32 }
 0x7e5   : > { %2757 = vadd.xlane.f32.xlu1 %v2756_v53  ;;  %6665 = vpow2.f32 %v2727_v0 }
 0x7ea   : > { %v8344_v36 = vpop.eup %6663 }
 0x7eb   : > { %v2750_v59 = vsel %vm574_vm0, %v8344_v36, 0.0  ;;  %v8348_v61 = vpop.eup %6665 }
 0x7ec   : > { %v2768_v24 = vsel %vm574_vm0, %v8348_v61, 0.0 }
 0x7ed   : > { %2751 = vadd.xlane.f32.xlu1 %v2750_v59 }
 0x7f2   : > { %v2683_v49 = vpop.xlane.xlu0 %2682 }
 0x7f3   : > { %v2705_v7 = vsub.f32 %v8274_v55, %v2683_v49 }
 0x7f5   : > { %2769 = vadd.xlane.f32.xlu1 %v2768_v24  ;;  %v2665_v52 = vpop.xlane.xlu1 %2664  ;;  %v2733_v12 = vmul.f32 1.442695, %v2705_v7 }
 0x7f6   : > { %v2699_v13 = vsub.f32 %v8278_v14, %v2665_v52 }
 0x7f8   : > { %v2721_v43 = vmul.f32 1.442695, %v2699_v13  ;;  %3111 = vrot.lane.b32.xlu0 %v7299_v29, %s7111_s17 }
 0x7fa   : > { %6667 = vpow2.f32 %v2721_v43  ;;  %v2677_v32 = vpop.xlane.xlu0 %2676 }
 0x7fb   : > { %v2703_v62 = vsub.f32 %v8282_v22, %v2677_v32 }
 0x7fd   : > { %v2729_v53 = vmul.f32 1.442695, %v2703_v62  ;;  %v2686_v24 = vpop.xlane.xlu1 %2685  ;;  %v2668_v7 = vpop.xlane.xlu2 %2667 }
 0x7fe   : > { %v2706_v52 = vsub.f32 %v8284_v51, %v2686_v24  ;;  %v2700_v34 = vsub.f32 %v8288_v20, %v2668_v7 }
 0x7ff   : > { %6669 = vpow2.f32 %v2729_v53 }
 0x800   : > { %v8357_v0 = vpop.eup %6667  ;;  %6671 = vpow2.f32 %v2733_v12  ;;  %v2735_v13 = vmul.f32 1.442695, %v2706_v52 }
 0x801   : > { %v2759_v59 = vsel %vm574_vm0, %v8357_v0, 0.0 }
 0x802   : > { %2760 = vadd.xlane.f32.xlu2 %v2759_v59  ;;  %6673 = vpow2.f32 %v2735_v13 }
 0x805   : > { %v8361_v14 = vpop.eup %6669  ;;  %v2680_v43 = vpop.xlane.xlu1 %2679 }
 0x806   : > { %v8363_v55 = vpop.eup %6671  ;;  %v2771_v49 = vsel %vm574_vm0, %v8361_v14, 0.0  ;;  %v2689_v12 = vpop.xlane.xlu2 %2688 }
 0x807   : > { %2772 = vadd.xlane.f32.xlu1 %v2771_v49  ;;  %v2777_v22 = vsel %vm574_vm0, %v8363_v55, 0.0  ;;  %v2707_v3 = vsub.f32 %v8296_v8, %v2689_v12 }
 0x808   : > { %v8370_v32 = vpop.eup %6673 }
 0x809   : > { %v2780_v62 = vsel %vm574_vm0, %v8370_v32, 0.0  ;;  %v2737_v16 = vmul.f32 1.442695, %v2707_v3 }
 0x80a   : > { %2778 = vadd.xlane.f32.xlu2 %v2777_v22 }
 0x820   : > { %3087 = vrot.lane.b32.xlu1 %v7291_v10, %s7111_s17 }
 0x822   : > { %3085 = vrot.lane.b32.xlu2 %v7295_v19, %s7111_s17  ;;  %2781 = vadd.xlane.f32.xlu0 %v2780_v62 }
 0x824   : > { %v2743_v53 = vpop.xlane.xlu1 %2742 }
 0x825   : > { %6675 = vrcp.f32 %v2743_v53 }
 0x82b   : > { %v6676_v59 = vpop.eup %6675 }
 0x82c   : > { %v2746_v51 = vpop.xlane.xlu2 %2745  ;;  %v2805_v49 = vmul.f32 %v6676_v59, %v8312_v25  ;;  %v2723_v25 = vmul.f32 1.442695, %v2700_v34 }
 0x82d   : > { %6677 = vrcp.f32 %v2746_v51  ;;  %v3045_v51 = vsel %vm574_vm0, %v8205_v15, 0  ;;  %v8396_v15 = vpop.xlane.xlu0 %2691 }
 0x82e   : > { %v2821_v24 = vpack.c.bf16 %v2805_v49, %v2805_v49  ;;  %6679 = vpow2.f32 %v2737_v16 }
 0x82f   : > { %6681 = vpow2.f32 %v2723_v25 }
 0x830   : > { %v2839_v1 = vunpack.c.l.b16 %v2821_v24 }
 0x833   : > { %v6678_v22 = vpop.eup %6677 }
 0x834   : > { %v2806_v52 = vmul.f32 %v6678_v22, %v8317_v46  ;;  %v2704_v46 = vsub.f32 %v8294_v26, %v2680_v43  ;;  %v8390_v12 = vpop.eup %6679  ;;  %v2767_v26 = vpop.xlane.xlu1 %2766 }
 0x835   : > { %v2783_v34 = vsel %vm574_vm0, %v8390_v12, 0.0 }
 0x836   : > { %v2822_v13 = vpack.c.bf16 %v2806_v52, %v2806_v52  ;;  %3183 = vrot.lane.b32.xlu0 %v7334_v42, %s7111_s17  ;;  %v2731_v8 = vmul.f32 1.442695, %v2704_v46 }
 0x838   : > { %v2840_v62 = vunpack.c.l.b16 %v2822_v13  ;;  %6683 = vpow2.f32 %v2731_v8 }
 0x83a   : > { %v2841_v53 = vpack.c.b16 %v2840_v62, %v2839_v1  ;;  %v8394_v1 = vpop.eup %6681 }
 0x83b   : > { %v2762_v16 = vsel %vm574_vm0, %v8394_v1, 0.0 }
 0x83c   : > { %6283 = vmatmul.msk.bf16.vlgmr.msra.gmra.mxu2 %vm574_vm0, %v2841_v53 }
 0x83d   : > { %3054 = vmatpush.bf16.xpose.msra.mxu2 %v3045_v51 }
 0x83e   : > { %3205 = vrot.lane.b32.xlu0 %v7358_v9, %s7111_s17  ;;  %v8404_v20 = vpop.eup %6683 }
 0x83f   : > { %v2774_v7 = vsel %vm574_vm0, %v8404_v20, 0.0 }
 0x846   : > { %3442 = vrot.lane.b32.xlu0 %v7350_v5, %s7111_s17 }
 0x84a   : > { %2784 = vadd.xlane.f32.xlu1 %v2783_v34 }
 0x84b   : > { %2763 = vadd.xlane.f32.xlu2 %v2762_v16 }
 0x84e   : > { %3567 = vrot.lane.b32.xlu0 %v7524_v63, %s7111_s17 }
 0x84f   : > { %v2755_v3 = vpop.xlane.xlu0 %2754 }
 0x850   : > { %6685 = vrcp.f32 %v2755_v3 }
 0x853   : > { %2775 = vadd.xlane.f32.xlu2 %v2774_v7 }
 0x856   : > { %3637 = vrot.lane.b32.xlu0 %v7261_v45, %s7112_s18  ;;  %v6686_v49 = vpop.eup %6685 }
 0x857   : > { %v2749_v43 = vpop.xlane.xlu0 %2748  ;;  %v2809_v22 = vmul.f32 %v6686_v49, %v8330_v40 }
 0x858   : > { %v2758_v59 = vpop.xlane.xlu1 %2757 }
 0x859   : > { %6687 = vrcp.f32 %v2758_v59  ;;  %v2825_v52 = vpack.c.bf16 %v2809_v22, %v2809_v22 }
 0x85a   : > { %6689 = vrcp.f32 %v2749_v43 }
 0x85b   : > { %v2889_v25 = vunpack.c.l.b16 %v2825_v52 }
 0x85e   : > { %3661 = vrot.lane.b32.xlu0 %v7283_v2, %s7112_s18 }
 0x85f   : > { %v6688_v24 = vpop.eup %6687 }
 0x860   : > { %v2810_v13 = vmul.f32 %v6688_v24, %v8337_v47  ;;  %v2752_v62 = vpop.xlane.xlu1 %2751  ;;  %v6690_v53 = vpop.eup %6689 }
 0x861   : > { %6691 = vrcp.f32 %v2752_v62  ;;  %v2807_v46 = vmul.f32 %v6690_v53, %v8335_v11 }
 0x862   : > { %v2826_v51 = vpack.c.bf16 %v2810_v13, %v2810_v13  ;;  %6693 = vrcp.f32 %v2767_v26 }
 0x863   : > { %3109 = vrot.lane.b32.xlu1 %v7306_v41, %s7111_s17  ;;  %v2823_v16 = vpack.c.bf16 %v2807_v46, %v2807_v46 }
 0x864   : > { %v2890_v8 = vunpack.c.l.b16 %v2826_v51  ;;  %v3141_v51 = vsel %vm574_vm0, %v8308_v35, 0 }
 0x865   : > { %v2864_v43 = vunpack.c.l.b16 %v2823_v16 }
 0x866   : > { %v2891_v40 = vpack.c.b16 %v2890_v8, %v2889_v25  ;;  %3735 = vrot.lane.b32.xlu0 %v7310_v54, %s7112_s18 }
 0x867   : > { %v6692_v34 = vpop.eup %6691 }
 0x868   : > { %v2808_v47 = vmul.f32 %v6692_v34, %v8344_v36  ;;  %6285 = vmatmul.msk.bf16.vlgmr.msrb.gmra.mxu0 %vm574_vm0, %v2891_v40  ;;  %v2770_v3 = vpop.xlane.xlu1 %2769  ;;  %v6694_v7 = vpop.eup %6693  ;;  %v3069_v36 = vsel %vm574_vm0, %v8197_v48, 0  ;;  %v2708_v48 = vsub.f32 %v8302_v30, %v8396_v15 }
 0x869   : > { %6695 = vrcp.f32 %v2770_v3  ;;  %v2813_v11 = vmul.f32 %v6694_v7, %v8321_v23 }
 0x86a   : > { %v2824_v26 = vpack.c.bf16 %v2808_v47, %v2808_v47  ;;  %v2739_v25 = vmul.f32 1.442695, %v2708_v48  ;;  %v3112_v35 = vpop.permute.xlu0 %3111 }
 0x86b   : > { %3207 = vrot.lane.b32.xlu2 %v7352_v56, %s7111_s17  ;;  %3181 = vrot.lane.b32.xlu1 %v7338_v50, %s7111_s17  ;;  %v2829_v24 = vpack.c.bf16 %v2813_v11, %v2813_v11 }
 0x86c   : > { %v2865_v59 = vunpack.c.l.b16 %v2824_v26  ;;  %6697 = vpow2.f32 %v2739_v25 }
 0x86d   : > { %v2939_v62 = vunpack.c.l.b16 %v2829_v24 }
 0x86e   : > { %v2866_v49 = vpack.c.b16 %v2865_v59, %v2864_v43 }
 0x86f   : > { %v6696_v22 = vpop.eup %6695 }
 0x870   : > { %v2814_v52 = vmul.f32 %v6696_v22, %v8348_v61  ;;  %6284 = vmatmul.msk.bf16.vlgmr.msrb.gmra.mxu3 %vm574_vm0, %v2866_v49 }
 0x871   : > { %3078 = vmatpush.bf16.xpose.msrb.mxu3 %v3069_v36 }
 0x872   : > { %v2830_v13 = vpack.c.bf16 %v2814_v52, %v2814_v52  ;;  %v8445_v40 = vpop.eup %6697 }
 0x873   : > { %3542 = vrot.lane.b32.xlu1 %v7327_v28, %s7111_s17  ;;  %v2786_v15 = vsel %vm574_vm0, %v8445_v40, 0.0 }
 0x874   : > { %v2940_v53 = vunpack.c.l.b16 %v2830_v13 }
 0x875   : > { %v2761_v61 = vpop.xlane.xlu2 %2760 }
 0x876   : > { %v2941_v23 = vpack.c.b16 %v2940_v53, %v2939_v62 }
 0x878   : > { %6287 = vmatmul.msk.bf16.vlgmr.msrb.gmra.mxu2 %vm574_vm0, %v2941_v23 }
 0x879   : > { %3150 = vmatpush.bf16.xpose.msrb.mxu2 %v3141_v51 }
 0x87a   : > { %v2773_v46 = vpop.xlane.xlu1 %2772 }
 0x87b   : > { %3517 = vrot.lane.b32.xlu1 %v7316_v4, %s7111_s17 }
 0x87d   : > { %v2779_v8 = vpop.xlane.xlu2 %2778 }
 0x87e   : > { %6699 = vrcp.f32 %v2779_v8 }
 0x883   : > { %3639 = vrot.lane.b32.xlu1 %v7259_v44, %s7112_s18 }
 0x888   : > { %6291 = vmatmul.msk.bf16.vlgmr.msra.gmra.mxu2 %vm574_vm0, %v8210_v37  ;;  %v6700_v37 = vpop.eup %6699 }
 0x889   : > { %v2817_v47 = vmul.f32 %v6700_v37, %v8363_v55  ;;  %v3086_v55 = vpop.permute.xlu2 %3085 }
 0x88b   : > { %3592 = vrot.lane.b32.xlu1 %v7536_v33, %s7111_s17  ;;  %v2833_v7 = vpack.c.bf16 %v2817_v47, %v2817_v47 }
 0x88d   : > { %v2989_v43 = vunpack.c.l.b16 %v2833_v7 }
 0x892   : > { %v3088_v34 = vpop.permute.xlu1 %3087 }
 0x893   : > { %v3093_v30 = vsel %vm574_vm0, %v3088_v34, 0 }
 0x894   : > { %2787 = vadd.xlane.f32.xlu2 %v2786_v15  ;;  %3102 = vmatpush.bf16.xpose.msrb.mxu0 %v3093_v30 }
 0x895   : > { %v2782_v16 = vpop.xlane.xlu0 %2781 }
 0x896   : > { %6701 = vrcp.f32 %v2782_v16 }
 0x897   : > { %6703 = vrcp.f32 %v2761_v61 }
 0x898   : > { %6295 = vmatmul.msk.bf16.vlgmr.msrb.gmra.mxu2 %vm574_vm0, %v8306_v58 }
 0x89c   : > { %v6702_v3 = vpop.eup %6701 }
 0x89d   : > { %v2818_v26 = vmul.f32 %v6702_v3, %v8370_v32  ;;  %v6704_v52 = vpop.eup %6703 }
 0x89e   : > { %v2811_v13 = vmul.f32 %v6704_v52, %v8357_v0  ;;  %v3117_v0 = vsel %vm574_vm0, %v3112_v35, 0 }
 0x89f   : > { %v2834_v11 = vpack.c.bf16 %v2818_v26, %v2818_v26 }
 0x8a0   : > { %v2827_v53 = vpack.c.bf16 %v2811_v13, %v2811_v13 }
 0x8a1   : > { %v2990_v59 = vunpack.c.l.b16 %v2834_v11 }
 0x8a2   : > { %v2914_v25 = vunpack.c.l.b16 %v2827_v53 }
 0x8a3   : > { %v2991_v49 = vpack.c.b16 %v2990_v59, %v2989_v43 }
 0x8a5   : > { %6289 = vmatmul.msk.bf16.vlgmr.msra.gmra.mxu0 %vm574_vm0, %v2991_v49 }
 0x8a8   : > { %v3184_v22 = vpop.permute.xlu0 %3183 }
 0x8a9   : > { %v3189_v36 = vsel %vm574_vm0, %v3184_v22, 0 }
 0x8aa   : > { %3198 = vmatpush.bf16.xpose.msra.mxu0 %v3189_v36 }
 0x8ac   : > { %3467 = vrot.lane.b32.xlu2 %v7360_v17, %s7111_s17 }
 0x8b0   : > { %v8458_v58 = vpop.permute.xlu0 %3205 }
 0x8b4   : > { %3492 = vrot.lane.b32.xlu2 %v7303_v39, %s7111_s17 }
 0x8b5   : > { %6293 = vmatmul.msk.bf16.vlgmr.msrb.gmra.mxu0 %vm574_vm0, %v3086_v55 }
 0x8b8   : > { %v3443_v32 = vpop.permute.xlu0 %3442 }
 0x8b9   : > { %3455 = vmatpush.bf16.msra.mxu2 %v3443_v32 }
 0x8bc   : > { %3663 = vrot.lane.b32.xlu2 %v7275_v57, %s7112_s18 }
 0x8be   : > { %v2764_v24 = vpop.xlane.xlu2 %2763 }
 0x8bf   : > { %6705 = vrcp.f32 %v2764_v24 }
 0x8c0   : > { %6707 = vrcp.f32 %v2773_v46  ;;  %v2785_v46 = vpop.xlane.xlu1 %2784 }
 0x8c4   : > { %3617 = vrot.lane.b32.xlu2 %v7554_v27, %s7111_s17 }
 0x8c5   : > { %v6706_v62 = vpop.eup %6705 }
 0x8c6   : > { %v2812_v23 = vmul.f32 %v6706_v62, %v8394_v1  ;;  %v2776_v51 = vpop.xlane.xlu2 %2775  ;;  %v6708_v48 = vpop.eup %6707 }
 0x8c7   : > { %6709 = vrcp.f32 %v2776_v51  ;;  %v2815_v8 = vmul.f32 %v6708_v48, %v8361_v14  ;;  %v3165_v14 = vsel %vm574_vm0, %v8214_v60, 0  ;;  %v3568_v51 = vpop.permute.xlu0 %3567 }
 0x8c8   : > { %v2828_v61 = vpack.c.bf16 %v2812_v23, %v2812_v23  ;;  %6711 = vrcp.f32 %v2785_v46 }
 0x8c9   : > { %v2831_v16 = vpack.c.bf16 %v2815_v8, %v2815_v8 }
 0x8ca   : > { %v2915_v34 = vunpack.c.l.b16 %v2828_v61 }
 0x8cb   : > { %v2964_v47 = vunpack.c.l.b16 %v2831_v16 }
 0x8cc   : > { %v2916_v30 = vpack.c.b16 %v2915_v34, %v2914_v25 }
 0x8cd   : > { %v6710_v15 = vpop.eup %6709 }
 0x8ce   : > { %v2816_v37 = vmul.f32 %v6710_v15, %v8404_v20  ;;  %6286 = vmatmul.msk.bf16.vlgmr.msrb.gmra.mxu1 %vm574_vm0, %v2916_v30  ;;  %v8479_v20 = vpop.f32.mrf.mxu2  ;;  %v3208_v60 = vpop.permute.xlu2 %3207 }
 0x8cf   : > { %3126 = vmatpush.bf16.xpose.msrb.mxu1 %v3117_v0  ;;  %v6712_v55 = vpop.eup %6711  ;;  %v3213_v46 = vsel %vm574_vm0, %v3208_v60, 0 }
 0x8d0   : > { %v2832_v1 = vpack.c.bf16 %v2816_v37, %v2816_v37 }
 0x8d2   : > { %v2965_v3 = vunpack.c.l.b16 %v2832_v1 }
 0x8d4   : > { %v2966_v7 = vpack.c.b16 %v2965_v3, %v2964_v47 }
 0x8d5   : > { %v3110_v26 = vpop.permute.xlu1 %3109 }
 0x8d6   : > { %6288 = vmatmul.msk.bf16.vlgmr.msra.gmra.mxu3 %vm574_vm0, %v2966_v7  ;;  %v8481_v43 = vpop.f32.mrf.mxu2 }
 0x8d7   : > { %3174 = vmatpush.bf16.xpose.msra.mxu3 %v3165_v14  ;;  %10162 = vst [vmem:[#allocation59_spill] sm:$0xff] %v8481_v43 }
 0x8dd   : > { %v3182_v11 = vpop.permute.xlu1 %3181 }
 0x8de   : > { %6297 = vmatmul.msk.bf16.vlgmr.msra.gmra.mxu0 %vm574_vm0, %v3182_v11 }
 0x8e5   : > { %v3543_v35 = vpop.permute.xlu1 %3542  ;;  %v8497_v48 = vpop.f32.mrf.mxu0 }
 0x8e6   : > { %6292 = vmatmul.msk.bf16.vlgmr.msrb.gmra.mxu3 %vm574_vm0, %v8201_v21  ;;  %3555 = vmatpush.bf16.msrb.mxu2 %v3543_v35  ;;  %v2819_v21 = vmul.f32 %v6712_v55, %v8390_v12  ;;  %10164 = vst [vmem:[#allocation61_spill] sm:$0xff] %v8497_v48 }
 0x8e8   : > { %v2835_v62 = vpack.c.bf16 %v2819_v21, %v2819_v21 }
 0x8ea   : > { %v3014_v12 = vunpack.c.l.b16 %v2835_v62 }
 0x8ed   : > { %v3518_v22 = vpop.permute.xlu1 %3517  ;;  %v8505_v16 = vpop.f32.mrf.mxu0 }
 0x8f5   : > { %v8492_v13 = vpop.permute.xlu1 %3639 }
 0x8f6   : > { %6296 = vmatmul.msk.bf16.vlgmr.msra.gmra.mxu3 %vm574_vm0, %v8325_v38 }
 0x8fb   : > { %v8485_v59 = vpop.f32.mrf.mxu2 }
 0x8fd   : > { %v3593_v0 = vpop.permute.xlu1 %3592 }
 0x903   : > { %v8487_v49 = vpop.f32.mrf.mxu2 }
 0x904   : > { %10163 = vst [vmem:[#allocation60_spill] sm:$0xff] %v8487_v49 }
 0x907   : > { %v2788_v36 = vpop.xlane.xlu2 %2787 }
 0x908   : > { %6713 = vrcp.f32 %v2788_v36 }
 0x90b   : > { %v3056_v32 = vpop.f32.mrf.mxu2 }
 0x90c   : > { %v8490_v24 = vmul.f32 0.25, %v3056_v32 }
 0x90e   : > { %v6714_v52 = vpop.eup %6713  ;;  %v3245_v38 = vsel %vm574_vm0, %v8490_v24, -inf }
 0x90f   : > { %v2820_v53 = vmul.f32 %v6714_v52, %v8445_v40  ;;  %v3468_v23 = vpop.permute.xlu2 %3467  ;;  %3246 = vmax.xlane.f32.xlu2 %v3245_v38 }
 0x910   : > { %3480 = vmatpush.bf16.msrb.mxu3 %v3468_v23 }
 0x911   : > { %v2836_v61 = vpack.c.bf16 %v2820_v53, %v2820_v53 }
 0x913   : > { %v3015_v25 = vunpack.c.l.b16 %v2836_v61  ;;  %v3058_v8 = vpop.f32.mrf.mxu2 }
 0x914   : > { %3580 = vmatpush.bf16.msra.mxu3 %v3568_v51  ;;  %v8499_v34 = vmul.f32 0.25, %v3058_v8 }
 0x915   : > { %v3016_v30 = vpack.c.b16 %v3015_v25, %v3014_v12 }
 0x916   : > { %v3248_v15 = vsel %vm574_vm0, %v8499_v34, -inf }
 0x917   : > { %v3493_v40 = vpop.permute.xlu2 %3492  ;;  %3249 = vmax.xlane.f32.xlu1 %v3248_v15  ;;  %6290 = vmatmul.msk.bf16.vlgmr.msra.gmra.mxu1 %vm574_vm0, %v3016_v30 }
 0x918   : > { %3222 = vmatpush.bf16.xpose.msra.mxu1 %v3213_v46  ;;  %3505 = vmatpush.bf16.msrb.mxu0 %v3493_v40 }
 0x91b   : > { %v3152_v37 = vpop.f32.mrf.mxu2 }
 0x91c   : > { %3605 = vmatpush.bf16.msra.mxu0 %v3593_v0  ;;  %v8507_v1 = vmul.f32 0.25, %v3152_v37 }
 0x91e   : > { %v3269_v47 = vsel %vm574_vm0, %v8507_v1, -inf }
 0x91f   : > { %3270 = vmax.xlane.f32.xlu1 %v3269_v47  ;;  %v8516_v14 = vpop.permute.xlu2 %3663 }
 0x922   : > { %v8511_v3 = vpop.f32.mrf.mxu0 }
 0x923   : > { %10165 = vst [vmem:[#allocation62_spill] sm:$0xff] %v8511_v3  ;;  %v3154_v23 = vpop.f32.mrf.mxu2 }
 0x924   : > { %v8540_v51 = vmul.f32 0.25, %v3154_v23 }
 0x926   : > { %v3272_v25 = vsel %vm574_vm0, %v8540_v51, -inf }
 0x927   : > { %6294 = vmatmul.msk.bf16.vlgmr.msrb.gmra.mxu1 %vm574_vm0, %v3110_v26  ;;  %v3618_v36 = vpop.permute.xlu2 %3617 }
 0x928   : > { %3530 = vmatpush.bf16.msrb.mxu1 %v3518_v22  ;;  %v8528_v22 = vpop.f32.mrf.mxu3 }
 0x92a   : > { %v8514_v7 = vpop.f32.mrf.mxu0 }
 0x92b   : > { %10166 = vst [vmem:[#allocation63_spill] sm:$0xff] %v8514_v7 }
 0x930   : > { %v8530_v32 = vpop.f32.mrf.mxu3 }
 0x931   : > { %10167 = vst [vmem:[#allocation64_spill] sm:$0xff] %v8530_v32 }
 0x932   : > { %v3104_v11 = vpop.f32.mrf.mxu0 }
 0x933   : > { %v8518_v35 = vmul.f32 0.25, %v3104_v11 }
 0x935   : > { %v3257_v60 = vsel %vm574_vm0, %v8518_v35, -inf }
 0x936   : > { %3258 = vmax.xlane.f32.xlu0 %v3257_v60 }
 0x937   : > { %6298 = vmatmul.msk.bf16.vlgmr.msra.gmra.mxu1 %vm574_vm0, %v8458_v58 }
 0x938   : > { %3630 = vmatpush.bf16.msra.mxu1 %v3618_v36  ;;  %v8562_v36 = vpop.permute.xlu0 %3637 }
 0x93a   : > { %v3106_v55 = vpop.f32.mrf.mxu0 }
 0x93b   : > { %v8524_v21 = vmul.f32 0.25, %v3106_v55 }
 0x93d   : > { %v3260_v26 = vsel %vm574_vm0, %v8524_v21, -inf }
 0x93e   : > { %3261 = vmax.xlane.f32.xlu2 %v3260_v26 }
 0x940   : > { %v8566_v26 = vpop.permute.xlu0 %3661 }
 0x94b   : > { %v8554_v37 = vpop.f32.mrf.mxu1 }
 0x94c   : > { %10169 = vst [vmem:[#allocation66_spill] sm:$0xff] %v8554_v37 }
 0x953   : > { %v8558_v11 = vpop.f32.mrf.mxu1 }
 0x954   : > { %10170 = vst [vmem:[#allocation67_spill] sm:$0xff] %v8558_v11 }
 0x959   : > { %v8532_v52 = vpop.f32.mrf.mxu3 }
 0x95a   : > { %10168 = vst [vmem:[#allocation65_spill] sm:$0xff] %v8532_v52 }
 0x95b   : > { %v3200_v30 = vpop.f32.mrf.mxu0 }
 0x95c   : > { %v8548_v15 = vmul.f32 0.25, %v3200_v30 }
 0x95e   : > { %v3281_v46 = vsel %vm574_vm0, %v8548_v15, -inf }
 0x961   : > { %v8534_v38 = vpop.f32.mrf.mxu3 }
 0x969   : > { %v3080_v62 = vpop.f32.mrf.mxu3 }
 0x96a   : > { %v8536_v53 = vmul.f32 0.25, %v3080_v62 }
 0x96c   : > { %v3251_v58 = vsel %vm574_vm0, %v8536_v53, -inf }
 0x96d   : > { %3252 = vmax.xlane.f32.xlu0 %v3251_v58 }
 0x971   : > { %v3082_v61 = vpop.f32.mrf.mxu3 }
 0x972   : > { %v8542_v12 = vmul.f32 0.25, %v3082_v61  ;;  %v3202_v61 = vpop.f32.mrf.mxu0 }
 0x973   : > { %v8574_v30 = vmul.f32 0.25, %v3202_v61 }
 0x974   : > { %v3254_v8 = vsel %vm574_vm0, %v8542_v12, -inf }
 0x975   : > { %3273 = vmax.xlane.f32.xlu0 %v3272_v25  ;;  %3255 = vmax.xlane.f32.xlu2 %v3254_v8  ;;  %v8572_v8 = vpop.permute.xlu0 %3735  ;;  %v3284_v7 = vsel %vm574_vm0, %v8574_v30, -inf }
 0x979   : > { %v3176_v40 = vpop.f32.mrf.mxu3 }
 0x97a   : > { %v8552_v0 = vmul.f32 0.25, %v3176_v40 }
 0x97c   : > { %v3275_v47 = vsel %vm574_vm0, %v8552_v0, -inf }
 0x97d   : > { %3282 = vmax.xlane.f32.xlu2 %v3281_v46 }
 0x981   : > { %v3178_v52 = vpop.f32.mrf.mxu3 }
 0x982   : > { %v3247_v46 = vpop.xlane.xlu2 %3246  ;;  %v8584_v11 = vmul.f32 0.25, %v3178_v52 }
 0x985   : > { %3276 = vmax.xlane.f32.xlu2 %v3275_v47 }
 0x98a   : > { %v3250_v25 = vpop.xlane.xlu1 %3249 }
 0x992   : > { %v3271_v61 = vpop.xlane.xlu1 %3270 }
 0x994   : > { %v8560_v60 = vpop.f32.mrf.mxu1 }
 0x995   : > { %10171 = vst [vmem:[#allocation68_spill] sm:$0xff] %v8560_v60  ;;  %v3294_v60 = vsub.f32 %v8499_v34, %v3250_v25 }
 0x997   : > { %v3311_v48 = vmul.f32 1.442695, %v3294_v60 }
 0x99c   : > { %v8564_v55 = vpop.f32.mrf.mxu1 }
 0x99d   : > { %10172 = vst [vmem:[#allocation69_spill] sm:$0xff] %v8564_v55  ;;  %v3293_v55 = vsub.f32 %v8490_v24, %v3247_v46  ;;  %v3301_v24 = vsub.f32 %v8507_v1, %v3271_v61 }
 0x99f   : > { %v3325_v52 = vmul.f32 1.442695, %v3301_v24 }
 0x9a4   : > { %v3128_v62 = vpop.f32.mrf.mxu1 }
 0x9a5   : > { %v8568_v58 = vmul.f32 0.25, %v3128_v62 }
 0x9a7   : > { %v3263_v23 = vsel %vm574_vm0, %v8568_v58, -inf }
 0x9a8   : > { %3264 = vmax.xlane.f32.xlu1 %v3263_v23  ;;  %v3309_v23 = vmul.f32 1.442695, %v3293_v55 }
 0x9aa   : > { %6715 = vpow2.f32 %v3309_v23 }
 0x9ab   : > { %6717 = vpow2.f32 %v3311_v48 }
 0x9ac   : > { %v3130_v40 = vpop.f32.mrf.mxu1  ;;  %6719 = vpow2.f32 %v3325_v52 }
 0x9ad   : > { %v8576_v47 = vmul.f32 0.25, %v3130_v40  ;;  %v3259_v40 = vpop.xlane.xlu0 %3258 }
 0x9ae   : > { %v3297_v34 = vsub.f32 %v8518_v35, %v3259_v40 }
 0x9af   : > { %v3266_v62 = vsel %vm574_vm0, %v8576_v47, -inf }
 0x9b0   : > { %3267 = vmax.xlane.f32.xlu0 %v3266_v62  ;;  %3285 = vmax.xlane.f32.xlu1 %v3284_v7  ;;  %v3278_v7 = vsel %vm574_vm0, %v8584_v11, -inf  ;;  %v3317_v60 = vmul.f32 1.442695, %v3297_v34  ;;  %v8594_v62 = vpop.eup %6715 }
 0x9b1   : > { %v3262_v55 = vpop.xlane.xlu2 %3261  ;;  %v3341_v61 = vsel %vm574_vm0, %v8594_v62, 0.0 }
 0x9b2   : > { %6721 = vpow2.f32 %v3317_v60  ;;  %v3298_v48 = vsub.f32 %v8524_v21, %v3262_v55 }
 0x9b4   : > { %v3224_v3 = vpop.f32.mrf.mxu1  ;;  %v3319_v24 = vmul.f32 1.442695, %v3298_v48 }
 0x9b5   : > { %v8587_v46 = vmul.f32 0.25, %v3224_v3  ;;  %v8596_v3 = vpop.eup %6717 }
 0x9b6   : > { %v3344_v40 = vsel %vm574_vm0, %v8596_v3, 0.0  ;;  %v8607_v34 = vpop.eup %6719  ;;  %6723 = vpow2.f32 %v3319_v24 }
 0x9b7   : > { %v3287_v25 = vsel %vm574_vm0, %v8587_v46, -inf }
 0x9b8   : > { %3288 = vmax.xlane.f32.xlu0 %v3287_v25  ;;  %3279 = vmax.xlane.f32.xlu1 %v3278_v7  ;;  %v8609_v25 = vpop.eup %6721  ;;  %v3365_v7 = vsel %vm574_vm0, %v8607_v34, 0.0 }
 0x9b9   : > { %v3353_v21 = vsel %vm574_vm0, %v8609_v25, 0.0 }
 0x9bc   : > { %v3226_v1 = vpop.f32.mrf.mxu1  ;;  %v8615_v52 = vpop.eup %6723 }
 0x9bd   : > { %v8598_v23 = vmul.f32 0.25, %v3226_v1  ;;  %v3356_v60 = vsel %vm574_vm0, %v8615_v52, 0.0 }
 0x9bf   : > { %v3290_v35 = vsel %vm574_vm0, %v8598_v23, -inf }
 0x9c0   : > { %3291 = vmax.xlane.f32.xlu2 %v3290_v35  ;;  %3342 = vadd.xlane.f32.xlu1 %v3341_v61 }
 0x9c1   : > { %3345 = vadd.xlane.f32.xlu0 %v3344_v40 }
 0x9c8   : > { %3354 = vadd.xlane.f32.xlu2 %v3353_v21  ;;  %3366 = vadd.xlane.f32.xlu1 %v3365_v7 }
 0x9d0   : > { %3357 = vadd.xlane.f32.xlu1 %v3356_v60 }
 0x9e0   : > { %v3253_v55 = vpop.xlane.xlu0 %3252 }
 0x9e1   : > { %v3295_v1 = vsub.f32 %v8536_v53, %v3253_v55 }
 0x9e3   : > { %v3313_v48 = vmul.f32 1.442695, %v3295_v1 }
 0x9e5   : > { %6725 = vpow2.f32 %v3313_v48 }
 0x9e8   : > { %v3256_v35 = vpop.xlane.xlu2 %3255  ;;  %v3274_v61 = vpop.xlane.xlu0 %3273 }
 0x9e9   : > { %v3296_v40 = vsub.f32 %v8542_v12, %v3256_v35  ;;  %v3302_v21 = vsub.f32 %v8540_v51, %v3274_v61 }
 0x9eb   : > { %v8621_v24 = vpop.eup %6725  ;;  %v3315_v43 = vmul.f32 1.442695, %v3296_v40  ;;  %v3327_v60 = vmul.f32 1.442695, %v3302_v21 }
 0x9ec   : > { %v3347_v7 = vsel %vm574_vm0, %v8621_v24, 0.0 }
 0x9ed   : > { %3348 = vadd.xlane.f32.xlu2 %v3347_v7  ;;  %6727 = vpow2.f32 %v3315_v43 }
 0x9ee   : > { %6729 = vpow2.f32 %v3327_v60 }
 0x9f0   : > { %v3283_v49 = vpop.xlane.xlu2 %3282 }
 0x9f1   : > { %v3305_v53 = vsub.f32 %v8548_v15, %v3283_v49 }
 0x9f3   : > { %v3333_v55 = vmul.f32 1.442695, %v3305_v53  ;;  %v8627_v1 = vpop.eup %6727 }
 0x9f4   : > { %v3350_v12 = vsel %vm574_vm0, %v8627_v1, 0.0  ;;  %v8632_v35 = vpop.eup %6729 }
 0x9f5   : > { %6731 = vpow2.f32 %v3333_v55  ;;  %3351 = vadd.xlane.f32.xlu1 %v3350_v12  ;;  %v3368_v15 = vsel %vm574_vm0, %v8632_v35, 0.0 }
 0x9f8   : > { %v3277_v48 = vpop.xlane.xlu2 %3276 }
 0x9f9   : > { %v3303_v51 = vsub.f32 %v8552_v0, %v3277_v48 }
 0x9fb   : > { %v8634_v61 = vpop.eup %6731  ;;  %v3329_v43 = vmul.f32 1.442695, %v3303_v51 }
 0x9fc   : > { %v3377_v49 = vsel %vm574_vm0, %v8634_v61, 0.0 }
 0x9fd   : > { %6733 = vpow2.f32 %v3329_v43  ;;  %3378 = vadd.xlane.f32.xlu0 %v3377_v49  ;;  %3369 = vadd.xlane.f32.xlu1 %v3368_v15 }
 0xa03   : > { %v8640_v40 = vpop.eup %6733 }
 0xa04   : > { %v3371_v21 = vsel %vm574_vm0, %v8640_v40, 0.0 }
 0xa05   : > { %3687 = vrot.lane.b32.xlu2 %v7291_v10, %s7112_s18  ;;  %3372 = vadd.xlane.f32.xlu0 %v3371_v21 }
 0xa0d   : > { %3757 = vrot.lane.b32.xlu2 %v7330_v31, %s7112_s18 }
 0xa15   : > { %3783 = vrot.lane.b32.xlu2 %v7334_v42, %s7112_s18 }
 0xa19   : > { %3711 = vrot.lane.b32.xlu0 %v7299_v29, %s7112_s18 }
 0xa1b   : > { %v3265_v0 = vpop.xlane.xlu1 %3264 }
 0xa1c   : > { %v3299_v7 = vsub.f32 %v8568_v58, %v3265_v0 }
 0xa1e   : > { %v3321_v60 = vmul.f32 1.442695, %v3299_v7 }
 0xa20   : > { %6735 = vpow2.f32 %v3321_v60 }
 0xa21   : > { %3685 = vrot.lane.b32.xlu0 %v7295_v19, %s7112_s18 }
 0xa23   : > { %v3268_v53 = vpop.xlane.xlu0 %3267  ;;  %v3286_v55 = vpop.xlane.xlu1 %3285 }
 0xa24   : > { %v3300_v12 = vsub.f32 %v8576_v47, %v3268_v53  ;;  %v3306_v43 = vsub.f32 %v8574_v30, %v3286_v55 }
 0xa26   : > { %v8656_v48 = vpop.eup %6735  ;;  %v3323_v51 = vmul.f32 1.442695, %v3300_v12  ;;  %v3335_v58 = vmul.f32 1.442695, %v3306_v43 }
 0xa27   : > { %v3359_v49 = vsel %vm574_vm0, %v8656_v48, 0.0 }
 0xa28   : > { %6737 = vpow2.f32 %v3323_v51  ;;  %3360 = vadd.xlane.f32.xlu1 %v3359_v49 }
 0xa29   : > { %6739 = vpow2.f32 %v3335_v58 }
 0xa2b   : > { %v3289_v15 = vpop.xlane.xlu0 %3288  ;;  %v3280_v21 = vpop.xlane.xlu1 %3279 }
 0xa2c   : > { %v3307_v0 = vsub.f32 %v8587_v46, %v3289_v15  ;;  %v3304_v47 = vsub.f32 %v8584_v11, %v3280_v21 }
 0xa2e   : > { %v8662_v7 = vpop.eup %6737  ;;  %v3337_v60 = vmul.f32 1.442695, %v3307_v0  ;;  %v3331_v30 = vmul.f32 1.442695, %v3304_v47 }
 0xa2f   : > { %v3362_v53 = vsel %vm574_vm0, %v8662_v7, 0.0  ;;  %v8667_v51 = vpop.eup %6739 }
 0xa30   : > { %3363 = vadd.xlane.f32.xlu1 %v3362_v53  ;;  %6741 = vpow2.f32 %v3337_v60  ;;  %v3380_v46 = vsel %vm574_vm0, %v8667_v51, 0.0 }
 0xa33   : > { %v3292_v55 = vpop.xlane.xlu2 %3291  ;;  %v3343_v12 = vpop.xlane.xlu1 %3342 }
 0xa34   : > { %v3346_v43 = vpop.xlane.xlu0 %3345  ;;  %6743 = vrcp.f32 %v3343_v12  ;;  %v3308_v49 = vsub.f32 %v8598_v23, %v3292_v55 }
 0xa35   : > { %6745 = vrcp.f32 %v3346_v43 }
 0xa36   : > { %6747 = vpow2.f32 %v3331_v30  ;;  %v8671_v11 = vpop.eup %6741  ;;  %v3339_v12 = vmul.f32 1.442695, %v3308_v49 }
 0xa37   : > { %v3383_v43 = vsel %vm574_vm0, %v8671_v11, 0.0 }
 0xa38   : > { %3381 = vadd.xlane.f32.xlu1 %v3380_v46 }
 0xa3a   : > { %v6744_v58 = vpop.eup %6743 }
 0xa3b   : > { %v6746_v15 = vpop.eup %6745  ;;  %v3405_v21 = vmul.f32 %v6744_v58, %v8594_v62  ;;  %v3355_v0 = vpop.xlane.xlu2 %3354 }
 0xa3c   : > { %v3367_v47 = vpop.xlane.xlu1 %3366  ;;  %v8675_v60 = vpop.eup %6747  ;;  %v3406_v53 = vmul.f32 %v6746_v15, %v8596_v3  ;;  %6749 = vrcp.f32 %v3355_v0  ;;  %v3645_v3 = vsel %vm574_vm0, %v8492_v13, 0 }
 0xa3d   : > { %v3421_v30 = vpack.c.bf16 %v3405_v21, %v3405_v21  ;;  %v3374_v23 = vsel %vm574_vm0, %v8675_v60, 0.0  ;;  %6751 = vpow2.f32 %v3339_v12 }
 0xa3e   : > { %v3422_v46 = vpack.c.bf16 %v3406_v53, %v3406_v53  ;;  %3384 = vadd.xlane.f32.xlu2 %v3383_v43 }
 0xa3f   : > { %v3439_v37 = vunpack.c.l.b16 %v3421_v30 }
 0xa40   : > { %v3440_v55 = vunpack.c.l.b16 %v3422_v46  ;;  %3375 = vadd.xlane.f32.xlu1 %v3374_v23 }
 0xa42   : > { %v3441_v62 = vpack.c.b16 %v3440_v55, %v3439_v37  ;;  %v6750_v32 = vpop.eup %6749 }
 0xa43   : > { %v8685_v49 = vpop.eup %6751  ;;  %v3409_v15 = vmul.f32 %v6750_v32, %v8609_v25 }
 0xa44   : > { %v3358_v58 = vpop.xlane.xlu1 %3357  ;;  %6299 = vmatmul.msk.bf16.vlgmr.msra.gmra.mxu2 %vm574_vm0, %v3441_v62  ;;  %v3386_v0 = vsel %vm574_vm0, %v8685_v49, 0.0 }
 0xa45   : > { %6753 = vrcp.f32 %v3358_v58  ;;  %3654 = vmatpush.bf16.xpose.msra.mxu2 %v3645_v3  ;;  %v3425_v53 = vpack.c.bf16 %v3409_v15, %v3409_v15 }
 0xa47   : > { %v3489_v30 = vunpack.c.l.b16 %v3425_v53 }
 0xa4b   : > { %v6754_v21 = vpop.eup %6753  ;;  %3387 = vadd.xlane.f32.xlu0 %v3386_v0 }
 0xa4c   : > { %v3410_v37 = vmul.f32 %v6754_v21, %v8615_v52 }
 0xa4e   : > { %v3426_v12 = vpack.c.bf16 %v3410_v37, %v3410_v37 }
 0xa50   : > { %v3490_v43 = vunpack.c.l.b16 %v3426_v12  ;;  %v3669_v12 = vsel %vm574_vm0, %v8516_v14, 0 }
 0xa52   : > { %v3491_v13 = vpack.c.b16 %v3490_v43, %v3489_v30 }
 0xa54   : > { %6301 = vmatmul.msk.bf16.vlgmr.msrb.gmra.mxu0 %vm574_vm0, %v3491_v13 }
 0xa56   : > { %3805 = vrot.lane.b32.xlu2 %v7358_v9, %s7112_s18 }
 0xa59   : > { %3759 = vrot.lane.b32.xlu1 %v7323_v18, %s7112_s18 }
 0xa5e   : > { %4142 = vrot.lane.b32.xlu2 %v7327_v28, %s7112_s18 }
 0xa5f   : > { %3807 = vrot.lane.b32.xlu0 %v7352_v56, %s7112_s18 }
 0xa60   : > { %v3349_v32 = vpop.xlane.xlu2 %3348 }
 0xa61   : > { %3733 = vrot.lane.b32.xlu1 %v7319_v6, %s7112_s18  ;;  %6755 = vrcp.f32 %v3349_v32 }
 0xa66   : > { %4117 = vrot.lane.b32.xlu2 %v7316_v4, %s7112_s18 }
 0xa67   : > { %4067 = vrot.lane.b32.xlu0 %v7360_v17, %s7112_s18  ;;  %v6756_v23 = vpop.eup %6755 }
 0xa68   : > { %v3688_v25 = vpop.permute.xlu2 %3687  ;;  %v3352_v46 = vpop.xlane.xlu1 %3351  ;;  %v3407_v55 = vmul.f32 %v6756_v23, %v8621_v24 }
 0xa69   : > { %v3693_v52 = vsel %vm574_vm0, %v3688_v25, 0  ;;  %3709 = vrot.lane.b32.xlu1 %v7306_v41, %s7112_s18  ;;  %6757 = vrcp.f32 %v3352_v46 }
 0xa6a   : > { %3702 = vmatpush.bf16.xpose.msrb.mxu0 %v3693_v52  ;;  %6759 = vrcp.f32 %v3367_v47  ;;  %v3423_v58 = vpack.c.bf16 %v3407_v55, %v3407_v55  ;;  %v3741_v52 = vsel %vm574_vm0, %v8572_v8, 0 }
 0xa6c   : > { %v3464_v24 = vunpack.c.l.b16 %v3423_v58 }
 0xa6e   : > { %4192 = vrot.lane.b32.xlu2 %v7536_v33, %s7112_s18 }
 0xa6f   : > { %4167 = vrot.lane.b32.xlu0 %v7524_v63, %s7112_s18  ;;  %v6758_v62 = vpop.eup %6757 }
 0xa70   : > { %v3408_v3 = vmul.f32 %v6758_v62, %v8627_v1  ;;  %v3370_v15 = vpop.xlane.xlu1 %3369  ;;  %v6760_v21 = vpop.eup %6759 }
 0xa71   : > { %3781 = vrot.lane.b32.xlu1 %v7338_v50, %s7112_s18  ;;  %6761 = vrcp.f32 %v3370_v15  ;;  %v3413_v47 = vmul.f32 %v6760_v21, %v8607_v34  ;;  %v3379_v14 = vpop.xlane.xlu0 %3378  ;;  %v8743_v23 = vpop.permute.xlu2 %3757 }
 0xa72   : > { %v3424_v0 = vpack.c.bf16 %v3408_v3, %v3408_v3 }
 0xa73   : > { %v3429_v30 = vpack.c.bf16 %v3413_v47, %v3413_v47 }
 0xa74   : > { %v3465_v53 = vunpack.c.l.b16 %v3424_v0 }
 0xa75   : > { %v3539_v13 = vunpack.c.l.b16 %v3429_v30 }
 0xa76   : > { %4335 = vrot.lane.b32.xlu2 %v7310_v54, %s7113_s19  ;;  %v3466_v37 = vpack.c.b16 %v3465_v53, %v3464_v24 }
 0xa77   : > { %4239 = vrot.lane.b32.xlu0 %v7259_v44, %s7113_s19  ;;  %v6762_v1 = vpop.eup %6761 }
 0xa78   : > { %v3414_v43 = vmul.f32 %v6762_v1, %v8632_v35  ;;  %6300 = vmatmul.msk.bf16.vlgmr.msrb.gmra.mxu3 %vm574_vm0, %v3466_v37 }
 0xa79   : > { %4042 = vrot.lane.b32.xlu1 %v7350_v5, %s7112_s18  ;;  %3678 = vmatpush.bf16.xpose.msrb.mxu3 %v3669_v12  ;;  %v3373_v55 = vpop.xlane.xlu0 %3372  ;;  %v3784_v24 = vpop.permute.xlu2 %3783 }
 0xa7a   : > { %v3430_v34 = vpack.c.bf16 %v3414_v43, %v3414_v43 }
 0xa7c   : > { %v3540_v32 = vunpack.c.l.b16 %v3430_v34 }
 0xa7e   : > { %v3541_v25 = vpack.c.b16 %v3540_v32, %v3539_v13 }
 0xa7f   : > { %4217 = vrot.lane.b32.xlu0 %v7554_v27, %s7112_s18 }
 0xa80   : > { %6303 = vmatmul.msk.bf16.vlgmr.msrb.gmra.mxu2 %vm574_vm0, %v3541_v25 }
 0xa81   : > { %4092 = vrot.lane.b32.xlu1 %v7303_v39, %s7112_s18  ;;  %3750 = vmatpush.bf16.xpose.msrb.mxu2 %v3741_v52 }
 0xa87   : > { %4237 = vrot.lane.b32.xlu0 %v7261_v45, %s7113_s19 }
 0xa89   : > { %4263 = vrot.lane.b32.xlu1 %v7275_v57, %s7113_s19 }
 0xa8b   : > { %v3712_v0 = vpop.permute.xlu0 %3711 }
 0xa90   : > { %6307 = vmatmul.msk.bf16.vlgmr.msra.gmra.mxu2 %vm574_vm0, %v8562_v36 }
 0xa91   : > { %4261 = vrot.lane.b32.xlu1 %v7283_v2, %s7113_s19 }
 0xa93   : > { %v3686_v25 = vpop.permute.xlu0 %3685 }
 0xa9b   : > { %v3361_v8 = vpop.xlane.xlu1 %3360 }
 0xa9c   : > { %6763 = vrcp.f32 %v3361_v8 }
 0xaa2   : > { %v6764_v46 = vpop.eup %6763 }
 0xaa3   : > { %v3364_v35 = vpop.xlane.xlu1 %3363  ;;  %v3411_v62 = vmul.f32 %v6764_v46, %v8656_v48  ;;  %v3717_v48 = vsel %vm574_vm0, %v3712_v0, 0 }
 0xaa4   : > { %6765 = vrcp.f32 %v3364_v35 }
 0xaa5   : > { %6767 = vrcp.f32 %v3379_v14  ;;  %v3427_v3 = vpack.c.bf16 %v3411_v62, %v3411_v62 }
 0xaa7   : > { %v3514_v37 = vunpack.c.l.b16 %v3427_v3 }
 0xaaa   : > { %v6766_v58 = vpop.eup %6765 }
 0xaab   : > { %v3412_v15 = vmul.f32 %v6766_v58, %v8662_v7  ;;  %v3382_v36 = vpop.xlane.xlu1 %3381  ;;  %v6768_v21 = vpop.eup %6767 }
 0xaac   : > { %6769 = vrcp.f32 %v3382_v36  ;;  %v3417_v53 = vmul.f32 %v6768_v21, %v8634_v61 }
 0xaad   : > { %v3428_v47 = vpack.c.bf16 %v3412_v15, %v3412_v15  ;;  %6771 = vrcp.f32 %v3373_v55  ;;  %v3789_v55 = vsel %vm574_vm0, %v3784_v24, 0 }
 0xaae   : > { %v3433_v43 = vpack.c.bf16 %v3417_v53, %v3417_v53 }
 0xaaf   : > { %v3515_v1 = vunpack.c.l.b16 %v3428_v47 }
 0xab0   : > { %v3589_v14 = vunpack.c.l.b16 %v3433_v43 }
 0xab1   : > { %v3516_v12 = vpack.c.b16 %v3515_v1, %v3514_v37  ;;  %v3385_v52 = vpop.xlane.xlu2 %3384 }
 0xab2   : > { %v6770_v30 = vpop.eup %6769 }
 0xab3   : > { %v3418_v34 = vmul.f32 %v6770_v30, %v8667_v51  ;;  %6302 = vmatmul.msk.bf16.vlgmr.msrb.gmra.mxu1 %vm574_vm0, %v3516_v12  ;;  %v3376_v7 = vpop.xlane.xlu1 %3375  ;;  %v6772_v13 = vpop.eup %6771 }
 0xab4   : > { %3726 = vmatpush.bf16.xpose.msrb.mxu1 %v3717_v48  ;;  %6773 = vrcp.f32 %v3376_v7  ;;  %v3415_v61 = vmul.f32 %v6772_v13, %v8640_v40 }
 0xab5   : > { %v3434_v32 = vpack.c.bf16 %v3418_v34, %v3418_v34  ;;  %6775 = vrcp.f32 %v3385_v52 }
 0xab6   : > { %v3431_v62 = vpack.c.bf16 %v3415_v61, %v3415_v61 }
 0xab7   : > { %v3590_v8 = vunpack.c.l.b16 %v3434_v32 }
 0xab8   : > { %v3564_v36 = vunpack.c.l.b16 %v3431_v62 }
 0xab9   : > { %v3591_v35 = vpack.c.b16 %v3590_v8, %v3589_v14  ;;  %v3806_v1 = vpop.permute.xlu2 %3805 }
 0xaba   : > { %v6774_v46 = vpop.eup %6773 }
 0xabb   : > { %v3416_v51 = vmul.f32 %v6774_v46, %v8675_v60  ;;  %6305 = vmatmul.msk.bf16.vlgmr.msra.gmra.mxu0 %vm574_vm0, %v3591_v35  ;;  %v6776_v15 = vpop.eup %6775 }
 0xabc   : > { %3798 = vmatpush.bf16.xpose.msra.mxu0 %v3789_v55  ;;  %v3419_v40 = vmul.f32 %v6776_v15, %v8671_v11 }
 0xabd   : > { %v3432_v58 = vpack.c.bf16 %v3416_v51, %v3416_v51 }
 0xabe   : > { %v3388_v3 = vpop.xlane.xlu0 %3387  ;;  %v3435_v53 = vpack.c.bf16 %v3419_v40, %v3419_v40 }
 0xabf   : > { %v3565_v21 = vunpack.c.l.b16 %v3432_v58  ;;  %6777 = vrcp.f32 %v3388_v3 }
 0xac0   : > { %v3614_v60 = vunpack.c.l.b16 %v3435_v53 }
 0xac1   : > { %v3566_v0 = vpack.c.b16 %v3565_v21, %v3564_v36  ;;  %v4143_v7 = vpop.permute.xlu2 %4142 }
 0xac3   : > { %6304 = vmatmul.msk.bf16.vlgmr.msra.gmra.mxu3 %vm574_vm0, %v3566_v0 }
 0xac5   : > { %v6778_v47 = vpop.eup %6777 }
 0xac6   : > { %v3420_v24 = vmul.f32 %v6778_v47, %v8685_v49 }
 0xac7   : > { %v8772_v35 = vpop.f32.mrf.mxu2 }
 0xac8   : > { %v3436_v37 = vpack.c.bf16 %v3420_v24, %v3420_v24 }
 0xaca   : > { %v3615_v12 = vunpack.c.l.b16 %v3436_v37 }
 0xacb   : > { %6309 = vmatmul.msk.bf16.vlgmr.msrb.gmra.mxu0 %vm574_vm0, %v3686_v25  ;;  %v3760_v30 = vpop.permute.xlu1 %3759  ;;  %v4118_v25 = vpop.permute.xlu2 %4117 }
 0xacc   : > { %v3616_v43 = vpack.c.b16 %v3615_v12, %v3614_v60  ;;  %v3765_v48 = vsel %vm574_vm0, %v3760_v30, 0 }
 0xacd   : > { %3774 = vmatpush.bf16.xpose.msra.mxu3 %v3765_v48 }
 0xace   : > { %6306 = vmatmul.msk.bf16.vlgmr.msra.gmra.mxu1 %vm574_vm0, %v3616_v43 }
 0xad1   : > { %v3808_v11 = vpop.permute.xlu0 %3807  ;;  %v8784_v36 = vpop.f32.mrf.mxu0 }
 0xad2   : > { %v3813_v34 = vsel %vm574_vm0, %v3808_v11, 0  ;;  %10176 = vst [vmem:[#allocation73_spill] sm:$0xff] %v8784_v36 }
 0xad3   : > { %6308 = vmatmul.msk.bf16.vlgmr.msrb.gmra.mxu3 %vm574_vm0, %v8566_v26  ;;  %3822 = vmatpush.bf16.xpose.msra.mxu1 %v3813_v34  ;;  %v3734_v49 = vpop.permute.xlu1 %3733  ;;  %v4193_v55 = vpop.permute.xlu2 %4192 }
 0xad4   : > { %6311 = vmatmul.msk.bf16.vlgmr.msrb.gmra.mxu2 %vm574_vm0, %v3734_v49 }
 0xad9   : > { %v4068_v13 = vpop.permute.xlu0 %4067  ;;  %v8786_v21 = vpop.f32.mrf.mxu0 }
 0xada   : > { %4080 = vmatpush.bf16.msrb.mxu3 %v4068_v13  ;;  %10177 = vst [vmem:[#allocation74_spill] sm:$0xff] %v8786_v21 }
 0xadb   : > { %v3710_v32 = vpop.permute.xlu1 %3709 }
 0xade   : > { %6310 = vmatmul.msk.bf16.vlgmr.msrb.gmra.mxu1 %vm574_vm0, %v3710_v32 }
 0xadf   : > { %4130 = vmatpush.bf16.msrb.mxu1 %v4118_v25 }
 0xae1   : > { %v4168_v52 = vpop.permute.xlu0 %4167 }
 0xae3   : > { %6312 = vmatmul.msk.bf16.vlgmr.msra.gmra.mxu3 %vm574_vm0, %v8743_v23  ;;  %v3782_v14 = vpop.permute.xlu1 %3781  ;;  %v8774_v23 = vpop.f32.mrf.mxu2 }
 0xae4   : > { %4180 = vmatpush.bf16.msra.mxu3 %v4168_v52  ;;  %6313 = vmatmul.msk.bf16.vlgmr.msra.gmra.mxu0 %vm574_vm0, %v3782_v14  ;;  %10173 = vst [vmem:[#allocation70_spill] sm:$0xff] %v8774_v23 }
 0xae9   : > { %v8769_v26 = vpop.permute.xlu0 %4239 }
 0xaeb   : > { %v4043_v61 = vpop.permute.xlu1 %4042 }
 0xaec   : > { %4055 = vmatpush.bf16.msra.mxu2 %v4043_v61 }
 0xaee   : > { %6314 = vmatmul.msk.bf16.vlgmr.msra.gmra.mxu1 %vm574_vm0, %v3806_v1 }
 0xaf0   : > { %4155 = vmatpush.bf16.msrb.mxu2 %v4143_v7 }
 0xaf1   : > { %v4218_v8 = vpop.permute.xlu0 %4217 }
 0xaf2   : > { %4230 = vmatpush.bf16.msra.mxu1 %v4218_v8 }
 0xaf3   : > { %v4093_v46 = vpop.permute.xlu1 %4092 }
 0xaf4   : > { %4105 = vmatpush.bf16.msrb.mxu0 %v4093_v46 }
 0xaf8   : > { %4205 = vmatpush.bf16.msra.mxu0 %v4193_v55 }
 0xafb   : > { %v8788_v0 = vpop.f32.mrf.mxu3 }
 0xafc   : > { %10178 = vst [vmem:[#allocation75_spill] sm:$0xff] %v8788_v0 }
 0xb03   : > { %v8776_v62 = vpop.f32.mrf.mxu2  ;;  %v8794_v53 = vpop.f32.mrf.mxu3 }
 0xb04   : > { %10174 = vst [vmem:[#allocation71_spill] sm:$0xff] %v8776_v62 }
 0xb0b   : > { %v8778_v51 = vpop.f32.mrf.mxu2 }
 0xb0c   : > { %10175 = vst [vmem:[#allocation72_spill] sm:$0xff] %v8778_v51 }
 0xb13   : > { %v3656_v58 = vpop.f32.mrf.mxu2 }
 0xb14   : > { %v8780_v3 = vmul.f32 0.25, %v3656_v58 }
 0xb16   : > { %v3845_v15 = vsel %vm574_vm0, %v8780_v3, -inf }
 0xb17   : > { %3846 = vmax.xlane.f32.xlu0 %v3845_v15 }
 0xb1b   : > { %v3658_v48 = vpop.f32.mrf.mxu2 }
 0xb1c   : > { %v8810_v34 = vmul.f32 0.25, %v3658_v48 }
 0xb1e   : > { %v3848_v32 = vsel %vm574_vm0, %v8810_v34, -inf }
 0xb30   : > { %v8792_v47 = vpop.f32.mrf.mxu1 }
 0xb31   : > { %10180 = vst [vmem:[#allocation77_spill] sm:$0xff] %v8792_v47 }
 0xb38   : > { %v8790_v40 = vpop.f32.mrf.mxu0  ;;  %v8798_v37 = vpop.f32.mrf.mxu1 }
 0xb39   : > { %10179 = vst [vmem:[#allocation76_spill] sm:$0xff] %v8790_v40 }
 0xb3a   : > { %10182 = vst [vmem:[#allocation79_spill] sm:$0xff] %v8798_v37 }
 0xb40   : > { %v8796_v24 = vpop.f32.mrf.mxu0 }
 0xb41   : > { %10181 = vst [vmem:[#allocation78_spill] sm:$0xff] %v8796_v24 }
 0xb46   : > { %v8800_v60 = vpop.f32.mrf.mxu3 }
 0xb47   : > { %10183 = vst [vmem:[#allocation80_spill] sm:$0xff] %v8800_v60 }
 0xb48   : > { %v3704_v1 = vpop.f32.mrf.mxu0 }
 0xb49   : > { %v8802_v12 = vmul.f32 0.25, %v3704_v1 }
 0xb4b   : > { %v8804_v30 = vpop.f32.mrf.mxu1  ;;  %v3857_v43 = vsel %vm574_vm0, %v8802_v12, -inf }
 0xb4c   : > { %10184 = vst [vmem:[#allocation81_spill] sm:$0xff] %v8804_v30  ;;  %3858 = vmax.xlane.f32.xlu1 %v3857_v43 }
 0xb4e   : > { %v8808_v11 = vpop.f32.mrf.mxu3 }
 0xb4f   : > { %10185 = vst [vmem:[#allocation82_spill] sm:$0xff] %v8808_v11 }
 0xb50   : > { %v3706_v49 = vpop.f32.mrf.mxu0 }
 0xb51   : > { %v8812_v7 = vmul.f32 0.25, %v3706_v49 }
 0xb53   : > { %v8814_v13 = vpop.f32.mrf.mxu1  ;;  %v3860_v25 = vsel %vm574_vm0, %v8812_v7, -inf }
 0xb54   : > { %10186 = vst [vmem:[#allocation83_spill] sm:$0xff] %v8814_v13  ;;  %3849 = vmax.xlane.f32.xlu1 %v3848_v32  ;;  %3861 = vmax.xlane.f32.xlu0 %v3860_v25 }
 0xb56   : > { %v3680_v52 = vpop.f32.mrf.mxu3 }
 0xb57   : > { %v8820_v14 = vmul.f32 0.25, %v3680_v52  ;;  %v3752_v61 = vpop.f32.mrf.mxu2 }
 0xb58   : > { %v8824_v55 = vmul.f32 0.25, %v3752_v61 }
 0xb59   : > { %v3851_v8 = vsel %vm574_vm0, %v8820_v14, -inf }
 0xb5a   : > { %3852 = vmax.xlane.f32.xlu2 %v3851_v8  ;;  %v3869_v48 = vsel %vm574_vm0, %v8824_v55, -inf }
 0xb5b   : > { %v3728_v46 = vpop.f32.mrf.mxu1 }
 0xb5c   : > { %v8836_v61 = vmul.f32 0.25, %v3728_v46 }
 0xb5e   : > { %v3682_v58 = vpop.f32.mrf.mxu3 }
 0xb5f   : > { %v3754_v15 = vpop.f32.mrf.mxu2 }
 0xb60   : > { %v8826_v1 = vmul.f32 0.25, %v3754_v15  ;;  %v8840_v15 = vmul.f32 0.25, %v3682_v58 }
 0xb61   : > { %v3800_v43 = vpop.f32.mrf.mxu0 }
 0xb62   : > { %v8830_v49 = vmul.f32 0.25, %v3800_v43  ;;  %3870 = vmax.xlane.f32.xlu2 %v3869_v48  ;;  %v3872_v32 = vsel %vm574_vm0, %v8826_v1, -inf  ;;  %v3863_v43 = vsel %vm574_vm0, %v8836_v61, -inf  ;;  %v3854_v46 = vsel %vm574_vm0, %v8840_v15, -inf }
 0xb63   : > { %3873 = vmax.xlane.f32.xlu1 %v3872_v32  ;;  %v3730_v25 = vpop.f32.mrf.mxu1 }
 0xb64   : > { %v3881_v52 = vsel %vm574_vm0, %v8830_v49, -inf  ;;  %v8838_v8 = vmul.f32 0.25, %v3730_v25 }
 0xb65   : > { %3882 = vmax.xlane.f32.xlu0 %v3881_v52 }
 0xb66   : > { %v3776_v30 = vpop.f32.mrf.mxu3  ;;  %v3866_v32 = vsel %vm574_vm0, %v8838_v8, -inf }
 0xb67   : > { %v8852_v58 = vmul.f32 0.25, %v3776_v30 }
 0xb69   : > { %v3802_v48 = vpop.f32.mrf.mxu0 }
 0xb6a   : > { %3864 = vmax.xlane.f32.xlu2 %v3863_v43  ;;  %v8848_v24 = vmul.f32 0.25, %v3802_v48 }
 0xb6b   : > { %3867 = vmax.xlane.f32.xlu1 %v3866_v32  ;;  %v3824_v11 = vpop.f32.mrf.mxu1  ;;  %v3875_v32 = vsel %vm574_vm0, %v8852_v58, -inf }
 0xb6c   : > { %v8850_v25 = vmul.f32 0.25, %v3824_v11  ;;  %v3884_v52 = vsel %vm574_vm0, %v8848_v24, -inf }
 0xb6d   : > { %3855 = vmax.xlane.f32.xlu0 %v3854_v46 }
 0xb6e   : > { %v3778_v62 = vpop.f32.mrf.mxu3  ;;  %v3887_v43 = vsel %vm574_vm0, %v8850_v25, -inf }
 0xb6f   : > { %v8860_v60 = vmul.f32 0.25, %v3778_v62 }
 0xb71   : > { %v3878_v30 = vsel %vm574_vm0, %v8860_v60, -inf }
 0xb72   : > { %3885 = vmax.xlane.f32.xlu2 %v3884_v52  ;;  %v8868_v52 = vpop.permute.xlu0 %4237 }
 0xb73   : > { %3888 = vmax.xlane.f32.xlu1 %v3887_v43  ;;  %v3826_v48 = vpop.f32.mrf.mxu1 }
 0xb74   : > { %v8862_v11 = vmul.f32 0.25, %v3826_v48  ;;  %v8877_v48 = vpop.permute.xlu1 %4263 }
 0xb75   : > { %3876 = vmax.xlane.f32.xlu0 %v3875_v32 }
 0xb76   : > { %v3890_v46 = vsel %vm574_vm0, %v8862_v11, -inf }
 0xb7a   : > { %3879 = vmax.xlane.f32.xlu2 %v3878_v30 }
 0xb7c   : > { %v8881_v30 = vpop.permute.xlu1 %4261 }
 0xb7d   : > { %3891 = vmax.xlane.f32.xlu0 %v3890_v46 }
 0xb8a   : > { %v3847_v43 = vpop.xlane.xlu0 %3846 }
 0xb8b   : > { %v3893_v21 = vsub.f32 %v8780_v3, %v3847_v43 }
 0xb8d   : > { %v3909_v37 = vmul.f32 1.442695, %v3893_v21 }
 0xb8f   : > { %6779 = vpow2.f32 %v3909_v37  ;;  %v8884_v37 = vpop.permute.xlu2 %4335 }
 0xb91   : > { %4359 = vrot.lane.b32.xlu0 %v7323_v18, %s7113_s19 }
 0xb95   : > { %v8873_v62 = vpop.eup %6779 }
 0xb96   : > { %v3941_v32 = vsel %vm574_vm0, %v8873_v62, 0.0 }
 0xb97   : > { %3942 = vadd.xlane.f32.xlu2 %v3941_v32 }
 0xbaf   : > { %4311 = vrot.lane.b32.xlu2 %v7299_v29, %s7113_s19 }
 0xbbf   : > { %v3859_v46 = vpop.xlane.xlu1 %3858 }
 0xbc0   : > { %v3897_v3 = vsub.f32 %v8802_v12, %v3859_v46 }
 0xbc2   : > { %v3917_v21 = vmul.f32 1.442695, %v3897_v3 }
 0xbc4   : > { %6781 = vpow2.f32 %v3917_v21 }
 0xbc7   : > { %v3862_v43 = vpop.xlane.xlu0 %3861  ;;  %v3850_v0 = vpop.xlane.xlu1 %3849 }
 0xbc8   : > { %v3898_v36 = vsub.f32 %v8812_v7, %v3862_v43  ;;  %v3894_v32 = vsub.f32 %v8810_v34, %v3850_v0 }
 0xbca   : > { %v8888_v23 = vpop.eup %6781  ;;  %v3911_v13 = vmul.f32 1.442695, %v3894_v32  ;;  %v3919_v40 = vmul.f32 1.442695, %v3898_v36 }
 0xbcb   : > { %v3953_v51 = vsel %vm574_vm0, %v8888_v23, 0.0 }
 0xbcc   : > { %3954 = vadd.xlane.f32.xlu1 %v3953_v51  ;;  %6783 = vpow2.f32 %v3911_v13 }
 0xbcd   : > { %v3853_v12 = vpop.xlane.xlu2 %3852  ;;  %6785 = vpow2.f32 %v3919_v40 }
 0xbce   : > { %v3895_v46 = vsub.f32 %v8820_v14, %v3853_v12 }
 0xbd0   : > { %v3913_v3 = vmul.f32 1.442695, %v3895_v46 }
 0xbd2   : > { %6787 = vpow2.f32 %v3913_v3  ;;  %v8893_v21 = vpop.eup %6783 }
 0xbd3   : > { %v3944_v0 = vsel %vm574_vm0, %v8893_v21, 0.0  ;;  %v8897_v34 = vpop.eup %6785 }
 0xbd4   : > { %3945 = vadd.xlane.f32.xlu1 %v3944_v0  ;;  %v3956_v40 = vsel %vm574_vm0, %v8897_v34, 0.0 }
 0xbd5   : > { %v3871_v36 = vpop.xlane.xlu2 %3870 }
 0xbd6   : > { %v3901_v7 = vsub.f32 %v8824_v55, %v3871_v36 }
 0xbd8   : > { %v8900_v43 = vpop.eup %6787  ;;  %v3925_v51 = vmul.f32 1.442695, %v3901_v7  ;;  %v3883_v13 = vpop.xlane.xlu0 %3882  ;;  %3957 = vadd.xlane.f32.xlu2 %v3956_v40 }
 0xbd9   : > { %v3905_v14 = vsub.f32 %v8830_v49, %v3883_v13  ;;  %v3947_v32 = vsel %vm574_vm0, %v8900_v43, 0.0 }
 0xbda   : > { %6789 = vpow2.f32 %v3925_v51  ;;  %3948 = vadd.xlane.f32.xlu0 %v3947_v32  ;;  %v3874_v51 = vpop.xlane.xlu1 %3873 }
 0xbdb   : > { %v3933_v12 = vmul.f32 1.442695, %v3905_v14 }
 0xbdd   : > { %6791 = vpow2.f32 %v3933_v12  ;;  %v3865_v46 = vpop.xlane.xlu2 %3864  ;;  %v3902_v12 = vsub.f32 %v8826_v1, %v3874_v51 }
 0xbde   : > { %v3899_v55 = vsub.f32 %v8836_v61, %v3865_v46 }
 0xbdf   : > { %v3927_v46 = vmul.f32 1.442695, %v3902_v12 }
 0xbe0   : > { %v8908_v3 = vpop.eup %6789  ;;  %v3921_v0 = vmul.f32 1.442695, %v3899_v55  ;;  %v3856_v36 = vpop.xlane.xlu0 %3855 }
 0xbe1   : > { %v3896_v7 = vsub.f32 %v8840_v15, %v3856_v36  ;;  %v3965_v49 = vsel %vm574_vm0, %v8908_v3, 0.0 }
 0xbe2   : > { %6793 = vpow2.f32 %v3921_v0  ;;  %3966 = vadd.xlane.f32.xlu2 %v3965_v49  ;;  %v3868_v55 = vpop.xlane.xlu1 %3867 }
 0xbe3   : > { %v8913_v13 = vpop.eup %6791  ;;  %v3915_v40 = vmul.f32 1.442695, %v3896_v7  ;;  %v3900_v49 = vsub.f32 %v8838_v8, %v3868_v55 }
 0xbe4   : > { %v3977_v14 = vsel %vm574_vm0, %v8913_v13, 0.0 }
 0xbe5   : > { %3978 = vadd.xlane.f32.xlu0 %v3977_v14  ;;  %v3886_v61 = vpop.xlane.xlu2 %3885  ;;  %6795 = vpow2.f32 %v3915_v40  ;;  %v3923_v51 = vmul.f32 1.442695, %v3900_v49 }
 0xbe6   : > { %6797 = vpow2.f32 %v3927_v46 }
 0xbe8   : > { %v8917_v32 = vpop.eup %6793  ;;  %v3877_v55 = vpop.xlane.xlu0 %3876 }
 0xbe9   : > { %v3959_v15 = vsel %vm574_vm0, %v8917_v32, 0.0 }
 0xbea   : > { %3960 = vadd.xlane.f32.xlu2 %v3959_v15 }
 0xbeb   : > { %v8922_v36 = vpop.eup %6795 }
 0xbec   : > { %v3950_v1 = vsel %vm574_vm0, %v8922_v36, 0.0  ;;  %v8930_v40 = vpop.eup %6797 }
 0xbed   : > { %v3880_v0 = vpop.xlane.xlu2 %3879  ;;  %4287 = vrot.lane.b32.xlu1 %v7291_v10, %s7113_s19  ;;  %v3968_v8 = vsel %vm574_vm0, %v8930_v40, 0.0 }
 0xbee   : > { %v3904_v7 = vsub.f32 %v8860_v60, %v3880_v0  ;;  %v3906_v60 = vsub.f32 %v8848_v24, %v3886_v61  ;;  %v3889_v24 = vpop.xlane.xlu1 %3888 }
 0xbf0   : > { %v3931_v14 = vmul.f32 1.442695, %v3904_v7  ;;  %v3935_v46 = vmul.f32 1.442695, %v3906_v60  ;;  %v3903_v7 = vsub.f32 %v8852_v58, %v3877_v55  ;;  %v3892_v55 = vpop.xlane.xlu0 %3891 }
 0xbf2   : > { %6799 = vpow2.f32 %v3931_v14  ;;  %3951 = vadd.xlane.f32.xlu2 %v3950_v1  ;;  %v3929_v61 = vmul.f32 1.442695, %v3903_v7  ;;  %v3907_v1 = vsub.f32 %v8850_v25, %v3889_v24 }
 0xbf3   : > { %6801 = vpow2.f32 %v3923_v51 }
 0xbf4   : > { %6803 = vpow2.f32 %v3935_v46  ;;  %v3937_v60 = vmul.f32 1.442695, %v3907_v1 }
 0xbf5   : > { %6805 = vpow2.f32 %v3929_v61 }
 0xbf6   : > { %6807 = vpow2.f32 %v3937_v60 }
 0xbf8   : > { %v8932_v12 = vpop.eup %6799 }
 0xbf9   : > { %v3974_v15 = vsel %vm574_vm0, %v8932_v12, 0.0  ;;  %v8939_v0 = vpop.eup %6801 }
 0xbfa   : > { %3975 = vadd.xlane.f32.xlu0 %v3974_v15  ;;  %3969 = vadd.xlane.f32.xlu2 %v3968_v8  ;;  %v3962_v49 = vsel %vm574_vm0, %v8939_v0, 0.0  ;;  %v8944_v14 = vpop.eup %6803 }
 0xbfb   : > { %v3980_v51 = vsel %vm574_vm0, %v8944_v14, 0.0  ;;  %v8949_v15 = vpop.eup %6805 }
 0xbfc   : > { %v3971_v58 = vsel %vm574_vm0, %v8949_v15, 0.0  ;;  %v8955_v8 = vpop.eup %6807 }
 0xbfd   : > { %v3983_v25 = vsel %vm574_vm0, %v8955_v8, 0.0 }
 0xc02   : > { %3963 = vadd.xlane.f32.xlu2 %v3962_v49  ;;  %v3908_v49 = vsub.f32 %v8862_v11, %v3892_v55 }
 0xc03   : > { %v8998_v47 = vpop.permute.xlu0 %4359 }
 0xc04   : > { %v3939_v24 = vmul.f32 1.442695, %v3908_v49 }
 0xc0a   : > { %3981 = vadd.xlane.f32.xlu2 %v3980_v51  ;;  %v3943_v46 = vpop.xlane.xlu2 %3942 }
 0xc0b   : > { %6809 = vrcp.f32 %v3943_v46 }
 0xc0e   : > { %4333 = vrot.lane.b32.xlu0 %v7319_v6, %s7113_s19 }
 0xc11   : > { %v6810_v51 = vpop.eup %6809 }
 0xc12   : > { %3972 = vadd.xlane.f32.xlu2 %v3971_v58  ;;  %v8980_v61 = vpop.permute.xlu2 %4311 }
 0xc16   : > { %4309 = vrot.lane.b32.xlu0 %v7306_v41, %s7113_s19 }
 0xc17   : > { %3984 = vadd.xlane.f32.xlu1 %v3983_v25 }
 0xc1e   : > { %4381 = vrot.lane.b32.xlu0 %v7338_v50, %s7113_s19 }
 0xc26   : > { %4667 = vrot.lane.b32.xlu0 %v7360_v17, %s7113_s19 }
 0xc2a   : > { %4285 = vrot.lane.b32.xlu2 %v7295_v19, %s7113_s19 }
 0xc2e   : > { %4692 = vrot.lane.b32.xlu0 %v7303_v39, %s7113_s19 }
 0xc30   : > { %4357 = vrot.lane.b32.xlu1 %v7330_v31, %s7113_s19 }
 0xc36   : > { %4742 = vrot.lane.b32.xlu0 %v7327_v28, %s7113_s19 }
 0xc38   : > { %4383 = vrot.lane.b32.xlu1 %v7334_v42, %s7113_s19 }
 0xc3e   : > { %4839 = vrot.lane.b32.xlu0 %v7259_v44, %s7114_s21  ;;  %v4005_v44 = vmul.f32 %v6810_v51, %v8873_v62 }
 0xc3f   : > { %v3955_v7 = vpop.xlane.xlu1 %3954 }
 0xc40   : > { %4405 = vrot.lane.b32.xlu1 %v7358_v9, %s7113_s19  ;;  %6811 = vrcp.f32 %v3955_v7  ;;  %v4021_v46 = vpack.c.bf16 %v4005_v44, %v4005_v44 }
 0xc41   : > { %6813 = vpow2.f32 %v3939_v24 }
 0xc46   : > { %4792 = vrot.lane.b32.xlu0 %v7536_v33, %s7113_s19  ;;  %v6812_v60 = vpop.eup %6811 }
 0xc47   : > { %v3946_v1 = vpop.xlane.xlu1 %3945  ;;  %v8987_v58 = vpop.eup %6813  ;;  %v4009_v55 = vmul.f32 %v6812_v60, %v8888_v23 }
 0xc48   : > { %6815 = vrcp.f32 %v3946_v1  ;;  %4717 = vrot.lane.b32.xlu1 %v7316_v4, %s7113_s19  ;;  %v3986_v62 = vsel %vm574_vm0, %v8987_v58, 0.0  ;;  %v4039_v1 = vunpack.c.l.b16 %v4021_v46 }
 0xc49   : > { %v4025_v51 = vpack.c.bf16 %v4009_v55, %v4009_v55 }
 0xc4b   : > { %v3958_v11 = vpop.xlane.xlu2 %3957 }
 0xc4c   : > { %6817 = vrcp.f32 %v3958_v11 }
 0xc4d   : > { %v3949_v46 = vpop.xlane.xlu0 %3948 }
 0xc4e   : > { %4837 = vrot.lane.b32.xlu0 %v7261_v45, %s7114_s21  ;;  %v6816_v25 = vpop.eup %6815  ;;  %6819 = vrcp.f32 %v3949_v46 }
 0xc4f   : > { %v4006_v7 = vmul.f32 %v6816_v25, %v8893_v21  ;;  %v4089_v21 = vunpack.c.l.b16 %v4025_v51 }
 0xc50   : > { %4863 = vrot.lane.b32.xlu1 %v7275_v57, %s7114_s21  ;;  %v4245_v57 = vsel %vm574_vm0, %v8769_v26, 0 }
 0xc51   : > { %v4022_v49 = vpack.c.bf16 %v4006_v7, %v4006_v7 }
 0xc52   : > { %v6818_v24 = vpop.eup %6817 }
 0xc53   : > { %3987 = vadd.xlane.f32.xlu2 %v3986_v62  ;;  %v4040_v11 = vunpack.c.l.b16 %v4022_v49  ;;  %v4010_v45 = vmul.f32 %v6818_v24, %v8897_v34 }
 0xc54   : > { %v6820_v49 = vpop.eup %6819 }
 0xc55   : > { %v3967_v44 = vpop.xlane.xlu2 %3966  ;;  %v4041_v23 = vpack.c.b16 %v4040_v11, %v4039_v1  ;;  %v4026_v60 = vpack.c.bf16 %v4010_v45, %v4010_v45 }
 0xc56   : > { %4887 = vrot.lane.b32.xlu0 %v7291_v10, %s7114_s21 }
 0xc57   : > { %v4090_v25 = vunpack.c.l.b16 %v4026_v60  ;;  %6315 = vmatmul.msk.bf16.vlgmr.msra.gmra.mxu2 %vm574_vm0, %v4041_v23 }
 0xc58   : > { %4254 = vmatpush.bf16.xpose.msra.mxu2 %v4245_v57  ;;  %4935 = vrot.lane.b32.xlu1 %v7310_v54, %s7114_s21  ;;  %v4007_v54 = vmul.f32 %v6820_v49, %v8900_v43 }
 0xc59   : > { %v4091_v34 = vpack.c.b16 %v4090_v25, %v4089_v21 }
 0xc5a   : > { %v4023_v62 = vpack.c.bf16 %v4007_v54, %v4007_v54 }
 0xc5b   : > { %6317 = vmatmul.msk.bf16.vlgmr.msrb.gmra.mxu0 %vm574_vm0, %v4091_v34 }
 0xc5c   : > { %v4064_v43 = vunpack.c.l.b16 %v4023_v62 }
 0xc5d   : > { %v3961_v55 = vpop.xlane.xlu2 %3960 }
 0xc5e   : > { %4959 = vrot.lane.b32.xlu0 %v7323_v18, %s7114_s21 }
 0xc5f   : > { %v4288_v10 = vpop.permute.xlu1 %4287 }
 0xc60   : > { %v4293_v26 = vsel %vm574_vm0, %v4288_v10, 0  ;;  %4909 = vrot.lane.b32.xlu1 %v7306_v41, %s7114_s21 }
 0xc61   : > { %4302 = vmatpush.bf16.xpose.msrb.mxu0 %v4293_v26 }
 0xc65   : > { %v3952_v7 = vpop.xlane.xlu2 %3951 }
 0xc66   : > { %6821 = vrcp.f32 %v3952_v7  ;;  %4933 = vrot.lane.b32.xlu0 %v7319_v6, %s7114_s21  ;;  %v3979_v6 = vpop.xlane.xlu0 %3978 }
 0xc67   : > { %6823 = vrcp.f32 %v3967_v44 }
 0xc68   : > { %4983 = vrot.lane.b32.xlu1 %v7334_v42, %s7114_s21 }
 0xc6b   : > { %4407 = vrot.lane.b32.xlu2 %v7352_v56, %s7113_s19 }
 0xc6c   : > { %v6822_v18 = vpop.eup %6821 }
 0xc6d   : > { %v4008_v41 = vmul.f32 %v6822_v18, %v8922_v36  ;;  %v3970_v24 = vpop.xlane.xlu2 %3969  ;;  %v6824_v1 = vpop.eup %6823 }
 0xc6e   : > { %5007 = vrot.lane.b32.xlu0 %v7352_v56, %s7114_s21  ;;  %6825 = vrcp.f32 %v3970_v24  ;;  %v4013_v42 = vmul.f32 %v6824_v1, %v8908_v3  ;;  %v4269_v56 = vsel %vm574_vm0, %v8877_v48, 0 }
 0xc6f   : > { %v4024_v51 = vpack.c.bf16 %v4008_v41, %v4008_v41  ;;  %6827 = vrcp.f32 %v3961_v55  ;;  %v4317_v41 = vsel %vm574_vm0, %v8980_v61, 0 }
 0xc70   : > { %5005 = vrot.lane.b32.xlu1 %v7358_v9, %s7114_s21  ;;  %v4029_v60 = vpack.c.bf16 %v4013_v42, %v4013_v42  ;;  %v3976_v9 = vpop.xlane.xlu0 %3975 }
 0xc71   : > { %v4065_v11 = vunpack.c.l.b16 %v4024_v51 }
 0xc72   : > { %v4139_v25 = vunpack.c.l.b16 %v4029_v60 }
 0xc73   : > { %v4066_v45 = vpack.c.b16 %v4065_v11, %v4064_v43  ;;  %4642 = vrot.lane.b32.xlu2 %v7350_v5, %s7113_s19 }
 0xc74   : > { %v6826_v36 = vpop.eup %6825 }
 0xc75   : > { %6316 = vmatmul.msk.bf16.vlgmr.msrb.gmra.mxu3 %vm574_vm0, %v4066_v45  ;;  %v3964_v44 = vpop.xlane.xlu2 %3963  ;;  %v6828_v23 = vpop.eup %6827  ;;  %v4014_v57 = vmul.f32 %v6826_v36, %v8930_v40 }
 0xc76   : > { %4278 = vmatpush.bf16.xpose.msrb.mxu3 %v4269_v56  ;;  %6829 = vrcp.f32 %v3964_v44  ;;  %5242 = vrot.lane.b32.xlu0 %v7350_v5, %s7114_s21  ;;  %v4011_v21 = vmul.f32 %v6828_v23, %v8917_v32  ;;  %v4341_v5 = vsel %vm574_vm0, %v8884_v37, 0 }
 0xc77   : > { %6831 = vrcp.f32 %v3979_v6  ;;  %v4030_v3 = vpack.c.bf16 %v4014_v57, %v4014_v57 }
 0xc78   : > { %v4027_v55 = vpack.c.bf16 %v4011_v21, %v4011_v21 }
 0xc79   : > { %v4140_v34 = vunpack.c.l.b16 %v4030_v3 }
 0xc7a   : > { %v4114_v54 = vunpack.c.l.b16 %v4027_v55 }
 0xc7b   : > { %4767 = vrot.lane.b32.xlu2 %v7524_v63, %s7113_s19  ;;  %v4141_v46 = vpack.c.b16 %v4140_v34, %v4139_v25 }
 0xc7c   : > { %v6830_v48 = vpop.eup %6829 }
 0xc7d   : > { %v4012_v40 = vmul.f32 %v6830_v48, %v8939_v0  ;;  %v3982_v10 = vpop.xlane.xlu2 %3981  ;;  %v6832_v26 = vpop.eup %6831  ;;  %6319 = vmatmul.msk.bf16.vlgmr.msrb.gmra.mxu2 %vm574_vm0, %v4141_v46 }
 0xc7e   : > { %6833 = vrcp.f32 %v3982_v10  ;;  %4350 = vmatpush.bf16.xpose.msrb.mxu2 %v4341_v5  ;;  %v4017_v49 = vmul.f32 %v6832_v26, %v8913_v13 }
 0xc7f   : > { %v4028_v7 = vpack.c.bf16 %v4012_v40, %v4012_v40  ;;  %6835 = vrcp.f32 %v3976_v9 }
 0xc80   : > { %v4334_v32 = vpop.permute.xlu0 %4333  ;;  %v4033_v37 = vpack.c.bf16 %v4017_v49, %v4017_v49 }
 0xc81   : > { %v4115_v18 = vunpack.c.l.b16 %v4028_v7 }
 0xc82   : > { %v4189_v43 = vunpack.c.l.b16 %v4033_v37 }
 0xc83   : > { %v4116_v62 = vpack.c.b16 %v4115_v18, %v4114_v54  ;;  %4817 = vrot.lane.b32.xlu2 %v7554_v27, %s7113_s19 }
 0xc84   : > { %v6834_v0 = vpop.eup %6833 }
 0xc85   : > { %v4018_v24 = vmul.f32 %v6834_v0, %v8944_v14  ;;  %6318 = vmatmul.msk.bf16.vlgmr.msrb.gmra.mxu1 %vm574_vm0, %v4116_v62  ;;  %v3973_v1 = vpop.xlane.xlu2 %3972  ;;  %v6836_v51 = vpop.eup %6835 }
 0xc86   : > { %4326 = vmatpush.bf16.xpose.msrb.mxu1 %v4317_v41  ;;  %6837 = vrcp.f32 %v3973_v1  ;;  %v4016_v11 = vmul.f32 %v6836_v51, %v8932_v12 }
 0xc87   : > { %v4034_v13 = vpack.c.bf16 %v4018_v24, %v4018_v24 }
 0xc88   : > { %v9048_v6 = vpop.permute.xlu0 %4309  ;;  %v4032_v36 = vpack.c.bf16 %v4016_v11, %v4016_v11 }
 0xc89   : > { %v4190_v42 = vunpack.c.l.b16 %v4034_v13 }
 0xc8a   : > { %v4165_v23 = vunpack.c.l.b16 %v4032_v36 }
 0xc8b   : > { %v4191_v45 = vpack.c.b16 %v4190_v42, %v4189_v43  ;;  %4861 = vrot.lane.b32.xlu2 %v7283_v2, %s7114_s21  ;;  %v4365_v2 = vsel %vm574_vm0, %v8998_v47, 0 }
 0xc8c   : > { %v6838_v61 = vpop.eup %6837 }
 0xc8d   : > { %v4015_v14 = vmul.f32 %v6838_v61, %v8949_v15  ;;  %6321 = vmatmul.msk.bf16.vlgmr.msra.gmra.mxu0 %vm574_vm0, %v4191_v45  ;;  %6323 = vmatmul.msk.bf16.vlgmr.msra.gmra.mxu2 %vm574_vm0, %v8868_v52  ;;  %v3985_v15 = vpop.xlane.xlu1 %3984  ;;  %v4286_v52 = vpop.permute.xlu2 %4285 }
 0xc8e   : > { %6839 = vrcp.f32 %v3985_v15 }
 0xc8f   : > { %v4031_v56 = vpack.c.bf16 %v4015_v14, %v4015_v14 }
 0xc90   : > { %v4382_v44 = vpop.permute.xlu0 %4381 }
 0xc91   : > { %v4164_v60 = vunpack.c.l.b16 %v4031_v56 }
 0xc93   : > { %v4166_v57 = vpack.c.b16 %v4165_v23, %v4164_v60  ;;  %4911 = vrot.lane.b32.xlu2 %v7299_v29, %s7114_s21 }
 0xc94   : > { %v6840_v25 = vpop.eup %6839 }
 0xc95   : > { %6320 = vmatmul.msk.bf16.vlgmr.msra.gmra.mxu3 %vm574_vm0, %v4166_v57  ;;  %v4019_v34 = vmul.f32 %v6840_v25, %v8955_v8 }
 0xc96   : > { %4374 = vmatpush.bf16.xpose.msra.mxu3 %v4365_v2 }
 0xc98   : > { %v4668_v12 = vpop.permute.xlu0 %4667 }
 0xc9b   : > { %4885 = vrot.lane.b32.xlu2 %v7295_v19, %s7114_s21 }
 0xc9d   : > { %6325 = vmatmul.msk.bf16.vlgmr.msrb.gmra.mxu0 %vm574_vm0, %v4286_v52  ;;  %6327 = vmatmul.msk.bf16.vlgmr.msrb.gmra.mxu2 %vm574_vm0, %v4334_v32 }
 0xca0   : > { %v4693_v9 = vpop.permute.xlu0 %4692 }
 0xca2   : > { %v4358_v3 = vpop.permute.xlu1 %4357 }
 0xca3   : > { %4957 = vrot.lane.b32.xlu2 %v7330_v31, %s7114_s21 }
 0xca5   : > { %6324 = vmatmul.msk.bf16.vlgmr.msrb.gmra.mxu3 %vm574_vm0, %v8881_v30 }
 0xca6   : > { %4680 = vmatpush.bf16.msrb.mxu3 %v4668_v12 }
 0xca8   : > { %v4743_v29 = vpop.permute.xlu0 %4742 }
 0xcaa   : > { %v4384_v47 = vpop.permute.xlu1 %4383 }
 0xcab   : > { %4981 = vrot.lane.b32.xlu2 %v7338_v50, %s7114_s21  ;;  %v4389_v19 = vsel %vm574_vm0, %v4384_v47, 0  ;;  %v4035_v50 = vpack.c.bf16 %v4019_v34, %v4019_v34 }
 0xcac   : > { %4398 = vmatpush.bf16.xpose.msra.mxu0 %v4389_v19 }
 0xcad   : > { %v4214_v10 = vunpack.c.l.b16 %v4035_v50 }
 0xcb0   : > { %v9073_v21 = vpop.permute.xlu0 %4839 }
 0xcb2   : > { %v4406_v49 = vpop.permute.xlu1 %4405 }
 0xcb3   : > { %6329 = vmatmul.msk.bf16.vlgmr.msra.gmra.mxu0 %vm574_vm0, %v4382_v44 }
 0xcb4   : > { %4705 = vmatpush.bf16.msrb.mxu0 %v4693_v9 }
 0xcb5   : > { %6328 = vmatmul.msk.bf16.vlgmr.msra.gmra.mxu3 %vm574_vm0, %v4358_v3 }
 0xcb8   : > { %v4793_v31 = vpop.permute.xlu0 %4792 }
 0xcb9   : > { %4805 = vmatpush.bf16.msra.mxu0 %v4793_v31 }
 0xcba   : > { %v4718_v8 = vpop.permute.xlu1 %4717 }
 0xcc0   : > { %v9138_v25 = vpop.permute.xlu0 %4837 }
 0xcc6   : > { %v3988_v30 = vpop.xlane.xlu2 %3987 }
 0xcc7   : > { %6841 = vrcp.f32 %v3988_v30 }
 0xcc8   : > { %v9144_v50 = vpop.permute.xlu0 %4887 }
 0xccd   : > { %v6842_v48 = vpop.eup %6841 }
 0xcce   : > { %v4020_v46 = vmul.f32 %v6842_v48, %v8987_v58  ;;  %v4408_v55 = vpop.permute.xlu2 %4407 }
 0xccf   : > { %v4413_v7 = vsel %vm574_vm0, %v4408_v55, 0 }
 0xcd0   : > { %v4036_v40 = vpack.c.bf16 %v4020_v46, %v4020_v46 }
 0xcd2   : > { %v4215_v26 = vunpack.c.l.b16 %v4036_v40 }
 0xcd4   : > { %v4216_v5 = vpack.c.b16 %v4215_v26, %v4214_v10 }
 0xcd6   : > { %v4643_v32 = vpop.permute.xlu2 %4642  ;;  %6322 = vmatmul.msk.bf16.vlgmr.msra.gmra.mxu1 %vm574_vm0, %v4216_v5 }
 0xcd7   : > { %4422 = vmatpush.bf16.xpose.msra.mxu1 %v4413_v7  ;;  %4655 = vmatpush.bf16.msra.mxu2 %v4643_v32  ;;  %v9152_v7 = vpop.permute.xlu1 %4863 }
 0xcd8   : > { %v9086_v62 = vpop.f32.mrf.mxu0 }
 0xcd9   : > { %10188 = vst [vmem:[#allocation85_spill] sm:$0xff] %v9086_v62 }
 0xcda   : > { %v9083_v58 = vpop.f32.mrf.mxu2 }
 0xcdb   : > { %4755 = vmatpush.bf16.msrb.mxu2 %v4743_v29  ;;  %10187 = vst [vmem:[#allocation84_spill] sm:$0xff] %v9083_v58 }
 0xcde   : > { %v4768_v54 = vpop.permute.xlu2 %4767 }
 0xcdf   : > { %4780 = vmatpush.bf16.msra.mxu3 %v4768_v54 }
 0xce0   : > { %v9092_v37 = vpop.f32.mrf.mxu0 }
 0xce2   : > { %v9088_v0 = vpop.f32.mrf.mxu2 }
 0xce3   : > { %10189 = vst [vmem:[#allocation86_spill] sm:$0xff] %v9088_v0 }
 0xce6   : > { %6326 = vmatmul.msk.bf16.vlgmr.msrb.gmra.mxu1 %vm574_vm0, %v9048_v6  ;;  %v4818_v18 = vpop.permute.xlu2 %4817 }
 0xce7   : > { %4730 = vmatpush.bf16.msrb.mxu1 %v4718_v8 }
 0xcee   : > { %v9140_v34 = vpop.permute.xlu2 %4861 }
 0xcf6   : > { %6330 = vmatmul.msk.bf16.vlgmr.msra.gmra.mxu1 %vm574_vm0, %v4406_v49  ;;  %v9146_v46 = vpop.permute.xlu2 %4911  ;;  %v9156_v49 = vpop.permute.xlu0 %4959 }
 0xcf7   : > { %4830 = vmatpush.bf16.msra.mxu1 %v4818_v18 }
 0xcf8   : > { %v9094_v24 = vpop.f32.mrf.mxu3 }
 0xcfe   : > { %v9158_v8 = vpop.permute.xlu2 %4885 }
 0xd00   : > { %v9090_v41 = vpop.f32.mrf.mxu2  ;;  %v9100_v13 = vpop.f32.mrf.mxu3 }
 0xd01   : > { %10192 = vst [vmem:[#allocation89_spill] sm:$0xff] %v9100_v13 }
 0xd02   : > { %v9132_v19 = vpop.f32.mrf.mxu1 }
 0xd03   : > { %10196 = vst [vmem:[#allocation93_spill] sm:$0xff] %v9132_v19 }
 0xd08   : > { %v9096_v1 = vpop.f32.mrf.mxu2 }
 0xd09   : > { %10190 = vst [vmem:[#allocation87_spill] sm:$0xff] %v9096_v1 }
 0xd0a   : > { %v9098_v51 = vpop.f32.mrf.mxu0  ;;  %v9134_v31 = vpop.f32.mrf.mxu1 }
 0xd0b   : > { %10191 = vst [vmem:[#allocation88_spill] sm:$0xff] %v9098_v51 }
 0xd0c   : > { %10197 = vst [vmem:[#allocation94_spill] sm:$0xff] %v9134_v31 }
 0xd10   : > { %v4256_v6 = vpop.f32.mrf.mxu2 }
 0xd11   : > { %v9102_v43 = vmul.f32 0.25, %v4256_v6 }
 0xd12   : > { %v9104_v11 = vpop.f32.mrf.mxu0 }
 0xd13   : > { %10193 = vst [vmem:[#allocation90_spill] sm:$0xff] %v9104_v11  ;;  %v4445_v42 = vsel %vm574_vm0, %v9102_v43, -inf }
 0xd14   : > { %4446 = vmax.xlane.f32.xlu2 %v4445_v42 }
 0xd18   : > { %v9108_v45 = vpop.f32.mrf.mxu3  ;;  %v4258_v56 = vpop.f32.mrf.mxu2 }
 0xd19   : > { %10194 = vst [vmem:[#allocation91_spill] sm:$0xff] %v9108_v45  ;;  %v9116_v23 = vmul.f32 0.25, %v4258_v56 }
 0xd1a   : > { %v4304_v61 = vpop.f32.mrf.mxu0 }
 0xd1b   : > { %v9110_v36 = vmul.f32 0.25, %v4304_v61  ;;  %v4448_v2 = vsel %vm574_vm0, %v9116_v23, -inf }
 0xd1d   : > { %v4457_v14 = vsel %vm574_vm0, %v9110_v36, -inf }
 0xd1e   : > { %4458 = vmax.xlane.f32.xlu0 %v4457_v14 }
 0xd20   : > { %v9114_v44 = vpop.f32.mrf.mxu3  ;;  %v4352_v3 = vpop.f32.mrf.mxu2 }
 0xd21   : > { %10195 = vst [vmem:[#allocation92_spill] sm:$0xff] %v9114_v44  ;;  %v9128_v29 = vmul.f32 0.25, %v4352_v3  ;;  %v9176_v3 = vpop.permute.xlu2 %4957 }
 0xd22   : > { %v4306_v60 = vpop.f32.mrf.mxu0 }
 0xd23   : > { %v9118_v57 = vmul.f32 0.25, %v4306_v60  ;;  %v4469_v47 = vsel %vm574_vm0, %v9128_v29, -inf }
 0xd25   : > { %v4460_v12 = vsel %vm574_vm0, %v9118_v57, -inf }
 0xd26   : > { %4449 = vmax.xlane.f32.xlu0 %v4448_v2  ;;  %4461 = vmax.xlane.f32.xlu1 %v4460_v12  ;;  %v9170_v2 = vpop.permute.xlu1 %4935 }
 0xd28   : > { %v4280_v15 = vpop.f32.mrf.mxu3 }
 0xd29   : > { %v9124_v52 = vmul.f32 0.25, %v4280_v15  ;;  %v9196_v11 = vpop.permute.xlu2 %4981 }
 0xd2b   : > { %v4451_v9 = vsel %vm574_vm0, %v9124_v52, -inf }
 0xd2e   : > { %4452 = vmax.xlane.f32.xlu1 %v4451_v9  ;;  %v9174_v9 = vpop.permute.xlu0 %4933 }
 0xd30   : > { %v4282_v40 = vpop.f32.mrf.mxu3  ;;  %v4400_v26 = vpop.f32.mrf.mxu0 }
 0xd31   : > { %v9154_v32 = vmul.f32 0.25, %v4400_v26  ;;  %v9166_v56 = vmul.f32 0.25, %v4282_v40 }
 0xd33   : > { %v4481_v61 = vsel %vm574_vm0, %v9154_v32, -inf }
 0xd36   : > { %4470 = vmax.xlane.f32.xlu1 %v4469_v47  ;;  %v4454_v47 = vsel %vm574_vm0, %v9166_v56, -inf }
 0xd38   : > { %v4376_v6 = vpop.f32.mrf.mxu3  ;;  %v4402_v14 = vpop.f32.mrf.mxu0 }
 0xd39   : > { %v9168_v60 = vmul.f32 0.25, %v4402_v14  ;;  %v9192_v14 = vpop.permute.xlu0 %5007 }
 0xd40   : > { %v4378_v26 = vpop.f32.mrf.mxu3 }
 0xd53   : > { %v9136_v30 = vpop.f32.mrf.mxu1 }
 0xd54   : > { %10198 = vst [vmem:[#allocation95_spill] sm:$0xff] %v9136_v30 }
 0xd5b   : > { %v9142_v48 = vpop.f32.mrf.mxu1 }
 0xd5c   : > { %10199 = vst [vmem:[#allocation96_spill] sm:$0xff] %v9142_v48 }
 0xd63   : > { %v4328_v55 = vpop.f32.mrf.mxu1 }
 0xd64   : > { %v9148_v10 = vmul.f32 0.25, %v4328_v55  ;;  %v4484_v55 = vsel %vm574_vm0, %v9168_v60, -inf }
 0xd66   : > { %v4463_v5 = vsel %vm574_vm0, %v9148_v10, -inf }
 0xd67   : > { %4464 = vmax.xlane.f32.xlu2 %v4463_v5  ;;  %v9184_v5 = vmul.f32 0.25, %v4376_v6 }
 0xd6b   : > { %v4330_v54 = vpop.f32.mrf.mxu1 }
 0xd6c   : > { %v9160_v18 = vmul.f32 0.25, %v4330_v54  ;;  %v9186_v54 = vmul.f32 0.25, %v4378_v26 }
 0xd6e   : > { %v4466_v42 = vsel %vm574_vm0, %v9160_v18, -inf }
 0xd6f   : > { %4467 = vmax.xlane.f32.xlu0 %v4466_v42  ;;  %4482 = vmax.xlane.f32.xlu2 %v4481_v61  ;;  %v9188_v42 = vpop.permute.xlu1 %4909  ;;  %v4475_v61 = vsel %vm574_vm0, %v9184_v5, -inf }
 0xd73   : > { %v4424_v12 = vpop.f32.mrf.mxu1 }
 0xd74   : > { %v9172_v15 = vmul.f32 0.25, %v4424_v12  ;;  %v4478_v12 = vsel %vm574_vm0, %v9186_v54, -inf }
 0xd76   : > { %v4487_v40 = vsel %vm574_vm0, %v9172_v15, -inf }
 0xd77   : > { %4455 = vmax.xlane.f32.xlu2 %v4454_v47  ;;  %4485 = vmax.xlane.f32.xlu0 %v4484_v55  ;;  %v9198_v47 = vpop.permute.xlu1 %4983  ;;  %v9200_v55 = vpop.permute.xlu0 %5242 }
 0xd78   : > { %4488 = vmax.xlane.f32.xlu1 %v4487_v40 }
 0xd7f   : > { %4476 = vmax.xlane.f32.xlu0 %v4475_v61  ;;  %v9205_v48 = vpop.permute.xlu1 %5005 }
 0xd80   : > { %4479 = vmax.xlane.f32.xlu1 %v4478_v12 }
 0xd87   : > { %v4447_v6 = vpop.xlane.xlu2 %4446 }
 0xd88   : > { %v4493_v40 = vsub.f32 %v9102_v43, %v4447_v6 }
 0xd8a   : > { %v4509_v26 = vmul.f32 1.442695, %v4493_v40 }
 0xd8c   : > { %6843 = vpow2.f32 %v4509_v26 }
 0xd8f   : > { %5267 = vrot.lane.b32.xlu2 %v7360_v17, %s7114_s21 }
 0xd91   : > { %v4459_v61 = vpop.xlane.xlu0 %4458 }
 0xd92   : > { %v4497_v45 = vsub.f32 %v9110_v36, %v4459_v61  ;;  %v9208_v51 = vpop.eup %6843 }
 0xd93   : > { %v4541_v31 = vsel %vm574_vm0, %v9208_v51, 0.0 }
 0xd94   : > { %v4517_v12 = vmul.f32 1.442695, %v4497_v45  ;;  %4542 = vadd.xlane.f32.xlu0 %v4541_v31 }
 0xd96   : > { %6845 = vpow2.f32 %v4517_v12 }
 0xd99   : > { %v4450_v1 = vpop.xlane.xlu0 %4449  ;;  %v4462_v43 = vpop.xlane.xlu1 %4461 }
 0xd9a   : > { %v4494_v6 = vsub.f32 %v9116_v23, %v4450_v1  ;;  %v4354_v1 = vpop.f32.mrf.mxu2 }
 0xd9b   : > { %v9222_v23 = vmul.f32 0.25, %v4354_v1 }
 0xd9c   : > { %v9213_v40 = vpop.eup %6845  ;;  %v4511_v17 = vmul.f32 1.442695, %v4494_v6 }
 0xd9d   : > { %v4553_v26 = vsel %vm574_vm0, %v9213_v40, 0.0  ;;  %v4472_v19 = vsel %vm574_vm0, %v9222_v23, -inf }
 0xd9e   : > { %6847 = vpow2.f32 %v4511_v17  ;;  %4554 = vadd.xlane.f32.xlu1 %v4553_v26  ;;  %v4498_v26 = vsub.f32 %v9118_v57, %v4462_v43 }
 0xda0   : > { %v4519_v0 = vmul.f32 1.442695, %v4498_v26 }
 0xda1   : > { %v4453_v36 = vpop.xlane.xlu1 %4452 }
 0xda4   : > { %v9217_v61 = vpop.eup %6847 }
 0xda5   : > { %v4544_v45 = vsel %vm574_vm0, %v9217_v61, 0.0 }
 0xda6   : > { %4545 = vadd.xlane.f32.xlu1 %v4544_v45  ;;  %v4426_v45 = vpop.f32.mrf.mxu1 }
 0xda9   : > { %v4471_v31 = vpop.xlane.xlu1 %4470 }
 0xdaa   : > { %v4501_v12 = vsub.f32 %v9128_v29, %v4471_v31  ;;  %v9231_v29 = vmul.f32 0.25, %v4426_v45 }
 0xdac   : > { %v4525_v62 = vmul.f32 1.442695, %v4501_v12  ;;  %v4490_v31 = vsel %vm574_vm0, %v9231_v29, -inf }
 0xdae   : > { %6849 = vpow2.f32 %v4525_v62  ;;  %v4495_v62 = vsub.f32 %v9124_v52, %v4453_v36 }
 0xdaf   : > { %6851 = vpow2.f32 %v4519_v0 }
 0xdb0   : > { %v4513_v12 = vmul.f32 1.442695, %v4495_v62 }
 0xdb2   : > { %6853 = vpow2.f32 %v4513_v12 }
 0xdb4   : > { %v9224_v6 = vpop.eup %6849 }
 0xdb5   : > { %v4565_v17 = vsel %vm574_vm0, %v9224_v6, 0.0  ;;  %v9236_v1 = vpop.eup %6851 }
 0xdb6   : > { %4566 = vadd.xlane.f32.xlu1 %v4565_v17  ;;  %v4556_v57 = vsel %vm574_vm0, %v9236_v1, 0.0 }
 0xdb8   : > { %4473 = vmax.xlane.f32.xlu2 %v4472_v19  ;;  %v9240_v43 = vpop.eup %6853 }
 0xdb9   : > { %v4547_v19 = vsel %vm574_vm0, %v9240_v43, 0.0 }
 0xdc0   : > { %4491 = vmax.xlane.f32.xlu2 %v4490_v31 }
 0xdc8   : > { %4557 = vadd.xlane.f32.xlu2 %v4556_v57 }
 0xdd0   : > { %4548 = vadd.xlane.f32.xlu2 %v4547_v19 }
 0xdda   : > { %v4465_v0 = vpop.xlane.xlu2 %4464 }
 0xddb   : > { %v4499_v52 = vsub.f32 %v9148_v10, %v4465_v0 }
 0xddd   : > { %v4521_v36 = vmul.f32 1.442695, %v4499_v52 }
 0xddf   : > { %6855 = vpow2.f32 %v4521_v36 }
 0xde2   : > { %v4468_v17 = vpop.xlane.xlu0 %4467  ;;  %v4483_v26 = vpop.xlane.xlu2 %4482 }
 0xde3   : > { %v4500_v45 = vsub.f32 %v9160_v18, %v4468_v17  ;;  %v4505_v62 = vsub.f32 %v9154_v32, %v4483_v26 }
 0xde5   : > { %v9247_v31 = vpop.eup %6855  ;;  %v4523_v12 = vmul.f32 1.442695, %v4500_v45  ;;  %v4533_v57 = vmul.f32 1.442695, %v4505_v62 }
 0xde6   : > { %v4559_v13 = vsel %vm574_vm0, %v9247_v31, 0.0 }
 0xde7   : > { %6857 = vpow2.f32 %v4523_v12  ;;  %4560 = vadd.xlane.f32.xlu0 %v4559_v13 }
 0xde8   : > { %6859 = vpow2.f32 %v4533_v57 }
 0xdea   : > { %v4456_v19 = vpop.xlane.xlu2 %4455  ;;  %v4486_v10 = vpop.xlane.xlu0 %4485 }
 0xdeb   : > { %v4496_v0 = vsub.f32 %v9166_v56, %v4456_v19  ;;  %v4506_v52 = vsub.f32 %v9168_v60, %v4486_v10  ;;  %v4489_v36 = vpop.xlane.xlu1 %4488 }
 0xdec   : > { %v4507_v18 = vsub.f32 %v9172_v15, %v4489_v36 }
 0xded   : > { %v9254_v32 = vpop.eup %6857  ;;  %v4515_v17 = vmul.f32 1.442695, %v4496_v0  ;;  %v4535_v26 = vmul.f32 1.442695, %v4506_v52 }
 0xdee   : > { %v9256_v45 = vpop.eup %6859  ;;  %v4537_v62 = vmul.f32 1.442695, %v4507_v18  ;;  %v4562_v13 = vsel %vm574_vm0, %v9254_v32, 0.0 }
 0xdef   : > { %6861 = vpow2.f32 %v4515_v17  ;;  %v4577_v12 = vsel %vm574_vm0, %v9256_v45, 0.0  ;;  %4563 = vadd.xlane.f32.xlu1 %v4562_v13  ;;  %v10200_v17 = vld [vmem:[#allocation27_spill] sm:$0xff]  ;;  %v10201_v13 = vld [vmem:[#allocation29_spill] sm:$0xff] }
 0xdf0   : > { %6863 = vpow2.f32 %v4535_v26  ;;  %4578 = vadd.xlane.f32.xlu0 %v4577_v12 }
 0xdf1   : > { %6865 = vpow2.f32 %v4537_v62 }
 0xdf2   : > { %v4477_v0 = vpop.xlane.xlu0 %4476  ;;  %v9282_v58 = vpop.permute.xlu2 %5267 }
 0xdf3   : > { %v4480_v52 = vpop.xlane.xlu1 %4479 }
 0xdf5   : > { %v9262_v56 = vpop.eup %6861 }
 0xdf6   : > { %v9264_v60 = vpop.eup %6863  ;;  %v4550_v15 = vsel %vm574_vm0, %v9262_v56, 0.0 }
 0xdf7   : > { %v9268_v57 = vpop.eup %6865  ;;  %v4580_v19 = vsel %vm574_vm0, %v9264_v60, 0.0 }
 0xdf8   : > { %4551 = vadd.xlane.f32.xlu0 %v4550_v15  ;;  %4581 = vadd.xlane.f32.xlu1 %v4580_v19  ;;  %v4583_v10 = vsel %vm574_vm0, %v9268_v57, 0.0 }
 0xdf9   : > { %4584 = vadd.xlane.f32.xlu2 %v4583_v10 }
 0xe07   : > { %v4543_v36 = vpop.xlane.xlu0 %4542 }
 0xe08   : > { %6867 = vrcp.f32 %v4543_v36  ;;  %v10202_v36 = vld [vmem:[#allocation35_spill] sm:$0xff] }
 0xe0c   : > { %5367 = vrot.lane.b32.xlu0 %v7524_v63, %s7114_s21 }
 0xe0e   : > { %v6868_v62 = vpop.eup %6867 }
 0xe0f   : > { %v4605_v12 = vmul.f32 %v6868_v62, %v9208_v51 }
 0xe11   : > { %v4555_v18 = vpop.xlane.xlu1 %4554  ;;  %v4621_v19 = vpack.c.bf16 %v4605_v12, %v4605_v12 }
 0xe13   : > { %v4639_v30 = vunpack.c.l.b16 %v4621_v19 }
 0xe14   : > { %5453 = vrot.lane.b32.xlu0 %v10200_v17, %s7114_s21 }
 0xe19   : > { %v4546_v26 = vpop.xlane.xlu1 %4545 }
 0xe1a   : > { %6869 = vrcp.f32 %v4546_v26  ;;  %v4845_v26 = vsel %vm574_vm0, %v9073_v21, 0 }
 0xe1c   : > { %5457 = vrot.lane.b32.xlu0 %v10201_v13, %s7114_s21  ;;  %v4503_v13 = vsub.f32 %v9184_v5, %v4477_v0 }
 0xe20   : > { %v6870_v15 = vpop.eup %6869 }
 0xe21   : > { %v4606_v10 = vmul.f32 %v6870_v15, %v9217_v61  ;;  %v10203_v61 = vld [vmem:[#allocation38_spill] sm:$0xff]  ;;  %v4529_v15 = vmul.f32 1.442695, %v4503_v13 }
 0xe23   : > { %v4622_v63 = vpack.c.bf16 %v4606_v10, %v4606_v10  ;;  %v4504_v10 = vsub.f32 %v9186_v54, %v4480_v52 }
 0xe24   : > { %5461 = vrot.lane.b32.xlu0 %v10202_v36, %s7114_s21 }
 0xe25   : > { %v4640_v17 = vunpack.c.l.b16 %v4622_v63  ;;  %v4531_v5 = vmul.f32 1.442695, %v4504_v10  ;;  %v4893_v10 = vsel %vm574_vm0, %v9144_v50, 0 }
 0xe27   : > { %v4641_v44 = vpack.c.b16 %v4640_v17, %v4639_v30  ;;  %v10204_v30 = vld [vmem:[#allocation33_spill] sm:$0xff] }
 0xe29   : > { %6331 = vmatmul.msk.bf16.vlgmr.msra.gmra.mxu2 %vm574_vm0, %v4641_v44 }
 0xe2a   : > { %4854 = vmatpush.bf16.xpose.msra.mxu2 %v4845_v26  ;;  %v10205_v26 = vld [vmem:[#allocation41_spill] sm:$0xff] }
 0xe2b   : > { %v4474_v51 = vpop.xlane.xlu2 %4473 }
 0xe2c   : > { %v4502_v62 = vsub.f32 %v9222_v23, %v4474_v51  ;;  %5467 = vrot.lane.b32.xlu0 %v10203_v61, %s7114_s21 }
 0xe2e   : > { %v4527_v12 = vmul.f32 1.442695, %v4502_v62 }
 0xe30   : > { %6871 = vpow2.f32 %v4527_v12  ;;  %v10206_v12 = vld [vmem:[#allocation43_spill] sm:$0xff] }
 0xe31   : > { %6873 = vpow2.f32 %v4529_v15 }
 0xe32   : > { %6875 = vrcp.f32 %v4555_v18 }
 0xe33   : > { %v4492_v19 = vpop.xlane.xlu2 %4491 }
 0xe34   : > { %5473 = vrot.lane.b32.xlu0 %v10204_v30, %s7114_s21  ;;  %v4508_v21 = vsub.f32 %v9231_v29, %v4492_v19 }
 0xe36   : > { %v9296_v44 = vpop.eup %6871  ;;  %v4539_v23 = vmul.f32 1.442695, %v4508_v21 }
 0xe37   : > { %v4568_v63 = vsel %vm574_vm0, %v9296_v44, 0.0  ;;  %v9301_v0 = vpop.eup %6873 }
 0xe38   : > { %6877 = vpow2.f32 %v4539_v23  ;;  %4569 = vadd.xlane.f32.xlu1 %v4568_v63  ;;  %v6876_v17 = vpop.eup %6875  ;;  %v4571_v52 = vsel %vm574_vm0, %v9301_v0, 0.0  ;;  %v10208_v23 = vld [vmem:[#allocation55_spill] sm:$0xff]  ;;  %v9328_v63 = vpop.xlane.xlu1 %4566 }
 0xe39   : > { %v4609_v54 = vmul.f32 %v6876_v17, %v9213_v40 }
 0xe3b   : > { %v4558_v36 = vpop.xlane.xlu2 %4557  ;;  %v4625_v62 = vpack.c.bf16 %v4609_v54, %v4609_v54 }
 0xe3c   : > { %5479 = vrot.lane.b32.xlu0 %v10205_v26, %s7114_s21  ;;  %6879 = vrcp.f32 %v4558_v36  ;;  %v10209_v36 = vld [vmem:[#allocation46_spill] sm:$0xff] }
 0xe3d   : > { %6881 = vpow2.f32 %v4531_v5  ;;  %v4689_v19 = vunpack.c.l.b16 %v4625_v62 }
 0xe3e   : > { %v9305_v29 = vpop.eup %6877 }
 0xe3f   : > { %v4586_v18 = vsel %vm574_vm0, %v9305_v29, 0.0 }
 0xe40   : > { %4572 = vadd.xlane.f32.xlu1 %v4571_v52  ;;  %4587 = vadd.xlane.f32.xlu2 %v4586_v18 }
 0xe42   : > { %v6880_v51 = vpop.eup %6879 }
 0xe43   : > { %v4610_v61 = vmul.f32 %v6880_v51, %v9236_v1  ;;  %v9313_v13 = vpop.eup %6881  ;;  %v10207_v1 = vld [vmem:[#allocation49_spill] sm:$0xff]  ;;  %v4549_v26 = vpop.xlane.xlu2 %4548 }
 0xe44   : > { %5517 = vrot.lane.b32.xlu0 %v10206_v12, %s7113_s19  ;;  %v4574_v30 = vsel %vm574_vm0, %v9313_v13, 0.0 }
 0xe45   : > { %v4626_v15 = vpack.c.bf16 %v4610_v61, %v4610_v61 }
 0xe47   : > { %v4690_v40 = vunpack.c.l.b16 %v4626_v15 }
 0xe48   : > { %4575 = vadd.xlane.f32.xlu2 %v4574_v30 }
 0xe49   : > { %v4691_v21 = vpack.c.b16 %v4690_v40, %v4689_v19  ;;  %v10212_v19 = vld [vmem:[#allocation58_spill] sm:$0xff] }
 0xe4b   : > { %6333 = vmatmul.msk.bf16.vlgmr.msrb.gmra.mxu0 %vm574_vm0, %v4691_v21 }
 0xe4c   : > { %5523 = vrot.lane.b32.xlu0 %v10207_v1, %s7113_s19  ;;  %4902 = vmatpush.bf16.xpose.msrb.mxu0 %v4893_v10  ;;  %v10213_v10 = vld [vmem:[#allocation30_spill] sm:$0xff] }
 0xe54   : > { %5529 = vrot.lane.b32.xlu0 %v10208_v23, %s7113_s19  ;;  %v4917_v23 = vsel %vm574_vm0, %v9146_v46, 0 }
 0xe59   : > { %5317 = vrot.lane.b32.xlu1 %v7316_v4, %s7114_s21  ;;  %v10210_v4 = vld [vmem:[#allocation52_spill] sm:$0xff] }
 0xe5a   : > { %v4561_v5 = vpop.xlane.xlu0 %4560 }
 0xe5b   : > { %6883 = vrcp.f32 %v4561_v5 }
 0xe5c   : > { %5535 = vrot.lane.b32.xlu0 %v10209_v36, %s7113_s19 }
 0xe60   : > { %5292 = vrot.lane.b32.xlu2 %v7303_v39, %s7114_s21  ;;  %v10211_v39 = vld [vmem:[#allocation37_spill] sm:$0xff] }
 0xe61   : > { %5392 = vrot.lane.b32.xlu1 %v7536_v33, %s7114_s21  ;;  %v6884_v17 = vpop.eup %6883 }
 0xe62   : > { %v4564_v50 = vpop.xlane.xlu1 %4563  ;;  %v4611_v52 = vmul.f32 %v6884_v17, %v9247_v31 }
 0xe63   : > { %v4579_v54 = vpop.xlane.xlu0 %4578  ;;  %6885 = vrcp.f32 %v4564_v50 }
 0xe64   : > { %5541 = vrot.lane.b32.xlu0 %v10210_v4, %s7113_s19  ;;  %6887 = vrcp.f32 %v4549_v26  ;;  %v4627_v33 = vpack.c.bf16 %v4611_v52, %v4611_v52  ;;  %v10214_v4 = vld [vmem:[#allocation28_spill] sm:$0xff] }
 0xe65   : > { %6889 = vrcp.f32 %v4579_v54 }
 0xe66   : > { %v4714_v40 = vunpack.c.l.b16 %v4627_v33 }
 0xe68   : > { %5342 = vrot.lane.b32.xlu2 %v7327_v28, %s7114_s21 }
 0xe69   : > { %v6886_v18 = vpop.eup %6885  ;;  %5463 = vrot.lane.b32.xlu1 %v10211_v39, %s7114_s21  ;;  %v4869_v39 = vsel %vm574_vm0, %v9152_v7, 0  ;;  %v10217_v7 = vld [vmem:[#allocation40_spill] sm:$0xff] }
 0xe6a   : > { %v4612_v51 = vmul.f32 %v6886_v18, %v9254_v32  ;;  %v6888_v12 = vpop.eup %6887 }
 0xe6b   : > { %v4552_v62 = vpop.xlane.xlu0 %4551  ;;  %v4582_v61 = vpop.xlane.xlu1 %4581  ;;  %v4607_v28 = vmul.f32 %v6888_v12, %v9240_v43  ;;  %v10220_v12 = vld [vmem:[#allocation32_spill] sm:$0xff] }
 0xe6c   : > { %v4628_v15 = vpack.c.bf16 %v4612_v51, %v4612_v51  ;;  %6891 = vrcp.f32 %v4552_v62  ;;  %5547 = vrot.lane.b32.xlu0 %v10212_v19, %s7113_s19  ;;  %v6890_v31 = vpop.eup %6889  ;;  %v10216_v51 = vld [vmem:[#allocation31_spill] sm:$0xff] }
 0xe6d   : > { %6893 = vrcp.f32 %v4582_v61  ;;  %v4617_v32 = vmul.f32 %v6890_v31, %v9256_v45  ;;  %v4623_v5 = vpack.c.bf16 %v4607_v28, %v4607_v28  ;;  %v10222_v19 = vld [vmem:[#allocation39_spill] sm:$0xff]  ;;  %v10223_v31 = vld [vmem:[#allocation56_spill] sm:$0xff] }
 0xe6e   : > { %v4715_v30 = vunpack.c.l.b16 %v4628_v15  ;;  %6895 = vrcp.f32 %v9328_v63  ;;  %v10226_v28 = vld [vmem:[#allocation47_spill] sm:$0xff] }
 0xe6f   : > { %v4664_v17 = vunpack.c.l.b16 %v4623_v5  ;;  %v10228_v5 = vld [vmem:[#allocation50_spill] sm:$0xff] }
 0xe70   : > { %v4716_v21 = vpack.c.b16 %v4715_v30, %v4714_v40  ;;  %5417 = vrot.lane.b32.xlu2 %v7554_v27, %s7114_s21  ;;  %v4633_v27 = vpack.c.bf16 %v4617_v32, %v4617_v32  ;;  %v10225_v40 = vld [vmem:[#allocation51_spill] sm:$0xff]  ;;  %v4585_v32 = vpop.xlane.xlu2 %4584 }
 0xe71   : > { %5469 = vrot.lane.b32.xlu1 %v10213_v10, %s7114_s21 }
 0xe72   : > { %v6892_v1 = vpop.eup %6891  ;;  %6334 = vmatmul.msk.bf16.vlgmr.msrb.gmra.mxu1 %vm574_vm0, %v4716_v21  ;;  %v4789_v46 = vunpack.c.l.b16 %v4633_v27  ;;  %v10227_v21 = vld [vmem:[#allocation54_spill] sm:$0xff] }
 0xe73   : > { %v4608_v36 = vmul.f32 %v6892_v1, %v9262_v56  ;;  %4926 = vmatpush.bf16.xpose.msrb.mxu1 %v4917_v23  ;;  %v6894_v43 = vpop.eup %6893  ;;  %v10215_v56 = vld [vmem:[#allocation34_spill] sm:$0xff] }
 0xe74   : > { %5585 = vrot.lane.b32.xlu0 %v8528_v22, %s7112_s18  ;;  %v4618_v45 = vmul.f32 %v6894_v43, %v9264_v60  ;;  %v4989_v60 = vsel %vm574_vm0, %v9198_v47, 0  ;;  %v10219_v47 = vld [vmem:[#allocation44_spill] sm:$0xff]  ;;  %v6896_v10 = vpop.eup %6895 }
 0xe75   : > { %v4624_v50 = vpack.c.bf16 %v4608_v36, %v4608_v36  ;;  %v4613_v23 = vmul.f32 %v6896_v10, %v9224_v6 }
 0xe76   : > { %v4634_v54 = vpack.c.bf16 %v4618_v45, %v4618_v45 }
 0xe77   : > { %v4665_v26 = vunpack.c.l.b16 %v4624_v50  ;;  %v4629_v36 = vpack.c.bf16 %v4613_v23, %v4613_v23  ;;  %v10235_v23 = vld [vmem:[#allocation60_spill] sm:$0xff] }
 0xe78   : > { %5455 = vrot.lane.b32.xlu2 %v10214_v4, %s7114_s21  ;;  %v4790_v18 = vunpack.c.l.b16 %v4634_v54 }
 0xe79   : > { %v4666_v52 = vpack.c.b16 %v4665_v26, %v4664_v17  ;;  %5475 = vrot.lane.b32.xlu1 %v10215_v56, %s7114_s21  ;;  %v10229_v26 = vld [vmem:[#allocation11_spill] sm:$0xff]  ;;  %v4739_v4 = vunpack.c.l.b16 %v4629_v36  ;;  %v10231_v56 = vld [vmem:[#allocation64_spill] sm:$0xff]  ;;  %v10237_v36 = vld [vmem:[#allocation62_spill] sm:$0xff] }
 0xe7a   : > { %v4791_v22 = vpack.c.b16 %v4790_v18, %v4789_v46 }
 0xe7b   : > { %6332 = vmatmul.msk.bf16.vlgmr.msrb.gmra.mxu3 %vm574_vm0, %v4666_v52 }
 0xe7c   : > { %4878 = vmatpush.bf16.xpose.msrb.mxu3 %v4869_v39  ;;  %5591 = vrot.lane.b32.xlu0 %v8505_v16, %s7112_s18  ;;  %v10218_v16 = vld [vmem:[#allocation36_spill] sm:$0xff] }
 0xe7d   : > { %6337 = vmatmul.msk.bf16.vlgmr.msra.gmra.mxu0 %vm574_vm0, %v4791_v22  ;;  %v4941_v22 = vsel %vm574_vm0, %v9170_v2, 0  ;;  %v10233_v2 = vld [vmem:[#allocation66_spill] sm:$0xff] }
 0xe7e   : > { %4998 = vmatpush.bf16.xpose.msra.mxu0 %v4989_v60  ;;  %v9371_v33 = vpop.permute.xlu0 %5367 }
 0xe80   : > { %5459 = vrot.lane.b32.xlu2 %v10216_v51, %s7114_s21 }
 0xe81   : > { %5481 = vrot.lane.b32.xlu1 %v10217_v7, %s7114_s21 }
 0xe84   : > { %5597 = vrot.lane.b32.xlu0 %v8485_v59, %s7112_s18  ;;  %v10221_v59 = vld [vmem:[#allocation48_spill] sm:$0xff] }
 0xe86   : > { %v5454_v62 = vpop.permute.xlu0 %5453 }
 0xe87   : > { %v5885_v54 = vsel %vm574_vm0, %v10229_v26, %v5454_v62 }
 0xe88   : > { %5465 = vrot.lane.b32.xlu2 %v10218_v16, %s7114_s21 }
 0xe89   : > { %5519 = vrot.lane.b32.xlu1 %v10219_v47, %s7113_s19 }
 0xe8c   : > { %5603 = vrot.lane.b32.xlu0 %v8534_v38, %s7112_s18 }
 0xe8d   : > { %6341 = vmatmul.msk.bf16.vlgmr.msrb.gmra.mxu0 %vm574_vm0, %v9158_v8  ;;  %v10224_v8 = vld [vmem:[#allocation42_spill] sm:$0xff] }
 0xe8e   : > { %v9387_v61 = vpop.permute.xlu0 %5457 }
 0xe90   : > { %5471 = vrot.lane.b32.xlu2 %v10220_v12, %s7114_s21 }
 0xe91   : > { %5525 = vrot.lane.b32.xlu1 %v10221_v59, %s7113_s19  ;;  %v10232_v59 = vld [vmem:[#allocation53_spill] sm:$0xff] }
 0xe96   : > { %v9393_v15 = vpop.permute.xlu0 %5461 }
 0xe98   : > { %5477 = vrot.lane.b32.xlu2 %v10222_v19, %s7114_s21 }
 0xe99   : > { %5531 = vrot.lane.b32.xlu1 %v10223_v31, %s7113_s19 }
 0xe9d   : > { %6345 = vmatmul.msk.bf16.vlgmr.msra.gmra.mxu0 %vm574_vm0, %v9196_v11 }
 0xe9e   : > { %v9401_v38 = vpop.permute.xlu0 %5467 }
 0xea0   : > { %5483 = vrot.lane.b32.xlu2 %v10224_v8, %s7114_s21 }
 0xea1   : > { %5537 = vrot.lane.b32.xlu1 %v10225_v40, %s7113_s19 }
 0xea6   : > { %v9408_v30 = vpop.permute.xlu0 %5473 }
 0xea8   : > { %5521 = vrot.lane.b32.xlu2 %v10226_v28, %s7113_s19 }
 0xea9   : > { %5543 = vrot.lane.b32.xlu1 %v10227_v21, %s7113_s19 }
 0xeab   : > { %v4570_v11 = vpop.xlane.xlu1 %4569 }
 0xeac   : > { %6897 = vrcp.f32 %v4570_v11  ;;  %v10234_v11 = vld [vmem:[#allocation57_spill] sm:$0xff] }
 0xead   : > { %6899 = vrcp.f32 %v4585_v32 }
 0xeae   : > { %v9414_v1 = vpop.permute.xlu0 %5479 }
 0xeb0   : > { %5527 = vrot.lane.b32.xlu2 %v10228_v5, %s7113_s19 }
 0xeb1   : > { %5581 = vrot.lane.b32.xlu1 %v8479_v20, %s7112_s18 }
 0xeb2   : > { %v6898_v63 = vpop.eup %6897 }
 0xeb3   : > { %v4614_v43 = vmul.f32 %v6898_v63, %v9296_v44  ;;  %v4588_v27 = vpop.xlane.xlu2 %4587  ;;  %v4573_v50 = vpop.xlane.xlu1 %4572  ;;  %v10230_v44 = vld [vmem:[#allocation45_spill] sm:$0xff]  ;;  %v10236_v63 = vld [vmem:[#allocation59_spill] sm:$0xff] }
 0xeb4   : > { %v6900_v45 = vpop.eup %6899  ;;  %6901 = vrcp.f32 %v4588_v27 }
 0xeb5   : > { %v4630_v17 = vpack.c.bf16 %v4614_v43, %v4614_v43  ;;  %6903 = vrcp.f32 %v4573_v50  ;;  %v4619_v46 = vmul.f32 %v6900_v45, %v9268_v57 }
 0xeb6   : > { %v5518_v6 = vpop.permute.xlu0 %5517 }
 0xeb7   : > { %v4740_v52 = vunpack.c.l.b16 %v4630_v17  ;;  %v9426_v20 = vsel %vm5901_vm1, %v5885_v54, %v5518_v6  ;;  %v4635_v60 = vpack.c.bf16 %v4619_v46, %v4619_v46  ;;  %v10240_v54 = vld [vmem:[#allocation15_spill] sm:$0xff] }
 0xeb8   : > { %5533 = vrot.lane.b32.xlu2 %v10230_v44, %s7113_s19 }
 0xeb9   : > { %v4741_v18 = vpack.c.b16 %v4740_v52, %v4739_v4  ;;  %5587 = vrot.lane.b32.xlu1 %v10231_v56, %s7112_s18  ;;  %v4814_v16 = vunpack.c.l.b16 %v4635_v60 }
 0xeba   : > { %v6902_v39 = vpop.eup %6901 }
 0xebb   : > { %v4620_v51 = vmul.f32 %v6902_v39, %v9305_v29  ;;  %v4576_v7 = vpop.xlane.xlu2 %4575  ;;  %6335 = vmatmul.msk.bf16.vlgmr.msrb.gmra.mxu2 %vm574_vm0, %v4741_v18  ;;  %v6904_v57 = vpop.eup %6903  ;;  %v5013_v29 = vsel %vm574_vm0, %v9192_v14, 0  ;;  %v4965_v14 = vsel %vm574_vm0, %v9156_v49, 0 }
 0xebc   : > { %6905 = vrcp.f32 %v4576_v7  ;;  %4950 = vmatpush.bf16.xpose.msrb.mxu2 %v4941_v22  ;;  %v4615_v12 = vmul.f32 %v6904_v57, %v9301_v0 }
 0xebd   : > { %v4636_v62 = vpack.c.bf16 %v4620_v51, %v4620_v51  ;;  %v10243_v51 = vld [vmem:[#allocation16_spill] sm:$0xff] }
 0xebe   : > { %v4631_v8 = vpack.c.bf16 %v4615_v12, %v4615_v12  ;;  %v5524_v27 = vpop.permute.xlu0 %5523  ;;  %v10245_v12 = vld [vmem:[#allocation21_spill] sm:$0xff] }
 0xebf   : > { %v4815_v47 = vunpack.c.l.b16 %v4636_v62  ;;  %v10244_v62 = vld [vmem:[#allocation12_spill] sm:$0xff] }
 0xec0   : > { %5539 = vrot.lane.b32.xlu2 %v10232_v59, %s7113_s19  ;;  %v4764_v21 = vunpack.c.l.b16 %v4631_v8  ;;  %v10246_v8 = vld [vmem:[#allocation19_spill] sm:$0xff] }
 0xec1   : > { %v4816_v19 = vpack.c.b16 %v4815_v47, %v4814_v16  ;;  %5593 = vrot.lane.b32.xlu1 %v10233_v2, %s7112_s18 }
 0xec2   : > { %v6906_v31 = vpop.eup %6905 }
 0xec3   : > { %v4616_v40 = vmul.f32 %v6906_v31, %v9313_v13  ;;  %v5293_v28 = vpop.permute.xlu2 %5292  ;;  %6338 = vmatmul.msk.bf16.vlgmr.msra.gmra.mxu1 %vm574_vm0, %v4816_v19 }
 0xec4   : > { %5022 = vmatpush.bf16.xpose.msra.mxu1 %v5013_v29  ;;  %5305 = vmatpush.bf16.msrb.mxu0 %v5293_v28 }
 0xec5   : > { %v4632_v0 = vpack.c.bf16 %v4616_v40, %v4616_v40  ;;  %v5889_v40 = vsel %vm574_vm0, %v10246_v8, %v9393_v15 }
 0xec6   : > { %v5530_v45 = vpop.permute.xlu0 %5529 }
 0xec7   : > { %v4765_v32 = vunpack.c.l.b16 %v4632_v0 }
 0xec8   : > { %5545 = vrot.lane.b32.xlu2 %v10234_v11, %s7113_s19 }
 0xec9   : > { %v4766_v10 = vpack.c.b16 %v4765_v32, %v4764_v21  ;;  %5599 = vrot.lane.b32.xlu1 %v10235_v23, %s7112_s18  ;;  %v10247_v21 = vld [vmem:[#allocation26_spill] sm:$0xff] }
 0xecb   : > { %v5343_v5 = vpop.permute.xlu2 %5342  ;;  %6336 = vmatmul.msk.bf16.vlgmr.msra.gmra.mxu3 %vm574_vm0, %v4766_v10  ;;  %6339 = vmatmul.msk.bf16.vlgmr.msra.gmra.mxu2 %vm574_vm0, %v9138_v25  ;;  %v5318_v13 = vpop.permute.xlu1 %5317  ;;  %v10238_v25 = vld [vmem:[#allocation61_spill] sm:$0xff] }
 0xecc   : > { %4974 = vmatpush.bf16.xpose.msra.mxu3 %v4965_v14  ;;  %5255 = vmatpush.bf16.msra.mxu2 %v9200_v55 }
 0xece   : > { %v5536_v4 = vpop.permute.xlu0 %5535 }
 0xed0   : > { %5583 = vrot.lane.b32.xlu2 %v10236_v63, %s7112_s18  ;;  %v10249_v63 = vld [vmem:[#allocation24_spill] sm:$0xff] }
 0xed1   : > { %5605 = vrot.lane.b32.xlu1 %v10237_v36, %s7112_s18  ;;  %v5892_v15 = vsel %vm574_vm0, %v10249_v63, %v9401_v38 }
 0xed3   : > { %v5418_v43 = vpop.permute.xlu2 %5417  ;;  %6342 = vmatmul.msk.bf16.vlgmr.msrb.gmra.mxu1 %vm574_vm0, %v9188_v42  ;;  %v5393_v49 = vpop.permute.xlu1 %5392  ;;  %v10239_v42 = vld [vmem:[#allocation67_spill] sm:$0xff] }
 0xed4   : > { %5330 = vmatpush.bf16.msrb.mxu1 %v5318_v13  ;;  %5405 = vmatpush.bf16.msra.mxu0 %v5393_v49 }
 0xed6   : > { %v5542_v60 = vpop.permute.xlu0 %5541 }
 0xed8   : > { %5589 = vrot.lane.b32.xlu2 %v10238_v25, %s7112_s18 }
 0xedb   : > { %v5456_v50 = vpop.permute.xlu2 %5455  ;;  %6340 = vmatmul.msk.bf16.vlgmr.msrb.gmra.mxu3 %vm574_vm0, %v9140_v34  ;;  %6343 = vmatmul.msk.bf16.vlgmr.msrb.gmra.mxu2 %vm574_vm0, %v9174_v9  ;;  %v5464_v55 = vpop.permute.xlu1 %5463 }
 0xedc   : > { %5280 = vmatpush.bf16.msrb.mxu3 %v9282_v58  ;;  %5355 = vmatpush.bf16.msrb.mxu2 %v5343_v5  ;;  %v9477_v9 = vpop.f32.mrf.mxu0  ;;  %v10241_v58 = vld [vmem:[#allocation65_spill] sm:$0xff]  ;;  %v5886_v16 = vsel %vm574_vm0, %v10244_v62, %v5456_v50 }
 0xedd   : > { %v10248_v5 = vld [vmem:[#allocation13_spill] sm:$0xff] }
 0xede   : > { %v5548_v31 = vpop.permute.xlu0 %5547  ;;  %v5887_v13 = vsel %vm574_vm0, %v10248_v5, %v9387_v61 }
 0xee0   : > { %5595 = vrot.lane.b32.xlu2 %v10239_v42, %s7112_s18 }
 0xee3   : > { %v5460_v17 = vpop.permute.xlu2 %5459  ;;  %6346 = vmatmul.msk.bf16.vlgmr.msra.gmra.mxu1 %vm574_vm0, %v9205_v48  ;;  %v5470_v26 = vpop.permute.xlu1 %5469  ;;  %v10242_v48 = vld [vmem:[#allocation22_spill] sm:$0xff] }
 0xee4   : > { %v5888_v6 = vsel %vm574_vm0, %v10240_v54, %v5460_v17  ;;  %5430 = vmatpush.bf16.msra.mxu1 %v5418_v43  ;;  %v9489_v56 = vpop.f32.mrf.mxu0  ;;  %v10250_v17 = vld [vmem:[#allocation17_spill] sm:$0xff]  ;;  %v10251_v54 = vld [vmem:[#allocation20_spill] sm:$0xff] }
 0xee5   : > { %v9475_v34 = vsel %vm5901_vm1, %v5888_v6, %v5524_v27  ;;  %v5895_v38 = vsel %vm574_vm0, %v10250_v17, %v9408_v30  ;;  %v5890_v6 = vsel %vm574_vm0, %v10251_v54, %v5464_v55  ;;  %v10252_v30 = vld [vmem:[#allocation23_spill] sm:$0xff]  ;;  %v10253_v55 = vld [vmem:[#allocation14_spill] sm:$0xff] }
 0xee6   : > { %v5586_v23 = vpop.permute.xlu0 %5585 }
 0xee8   : > { %5601 = vrot.lane.b32.xlu2 %v10241_v58, %s7112_s18 }
 0xeeb   : > { %v5466_v46 = vpop.permute.xlu2 %5465  ;;  %6344 = vmatmul.msk.bf16.vlgmr.msra.gmra.mxu3 %vm574_vm0, %v9176_v3  ;;  %v5476_v52 = vpop.permute.xlu1 %5475 }
 0xeec   : > { %v5891_v44 = vsel %vm574_vm0, %v10242_v48, %v5466_v46  ;;  %5380 = vmatpush.bf16.msra.mxu3 %v9371_v33 }
 0xeed   : > { %v9487_v18 = vsel %vm5901_vm1, %v5891_v44, %v5530_v45 }
 0xeee   : > { %v5592_v61 = vpop.permute.xlu0 %5591 }
 0xef3   : > { %v5472_v39 = vpop.permute.xlu2 %5471  ;;  %v5482_v22 = vpop.permute.xlu1 %5481 }
 0xef4   : > { %v5894_v7 = vsel %vm574_vm0, %v10243_v51, %v5472_v39  ;;  %v5898_v51 = vsel %vm574_vm0, %v10252_v30, %v9414_v1 }
 0xef5   : > { %v9494_v57 = vsel %vm5901_vm1, %v5894_v7, %v5536_v4  ;;  %v5893_v7 = vsel %vm574_vm0, %v10253_v55, %v5470_v26 }
 0xefa   : > { %v9496_v3 = vpop.f32.mrf.mxu0 }
 0xefb   : > { %v5478_v33 = vpop.permute.xlu2 %5477  ;;  %v5520_v47 = vpop.permute.xlu1 %5519 }
 0xefc   : > { %v5897_v59 = vsel %vm574_vm0, %v10245_v12, %v5478_v33  ;;  %v5903_v19 = vsel %vm5901_vm1, %v5886_v16, %v5520_v47  ;;  %v5598_v33 = vpop.permute.xlu0 %5597 }
 0xefd   : > { %v9504_v2 = vsel %vm5901_vm1, %v5897_v59, %v5542_v60 }
 0xf02   : > { %v9506_v29 = vpop.f32.mrf.mxu0 }
 0xf03   : > { %v5484_v28 = vpop.permute.xlu2 %5483  ;;  %v5526_v0 = vpop.permute.xlu1 %5525 }
 0xf04   : > { %v5900_v32 = vsel %vm574_vm0, %v10247_v21, %v5484_v28  ;;  %v5906_v11 = vsel %vm5901_vm1, %v5889_v40, %v5526_v0  ;;  %v10257_v0 = vld [vmem:[#allocation25_spill] sm:$0xff] }
 0xf05   : > { %v9515_v10 = vsel %vm5901_vm1, %v5900_v32, %v5548_v31  ;;  %v10255_v31 = vld [vmem:[#allocation18_spill] sm:$0xff]  ;;  %v5899_v21 = vsel %vm574_vm0, %v10257_v0, %v5482_v22 }
 0xf06   : > { %v5896_v8 = vsel %vm574_vm0, %v10255_v31, %v5476_v52 }
 0xf0a   : > { %v4904_v14 = vpop.f32.mrf.mxu0 }
 0xf0b   : > { %v5522_v36 = vpop.permute.xlu2 %5521  ;;  %v5532_v43 = vpop.permute.xlu1 %5531  ;;  %v9523_v49 = vmul.f32 0.25, %v4904_v14 }
 0xf0c   : > { %v5904_v27 = vsel %vm5901_vm1, %v5887_v13, %v5522_v36  ;;  %v5909_v25 = vsel %vm5901_vm1, %v5892_v15, %v5532_v43  ;;  %v9569_v14 = vpop.f32.mrf.mxu2  ;;  %v9578_v13 = vpop.f32.mrf.mxu1 }
 0xf0d   : > { %v9528_v50 = vsel %vm5918_vm2, %v5904_v27, %v5586_v23  ;;  %v5057_v45 = vsel %vm574_vm0, %v9523_v49, -inf }
 0xf11   : > { %5058 = vmax.xlane.f32.xlu2 %v5057_v45 }
 0xf12   : > { %v4906_v42 = vpop.f32.mrf.mxu0 }
 0xf13   : > { %v9537_v58 = vmul.f32 0.25, %v4906_v42  ;;  %v5528_v4 = vpop.permute.xlu2 %5527  ;;  %v5538_v46 = vpop.permute.xlu1 %5537 }
 0xf14   : > { %v5907_v48 = vsel %vm5901_vm1, %v5890_v6, %v5528_v4  ;;  %v5912_v44 = vsel %vm5901_vm1, %v5895_v38, %v5538_v46  ;;  %v9587_v36 = vpop.f32.mrf.mxu2  ;;  %v9589_v43 = vpop.f32.mrf.mxu1 }
 0xf15   : > { %v5060_v39 = vsel %vm574_vm0, %v9537_v58, -inf  ;;  %v9544_v60 = vsel %vm5918_vm2, %v5907_v48, %v5592_v61  ;;  %v9591_v61 = vpop.f32.mrf.mxu3 }
 0xf16   : > { %5061 = vmax.xlane.f32.xlu1 %v5060_v39 }
 0xf1b   : > { %v5534_v62 = vpop.permute.xlu2 %5533  ;;  %v5544_v16 = vpop.permute.xlu1 %5543 }
 0xf1c   : > { %v5910_v47 = vsel %vm5901_vm1, %v5893_v7, %v5534_v62  ;;  %v9553_v12 = vsel %vm5901_vm1, %v5898_v51, %v5544_v16  ;;  %v5000_v16 = vpop.f32.mrf.mxu0 }
 0xf1d   : > { %v9556_v59 = vsel %vm5918_vm2, %v5910_v47, %v5598_v33  ;;  %v9607_v54 = vpop.f32.mrf.mxu3  ;;  %v9632_v31 = vmul.f32 0.25, %v5000_v16 }
 0xf1e   : > { %10254 = vst [vmem:[#allocation27_spill] sm:$0xff] %v9556_v59 }
 0xf23   : > { %v5540_v40 = vpop.permute.xlu2 %5539  ;;  %v5582_v28 = vpop.permute.xlu1 %5581 }
 0xf24   : > { %v9561_v1 = vsel %vm5901_vm1, %v5896_v8, %v5540_v40  ;;  %v9565_v26 = vsel %vm5918_vm2, %v9426_v20, %v5582_v28 }
 0xf25   : > { %10256 = vst [vmem:[#allocation29_spill] sm:$0xff] %v9561_v1 }
 0xf2b   : > { %v5546_v32 = vpop.permute.xlu2 %5545  ;;  %v5588_v23 = vpop.permute.xlu1 %5587 }
 0xf2c   : > { %v9572_v5 = vsel %vm5901_vm1, %v5899_v21, %v5546_v32  ;;  %v9576_v52 = vsel %vm5918_vm2, %v9475_v34, %v5588_v23  ;;  %v5081_v21 = vsel %vm574_vm0, %v9632_v31, -inf }
 0xf33   : > { %v5584_v63 = vpop.permute.xlu2 %5583  ;;  %v5594_v15 = vpop.permute.xlu1 %5593 }
 0xf34   : > { %v9581_v20 = vsel %vm5918_vm2, %v5903_v19, %v5584_v63  ;;  %v9585_v22 = vsel %vm5918_vm2, %v9487_v18, %v5594_v15  ;;  %v5002_v63 = vpop.f32.mrf.mxu0 }
 0xf35   : > { %v9644_v15 = vmul.f32 0.25, %v5002_v63 }
 0xf3b   : > { %v5590_v27 = vpop.permute.xlu2 %5589  ;;  %v5600_v45 = vpop.permute.xlu1 %5599 }
 0xf3c   : > { %v9594_v34 = vsel %vm5918_vm2, %v5906_v11, %v5590_v27  ;;  %v9598_v42 = vsel %vm5918_vm2, %v9494_v57, %v5600_v45 }
 0xf3e   : > { %v9600_v19 = vpop.f32.mrf.mxu2 }
 0xf40   : > { %v9602_v17 = vpop.f32.mrf.mxu1 }
 0xf43   : > { %v5596_v18 = vpop.permute.xlu2 %5595 }
 0xf44   : > { %v9605_v38 = vsel %vm5918_vm2, %v5909_v25, %v5596_v18 }
 0xf46   : > { %v9609_v6 = vpop.f32.mrf.mxu2 }
 0xf48   : > { %v9611_v4 = vpop.f32.mrf.mxu1 }
 0xf4b   : > { %v5602_v11 = vpop.permute.xlu2 %5601 }
 0xf4c   : > { %v9614_v46 = vsel %vm5918_vm2, %v5912_v44, %v5602_v11 }
 0xf4d   : > { %10258 = vst [vmem:[#allocation35_spill] sm:$0xff] %v9614_v46 }
 0xf4e   : > { %v9616_v57 = vpop.f32.mrf.mxu3  ;;  %v4856_v48 = vpop.f32.mrf.mxu2 }
 0xf4f   : > { %v9618_v39 = vmul.f32 0.25, %v4856_v48  ;;  %v5084_v48 = vsel %vm574_vm0, %v9644_v15, -inf }
 0xf50   : > { %v4928_v30 = vpop.f32.mrf.mxu1 }
 0xf51   : > { %v5045_v25 = vsel %vm574_vm0, %v9618_v39, -inf  ;;  %v9622_v51 = vmul.f32 0.25, %v4928_v30 }
 0xf52   : > { %5046 = vmax.xlane.f32.xlu0 %v5045_v25 }
 0xf53   : > { %v5063_v44 = vsel %vm574_vm0, %v9622_v51, -inf }
 0xf56   : > { %v9624_v55 = vpop.f32.mrf.mxu3  ;;  %v4858_v7 = vpop.f32.mrf.mxu2 }
 0xf57   : > { %v9626_v62 = vmul.f32 0.25, %v4858_v7 }
 0xf58   : > { %v4930_v47 = vpop.f32.mrf.mxu1 }
 0xf59   : > { %v5048_v33 = vsel %vm574_vm0, %v9626_v62, -inf  ;;  %v9634_v8 = vmul.f32 0.25, %v4930_v47 }
 0xf5a   : > { %5064 = vmax.xlane.f32.xlu0 %v5063_v44  ;;  %5049 = vmax.xlane.f32.xlu2 %v5048_v33 }
 0xf5b   : > { %v5066_v32 = vsel %vm574_vm0, %v9634_v8, -inf }
 0xf5e   : > { %v4880_v40 = vpop.f32.mrf.mxu3  ;;  %v4952_v0 = vpop.f32.mrf.mxu2 }
 0xf5f   : > { %v9636_v28 = vmul.f32 0.25, %v4880_v40  ;;  %v9646_v27 = vmul.f32 0.25, %v4952_v0 }
 0xf60   : > { %v5024_v11 = vpop.f32.mrf.mxu1 }
 0xf61   : > { %v5051_v23 = vsel %vm574_vm0, %v9636_v28, -inf  ;;  %v5069_v7 = vsel %vm574_vm0, %v9646_v27, -inf  ;;  %v9658_v44 = vmul.f32 0.25, %v5024_v11 }
 0xf62   : > { %5082 = vmax.xlane.f32.xlu0 %v5081_v21  ;;  %5067 = vmax.xlane.f32.xlu2 %v5066_v32 }
 0xf63   : > { %5052 = vmax.xlane.f32.xlu1 %v5051_v23  ;;  %v5087_v32 = vsel %vm574_vm0, %v9658_v44, -inf }
 0xf66   : > { %v4882_v45 = vpop.f32.mrf.mxu3  ;;  %v4954_v25 = vpop.f32.mrf.mxu2 }
 0xf67   : > { %v9648_v18 = vmul.f32 0.25, %v4882_v45  ;;  %v9656_v16 = vmul.f32 0.25, %v4954_v25 }
 0xf68   : > { %v5026_v21 = vpop.f32.mrf.mxu1 }
 0xf69   : > { %v5054_v30 = vsel %vm574_vm0, %v9648_v18, -inf  ;;  %v5072_v40 = vsel %vm574_vm0, %v9656_v16, -inf  ;;  %v9668_v23 = vmul.f32 0.25, %v5026_v21 }
 0xf6a   : > { %5085 = vmax.xlane.f32.xlu2 %v5084_v48  ;;  %5055 = vmax.xlane.f32.xlu0 %v5054_v30  ;;  %v9676_v30 = vpop.permute.xlu1 %5605 }
 0xf6b   : > { %5070 = vmax.xlane.f32.xlu1 %v5069_v7  ;;  %v5090_v11 = vsel %vm574_vm0, %v9668_v23, -inf }
 0xf6e   : > { %v4976_v33 = vpop.f32.mrf.mxu3 }
 0xf6f   : > { %v9660_v47 = vmul.f32 0.25, %v4976_v33 }
 0xf71   : > { %v5075_v0 = vsel %vm574_vm0, %v9660_v47, -inf }
 0xf72   : > { %5073 = vmax.xlane.f32.xlu0 %v5072_v40  ;;  %5076 = vmax.xlane.f32.xlu2 %v5075_v0 }
 0xf73   : > { %5088 = vmax.xlane.f32.xlu1 %v5087_v32 }
 0xf76   : > { %v4978_v63 = vpop.f32.mrf.mxu3 }
 0xf77   : > { %v9670_v45 = vmul.f32 0.25, %v4978_v63 }
 0xf79   : > { %v5078_v48 = vsel %vm574_vm0, %v9670_v45, -inf }
 0xf7a   : > { %5091 = vmax.xlane.f32.xlu0 %v5090_v11 }
 0xf7b   : > { %5079 = vmax.xlane.f32.xlu1 %v5078_v48 }
 0xf84   : > { %v5059_v25 = vpop.xlane.xlu2 %5058 }
 0xf85   : > { %v5097_v7 = vsub.f32 %v9523_v49, %v5059_v25  ;;  %v9688_v49 = vpop.permute.xlu0 %5603 }
 0xf86   : > { %10259 = vst [vmem:[#allocation38_spill] sm:$0xff] %v9688_v49 }
 0xf87   : > { %v5117_v33 = vmul.f32 1.442695, %v5097_v7 }
 0xf89   : > { %6907 = vpow2.f32 %v5117_v33  ;;  %v5062_v40 = vpop.xlane.xlu1 %5061 }
 0xf8a   : > { %v5098_v0 = vsub.f32 %v9537_v58, %v5062_v40 }
 0xf8c   : > { %v5119_v21 = vmul.f32 1.442695, %v5098_v0 }
 0xf8e   : > { %6909 = vpow2.f32 %v5119_v21 }
 0xf8f   : > { %v9680_v32 = vpop.eup %6907 }
 0xf90   : > { %v5153_v63 = vsel %vm574_vm0, %v9680_v32, 0.0 }
 0xf91   : > { %5154 = vadd.xlane.f32.xlu1 %v5153_v63 }
 0xf94   : > { %v9684_v11 = vpop.eup %6909 }
 0xf95   : > { %v5156_v48 = vsel %vm574_vm0, %v9684_v11, 0.0 }
 0xf96   : > { %5157 = vadd.xlane.f32.xlu0 %v5156_v48 }
 0xfc5   : > { %v5047_v25 = vpop.xlane.xlu0 %5046 }
 0xfc6   : > { %v5093_v7 = vsub.f32 %v9618_v39, %v5047_v25 }
 0xfc8   : > { %v5109_v58 = vmul.f32 1.442695, %v5093_v7 }
 0xfca   : > { %6911 = vpow2.f32 %v5109_v58 }
 0xfcd   : > { %v5065_v33 = vpop.xlane.xlu0 %5064  ;;  %v5050_v40 = vpop.xlane.xlu2 %5049 }
 0xfce   : > { %v5099_v0 = vsub.f32 %v9622_v51, %v5065_v33  ;;  %v5094_v21 = vsub.f32 %v9626_v62, %v5050_v40 }
 0xfd0   : > { %v9693_v63 = vpop.eup %6911  ;;  %v5121_v1 = vmul.f32 1.442695, %v5099_v0  ;;  %v5111_v59 = vmul.f32 1.442695, %v5094_v21 }
 0xfd1   : > { %v5141_v48 = vsel %vm574_vm0, %v9693_v63, 0.0 }
 0xfd2   : > { %6913 = vpow2.f32 %v5121_v1  ;;  %5142 = vadd.xlane.f32.xlu2 %v5141_v48 }
 0xfd3   : > { %6915 = vpow2.f32 %v5111_v59 }
 0xfd5   : > { %v5083_v49 = vpop.xlane.xlu0 %5082  ;;  %v5068_v39 = vpop.xlane.xlu2 %5067 }
 0xfd6   : > { %v5105_v25 = vsub.f32 %v9632_v31, %v5083_v49  ;;  %v5100_v7 = vsub.f32 %v9634_v8, %v5068_v39  ;;  %v5053_v58 = vpop.xlane.xlu1 %5052 }
 0xfd7   : > { %v5095_v51 = vsub.f32 %v9636_v28, %v5053_v58 }
 0xfd8   : > { %v9700_v62 = vpop.eup %6913  ;;  %v5133_v33 = vmul.f32 1.442695, %v5105_v25  ;;  %v5123_v40 = vmul.f32 1.442695, %v5100_v7 }
 0xfd9   : > { %v9702_v0 = vpop.eup %6915  ;;  %v5113_v21 = vmul.f32 1.442695, %v5095_v51  ;;  %v5159_v1 = vsel %vm574_vm0, %v9700_v62, 0.0 }
 0xfda   : > { %6917 = vpow2.f32 %v5133_v33  ;;  %5160 = vadd.xlane.f32.xlu2 %v5159_v1  ;;  %v5144_v59 = vsel %vm574_vm0, %v9702_v0, 0.0 }
 0xfdb   : > { %6919 = vpow2.f32 %v5123_v40  ;;  %5145 = vadd.xlane.f32.xlu1 %v5144_v59 }
 0xfdc   : > { %6921 = vpow2.f32 %v5113_v21 }
 0xfdd   : > { %v5086_v31 = vpop.xlane.xlu2 %5085  ;;  %v5056_v8 = vpop.xlane.xlu0 %5055 }
 0xfde   : > { %v5106_v28 = vsub.f32 %v9644_v15, %v5086_v31  ;;  %v5096_v49 = vsub.f32 %v9648_v18, %v5056_v8  ;;  %v5071_v48 = vpop.xlane.xlu1 %5070 }
 0xfdf   : > { %v5101_v51 = vsub.f32 %v9646_v27, %v5071_v48 }
 0xfe0   : > { %v9710_v39 = vpop.eup %6917  ;;  %v5135_v25 = vmul.f32 1.442695, %v5106_v28  ;;  %v5115_v7 = vmul.f32 1.442695, %v5096_v49 }
 0xfe1   : > { %v9712_v58 = vpop.eup %6919  ;;  %v5177_v33 = vsel %vm574_vm0, %v9710_v39, 0.0  ;;  %v5125_v21 = vmul.f32 1.442695, %v5101_v51 }
 0xfe2   : > { %v9717_v40 = vpop.eup %6921  ;;  %6923 = vpow2.f32 %v5135_v25  ;;  %5178 = vadd.xlane.f32.xlu2 %v5177_v33  ;;  %v5162_v15 = vsel %vm574_vm0, %v9712_v58, 0.0 }
 0xfe3   : > { %6925 = vpow2.f32 %v5115_v7  ;;  %5163 = vadd.xlane.f32.xlu1 %v5162_v15  ;;  %v5147_v18 = vsel %vm574_vm0, %v9717_v40, 0.0 }
 0xfe4   : > { %5148 = vadd.xlane.f32.xlu0 %v5147_v18  ;;  %6927 = vpow2.f32 %v5125_v21  ;;  %v10260_v18 = vld [vmem:[#allocation63_spill] sm:$0xff] }
 0xfe5   : > { %v5074_v51 = vpop.xlane.xlu0 %5073 }
 0xfe6   : > { %v5089_v1 = vpop.xlane.xlu1 %5088 }
 0xfe7   : > { %v5107_v27 = vsub.f32 %v9658_v44, %v5089_v1  ;;  %v10261_v1 = vld [vmem:[#allocation68_spill] sm:$0xff] }
 0xfe8   : > { %v9724_v59 = vpop.eup %6923 }
 0xfe9   : > { %v9726_v31 = vpop.eup %6925  ;;  %v5137_v8 = vmul.f32 1.442695, %v5107_v27  ;;  %v5180_v28 = vsel %vm574_vm0, %v9724_v59, 0.0 }
 0xfea   : > { %v5150_v49 = vsel %vm574_vm0, %v9726_v31, 0.0  ;;  %v9732_v48 = vpop.eup %6927 }
 0xfeb   : > { %5151 = vadd.xlane.f32.xlu2 %v5150_v49  ;;  %5181 = vadd.xlane.f32.xlu1 %v5180_v28  ;;  %6929 = vpow2.f32 %v5137_v8  ;;  %v5165_v44 = vsel %vm574_vm0, %v9732_v48, 0.0  ;;  %v10262_v28 = vld [vmem:[#allocation69_spill] sm:$0xff] }
 0xfed   : > { %v5092_v15 = vpop.xlane.xlu0 %5091 }
 0xfee   : > { %v5080_v33 = vpop.xlane.xlu1 %5079 }
 0xff1   : > { %v9734_v25 = vpop.eup %6929 }
 0xff2   : > { %v5183_v7 = vsel %vm574_vm0, %v9734_v25, 0.0 }
 0xff3   : > { %5166 = vadd.xlane.f32.xlu1 %v5165_v44  ;;  %5184 = vadd.xlane.f32.xlu0 %v5183_v7 }
0x1003   : > { %5607 = vrot.lane.b32.xlu2 %v10260_v18, %s7112_s18 }
0x1004   : > { %v5155_v21 = vpop.xlane.xlu1 %5154 }
0x1005   : > { %6931 = vrcp.f32 %v5155_v21 }
0x1007   : > { %5609 = vrot.lane.b32.xlu0 %v10261_v1, %s7112_s18 }
0x1009   : > { %v5158_v27 = vpop.xlane.xlu0 %5157 }
0x100a   : > { %6933 = vrcp.f32 %v5158_v27 }
0x100b   : > { %v6932_v8 = vpop.eup %6931  ;;  %5645 = vrot.lane.b32.xlu2 %v8772_v35, %s7111_s17  ;;  %v10263_v35 = vld [vmem:[#allocation77_spill] sm:$0xff] }
0x100c   : > { %5611 = vrot.lane.b32.xlu1 %v10262_v28, %s7112_s18  ;;  %v5209_v49 = vmul.f32 %v6932_v8, %v9680_v32  ;;  %v5108_v28 = vsub.f32 %v9668_v23, %v5092_v15  ;;  %v10264_v32 = vld [vmem:[#allocation72_spill] sm:$0xff]  ;;  %v5102_v8 = vsub.f32 %v9656_v16, %v5074_v51 }
0x100e   : > { %v5225_v7 = vpack.c.bf16 %v5209_v49, %v5209_v49  ;;  %v5077_v49 = vpop.xlane.xlu2 %5076 }
0x1010   : > { %v6934_v44 = vpop.eup %6933  ;;  %v5289_v21 = vunpack.c.l.b16 %v5225_v7 }
0x1011   : > { %v5210_v18 = vmul.f32 %v6934_v44, %v9684_v11  ;;  %v5139_v11 = vmul.f32 1.442695, %v5108_v28  ;;  %v5127_v44 = vmul.f32 1.442695, %v5102_v8 }
0x1013   : > { %v5226_v46 = vpack.c.bf16 %v5210_v18, %v5210_v18  ;;  %5651 = vrot.lane.b32.xlu2 %v8794_v53, %s7111_s17  ;;  %v5103_v53 = vsub.f32 %v9660_v47, %v5077_v49  ;;  %6935 = vpow2.f32 %v5139_v11  ;;  %v5104_v18 = vsub.f32 %v9670_v45, %v5080_v33  ;;  %v10266_v47 = vld [vmem:[#allocation83_spill] sm:$0xff]  ;;  %v10268_v49 = vld [vmem:[#allocation92_spill] sm:$0xff] }
0x1014   : > { %6937 = vpow2.f32 %v5127_v44 }
0x1015   : > { %v5290_v1 = vunpack.c.l.b16 %v5226_v46  ;;  %v10265_v46 = vld [vmem:[#allocation76_spill] sm:$0xff]  ;;  %v5129_v7 = vmul.f32 1.442695, %v5103_v53  ;;  %v5131_v23 = vmul.f32 1.442695, %v5104_v18 }
0x1017   : > { %v5291_v27 = vpack.c.b16 %v5290_v1, %v5289_v21  ;;  %6939 = vpow2.f32 %v5129_v7 }
0x1018   : > { %6941 = vpow2.f32 %v5131_v23 }
0x1019   : > { %6349 = vmatmul.msk.bf16.vlgmr.msrb.gmra.mxu0 %vm574_vm0, %v5291_v27  ;;  %v9763_v21 = vpop.eup %6935 }
0x101a   : > { %v5186_v16 = vsel %vm574_vm0, %v9763_v21, 0.0  ;;  %v9767_v51 = vpop.eup %6937 }
0x101b   : > { %5657 = vrot.lane.b32.xlu2 %v10263_v35, %s7111_s17  ;;  %v5168_v15 = vsel %vm574_vm0, %v9767_v51, 0.0 }
0x101d   : > { %v9773_v1 = vpop.eup %6939 }
0x101e   : > { %v5171_v45 = vsel %vm574_vm0, %v9773_v1, 0.0  ;;  %v9777_v33 = vpop.eup %6941 }
0x101f   : > { %v5174_v27 = vsel %vm574_vm0, %v9777_v33, 0.0 }
0x1023   : > { %5663 = vrot.lane.b32.xlu2 %v10264_v32, %s7111_s17  ;;  %v10267_v32 = vld [vmem:[#allocation70_spill] sm:$0xff] }
0x102b   : > { %5669 = vrot.lane.b32.xlu2 %v10265_v46, %s7111_s17 }
0x1031   : > { %5187 = vadd.xlane.f32.xlu0 %v5186_v16  ;;  %v10270_v16 = vld [vmem:[#allocation75_spill] sm:$0xff] }
0x1033   : > { %5675 = vrot.lane.b32.xlu2 %v10266_v47, %s7111_s17 }
0x1036   : > { %5169 = vadd.xlane.f32.xlu1 %v5168_v15 }
0x1039   : > { %5172 = vadd.xlane.f32.xlu0 %v5171_v45 }
0x103b   : > { %5713 = vrot.lane.b32.xlu2 %v9094_v24, %s7110_s8 }
0x103e   : > { %5175 = vadd.xlane.f32.xlu1 %v5174_v27  ;;  %v10271_v27 = vld [vmem:[#allocation95_spill] sm:$0xff] }
0x1043   : > { %5719 = vrot.lane.b32.xlu2 %v9092_v37, %s7110_s8 }
0x1045   : > { %v5143_v35 = vpop.xlane.xlu2 %5142 }
0x1046   : > { %6943 = vrcp.f32 %v5143_v35 }
0x104b   : > { %5725 = vrot.lane.b32.xlu2 %v9090_v41, %s7110_s8  ;;  %v10269_v41 = vld [vmem:[#allocation73_spill] sm:$0xff] }
0x104c   : > { %v6944_v11 = vpop.eup %6943 }
0x104d   : > { %v5161_v28 = vpop.xlane.xlu2 %5160  ;;  %5647 = vrot.lane.b32.xlu0 %v10267_v32, %s7111_s17  ;;  %v5205_v24 = vmul.f32 %v6944_v11, %v9693_v63 }
0x104e   : > { %v5146_v8 = vpop.xlane.xlu1 %5145 }
0x104f   : > { %6945 = vrcp.f32 %v5146_v8  ;;  %v5221_v53 = vpack.c.bf16 %v5205_v24, %v5205_v24  ;;  %v10272_v8 = vld [vmem:[#allocation79_spill] sm:$0xff] }
0x1050   : > { %6947 = vrcp.f32 %v5161_v28 }
0x1051   : > { %v5239_v63 = vunpack.c.l.b16 %v5221_v53 }
0x1053   : > { %5731 = vrot.lane.b32.xlu2 %v10268_v49, %s7110_s8 }
0x1055   : > { %v6946_v44 = vpop.eup %6945  ;;  %v5179_v37 = vpop.xlane.xlu2 %5178  ;;  %5653 = vrot.lane.b32.xlu0 %v10269_v41, %s7111_s17 }
0x1056   : > { %v5206_v46 = vmul.f32 %v6946_v44, %v9702_v0  ;;  %v5164_v7 = vpop.xlane.xlu1 %5163  ;;  %v6948_v18 = vpop.eup %6947 }
0x1057   : > { %v5149_v23 = vpop.xlane.xlu0 %5148  ;;  %6949 = vrcp.f32 %v5164_v7  ;;  %5649 = vrot.lane.b32.xlu1 %v10270_v16, %s7111_s17  ;;  %v5211_v15 = vmul.f32 %v6948_v18, %v9700_v62  ;;  %v10273_v62 = vld [vmem:[#allocation74_spill] sm:$0xff] }
0x1058   : > { %v5222_v47 = vpack.c.bf16 %v5206_v46, %v5206_v46  ;;  %6951 = vrcp.f32 %v5149_v23 }
0x1059   : > { %6953 = vrcp.f32 %v5179_v37  ;;  %v5227_v28 = vpack.c.bf16 %v5211_v15, %v5211_v15 }
0x105a   : > { %v5240_v45 = vunpack.c.l.b16 %v5222_v47 }
0x105b   : > { %5737 = vrot.lane.b32.xlu2 %v10271_v27, %s7110_s8  ;;  %v5314_v53 = vunpack.c.l.b16 %v5227_v28 }
0x105c   : > { %v5241_v0 = vpack.c.b16 %v5240_v45, %v5239_v63  ;;  %v10274_v63 = vld [vmem:[#allocation80_spill] sm:$0xff] }
0x105d   : > { %v6950_v35 = vpop.eup %6949  ;;  %5659 = vrot.lane.b32.xlu0 %v10272_v8, %s7111_s17 }
0x105e   : > { %v5212_v32 = vmul.f32 %v6950_v35, %v9712_v58  ;;  %v5152_v11 = vpop.xlane.xlu2 %5151  ;;  %6347 = vmatmul.msk.bf16.vlgmr.msra.gmra.mxu2 %vm574_vm0, %v5241_v0  ;;  %v5182_v24 = vpop.xlane.xlu1 %5181 }
0x105f   : > { %v6952_v49 = vpop.eup %6951  ;;  %6955 = vrcp.f32 %v5152_v11  ;;  %5655 = vrot.lane.b32.xlu1 %v10273_v62, %s7111_s17 }
0x1060   : > { %v6954_v44 = vpop.eup %6953  ;;  %v5228_v37 = vpack.c.bf16 %v5212_v32, %v5212_v32  ;;  %6957 = vrcp.f32 %v5182_v24  ;;  %v5207_v46 = vmul.f32 %v6952_v49, %v9717_v40  ;;  %v10277_v49 = vld [vmem:[#allocation82_spill] sm:$0xff] }
0x1061   : > { %v5217_v58 = vmul.f32 %v6954_v44, %v9710_v39  ;;  %v10278_v44 = vld [vmem:[#allocation84_spill] sm:$0xff] }
0x1062   : > { %v5315_v41 = vunpack.c.l.b16 %v5228_v37  ;;  %v5223_v16 = vpack.c.bf16 %v5207_v46, %v5207_v46 }
0x1063   : > { %5775 = vrot.lane.b32.xlu2 %v9587_v36, %s7109_s20  ;;  %v5233_v45 = vpack.c.bf16 %v5217_v58, %v5217_v58  ;;  %v10275_v36 = vld [vmem:[#allocation71_spill] sm:$0xff] }
0x1064   : > { %v5316_v7 = vpack.c.b16 %v5315_v41, %v5314_v53  ;;  %v5264_v35 = vunpack.c.l.b16 %v5223_v16 }
0x1065   : > { %v6956_v18 = vpop.eup %6955  ;;  %5665 = vrot.lane.b32.xlu0 %v10274_v63, %s7111_s17  ;;  %v5389_v28 = vunpack.c.l.b16 %v5233_v45 }
0x1066   : > { %v6958_v23 = vpop.eup %6957  ;;  %v5208_v47 = vmul.f32 %v6956_v18, %v9726_v31  ;;  %v5608_v15 = vpop.permute.xlu2 %5607  ;;  %6350 = vmatmul.msk.bf16.vlgmr.msrb.gmra.mxu1 %vm574_vm0, %v5316_v7 }
0x1067   : > { %v5218_v40 = vmul.f32 %v6958_v23, %v9724_v59  ;;  %v9817_v39 = vsel %vm5918_vm2, %v9553_v12, %v5608_v15  ;;  %5661 = vrot.lane.b32.xlu1 %v10275_v36, %s7111_s17  ;;  %v10276_v59 = vld [vmem:[#allocation78_spill] sm:$0xff]  ;;  %v5185_v62 = vpop.xlane.xlu0 %5184  ;;  %v10287_v36 = vld [vmem:[#allocation91_spill] sm:$0xff] }
0x1068   : > { %v5224_v27 = vpack.c.bf16 %v5208_v47, %v5208_v47  ;;  %v10281_v23 = vld [vmem:[#allocation86_spill] sm:$0xff]  ;;  %v10284_v47 = vld [vmem:[#allocation87_spill] sm:$0xff]  ;;  %6959 = vrcp.f32 %v5185_v62 }
0x1069   : > { %v5234_v0 = vpack.c.bf16 %v5218_v40, %v5218_v40  ;;  %v10285_v15 = vld [vmem:[#allocation94_spill] sm:$0xff] }
0x106a   : > { %v5265_v31 = vunpack.c.l.b16 %v5224_v27 }
0x106b   : > { %v5390_v32 = vunpack.c.l.b16 %v5234_v0  ;;  %5781 = vrot.lane.b32.xlu2 %v9477_v9, %s7109_s20  ;;  %v5167_v9 = vpop.xlane.xlu1 %5166 }
0x106c   : > { %v5266_v8 = vpack.c.b16 %v5265_v31, %v5264_v35  ;;  %6961 = vrcp.f32 %v5167_v9 }
0x106d   : > { %v5391_v11 = vpack.c.b16 %v5390_v32, %v5389_v28  ;;  %5671 = vrot.lane.b32.xlu0 %v10276_v59, %s7111_s17 }
0x106e   : > { %v5646_v12 = vpop.permute.xlu2 %5645  ;;  %6348 = vmatmul.msk.bf16.vlgmr.msrb.gmra.mxu3 %vm574_vm0, %v5266_v8  ;;  %v6960_v0 = vpop.eup %6959 }
0x106f   : > { %v9828_v24 = vsel %vm5935_vm3, %v9565_v26, %v5646_v12  ;;  %6353 = vmatmul.msk.bf16.vlgmr.msra.gmra.mxu0 %vm574_vm0, %v5391_v11  ;;  %5667 = vrot.lane.b32.xlu1 %v10277_v49, %s7111_s17  ;;  %v10279_v26 = vld [vmem:[#allocation81_spill] sm:$0xff]  ;;  %v5219_v35 = vmul.f32 %v6960_v0, %v9734_v25 }
0x1071   : > { %v5235_v8 = vpack.c.bf16 %v5219_v35, %v5219_v35 }
0x1072   : > { %v6962_v28 = vpop.eup %6961 }
0x1073   : > { %5787 = vrot.lane.b32.xlu2 %v9589_v43, %s7109_s20  ;;  %v10280_v43 = vld [vmem:[#allocation89_spill] sm:$0xff]  ;;  %v5213_v11 = vmul.f32 %v6962_v28, %v9732_v48  ;;  %v5414_v25 = vunpack.c.l.b16 %v5235_v8  ;;  %v10292_v28 = vld [vmem:[#allocation38_spill] sm:$0xff] }
0x1075   : > { %5709 = vrot.lane.b32.xlu0 %v10278_v44, %s7110_s8  ;;  %v5229_v49 = vpack.c.bf16 %v5213_v11, %v5213_v11 }
0x1076   : > { %v5652_v37 = vpop.permute.xlu2 %5651 }
0x1077   : > { %v9839_v53 = vsel %vm5935_vm3, %v9576_v52, %v5652_v37  ;;  %5673 = vrot.lane.b32.xlu1 %v10279_v26, %s7111_s17  ;;  %v5339_v26 = vunpack.c.l.b16 %v5229_v49 }
0x1079   : > { %v5610_v46 = vpop.permute.xlu0 %5609 }
0x107a   : > { %v9845_v41 = vsel %vm5918_vm2, %v9572_v5, %v5610_v46  ;;  %v10282_v5 = vld [vmem:[#allocation93_spill] sm:$0xff] }
0x107b   : > { %5793 = vrot.lane.b32.xlu2 %v9616_v57, %s7109_s20 }
0x107d   : > { %5715 = vrot.lane.b32.xlu0 %v10280_v43, %s7110_s8 }
0x107e   : > { %v5658_v58 = vpop.permute.xlu2 %5657  ;;  %v5612_v7 = vpop.permute.xlu1 %5611 }
0x107f   : > { %v9853_v52 = vsel %vm5935_vm3, %v9585_v22, %v5658_v58  ;;  %v5934_v18 = vsel %vm5918_vm2, %v9515_v10, %v5612_v7  ;;  %5711 = vrot.lane.b32.xlu1 %v10281_v23, %s7110_s8  ;;  %v10283_v22 = vld [vmem:[#allocation85_spill] sm:$0xff]  ;;  %v5931_v10 = vsel %vm5918_vm2, %v9504_v2, %v9676_v30  ;;  %v10288_v2 = vld [vmem:[#allocation96_spill] sm:$0xff]  ;;  %v10289_v30 = vld [vmem:[#allocation90_spill] sm:$0xff] }
0x1083   : > { %5799 = vrot.lane.b32.xlu2 %v9506_v29, %s7109_s20 }
0x1085   : > { %5721 = vrot.lane.b32.xlu0 %v10282_v5, %s7110_s8 }
0x1086   : > { %v5664_v57 = vpop.permute.xlu2 %5663 }
0x1087   : > { %v9865_v16 = vsel %vm5935_vm3, %v9598_v42, %v5664_v57  ;;  %5717 = vrot.lane.b32.xlu1 %v10283_v22, %s7110_s8  ;;  %v10286_v42 = vld [vmem:[#allocation88_spill] sm:$0xff] }
0x108d   : > { %5727 = vrot.lane.b32.xlu0 %v10284_v47, %s7110_s8 }
0x108e   : > { %v5670_v63 = vpop.permute.xlu2 %5669 }
0x108f   : > { %v9875_v29 = vsel %vm5935_vm3, %v5931_v10, %v5670_v63  ;;  %5723 = vrot.lane.b32.xlu1 %v10285_v15, %s7110_s8 }
0x1095   : > { %5733 = vrot.lane.b32.xlu0 %v10286_v42, %s7110_s8 }
0x1096   : > { %v5676_v45 = vpop.permute.xlu2 %5675  ;;  %v5307_v10 = vpop.f32.mrf.mxu0 }
0x1097   : > { %v9882_v40 = vsel %vm5935_vm3, %v5934_v18, %v5676_v45  ;;  %5729 = vrot.lane.b32.xlu1 %v10287_v36, %s7110_s8  ;;  %v10290_v36 = vld [vmem:[#allocation35_spill] sm:$0xff] }
0x109d   : > { %5739 = vrot.lane.b32.xlu0 %v10288_v2, %s7110_s8 }
0x109e   : > { %v5309_v15 = vpop.f32.mrf.mxu0 }
0x109f   : > { %5735 = vrot.lane.b32.xlu1 %v10289_v30, %s7110_s8  ;;  %v10291_v30 = vld [vmem:[#allocation27_spill] sm:$0xff] }
0x10a4   : > { %v5188_v27 = vpop.xlane.xlu0 %5187 }
0x10a5   : > { %6963 = vrcp.f32 %v5188_v27  ;;  %5777 = vrot.lane.b32.xlu0 %v9591_v61, %s7109_s20 }
0x10a7   : > { %5773 = vrot.lane.b32.xlu1 %v9569_v14, %s7109_s20 }
0x10a9   : > { %v5170_v31 = vpop.xlane.xlu1 %5169 }
0x10aa   : > { %6965 = vrcp.f32 %v5170_v31 }
0x10ab   : > { %v6964_v32 = vpop.eup %6963 }
0x10ac   : > { %v5220_v59 = vmul.f32 %v6964_v32, %v9763_v21  ;;  %v5173_v12 = vpop.xlane.xlu0 %5172  ;;  %v10293_v32 = vld [vmem:[#allocation29_spill] sm:$0xff] }
0x10ad   : > { %6967 = vrcp.f32 %v5173_v12  ;;  %5783 = vrot.lane.b32.xlu0 %v9489_v56, %s7109_s20  ;;  %v5930_v8 = vsel %vm5918_vm2, %v10293_v32, %v10292_v28 }
0x10ae   : > { %v5236_v61 = vpack.c.bf16 %v5220_v59, %v5220_v59 }
0x10af   : > { %5779 = vrot.lane.b32.xlu1 %v9607_v54, %s7109_s20 }
0x10b0   : > { %v6966_v14 = vpop.eup %6965  ;;  %v5415_v62 = vunpack.c.l.b16 %v5236_v61 }
0x10b1   : > { %v5214_v9 = vmul.f32 %v6966_v14, %v9767_v51  ;;  %v5176_v44 = vpop.xlane.xlu1 %5175  ;;  %v5714_v51 = vpop.permute.xlu2 %5713 }
0x10b2   : > { %6969 = vrcp.f32 %v5176_v44  ;;  %v5416_v48 = vpack.c.b16 %v5415_v62, %v5414_v25 }
0x10b3   : > { %v5230_v37 = vpack.c.bf16 %v5214_v9, %v5214_v9  ;;  %v6968_v21 = vpop.eup %6967 }
0x10b4   : > { %v5215_v43 = vmul.f32 %v6968_v21, %v9773_v1  ;;  %6354 = vmatmul.msk.bf16.vlgmr.msra.gmra.mxu1 %vm574_vm0, %v5416_v48 }
0x10b5   : > { %v5340_v46 = vunpack.c.l.b16 %v5230_v37  ;;  %5789 = vrot.lane.b32.xlu0 %v9600_v19, %s7109_s20 }
0x10b6   : > { %v5231_v58 = vpack.c.bf16 %v5215_v43, %v5215_v43 }
0x10b7   : > { %v5341_v56 = vpack.c.b16 %v5340_v46, %v5339_v26  ;;  %5785 = vrot.lane.b32.xlu1 %v9578_v13, %s7109_s20 }
0x10b8   : > { %v6970_v54 = vpop.eup %6969  ;;  %v5364_v23 = vunpack.c.l.b16 %v5231_v58 }
0x10b9   : > { %v5216_v7 = vmul.f32 %v6970_v54, %v9777_v33  ;;  %6351 = vmatmul.msk.bf16.vlgmr.msrb.gmra.mxu2 %vm574_vm0, %v5341_v56  ;;  %v5720_v57 = vpop.permute.xlu2 %5719 }
0x10bb   : > { %v5232_v18 = vpack.c.bf16 %v5216_v7, %v5216_v7 }
0x10bd   : > { %v5365_v5 = vunpack.c.l.b16 %v5232_v18  ;;  %5795 = vrot.lane.b32.xlu0 %v9624_v55, %s7109_s20 }
0x10bf   : > { %v5366_v1 = vpack.c.b16 %v5365_v5, %v5364_v23  ;;  %5791 = vrot.lane.b32.xlu1 %v9609_v6, %s7109_s20  ;;  %v5648_v19 = vpop.permute.xlu0 %5647 }
0x10c0   : > { %v5937_v13 = vsel %vm5935_vm3, %v9581_v20, %v5648_v19 }
0x10c1   : > { %6352 = vmatmul.msk.bf16.vlgmr.msra.gmra.mxu3 %vm574_vm0, %v5366_v1  ;;  %v5726_v47 = vpop.permute.xlu2 %5725 }
0x10c5   : > { %5801 = vrot.lane.b32.xlu0 %v9602_v17, %s7109_s20 }
0x10c7   : > { %5797 = vrot.lane.b32.xlu1 %v9496_v3, %s7109_s20  ;;  %v5654_v33 = vpop.permute.xlu0 %5653 }
0x10c8   : > { %v5940_v55 = vsel %vm5935_vm3, %v9594_v34, %v5654_v33 }
0x10c9   : > { %v5650_v22 = vpop.permute.xlu1 %5649  ;;  %v5732_v42 = vpop.permute.xlu2 %5731 }
0x10ca   : > { %v5938_v6 = vsel %vm5935_vm3, %v9528_v50, %v5650_v22 }
0x10cb   : > { %v9926_v20 = vsel %vm5952_vm4, %v5938_v6, %v5714_v51 }
0x10cd   : > { %5845 = vrot.lane.b32.xlu0 %v5307_v10, %s7108_s15 }
0x10cf   : > { %5803 = vrot.lane.b32.xlu1 %v9611_v4, %s7109_s20  ;;  %v5660_v3 = vpop.permute.xlu0 %5659 }
0x10d0   : > { %v5943_v17 = vsel %vm5935_vm3, %v9605_v38, %v5660_v3 }
0x10d1   : > { %v5656_v63 = vpop.permute.xlu1 %5655  ;;  %v5738_v0 = vpop.permute.xlu2 %5737 }
0x10d2   : > { %v5941_v34 = vsel %vm5935_vm3, %v9544_v60, %v5656_v63 }
0x10d3   : > { %v9936_v50 = vsel %vm5952_vm4, %v5941_v34, %v5720_v57 }
0x10d7   : > { %5847 = vrot.lane.b32.xlu1 %v5309_v15, %s7108_s15  ;;  %v5666_v45 = vpop.permute.xlu0 %5665 }
0x10d8   : > { %v5946_v2 = vsel %vm5935_vm3, %v10290_v36, %v5666_v45 }
0x10d9   : > { %v5662_v4 = vpop.permute.xlu1 %5661 }
0x10da   : > { %v5944_v27 = vsel %vm5935_vm3, %v10291_v30, %v5662_v4 }
0x10db   : > { %v9944_v38 = vsel %vm5952_vm4, %v5944_v27, %v5726_v47 }
0x10df   : > { %v5672_v60 = vpop.permute.xlu0 %5671 }
0x10e0   : > { %v5949_v35 = vsel %vm5935_vm3, %v9817_v39, %v5672_v60  ;;  %v5776_v39 = vpop.permute.xlu2 %5775 }
0x10e1   : > { %v5257_v31 = vpop.f32.mrf.mxu2  ;;  %v5668_v11 = vpop.permute.xlu1 %5667 }
0x10e2   : > { %v5947_v59 = vsel %vm5935_vm3, %v5930_v8, %v5668_v11  ;;  %5837 = vrot.lane.b32.xlu2 %v5257_v31, %s7108_s15 }
0x10e3   : > { %v5964_v12 = vsel %vm5952_vm4, %v5947_v59, %v5732_v42  ;;  %v5332_v61 = vpop.f32.mrf.mxu1 }
0x10e7   : > { %v5710_v14 = vpop.permute.xlu0 %5709 }
0x10e8   : > { %v5953_v25 = vsel %vm5952_vm4, %v9828_v24, %v5710_v14  ;;  %v5782_v56 = vpop.permute.xlu2 %5781 }
0x10e9   : > { %v5259_v49 = vpop.f32.mrf.mxu2  ;;  %v5674_v62 = vpop.permute.xlu1 %5673 }
0x10ea   : > { %v5950_v9 = vsel %vm5935_vm3, %v9845_v41, %v5674_v62  ;;  %5839 = vrot.lane.b32.xlu0 %v5259_v49, %s7108_s15  ;;  %5849 = vrot.lane.b32.xlu2 %v5332_v61, %s7108_s15 }
0x10eb   : > { %v5967_v44 = vsel %vm5952_vm4, %v5950_v9, %v5738_v0  ;;  %v5334_v48 = vpop.f32.mrf.mxu1 }
0x10ec   : > { %v5407_v46 = vpop.f32.mrf.mxu0 }
0x10ef   : > { %v5716_v37 = vpop.permute.xlu0 %5715 }
0x10f0   : > { %v9963_v21 = vsel %vm5952_vm4, %v9839_v53, %v5716_v37  ;;  %v9976_v18 = vpop.permute.xlu2 %5787 }
0x10f1   : > { %v5282_v24 = vpop.f32.mrf.mxu3  ;;  %v5712_v26 = vpop.permute.xlu1 %5711 }
0x10f2   : > { %v5954_v43 = vsel %vm5952_vm4, %v5937_v13, %v5712_v26  ;;  %5841 = vrot.lane.b32.xlu1 %v5282_v24, %s7108_s15  ;;  %5851 = vrot.lane.b32.xlu0 %v5334_v48, %s7108_s15 }
0x10f3   : > { %5861 = vrot.lane.b32.xlu2 %v5407_v46, %s7108_s15  ;;  %v9970_v41 = vsel %vm5969_vm5, %v5954_v43, %v5776_v39 }
0x10f4   : > { %v5409_v37 = vpop.f32.mrf.mxu0 }
0x10f7   : > { %v5722_v54 = vpop.permute.xlu0 %5721 }
0x10f8   : > { %v5959_v53 = vsel %vm5952_vm4, %v9853_v52, %v5722_v54  ;;  %v5794_v13 = vpop.permute.xlu2 %5793 }
0x10f9   : > { %v5284_v51 = vpop.f32.mrf.mxu3  ;;  %v5718_v58 = vpop.permute.xlu1 %5717 }
0x10fa   : > { %v5957_v7 = vsel %vm5952_vm4, %v5940_v55, %v5718_v58 }
0x10fb   : > { %5843 = vrot.lane.b32.xlu2 %v5284_v51, %s7108_s15  ;;  %v5974_v8 = vsel %vm5969_vm5, %v5957_v7, %v5782_v56 }
0x10ff   : > { %v5728_v23 = vpop.permute.xlu0 %5727 }
0x1100   : > { %v5962_v5 = vsel %vm5952_vm4, %v9865_v16, %v5728_v23  ;;  %v5800_v47 = vpop.permute.xlu2 %5799 }
0x1101   : > { %v5724_v1 = vpop.permute.xlu1 %5723 }
0x1102   : > { %v9981_v19 = vsel %vm5952_vm4, %v5943_v17, %v5724_v1 }
0x1103   : > { %v5977_v23 = vsel %vm5969_vm5, %v9981_v19, %v9976_v18 }
0x1107   : > { %v5734_v57 = vpop.permute.xlu0 %5733 }
0x1108   : > { %v5965_v52 = vsel %vm5952_vm4, %v9875_v29, %v5734_v57 }
0x1109   : > { %v5730_v33 = vpop.permute.xlu1 %5729 }
0x110a   : > { %v5963_v55 = vsel %vm5952_vm4, %v5946_v2, %v5730_v33 }
0x110b   : > { %v9987_v22 = vsel %vm5969_vm5, %v5963_v55, %v5794_v13 }
0x110f   : > { %v5740_v6 = vpop.permute.xlu0 %5739 }
0x1110   : > { %v5968_v10 = vsel %vm5952_vm4, %v9882_v40, %v5740_v6 }
0x1111   : > { %v5736_v16 = vpop.permute.xlu1 %5735 }
0x1112   : > { %v5966_v3 = vsel %vm5952_vm4, %v5949_v35, %v5736_v16 }
0x1113   : > { %v9993_v17 = vsel %vm5969_vm5, %v5966_v3, %v5800_v47 }
0x1117   : > { %v5778_v63 = vpop.permute.xlu0 %5777 }
0x1118   : > { %v9997_v29 = vsel %vm5969_vm5, %v9926_v20, %v5778_v63 }
0x1119   : > { %v5774_v34 = vpop.permute.xlu1 %5773 }
0x111a   : > { %v5970_v35 = vsel %vm5969_vm5, %v5953_v25, %v5774_v34 }
0x111f   : > { %v5784_v15 = vpop.permute.xlu0 %5783 }
0x1120   : > { %v5975_v9 = vsel %vm5969_vm5, %v9936_v50, %v5784_v15 }
0x1121   : > { %v5780_v42 = vpop.permute.xlu1 %5779 }
0x1122   : > { %v5973_v50 = vsel %vm5969_vm5, %v9963_v21, %v5780_v42 }
0x1127   : > { %v5790_v45 = vpop.permute.xlu0 %5789 }
0x1128   : > { %v10001_v40 = vsel %vm5969_vm5, %v9944_v38, %v5790_v45 }
0x1129   : > { %v5786_v36 = vpop.permute.xlu1 %5785 }
0x112a   : > { %v5976_v14 = vsel %vm5969_vm5, %v5959_v53, %v5786_v36 }
0x112f   : > { %v5796_v2 = vpop.permute.xlu0 %5795 }
0x1130   : > { %v10004_v4 = vsel %vm5969_vm5, %v5964_v12, %v5796_v2 }
0x1131   : > { %v5792_v30 = vpop.permute.xlu1 %5791  ;;  %v5432_v12 = vpop.f32.mrf.mxu1 }
0x1132   : > { %v5979_v27 = vsel %vm5969_vm5, %v5962_v5, %v5792_v30 }
0x1137   : > { %v5802_v0 = vpop.permute.xlu0 %5801 }
0x1138   : > { %v10008_v20 = vsel %vm5969_vm5, %v5967_v44, %v5802_v0 }
0x1139   : > { %v5798_v60 = vpop.permute.xlu1 %5797  ;;  %v5434_v24 = vpop.f32.mrf.mxu1 }
0x113a   : > { %v5982_v26 = vsel %vm5969_vm5, %v5965_v52, %v5798_v60 }
0x113c   : > { %v5838_v31 = vpop.permute.xlu2 %5837  ;;  %v5357_v28 = vpop.f32.mrf.mxu2 }
0x113d   : > { %v5987_v38 = vsel %vm5986_vm6, %v5970_v35, %v5838_v31  ;;  %5853 = vrot.lane.b32.xlu1 %v5357_v28, %s7108_s15 }
0x113e   : > { %6003 = vst [vmem:[%s10015_s22] sm:$0xff] %v5987_v38 }
0x113f   : > { %v5846_v32 = vpop.permute.xlu0 %5845 }
0x1140   : > { %v5991_v11 = vsel %vm5986_vm6, %v5974_v8, %v5846_v32 }
0x1141   : > { %v5804_v59 = vpop.permute.xlu1 %5803  ;;  %6007 = vst [vmem:[%s10015_s22 + $0x20] sm:$0xff] %v5991_v11 }
0x1142   : > { %v5985_v61 = vsel %vm5969_vm5, %v5968_v10, %v5804_v59 }
0x1144   : > { %v5850_v25 = vpop.permute.xlu2 %5849  ;;  %v5359_v49 = vpop.f32.mrf.mxu2 }
0x1145   : > { %v5993_v62 = vsel %vm5986_vm6, %v5976_v14, %v5850_v25  ;;  %v5382_v39 = vpop.f32.mrf.mxu3  ;;  %5855 = vrot.lane.b32.xlu2 %v5359_v49, %s7108_s15 }
0x1146   : > { %6009 = vst [vmem:[%s10015_s22 + $0x30] sm:$0xff] %v5993_v62  ;;  %5857 = vrot.lane.b32.xlu0 %v5382_v39, %s7108_s15 }
0x1149   : > { %v5848_v44 = vpop.permute.xlu1 %5847 }
0x114a   : > { %v5992_v48 = vsel %vm5986_vm6, %v5975_v9, %v5848_v44 }
0x114b   : > { %6008 = vst [vmem:[%s10015_s22 + $0x28] sm:$0xff] %v5992_v48 }
0x114d   : > { %v5862_v46 = vpop.permute.xlu2 %5861  ;;  %v5384_v43 = vpop.f32.mrf.mxu3  ;;  %5867 = vrot.lane.b32.xlu2 %v5434_v24, %s7108_s15 }
0x114e   : > { %v5999_v56 = vsel %vm5986_vm6, %v5982_v26, %v5862_v46  ;;  %5863 = vrot.lane.b32.xlu0 %v5409_v37, %s7108_s15  ;;  %5859 = vrot.lane.b32.xlu1 %v5384_v43, %s7108_s15 }
0x114f   : > { %6015 = vst [vmem:[%s10015_s22 + $0x60] sm:$0xff] %v5999_v56 }
0x1155   : > { %v5844_v54 = vpop.permute.xlu2 %5843 }
0x1156   : > { %v5990_v53 = vsel %vm5986_vm6, %v5973_v50, %v5844_v54  ;;  %5865 = vrot.lane.b32.xlu1 %v5432_v12, %s7108_s15  ;;  %s7051_s15 = scalar_lea.hbm %s10108_s2, 256 }
0x1157   : > { %6006 = vst [vmem:[%s10015_s22 + $0x18] sm:$0xff] %v5990_v53  ;;  %p7053_p9 = scmp.lt.s32.totalorder %s7051_s15, %s7047_s6 }
0x1159   : > { %p7054_p2 = por %p7053_p9, %p7052_p11 }
0x115b   : > { %p7055_p10 = pnand %p7054_p2, %p7050_p8 }
0x115c   : > { %v5840_v51 = vpop.permute.xlu0 %5839 }
0x115d   : > { %v5988_v58 = vsel %vm5986_vm6, %v9970_v41, %v5840_v51 }
0x115e   : > { %6004 = vst [vmem:[%s10015_s22 + $0x8] sm:$0xff] %v5988_v58 }
0x1164   : > { %v5852_v7 = vpop.permute.xlu0 %5851  ;;  %v5842_v21 = vpop.permute.xlu1 %5841 }
0x1165   : > { %v5994_v5 = vsel %vm5986_vm6, %v5977_v23, %v5852_v7  ;;  %v5989_v1 = vsel %vm5986_vm6, %v9997_v29, %v5842_v21 }
0x1166   : > { %6010 = vst [vmem:[%s10015_s22 + $0x38] sm:$0xff] %v5994_v5 }
0x1167   : > { %6005 = vst [vmem:[%s10015_s22 + $0x10] sm:$0xff] %v5989_v1 }
0x119f   : > { %v5856_v13 = vpop.permute.xlu2 %5855 }
0x11a0   : > { %v5996_v41 = vsel %vm5986_vm6, %v5979_v27, %v5856_v13 }
0x11a1   : > { %6012 = vst [vmem:[%s10015_s22 + $0x48] sm:$0xff] %v5996_v41 }
0x11a7   : > { %v5868_v57 = vpop.permute.xlu2 %5867 }
0x11a8   : > { %v6002_v52 = vsel %vm5986_vm6, %v5985_v61, %v5868_v57 }
0x11a9   : > { %6018 = vst [vmem:[%s10015_s22 + $0x78] sm:$0xff] %v6002_v52 }
0x11af   : > { %v5854_v18 = vpop.permute.xlu1 %5853 }
0x11b0   : > { %v5995_v19 = vsel %vm5986_vm6, %v10001_v40, %v5854_v18 }
0x11b1   : > { %6011 = vst [vmem:[%s10015_s22 + $0x40] sm:$0xff] %v5995_v19 }
0x11b8   : > { %v5858_v33 = vpop.permute.xlu0 %5857 }
0x11b9   : > { %v5997_v55 = vsel %vm5986_vm6, %v9987_v22, %v5858_v33 }
0x11ba   : > { %6013 = vst [vmem:[%s10015_s22 + $0x50] sm:$0xff] %v5997_v55 }
0x11c0   : > { %v5864_v6 = vpop.permute.xlu0 %5863  ;;  %v5860_v10 = vpop.permute.xlu1 %5859 }
0x11c1   : > { %v6000_v16 = vsel %vm5986_vm6, %v9993_v17, %v5864_v6  ;;  %v5998_v47 = vsel %vm5986_vm6, %v10004_v4, %v5860_v10 }
0x11c2   : > { %6016 = vst [vmem:[%s10015_s22 + $0x68] sm:$0xff] %v6000_v16 }
0x11c3   : > { %6014 = vst [vmem:[%s10015_s22 + $0x58] sm:$0xff] %v5998_v47 }
0x11c8   : > { %v5866_v22 = vpop.permute.xlu1 %5865 }
0x11c9   : > { %v6001_v3 = vsel %vm5986_vm6, %v10008_v20, %v5866_v22 }
0x11ca   : > { %6017 = vst [vmem:[%s10015_s22 + $0x70] sm:$0xff] %v6001_v3 }
0x11cb   : > { %7058 = shalt.err (!%p7055_p10)
}
0x11cc   : > { %s7115_s5 = smov 128   ;;  %s7116_s17 = smov 8  }
0x11cd   : > { %6395 = dma.vmem_to_hbm [thread:$0]  (%p7199_p7), %s6034_s3, 2048, %s6036_s30, %s6020_s13, %s7115_s5, %s7115_s5, %s7116_s17  }
0x11ce PF: > { %s6050_s18 = sand.u32 1, %s7089_s9   ;;  %p10294_p12 = scmp.ge.s32.totalorder %s7101_s12, 2 }
0x11cf   : > { %s6051_s19 = scalar_lea.sflag [#allocation4], %s6050_s18 }
0x11d0   : > { %p6406_p13 = pnand %p10294_p12, %p7167_p6 }
0x11d2   : > { %p6407_p0 = pneg %p6406_p13 }
0x11d4   : > { %7084 = dma.done.wait (%p6407_p0), %s6051_s19, 2048  }
0x11d5   : > { %7086 = vsyncadd (%p6407_p0), %s6051_s19, 4294965248  ;;  %p16_p3 = scmp.ge.s32.totalorder %s7185_s23, 4   ;;  %s10295_s9 = smov %s7093_s10 }
0x11d6   : > { %s10296_s10 = smov %s7097_s11  ;;  %s10297_s11 = smov %s7195_s28 }
0x11d7   : > { %s10298_s12 = smov %s7185_s23  ;;  %18 = sbr.rel (!%p16_p3) target bundleno = 6 (0x6), region = 77 }
0x11dc   :  { %6057 = vsyncpa [#allocation3], 1 }
0x11dd   :  { %6059 = vsyncpa [#allocation3 + $0x1], 1 }
0x11de   :  { %6060 = vsyncpa [#allocation6], 1 }
0x11df   :  { %6061 = vsyncpa [#allocation4], 1 }
0x11e0   :  { %6063 = vsyncpa [#allocation4 + $0x1], 1 }

</bundles_post_ra>
